<compile_context>
chip_gen: v7x
topology: tpu7x:2x2x1
jax: 0.10.0
libtpu: 0.0.40
codegen_flags: <defaults>
</compile_context>

<pallas_src>
import functools

import jax
import jax.numpy as jnp
from jax.experimental import pallas as pl
from jax.experimental.pallas import tpu as pltpu

N_CLASSES = 4
H_IN = 16              # input spatial size
HH = H_IN // 2         # space-to-depth plane size = 8
H1 = H_IN - 1          # conv1 "valid" 2x2/1 output spatial = 15
HP = H1 // 2           # AvgPool2d(2,2) output spatial = 7 (floor drops row/col 14)
H2 = HP - 1            # conv2 "valid" 2x2/1 output spatial = 6
LANE = 128             # TPU lane width
SUBLANE = 8            # TPU sublane count
BT_UNIT = SUBLANE * LANE   # minimum batch tile = one full (8,128) vreg = 1024


def tiny_cnn_kernel(x_ref, k1_ref, b1_ref, w2_ref, b2_ref, o_ref):
    # x_ref : (4, HH, HH, sub, 128)        VMEM  space-to-depth planes,
    #                                             batch on (sublane, lane)
    #                                             plane r*2+s holds x[2u+r, 2v+s, batch]
    # k1_ref: (2*3*3,)                     SMEM  conv1 (*) avgpool fused 3x3 kernel (x0.25)
    # b1_ref: (2,)                         SMEM  conv1 bias
    # w2_ref: (N_CLASSES*2*2*2,)           SMEM  conv2 weight, flattened OIHW
    # b2_ref: (N_CLASSES,)                 SMEM  conv2 bias
    # o_ref : (N_CLASSES, H2, H2, sub,128) VMEM  lane-dense output slab

    # ---- distinct conv1 input windows, loaded once (leading-dim slices: free) ----
    # pooled[p,q] = b1 + sum_{a,c in 0..2} K[a,c] * x[2p+a, 2q+c]
    #            -> planes[(a%2)*2+(c%2)][p + a//2, q + c//2]
    win = {}
    for a in range(3):
        for c in range(3):
            key = ((a % 2) * 2 + (c % 2), a // 2, c // 2)   # (plane, row off, col off)
            if key not in win:
                p, du, dv = key
                win[key] = x_ref[p, du:du + HP, dv:dv + HP]  # (HP, HP, sub, 128)

    # ---- fused conv1 (1->2 ch, 2x2, valid) + AvgPool2d(2,2) + ReLU ----
    hidden = []
    for co in range(2):
        acc = None
        for a in range(3):
            for c in range(3):
                key = ((a % 2) * 2 + (c % 2), a // 2, c // 2)
                tap = k1_ref[co * 9 + a * 3 + c] * win[key]
                acc = tap if acc is None else acc + tap
        hidden.append(jnp.maximum(acc + b1_ref[co], 0.0))        # (HP, HP, sub, 128)

    # ---- distinct conv2 windows, computed once ----
    hwin = {}
    for ci in range(2):
        for ki in range(2):
            for kj in range(2):
                hwin[(ci, ki, kj)] = hidden[ci][ki:ki + H2, kj:kj + H2]

    # ---- conv2 (2 -> n_classes ch, 2x2, stride 1, valid) + ReLU ----
    for co in range(N_CLASSES):
        acc = None
        for ci in range(2):
            for ki in range(2):
                for kj in range(2):
                    w = w2_ref[co * 8 + ci * 4 + ki * 2 + kj]
                    tap = w * hwin[(ci, ki, kj)]
                    acc = tap if acc is None else acc + tap
        # one unmasked lane-dense store per output channel
        o_ref[co] = jnp.maximum(acc + b2_ref[co], 0.0)           # (H2, H2, sub, 128)


def _round_up(a, m):
    return (a + m - 1) // m * m


@functools.partial(jax.jit, static_argnames=("block_b",))
def tiny_cnn_forward(x, w1, b1, w2, b2, *, block_b=4096):
    """x: (B, 1, 16, 16) float32 NCHW -> (B, N_CLASSES, 6, 6) float32 NCHW."""
    b = x.shape[0]

    # batch tile: multiple of 1024 so the (sub, 128) minor pair is full 8x128 vregs
    bt = min(_round_up(block_b, BT_UNIT), _round_up(b, BT_UNIT))
    sub = bt // LANE                                   # sublane extent, multiple of 8
    grid_b = pl.cdiv(b, bt)
    padded_b = grid_b * bt

    # glue: fold AvgPool2d(2,2) into conv1 -> effective 3x3 stride-2 kernel (x0.25)
    w = w1[:, 0, :, :].astype(jnp.float32)             # (2, 2, 2) O,H,W
    k1 = jnp.zeros((2, 3, 3), jnp.float32)
    for di in range(2):
        for dj in range(2):
            k1 = k1.at[:, di:di + 2, dj:dj + 2].add(w)
    k1 = (0.25 * k1).reshape(-1)

    # glue: space-to-depth + batch->(sublane, lane):
    #   planes[r*2+s, u, v, n//128, n%128] = x[n, 0, 2u+r, 2v+s]
    xs = x[:, 0, :, :].astype(jnp.float32).reshape(b, HH, 2, HH, 2)
    planes = jnp.transpose(xs, (2, 4, 1, 3, 0)).reshape(4, HH, HH, b)
    planes = jnp.pad(planes, ((0, 0), (0, 0), (0, 0), (0, padded_b - b)))
    planes = planes.reshape(4, HH, HH, padded_b // LANE, LANE)

    out = pl.pallas_call(
        tiny_cnn_kernel,
        out_shape=jax.ShapeDtypeStruct(
            (N_CLASSES, H2, H2, padded_b // LANE, LANE), jnp.float32),
        grid=(grid_b,),
        in_specs=[
            pl.BlockSpec((4, HH, HH, sub, LANE), lambda i: (0, 0, 0, i, 0)),  # x planes
            pl.BlockSpec(memory_space=pltpu.MemorySpace.SMEM),                # fused K1
            pl.BlockSpec(memory_space=pltpu.MemorySpace.SMEM),                # b1
            pl.BlockSpec(memory_space=pltpu.MemorySpace.SMEM),                # w2 flat
            pl.BlockSpec(memory_space=pltpu.MemorySpace.SMEM),                # b2
        ],
        out_specs=pl.BlockSpec((N_CLASSES, H2, H2, sub, LANE),
                               lambda i: (0, 0, 0, i, 0)),
        compiler_params=pltpu.CompilerParams(dimension_semantics=("parallel",)),
    )(planes, k1, b1.astype(jnp.float32), w2.reshape(-1).astype(jnp.float32),
      b2.astype(jnp.float32))

    # glue: un-tile batch, strip padding, restore NCHW
    out = out.reshape(N_CLASSES, H2, H2, padded_b)[..., :b]
    return jnp.transpose(out, (3, 0, 1, 2))


def reference(x, w1, b1, w2, b2):
    """Pure-JAX (XLA) reference with PyTorch semantics."""
    y = jax.lax.conv_general_dilated(
        x, w1, window_strides=(1, 1), padding="VALID",
        dimension_numbers=("NCHW", "OIHW", "NCHW"))
    y = y + b1[None, :, None, None]
    y = jax.lax.reduce_window(y, 0.0, jax.lax.add,
                              (1, 1, 2, 2), (1, 1, 2, 2), "VALID") * 0.25
    y = jnp.maximum(y, 0.0)
    y = jax.lax.conv_general_dilated(
        y, w2, window_strides=(1, 1), padding="VALID",
        dimension_numbers=("NCHW", "OIHW", "NCHW"))
    y = y + b2[None, :, None, None]
    return jnp.maximum(y, 0.0)


if __name__ == "__main__":
    key = jax.random.PRNGKey(0)
    kx, k1, k2, k3, k4 = jax.random.split(key, 5)

    # deterministic synthetic parameters (shapes from TinyCNN.__init__, n_classes=4)
    x = jax.random.normal(kx, (2, 1, H_IN, H_IN), jnp.float32)
    w1 = jax.random.normal(k1, (2, 1, 2, 2), jnp.float32) * 0.5
    b1 = jax.random.normal(k2, (2,), jnp.float32) * 0.1
    w2 = jax.random.normal(k3, (N_CLASSES, 2, 2, 2), jnp.float32) * 0.5
    b2 = jax.random.normal(k4, (N_CLASSES,), jnp.float32) * 0.1

    out = tiny_cnn_forward(x, w1, b1, w2, b2)
    out = jax.block_until_ready(out)

    ref = reference(x, w1, b1, w2, b2)
    assert out.shape == (2, N_CLASSES, H2, H2), out.shape
    assert jnp.allclose(out, ref, atol=1e-4, rtol=1e-4), float(
        jnp.max(jnp.abs(out - ref)))
    print("KERNEL_OK")
</pallas_src>

<mosaic_0001>
module attributes {stable_mosaic.version = 11 : i64} {
  func.func @tiny_cnn_kernel(%arg0: i32, %arg1: memref<4x8x8x8x128xf32, #tpu.memory_space<vmem>>, %arg2: memref<18xf32, #tpu.memory_space<smem>>, %arg3: memref<2xf32, #tpu.memory_space<smem>>, %arg4: memref<32xf32, #tpu.memory_space<smem>>, %arg5: memref<4xf32, #tpu.memory_space<smem>>, %arg6: memref<4x6x6x8x128xf32, #tpu.memory_space<vmem>>) attributes {dimension_semantics = [#tpu.dimension_semantics<parallel>], iteration_bounds = array<i64: 1>, scalar_prefetch = 0 : i64, scratch_operands = 0 : i64, tpu.core_type = #tpu.core_type<tc>, window_params = [{transform_indices = @transform_0, window_bounds = array<i64: 4, 8, 8, 8, 128>}, {transform_indices = @transform_1, window_bounds = array<i64: 18>}, {transform_indices = @transform_2, window_bounds = array<i64: 2>}, {transform_indices = @transform_3, window_bounds = array<i64: 32>}, {transform_indices = @transform_4, window_bounds = array<i64: 4>}, {transform_indices = @transform_5, window_bounds = array<i64: 4, 6, 6, 8, 128>}]} {
    %c0 = arith.constant 0 : index
    %c0_0 = arith.constant 0 : index
    %c0_1 = arith.constant 0 : index
    %c0_2 = arith.constant 0 : index
    %c0_3 = arith.constant 0 : index
    %0 = vector.load %arg1[%c0, %c0_0, %c0_1, %c0_2, %c0_3] : memref<4x8x8x8x128xf32, #tpu.memory_space<vmem>>, vector<1x7x7x8x128xf32>
    %1 = vector.shape_cast %0 : vector<1x7x7x8x128xf32> to vector<7x7x8x128xf32>
    %c1 = arith.constant 1 : index
    %c0_4 = arith.constant 0 : index
    %c0_5 = arith.constant 0 : index
    %c0_6 = arith.constant 0 : index
    %c0_7 = arith.constant 0 : index
    %2 = vector.load %arg1[%c1, %c0_4, %c0_5, %c0_6, %c0_7] : memref<4x8x8x8x128xf32, #tpu.memory_space<vmem>>, vector<1x7x7x8x128xf32>
    %3 = vector.shape_cast %2 : vector<1x7x7x8x128xf32> to vector<7x7x8x128xf32>
    %c0_8 = arith.constant 0 : index
    %c0_9 = arith.constant 0 : index
    %c1_10 = arith.constant 1 : index
    %c0_11 = arith.constant 0 : index
    %c0_12 = arith.constant 0 : index
    %4 = vector.load %arg1[%c0_8, %c0_9, %c1_10, %c0_11, %c0_12] : memref<4x8x8x8x128xf32, #tpu.memory_space<vmem>>, vector<1x7x7x8x128xf32>
    %5 = vector.shape_cast %4 : vector<1x7x7x8x128xf32> to vector<7x7x8x128xf32>
    %c2 = arith.constant 2 : index
    %c0_13 = arith.constant 0 : index
    %c0_14 = arith.constant 0 : index
    %c0_15 = arith.constant 0 : index
    %c0_16 = arith.constant 0 : index
    %6 = vector.load %arg1[%c2, %c0_13, %c0_14, %c0_15, %c0_16] : memref<4x8x8x8x128xf32, #tpu.memory_space<vmem>>, vector<1x7x7x8x128xf32>
    %7 = vector.shape_cast %6 : vector<1x7x7x8x128xf32> to vector<7x7x8x128xf32>
    %c3 = arith.constant 3 : index
    %c0_17 = arith.constant 0 : index
    %c0_18 = arith.constant 0 : index
    %c0_19 = arith.constant 0 : index
    %c0_20 = arith.constant 0 : index
    %8 = vector.load %arg1[%c3, %c0_17, %c0_18, %c0_19, %c0_20] : memref<4x8x8x8x128xf32, #tpu.memory_space<vmem>>, vector<1x7x7x8x128xf32>
    %9 = vector.shape_cast %8 : vector<1x7x7x8x128xf32> to vector<7x7x8x128xf32>
    %c2_21 = arith.constant 2 : index
    %c0_22 = arith.constant 0 : index
    %c1_23 = arith.constant 1 : index
    %c0_24 = arith.constant 0 : index
    %c0_25 = arith.constant 0 : index
    %10 = vector.load %arg1[%c2_21, %c0_22, %c1_23, %c0_24, %c0_25] : memref<4x8x8x8x128xf32, #tpu.memory_space<vmem>>, vector<1x7x7x8x128xf32>
    %11 = vector.shape_cast %10 : vector<1x7x7x8x128xf32> to vector<7x7x8x128xf32>
    %c0_26 = arith.constant 0 : index
    %c1_27 = arith.constant 1 : index
    %c0_28 = arith.constant 0 : index
    %c0_29 = arith.constant 0 : index
    %c0_30 = arith.constant 0 : index
    %12 = vector.load %arg1[%c0_26, %c1_27, %c0_28, %c0_29, %c0_30] : memref<4x8x8x8x128xf32, #tpu.memory_space<vmem>>, vector<1x7x7x8x128xf32>
    %13 = vector.shape_cast %12 : vector<1x7x7x8x128xf32> to vector<7x7x8x128xf32>
    %c1_31 = arith.constant 1 : index
    %c1_32 = arith.constant 1 : index
    %c0_33 = arith.constant 0 : index
    %c0_34 = arith.constant 0 : index
    %c0_35 = arith.constant 0 : index
    %14 = vector.load %arg1[%c1_31, %c1_32, %c0_33, %c0_34, %c0_35] : memref<4x8x8x8x128xf32, #tpu.memory_space<vmem>>, vector<1x7x7x8x128xf32>
    %15 = vector.shape_cast %14 : vector<1x7x7x8x128xf32> to vector<7x7x8x128xf32>
    %c0_36 = arith.constant 0 : index
    %c1_37 = arith.constant 1 : index
    %c1_38 = arith.constant 1 : index
    %c0_39 = arith.constant 0 : index
    %c0_40 = arith.constant 0 : index
    %16 = vector.load %arg1[%c0_36, %c1_37, %c1_38, %c0_39, %c0_40] : memref<4x8x8x8x128xf32, #tpu.memory_space<vmem>>, vector<1x7x7x8x128xf32>
    %17 = vector.shape_cast %16 : vector<1x7x7x8x128xf32> to vector<7x7x8x128xf32>
    %c0_41 = arith.constant 0 : index
    %18 = memref.load %arg2[%c0_41] : memref<18xf32, #tpu.memory_space<smem>>
    %19 = vector.broadcast %18 : f32 to vector<7x7x8x128xf32>
    %20 = arith.mulf %19, %1 : vector<7x7x8x128xf32>
    %c1_42 = arith.constant 1 : index
    %21 = memref.load %arg2[%c1_42] : memref<18xf32, #tpu.memory_space<smem>>
    %22 = vector.broadcast %21 : f32 to vector<7x7x8x128xf32>
    %23 = arith.mulf %22, %3 : vector<7x7x8x128xf32>
    %24 = arith.addf %20, %23 : vector<7x7x8x128xf32>
    %c2_43 = arith.constant 2 : index
    %25 = memref.load %arg2[%c2_43] : memref<18xf32, #tpu.memory_space<smem>>
    %26 = vector.broadcast %25 : f32 to vector<7x7x8x128xf32>
    %27 = arith.mulf %26, %5 : vector<7x7x8x128xf32>
    %28 = arith.addf %24, %27 : vector<7x7x8x128xf32>
    %c3_44 = arith.constant 3 : index
    %29 = memref.load %arg2[%c3_44] : memref<18xf32, #tpu.memory_space<smem>>
    %30 = vector.broadcast %29 : f32 to vector<7x7x8x128xf32>
    %31 = arith.mulf %30, %7 : vector<7x7x8x128xf32>
    %32 = arith.addf %28, %31 : vector<7x7x8x128xf32>
    %c4 = arith.constant 4 : index
    %33 = memref.load %arg2[%c4] : memref<18xf32, #tpu.memory_space<smem>>
    %34 = vector.broadcast %33 : f32 to vector<7x7x8x128xf32>
    %35 = arith.mulf %34, %9 : vector<7x7x8x128xf32>
    %36 = arith.addf %32, %35 : vector<7x7x8x128xf32>
    %c5 = arith.constant 5 : index
    %37 = memref.load %arg2[%c5] : memref<18xf32, #tpu.memory_space<smem>>
    %38 = vector.broadcast %37 : f32 to vector<7x7x8x128xf32>
    %39 = arith.mulf %38, %11 : vector<7x7x8x128xf32>
    %40 = arith.addf %36, %39 : vector<7x7x8x128xf32>
    %c6 = arith.constant 6 : index
    %41 = memref.load %arg2[%c6] : memref<18xf32, #tpu.memory_space<smem>>
    %42 = vector.broadcast %41 : f32 to vector<7x7x8x128xf32>
    %43 = arith.mulf %42, %13 : vector<7x7x8x128xf32>
    %44 = arith.addf %40, %43 : vector<7x7x8x128xf32>
    %c7 = arith.constant 7 : index
    %45 = memref.load %arg2[%c7] : memref<18xf32, #tpu.memory_space<smem>>
    %46 = vector.broadcast %45 : f32 to vector<7x7x8x128xf32>
    %47 = arith.mulf %46, %15 : vector<7x7x8x128xf32>
    %48 = arith.addf %44, %47 : vector<7x7x8x128xf32>
    %c8 = arith.constant 8 : index
    %49 = memref.load %arg2[%c8] : memref<18xf32, #tpu.memory_space<smem>>
    %50 = vector.broadcast %49 : f32 to vector<7x7x8x128xf32>
    %51 = arith.mulf %50, %17 : vector<7x7x8x128xf32>
    %52 = arith.addf %48, %51 : vector<7x7x8x128xf32>
    %c0_45 = arith.constant 0 : index
    %53 = memref.load %arg3[%c0_45] : memref<2xf32, #tpu.memory_space<smem>>
    %54 = vector.broadcast %53 : f32 to vector<7x7x8x128xf32>
    %55 = arith.addf %52, %54 : vector<7x7x8x128xf32>
    %cst = arith.constant 0.000000e+00 : f32
    %56 = vector.broadcast %cst : f32 to vector<7x7x8x128xf32>
    %57 = arith.maximumf %55, %56 : vector<7x7x8x128xf32>
    %c9 = arith.constant 9 : index
    %58 = memref.load %arg2[%c9] : memref<18xf32, #tpu.memory_space<smem>>
    %59 = vector.broadcast %58 : f32 to vector<7x7x8x128xf32>
    %60 = arith.mulf %59, %1 : vector<7x7x8x128xf32>
    %c10 = arith.constant 10 : index
    %61 = memref.load %arg2[%c10] : memref<18xf32, #tpu.memory_space<smem>>
    %62 = vector.broadcast %61 : f32 to vector<7x7x8x128xf32>
    %63 = arith.mulf %62, %3 : vector<7x7x8x128xf32>
    %64 = arith.addf %60, %63 : vector<7x7x8x128xf32>
    %c11 = arith.constant 11 : index
    %65 = memref.load %arg2[%c11] : memref<18xf32, #tpu.memory_space<smem>>
    %66 = vector.broadcast %65 : f32 to vector<7x7x8x128xf32>
    %67 = arith.mulf %66, %5 : vector<7x7x8x128xf32>
    %68 = arith.addf %64, %67 : vector<7x7x8x128xf32>
    %c12 = arith.constant 12 : index
    %69 = memref.load %arg2[%c12] : memref<18xf32, #tpu.memory_space<smem>>
    %70 = vector.broadcast %69 : f32 to vector<7x7x8x128xf32>
    %71 = arith.mulf %70, %7 : vector<7x7x8x128xf32>
    %72 = arith.addf %68, %71 : vector<7x7x8x128xf32>
    %c13 = arith.constant 13 : index
    %73 = memref.load %arg2[%c13] : memref<18xf32, #tpu.memory_space<smem>>
    %74 = vector.broadcast %73 : f32 to vector<7x7x8x128xf32>
    %75 = arith.mulf %74, %9 : vector<7x7x8x128xf32>
    %76 = arith.addf %72, %75 : vector<7x7x8x128xf32>
    %c14 = arith.constant 14 : index
    %77 = memref.load %arg2[%c14] : memref<18xf32, #tpu.memory_space<smem>>
    %78 = vector.broadcast %77 : f32 to vector<7x7x8x128xf32>
    %79 = arith.mulf %78, %11 : vector<7x7x8x128xf32>
    %80 = arith.addf %76, %79 : vector<7x7x8x128xf32>
    %c15 = arith.constant 15 : index
    %81 = memref.load %arg2[%c15] : memref<18xf32, #tpu.memory_space<smem>>
    %82 = vector.broadcast %81 : f32 to vector<7x7x8x128xf32>
    %83 = arith.mulf %82, %13 : vector<7x7x8x128xf32>
    %84 = arith.addf %80, %83 : vector<7x7x8x128xf32>
    %c16 = arith.constant 16 : index
    %85 = memref.load %arg2[%c16] : memref<18xf32, #tpu.memory_space<smem>>
    %86 = vector.broadcast %85 : f32 to vector<7x7x8x128xf32>
    %87 = arith.mulf %86, %15 : vector<7x7x8x128xf32>
    %88 = arith.addf %84, %87 : vector<7x7x8x128xf32>
    %c17 = arith.constant 17 : index
    %89 = memref.load %arg2[%c17] : memref<18xf32, #tpu.memory_space<smem>>
    %90 = vector.broadcast %89 : f32 to vector<7x7x8x128xf32>
    %91 = arith.mulf %90, %17 : vector<7x7x8x128xf32>
    %92 = arith.addf %88, %91 : vector<7x7x8x128xf32>
    %c1_46 = arith.constant 1 : index
    %93 = memref.load %arg3[%c1_46] : memref<2xf32, #tpu.memory_space<smem>>
    %94 = vector.broadcast %93 : f32 to vector<7x7x8x128xf32>
    %95 = arith.addf %92, %94 : vector<7x7x8x128xf32>
    %cst_47 = arith.constant 0.000000e+00 : f32
    %96 = vector.broadcast %cst_47 : f32 to vector<7x7x8x128xf32>
    %97 = arith.maximumf %95, %96 : vector<7x7x8x128xf32>
    %98 = vector.extract_strided_slice %57 {offsets = [0, 0, 0, 0], sizes = [6, 6, 8, 128], strides = [1, 1, 1, 1]} : vector<7x7x8x128xf32> to vector<6x6x8x128xf32>
    %99 = vector.extract_strided_slice %57 {offsets = [0, 1, 0, 0], sizes = [6, 6, 8, 128], strides = [1, 1, 1, 1]} : vector<7x7x8x128xf32> to vector<6x6x8x128xf32>
    %100 = vector.extract_strided_slice %57 {offsets = [1, 0, 0, 0], sizes = [6, 6, 8, 128], strides = [1, 1, 1, 1]} : vector<7x7x8x128xf32> to vector<6x6x8x128xf32>
    %101 = vector.extract_strided_slice %57 {offsets = [1, 1, 0, 0], sizes = [6, 6, 8, 128], strides = [1, 1, 1, 1]} : vector<7x7x8x128xf32> to vector<6x6x8x128xf32>
    %102 = vector.extract_strided_slice %97 {offsets = [0, 0, 0, 0], sizes = [6, 6, 8, 128], strides = [1, 1, 1, 1]} : vector<7x7x8x128xf32> to vector<6x6x8x128xf32>
    %103 = vector.extract_strided_slice %97 {offsets = [0, 1, 0, 0], sizes = [6, 6, 8, 128], strides = [1, 1, 1, 1]} : vector<7x7x8x128xf32> to vector<6x6x8x128xf32>
    %104 = vector.extract_strided_slice %97 {offsets = [1, 0, 0, 0], sizes = [6, 6, 8, 128], strides = [1, 1, 1, 1]} : vector<7x7x8x128xf32> to vector<6x6x8x128xf32>
    %105 = vector.extract_strided_slice %97 {offsets = [1, 1, 0, 0], sizes = [6, 6, 8, 128], strides = [1, 1, 1, 1]} : vector<7x7x8x128xf32> to vector<6x6x8x128xf32>
    %c0_48 = arith.constant 0 : index
    %106 = memref.load %arg4[%c0_48] : memref<32xf32, #tpu.memory_space<smem>>
    %107 = vector.broadcast %106 : f32 to vector<6x6x8x128xf32>
    %108 = arith.mulf %107, %98 : vector<6x6x8x128xf32>
    %c1_49 = arith.constant 1 : index
    %109 = memref.load %arg4[%c1_49] : memref<32xf32, #tpu.memory_space<smem>>
    %110 = vector.broadcast %109 : f32 to vector<6x6x8x128xf32>
    %111 = arith.mulf %110, %99 : vector<6x6x8x128xf32>
    %112 = arith.addf %108, %111 : vector<6x6x8x128xf32>
    %c2_50 = arith.constant 2 : index
    %113 = memref.load %arg4[%c2_50] : memref<32xf32, #tpu.memory_space<smem>>
    %114 = vector.broadcast %113 : f32 to vector<6x6x8x128xf32>
    %115 = arith.mulf %114, %100 : vector<6x6x8x128xf32>
    %116 = arith.addf %112, %115 : vector<6x6x8x128xf32>
    %c3_51 = arith.constant 3 : index
    %117 = memref.load %arg4[%c3_51] : memref<32xf32, #tpu.memory_space<smem>>
    %118 = vector.broadcast %117 : f32 to vector<6x6x8x128xf32>
    %119 = arith.mulf %118, %101 : vector<6x6x8x128xf32>
    %120 = arith.addf %116, %119 : vector<6x6x8x128xf32>
    %c4_52 = arith.constant 4 : index
    %121 = memref.load %arg4[%c4_52] : memref<32xf32, #tpu.memory_space<smem>>
    %122 = vector.broadcast %121 : f32 to vector<6x6x8x128xf32>
    %123 = arith.mulf %122, %102 : vector<6x6x8x128xf32>
    %124 = arith.addf %120, %123 : vector<6x6x8x128xf32>
    %c5_53 = arith.constant 5 : index
    %125 = memref.load %arg4[%c5_53] : memref<32xf32, #tpu.memory_space<smem>>
    %126 = vector.broadcast %125 : f32 to vector<6x6x8x128xf32>
    %127 = arith.mulf %126, %103 : vector<6x6x8x128xf32>
    %128 = arith.addf %124, %127 : vector<6x6x8x128xf32>
    %c6_54 = arith.constant 6 : index
    %129 = memref.load %arg4[%c6_54] : memref<32xf32, #tpu.memory_space<smem>>
    %130 = vector.broadcast %129 : f32 to vector<6x6x8x128xf32>
    %131 = arith.mulf %130, %104 : vector<6x6x8x128xf32>
    %132 = arith.addf %128, %131 : vector<6x6x8x128xf32>
    %c7_55 = arith.constant 7 : index
    %133 = memref.load %arg4[%c7_55] : memref<32xf32, #tpu.memory_space<smem>>
    %134 = vector.broadcast %133 : f32 to vector<6x6x8x128xf32>
    %135 = arith.mulf %134, %105 : vector<6x6x8x128xf32>
    %136 = arith.addf %132, %135 : vector<6x6x8x128xf32>
    %c0_56 = arith.constant 0 : index
    %137 = memref.load %arg5[%c0_56] : memref<4xf32, #tpu.memory_space<smem>>
    %138 = vector.broadcast %137 : f32 to vector<6x6x8x128xf32>
    %139 = arith.addf %136, %138 : vector<6x6x8x128xf32>
    %cst_57 = arith.constant 0.000000e+00 : f32
    %140 = vector.broadcast %cst_57 : f32 to vector<6x6x8x128xf32>
    %141 = arith.maximumf %139, %140 : vector<6x6x8x128xf32>
    %c0_58 = arith.constant 0 : index
    %c0_59 = arith.constant 0 : index
    %c0_60 = arith.constant 0 : index
    %c0_61 = arith.constant 0 : index
    %c0_62 = arith.constant 0 : index
    %142 = vector.load %arg6[%c0_58, %c0_59, %c0_60, %c0_61, %c0_62] : memref<4x6x6x8x128xf32, #tpu.memory_space<vmem>>, vector<1x6x6x8x128xf32>
    %143 = vector.shape_cast %142 : vector<1x6x6x8x128xf32> to vector<6x6x8x128xf32>
    %144 = vector.shape_cast %141 : vector<6x6x8x128xf32> to vector<1x6x6x8x128xf32>
    tpu.vector_store %arg6[%c0_58, %c0_59, %c0_60, %c0_61, %c0_62], %144 {strides = array<i32>} : memref<4x6x6x8x128xf32, #tpu.memory_space<vmem>>, vector<1x6x6x8x128xf32>,
    %c8_63 = arith.constant 8 : index
    %145 = memref.load %arg4[%c8_63] : memref<32xf32, #tpu.memory_space<smem>>
    %146 = vector.broadcast %145 : f32 to vector<6x6x8x128xf32>
    %147 = arith.mulf %146, %98 : vector<6x6x8x128xf32>
    %c9_64 = arith.constant 9 : index
    %148 = memref.load %arg4[%c9_64] : memref<32xf32, #tpu.memory_space<smem>>
    %149 = vector.broadcast %148 : f32 to vector<6x6x8x128xf32>
    %150 = arith.mulf %149, %99 : vector<6x6x8x128xf32>
    %151 = arith.addf %147, %150 : vector<6x6x8x128xf32>
    %c10_65 = arith.constant 10 : index
    %152 = memref.load %arg4[%c10_65] : memref<32xf32, #tpu.memory_space<smem>>
    %153 = vector.broadcast %152 : f32 to vector<6x6x8x128xf32>
    %154 = arith.mulf %153, %100 : vector<6x6x8x128xf32>
    %155 = arith.addf %151, %154 : vector<6x6x8x128xf32>
    %c11_66 = arith.constant 11 : index
    %156 = memref.load %arg4[%c11_66] : memref<32xf32, #tpu.memory_space<smem>>
    %157 = vector.broadcast %156 : f32 to vector<6x6x8x128xf32>
    %158 = arith.mulf %157, %101 : vector<6x6x8x128xf32>
    %159 = arith.addf %155, %158 : vector<6x6x8x128xf32>
    %c12_67 = arith.constant 12 : index
    %160 = memref.load %arg4[%c12_67] : memref<32xf32, #tpu.memory_space<smem>>
    %161 = vector.broadcast %160 : f32 to vector<6x6x8x128xf32>
    %162 = arith.mulf %161, %102 : vector<6x6x8x128xf32>
    %163 = arith.addf %159, %162 : vector<6x6x8x128xf32>
    %c13_68 = arith.constant 13 : index
    %164 = memref.load %arg4[%c13_68] : memref<32xf32, #tpu.memory_space<smem>>
    %165 = vector.broadcast %164 : f32 to vector<6x6x8x128xf32>
    %166 = arith.mulf %165, %103 : vector<6x6x8x128xf32>
    %167 = arith.addf %163, %166 : vector<6x6x8x128xf32>
    %c14_69 = arith.constant 14 : index
    %168 = memref.load %arg4[%c14_69] : memref<32xf32, #tpu.memory_space<smem>>
    %169 = vector.broadcast %168 : f32 to vector<6x6x8x128xf32>
    %170 = arith.mulf %169, %104 : vector<6x6x8x128xf32>
    %171 = arith.addf %167, %170 : vector<6x6x8x128xf32>
    %c15_70 = arith.constant 15 : index
    %172 = memref.load %arg4[%c15_70] : memref<32xf32, #tpu.memory_space<smem>>
    %173 = vector.broadcast %172 : f32 to vector<6x6x8x128xf32>
    %174 = arith.mulf %173, %105 : vector<6x6x8x128xf32>
    %175 = arith.addf %171, %174 : vector<6x6x8x128xf32>
    %c1_71 = arith.constant 1 : index
    %176 = memref.load %arg5[%c1_71] : memref<4xf32, #tpu.memory_space<smem>>
    %177 = vector.broadcast %176 : f32 to vector<6x6x8x128xf32>
    %178 = arith.addf %175, %177 : vector<6x6x8x128xf32>
    %cst_72 = arith.constant 0.000000e+00 : f32
    %179 = vector.broadcast %cst_72 : f32 to vector<6x6x8x128xf32>
    %180 = arith.maximumf %178, %179 : vector<6x6x8x128xf32>
    %c1_73 = arith.constant 1 : index
    %c0_74 = arith.constant 0 : index
    %c0_75 = arith.constant 0 : index
    %c0_76 = arith.constant 0 : index
    %c0_77 = arith.constant 0 : index
    %181 = vector.load %arg6[%c1_73, %c0_74, %c0_75, %c0_76, %c0_77] : memref<4x6x6x8x128xf32, #tpu.memory_space<vmem>>, vector<1x6x6x8x128xf32>
    %182 = vector.shape_cast %181 : vector<1x6x6x8x128xf32> to vector<6x6x8x128xf32>
    %183 = vector.shape_cast %180 : vector<6x6x8x128xf32> to vector<1x6x6x8x128xf32>
    tpu.vector_store %arg6[%c1_73, %c0_74, %c0_75, %c0_76, %c0_77], %183 {strides = array<i32>} : memref<4x6x6x8x128xf32, #tpu.memory_space<vmem>>, vector<1x6x6x8x128xf32>,
    %c16_78 = arith.constant 16 : index
    %184 = memref.load %arg4[%c16_78] : memref<32xf32, #tpu.memory_space<smem>>
    %185 = vector.broadcast %184 : f32 to vector<6x6x8x128xf32>
    %186 = arith.mulf %185, %98 : vector<6x6x8x128xf32>
    %c17_79 = arith.constant 17 : index
    %187 = memref.load %arg4[%c17_79] : memref<32xf32, #tpu.memory_space<smem>>
    %188 = vector.broadcast %187 : f32 to vector<6x6x8x128xf32>
    %189 = arith.mulf %188, %99 : vector<6x6x8x128xf32>
    %190 = arith.addf %186, %189 : vector<6x6x8x128xf32>
    %c18 = arith.constant 18 : index
    %191 = memref.load %arg4[%c18] : memref<32xf32, #tpu.memory_space<smem>>
    %192 = vector.broadcast %191 : f32 to vector<6x6x8x128xf32>
    %193 = arith.mulf %192, %100 : vector<6x6x8x128xf32>
    %194 = arith.addf %190, %193 : vector<6x6x8x128xf32>
    %c19 = arith.constant 19 : index
    %195 = memref.load %arg4[%c19] : memref<32xf32, #tpu.memory_space<smem>>
    %196 = vector.broadcast %195 : f32 to vector<6x6x8x128xf32>
    %197 = arith.mulf %196, %101 : vector<6x6x8x128xf32>
    %198 = arith.addf %194, %197 : vector<6x6x8x128xf32>
    %c20 = arith.constant 20 : index
    %199 = memref.load %arg4[%c20] : memref<32xf32, #tpu.memory_space<smem>>
    %200 = vector.broadcast %199 : f32 to vector<6x6x8x128xf32>
    %201 = arith.mulf %200, %102 : vector<6x6x8x128xf32>
    %202 = arith.addf %198, %201 : vector<6x6x8x128xf32>
    %c21 = arith.constant 21 : index
    %203 = memref.load %arg4[%c21] : memref<32xf32, #tpu.memory_space<smem>>
    %204 = vector.broadcast %203 : f32 to vector<6x6x8x128xf32>
    %205 = arith.mulf %204, %103 : vector<6x6x8x128xf32>
    %206 = arith.addf %202, %205 : vector<6x6x8x128xf32>
    %c22 = arith.constant 22 : index
    %207 = memref.load %arg4[%c22] : memref<32xf32, #tpu.memory_space<smem>>
    %208 = vector.broadcast %207 : f32 to vector<6x6x8x128xf32>
    %209 = arith.mulf %208, %104 : vector<6x6x8x128xf32>
    %210 = arith.addf %206, %209 : vector<6x6x8x128xf32>
    %c23 = arith.constant 23 : index
    %211 = memref.load %arg4[%c23] : memref<32xf32, #tpu.memory_space<smem>>
    %212 = vector.broadcast %211 : f32 to vector<6x6x8x128xf32>
    %213 = arith.mulf %212, %105 : vector<6x6x8x128xf32>
    %214 = arith.addf %210, %213 : vector<6x6x8x128xf32>
    %c2_80 = arith.constant 2 : index
    %215 = memref.load %arg5[%c2_80] : memref<4xf32, #tpu.memory_space<smem>>
    %216 = vector.broadcast %215 : f32 to vector<6x6x8x128xf32>
    %217 = arith.addf %214, %216 : vector<6x6x8x128xf32>
    %cst_81 = arith.constant 0.000000e+00 : f32
    %218 = vector.broadcast %cst_81 : f32 to vector<6x6x8x128xf32>
    %219 = arith.maximumf %217, %218 : vector<6x6x8x128xf32>
    %c2_82 = arith.constant 2 : index
    %c0_83 = arith.constant 0 : index
    %c0_84 = arith.constant 0 : index
    %c0_85 = arith.constant 0 : index
    %c0_86 = arith.constant 0 : index
    %220 = vector.load %arg6[%c2_82, %c0_83, %c0_84, %c0_85, %c0_86] : memref<4x6x6x8x128xf32, #tpu.memory_space<vmem>>, vector<1x6x6x8x128xf32>
    %221 = vector.shape_cast %220 : vector<1x6x6x8x128xf32> to vector<6x6x8x128xf32>
    %222 = vector.shape_cast %219 : vector<6x6x8x128xf32> to vector<1x6x6x8x128xf32>
    tpu.vector_store %arg6[%c2_82, %c0_83, %c0_84, %c0_85, %c0_86], %222 {strides = array<i32>} : memref<4x6x6x8x128xf32, #tpu.memory_space<vmem>>, vector<1x6x6x8x128xf32>,
    %c24 = arith.constant 24 : index
    %223 = memref.load %arg4[%c24] : memref<32xf32, #tpu.memory_space<smem>>
    %224 = vector.broadcast %223 : f32 to vector<6x6x8x128xf32>
    %225 = arith.mulf %224, %98 : vector<6x6x8x128xf32>
    %c25 = arith.constant 25 : index
    %226 = memref.load %arg4[%c25] : memref<32xf32, #tpu.memory_space<smem>>
    %227 = vector.broadcast %226 : f32 to vector<6x6x8x128xf32>
    %228 = arith.mulf %227, %99 : vector<6x6x8x128xf32>
    %229 = arith.addf %225, %228 : vector<6x6x8x128xf32>
    %c26 = arith.constant 26 : index
    %230 = memref.load %arg4[%c26] : memref<32xf32, #tpu.memory_space<smem>>
    %231 = vector.broadcast %230 : f32 to vector<6x6x8x128xf32>
    %232 = arith.mulf %231, %100 : vector<6x6x8x128xf32>
    %233 = arith.addf %229, %232 : vector<6x6x8x128xf32>
    %c27 = arith.constant 27 : index
    %234 = memref.load %arg4[%c27] : memref<32xf32, #tpu.memory_space<smem>>
    %235 = vector.broadcast %234 : f32 to vector<6x6x8x128xf32>
    %236 = arith.mulf %235, %101 : vector<6x6x8x128xf32>
    %237 = arith.addf %233, %236 : vector<6x6x8x128xf32>
    %c28 = arith.constant 28 : index
    %238 = memref.load %arg4[%c28] : memref<32xf32, #tpu.memory_space<smem>>
    %239 = vector.broadcast %238 : f32 to vector<6x6x8x128xf32>
    %240 = arith.mulf %239, %102 : vector<6x6x8x128xf32>
    %241 = arith.addf %237, %240 : vector<6x6x8x128xf32>
    %c29 = arith.constant 29 : index
    %242 = memref.load %arg4[%c29] : memref<32xf32, #tpu.memory_space<smem>>
    %243 = vector.broadcast %242 : f32 to vector<6x6x8x128xf32>
    %244 = arith.mulf %243, %103 : vector<6x6x8x128xf32>
    %245 = arith.addf %241, %244 : vector<6x6x8x128xf32>
    %c30 = arith.constant 30 : index
    %246 = memref.load %arg4[%c30] : memref<32xf32, #tpu.memory_space<smem>>
    %247 = vector.broadcast %246 : f32 to vector<6x6x8x128xf32>
    %248 = arith.mulf %247, %104 : vector<6x6x8x128xf32>
    %249 = arith.addf %245, %248 : vector<6x6x8x128xf32>
    %c31 = arith.constant 31 : index
    %250 = memref.load %arg4[%c31] : memref<32xf32, #tpu.memory_space<smem>>
    %251 = vector.broadcast %250 : f32 to vector<6x6x8x128xf32>
    %252 = arith.mulf %251, %105 : vector<6x6x8x128xf32>
    %253 = arith.addf %249, %252 : vector<6x6x8x128xf32>
    %c3_87 = arith.constant 3 : index
    %254 = memref.load %arg5[%c3_87] : memref<4xf32, #tpu.memory_space<smem>>
    %255 = vector.broadcast %254 : f32 to vector<6x6x8x128xf32>
    %256 = arith.addf %253, %255 : vector<6x6x8x128xf32>
    %cst_88 = arith.constant 0.000000e+00 : f32
    %257 = vector.broadcast %cst_88 : f32 to vector<6x6x8x128xf32>
    %258 = arith.maximumf %256, %257 : vector<6x6x8x128xf32>
    %c3_89 = arith.constant 3 : index
    %c0_90 = arith.constant 0 : index
    %c0_91 = arith.constant 0 : index
    %c0_92 = arith.constant 0 : index
    %c0_93 = arith.constant 0 : index
    %259 = vector.load %arg6[%c3_89, %c0_90, %c0_91, %c0_92, %c0_93] : memref<4x6x6x8x128xf32, #tpu.memory_space<vmem>>, vector<1x6x6x8x128xf32>
    %260 = vector.shape_cast %259 : vector<1x6x6x8x128xf32> to vector<6x6x8x128xf32>
    %261 = vector.shape_cast %258 : vector<6x6x8x128xf32> to vector<1x6x6x8x128xf32>
    tpu.vector_store %arg6[%c3_89, %c0_90, %c0_91, %c0_92, %c0_93], %261 {strides = array<i32>} : memref<4x6x6x8x128xf32, #tpu.memory_space<vmem>>, vector<1x6x6x8x128xf32>,
    return
  }
  func.func @transform_0(%arg0: i32) -> (i32, i32, i32, i32, i32) {
    %c0_i32 = arith.constant 0 : i32
    %c0_i32_0 = arith.constant 0 : i32
    %c0_i32_1 = arith.constant 0 : i32
    %c0_i32_2 = arith.constant 0 : i32
    %c0_i32_3 = arith.constant 0 : i32
    return %c0_i32, %c0_i32_0, %c0_i32_1, %arg0, %c0_i32_2 : i32, i32, i32, i32, i32
  }
  func.func @transform_1(%arg0: i32) -> i32 {
    %c0_i32 = arith.constant 0 : i32
    %c0_i32_0 = arith.constant 0 : i32
    return %c0_i32 : i32
  }
  func.func @transform_2(%arg0: i32) -> i32 {
    %c0_i32 = arith.constant 0 : i32
    %c0_i32_0 = arith.constant 0 : i32
    return %c0_i32 : i32
  }
  func.func @transform_3(%arg0: i32) -> i32 {
    %c0_i32 = arith.constant 0 : i32
    %c0_i32_0 = arith.constant 0 : i32
    return %c0_i32 : i32
  }
  func.func @transform_4(%arg0: i32) -> i32 {
    %c0_i32 = arith.constant 0 : i32
    %c0_i32_0 = arith.constant 0 : i32
    return %c0_i32 : i32
  }
  func.func @transform_5(%arg0: i32) -> (i32, i32, i32, i32, i32) {
    %c0_i32 = arith.constant 0 : i32
    %c0_i32_0 = arith.constant 0 : i32
    %c0_i32_1 = arith.constant 0 : i32
    %c0_i32_2 = arith.constant 0 : i32
    %c0_i32_3 = arith.constant 0 : i32
    return %c0_i32, %c0_i32_0, %c0_i32_1, %arg0, %c0_i32_2 : i32, i32, i32, i32, i32
  }
}

</mosaic_0001>

<bundles_post_ra>
// kernel: squeeze.3
= control target key start
LH: loop header
LB: loop body
LE: loop exit
PB: predicated region body
PF: predicated region fallthrough
CT: control target
= control target key end

     0   :  { %2 = vsyncpa [#allocation1], 0  ;;  %s377_s6 = smov [#allocation0]   ;;  %s663_s0 = inlined_call_operand.hbm [shape: f32[2,1,16,16], index: 0, kind: input, shape index: {}]   ;;  %s664_s1 = inlined_call_operand.vmem [shape: f32[2,8,2,8,2], index: 1, kind: output, shape index: {}]  }
   0x1   :  { %s7_s7 = sshll.u32 %s377_s6, 4  ;;  %s353_s10 = scalar_lea.hbm %s663_s0, 512  ;;  %s8_s7 = int_to_ptr.vmem [resolvable:$true] %s7_s7 }
   0x2   :  { %p354_p0 = scmp.ne.s32.totalorder %s663_s0, %s353_s10  ;;  %p357_p1 = scmp.lt.u32.totalorder %s353_s10, %s663_s0 }
   0x4   :  { %p359_p2 = pnand %p357_p1, %p354_p0 }
   0x6   :  { %362 = shalt.err (!%p359_p2)
}
   0x7   :  { %s363_s15 = scalar_lea.vmem %s8_s7, 512  ;;  %p368_p4 = scmp.lt.s32.totalorder %s8_s7, %s8_s7 }
   0x8   :  { %p364_p3 = scmp.ne.s32.totalorder %s8_s7, %s363_s15  ;;  %p369_p5 = scmp.lt.s32.totalorder %s363_s15, %s363_s15 }
   0xa   :  { %p370_p6 = por %p369_p5, %p368_p4 }
   0xc   :  { %p371_p7 = pnand %p370_p6, %p364_p3 }
   0xe   :  { %374 = shalt.err (!%p371_p7)
}
   0xf   :  { %10 = dma.hbm_to_vmem [thread:$0]  %s663_s0, 512, %s8_s7, [#allocation1]  }
  0x10   :  { %375 = dma.done.wait [#allocation1], 512  }
  0x11   :  { %376 = vsyncadd [#allocation1], 4294966784  ;;  %v55_v0 = vld [vmem:[#allocation0 + $0x10] sm:$0xff]   ;;  %v37_v1 = vld [vmem:[#allocation0] sm:$0xff]   ;;  %vm13_vm0 = vcmask 15360   ;;  %s378_s0 = smov 126  }
  0x12   :  { %v64_v2 = vld [vmem:[#allocation0 + $0x18] sm:$0xff]   ;;  %56 = vrot.lane.b32.xlu1 %v55_v0, %s378_s0  ;;  %38 = vrot.lane.b32.xlu0 %v37_v1, %s378_s0  ;;  %v46_v3 = vld [vmem:[#allocation0 + $0x8] sm:$0xff]   ;;  %14 = vst.msk [vmem:[%s664_s1] ss:$8 sm:$0xf] %vm13_vm0, %v37_v1   ;;  %s379_s5 = smov 124  }
  0x13   :  { %15 = vst.msk [vmem:[%s664_s1] ss:$8 sm:$0xf0] %vm13_vm0, %v37_v1   ;;  %285 = vst.msk [vmem:[%s664_s1 + $0x80] ss:$8 sm:$0xf] %vm13_vm0, %v55_v0  }
  0x14   :  { %286 = vst.msk [vmem:[%s664_s1 + $0x80] ss:$8 sm:$0xf0] %vm13_vm0, %v55_v0   ;;  %287 = vst.msk [vmem:[%s664_s1 + $0xc0] ss:$8 sm:$0xf] %vm13_vm0, %v64_v2  }
  0x15   :  { %288 = vst.msk [vmem:[%s664_s1 + $0xc0] ss:$8 sm:$0xf0] %vm13_vm0, %v64_v2   ;;  %283 = vst.msk [vmem:[%s664_s1 + $0x40] ss:$8 sm:$0xf] %vm13_vm0, %v46_v3  }
  0x16   :  { %284 = vst.msk [vmem:[%s664_s1 + $0x40] ss:$8 sm:$0xf0] %vm13_vm0, %v46_v3   ;;  %65 = vrot.lane.b32.xlu1 %v64_v2, %s378_s0  ;;  %47 = vrot.lane.b32.xlu0 %v46_v3, %s378_s0  ;;  %s380_s6 = smov 122   ;;  %s381_s7 = smov 120  }
  0x17   :  { %s382_s8 = smov 118   ;;  %s383_s9 = smov 116  }
  0x18   :  { %s384_s10 = smov 114  }
  0x1a   :  { %82 = vrot.lane.b32.xlu1 %v46_v3, %s379_s5  ;;  %73 = vrot.lane.b32.xlu0 %v37_v1, %s379_s5 }
  0x1e   :  { %100 = vrot.lane.b32.xlu1 %v64_v2, %s379_s5  ;;  %91 = vrot.lane.b32.xlu0 %v55_v0, %s379_s5 }
  0x22   :  { %117 = vrot.lane.b32.xlu1 %v46_v3, %s380_s6  ;;  %108 = vrot.lane.b32.xlu0 %v37_v1, %s380_s6 }
  0x26   :  { %135 = vrot.lane.b32.xlu1 %v64_v2, %s380_s6  ;;  %126 = vrot.lane.b32.xlu0 %v55_v0, %s380_s6 }
  0x2a   :  { %152 = vrot.lane.b32.xlu1 %v46_v3, %s381_s7  ;;  %143 = vrot.lane.b32.xlu0 %v37_v1, %s381_s7 }
  0x2e   :  { %170 = vrot.lane.b32.xlu1 %v64_v2, %s381_s7  ;;  %161 = vrot.lane.b32.xlu0 %v55_v0, %s381_s7 }
  0x32   :  { %187 = vrot.lane.b32.xlu1 %v46_v3, %s382_s8  ;;  %178 = vrot.lane.b32.xlu0 %v37_v1, %s382_s8 }
  0x36   :  { %205 = vrot.lane.b32.xlu1 %v64_v2, %s382_s8  ;;  %196 = vrot.lane.b32.xlu0 %v55_v0, %s382_s8 }
  0x3a   :  { %222 = vrot.lane.b32.xlu1 %v46_v3, %s383_s9  ;;  %213 = vrot.lane.b32.xlu0 %v37_v1, %s383_s9 }
  0x3e   :  { %240 = vrot.lane.b32.xlu1 %v64_v2, %s383_s9  ;;  %231 = vrot.lane.b32.xlu0 %v55_v0, %s383_s9 }
  0x42   :  { %257 = vrot.lane.b32.xlu1 %v46_v3, %s384_s10  ;;  %248 = vrot.lane.b32.xlu0 %v37_v1, %s384_s10 }
  0x46   :  { %275 = vrot.lane.b32.xlu1 %v64_v2, %s384_s10  ;;  %266 = vrot.lane.b32.xlu0 %v55_v0, %s384_s10 }
  0x84   :  { %v57_v4 = vpop.permute.xlu1 %56   ;;  %v39_v5 = vpop.permute.xlu0 %38  }
  0x85   :  { %293 = vst.msk [vmem:[%s664_s1 + $0x81] ss:$8 sm:$0xf] %vm13_vm0, %v57_v4   ;;  %294 = vst.msk [vmem:[%s664_s1 + $0x81] ss:$8 sm:$0xf0] %vm13_vm0, %v57_v4  }
  0x86   :  { %289 = vst.msk [vmem:[%s664_s1 + $0x1] ss:$8 sm:$0xf] %vm13_vm0, %v39_v5   ;;  %290 = vst.msk [vmem:[%s664_s1 + $0x1] ss:$8 sm:$0xf0] %vm13_vm0, %v39_v5  }
  0x88   :  { %v66_v6 = vpop.permute.xlu1 %65   ;;  %v48_v7 = vpop.permute.xlu0 %47  }
  0x89   :  { %295 = vst.msk [vmem:[%s664_s1 + $0xc1] ss:$8 sm:$0xf] %vm13_vm0, %v66_v6   ;;  %296 = vst.msk [vmem:[%s664_s1 + $0xc1] ss:$8 sm:$0xf0] %vm13_vm0, %v66_v6  }
  0x8a   :  { %291 = vst.msk [vmem:[%s664_s1 + $0x41] ss:$8 sm:$0xf] %vm13_vm0, %v48_v7   ;;  %292 = vst.msk [vmem:[%s664_s1 + $0x41] ss:$8 sm:$0xf0] %vm13_vm0, %v48_v7  }
  0x8c   :  { %v83_v8 = vpop.permute.xlu1 %82   ;;  %v74_v9 = vpop.permute.xlu0 %73  }
  0x8d   :  { %299 = vst.msk [vmem:[%s664_s1 + $0x42] ss:$8 sm:$0xf] %vm13_vm0, %v83_v8   ;;  %300 = vst.msk [vmem:[%s664_s1 + $0x42] ss:$8 sm:$0xf0] %vm13_vm0, %v83_v8  }
  0x8e   :  { %297 = vst.msk [vmem:[%s664_s1 + $0x2] ss:$8 sm:$0xf] %vm13_vm0, %v74_v9   ;;  %298 = vst.msk [vmem:[%s664_s1 + $0x2] ss:$8 sm:$0xf0] %vm13_vm0, %v74_v9  }
  0x90   :  { %v101_v10 = vpop.permute.xlu1 %100   ;;  %v92_v11 = vpop.permute.xlu0 %91  }
  0x91   :  { %303 = vst.msk [vmem:[%s664_s1 + $0xc2] ss:$8 sm:$0xf] %vm13_vm0, %v101_v10   ;;  %304 = vst.msk [vmem:[%s664_s1 + $0xc2] ss:$8 sm:$0xf0] %vm13_vm0, %v101_v10  }
  0x92   :  { %301 = vst.msk [vmem:[%s664_s1 + $0x82] ss:$8 sm:$0xf] %vm13_vm0, %v92_v11   ;;  %302 = vst.msk [vmem:[%s664_s1 + $0x82] ss:$8 sm:$0xf0] %vm13_vm0, %v92_v11  }
  0x94   :  { %v118_v12 = vpop.permute.xlu1 %117   ;;  %v109_v13 = vpop.permute.xlu0 %108  }
  0x95   :  { %307 = vst.msk [vmem:[%s664_s1 + $0x43] ss:$8 sm:$0xf] %vm13_vm0, %v118_v12   ;;  %308 = vst.msk [vmem:[%s664_s1 + $0x43] ss:$8 sm:$0xf0] %vm13_vm0, %v118_v12  }
  0x96   :  { %305 = vst.msk [vmem:[%s664_s1 + $0x3] ss:$8 sm:$0xf] %vm13_vm0, %v109_v13   ;;  %306 = vst.msk [vmem:[%s664_s1 + $0x3] ss:$8 sm:$0xf0] %vm13_vm0, %v109_v13  }
  0x98   :  { %v136_v14 = vpop.permute.xlu1 %135   ;;  %v127_v15 = vpop.permute.xlu0 %126  }
  0x99   :  { %311 = vst.msk [vmem:[%s664_s1 + $0xc3] ss:$8 sm:$0xf] %vm13_vm0, %v136_v14   ;;  %312 = vst.msk [vmem:[%s664_s1 + $0xc3] ss:$8 sm:$0xf0] %vm13_vm0, %v136_v14  }
  0x9a   :  { %309 = vst.msk [vmem:[%s664_s1 + $0x83] ss:$8 sm:$0xf] %vm13_vm0, %v127_v15   ;;  %310 = vst.msk [vmem:[%s664_s1 + $0x83] ss:$8 sm:$0xf0] %vm13_vm0, %v127_v15  }
  0x9c   :  { %v153_v16 = vpop.permute.xlu1 %152   ;;  %v144_v17 = vpop.permute.xlu0 %143  }
  0x9d   :  { %315 = vst.msk [vmem:[%s664_s1 + $0x44] ss:$8 sm:$0xf] %vm13_vm0, %v153_v16   ;;  %316 = vst.msk [vmem:[%s664_s1 + $0x44] ss:$8 sm:$0xf0] %vm13_vm0, %v153_v16  }
  0x9e   :  { %313 = vst.msk [vmem:[%s664_s1 + $0x4] ss:$8 sm:$0xf] %vm13_vm0, %v144_v17   ;;  %314 = vst.msk [vmem:[%s664_s1 + $0x4] ss:$8 sm:$0xf0] %vm13_vm0, %v144_v17  }
  0xa0   :  { %v171_v18 = vpop.permute.xlu1 %170   ;;  %v162_v19 = vpop.permute.xlu0 %161  }
  0xa1   :  { %319 = vst.msk [vmem:[%s664_s1 + $0xc4] ss:$8 sm:$0xf] %vm13_vm0, %v171_v18   ;;  %320 = vst.msk [vmem:[%s664_s1 + $0xc4] ss:$8 sm:$0xf0] %vm13_vm0, %v171_v18  }
  0xa2   :  { %317 = vst.msk [vmem:[%s664_s1 + $0x84] ss:$8 sm:$0xf] %vm13_vm0, %v162_v19   ;;  %318 = vst.msk [vmem:[%s664_s1 + $0x84] ss:$8 sm:$0xf0] %vm13_vm0, %v162_v19  }
  0xa4   :  { %v188_v20 = vpop.permute.xlu1 %187   ;;  %v179_v21 = vpop.permute.xlu0 %178  }
  0xa5   :  { %323 = vst.msk [vmem:[%s664_s1 + $0x45] ss:$8 sm:$0xf] %vm13_vm0, %v188_v20   ;;  %324 = vst.msk [vmem:[%s664_s1 + $0x45] ss:$8 sm:$0xf0] %vm13_vm0, %v188_v20  }
  0xa6   :  { %321 = vst.msk [vmem:[%s664_s1 + $0x5] ss:$8 sm:$0xf] %vm13_vm0, %v179_v21   ;;  %322 = vst.msk [vmem:[%s664_s1 + $0x5] ss:$8 sm:$0xf0] %vm13_vm0, %v179_v21  }
  0xa8   :  { %v206_v22 = vpop.permute.xlu1 %205   ;;  %v197_v23 = vpop.permute.xlu0 %196  }
  0xa9   :  { %327 = vst.msk [vmem:[%s664_s1 + $0xc5] ss:$8 sm:$0xf] %vm13_vm0, %v206_v22   ;;  %328 = vst.msk [vmem:[%s664_s1 + $0xc5] ss:$8 sm:$0xf0] %vm13_vm0, %v206_v22  }
  0xaa   :  { %325 = vst.msk [vmem:[%s664_s1 + $0x85] ss:$8 sm:$0xf] %vm13_vm0, %v197_v23   ;;  %326 = vst.msk [vmem:[%s664_s1 + $0x85] ss:$8 sm:$0xf0] %vm13_vm0, %v197_v23  }
  0xac   :  { %v223_v24 = vpop.permute.xlu1 %222   ;;  %v214_v25 = vpop.permute.xlu0 %213  }
  0xad   :  { %331 = vst.msk [vmem:[%s664_s1 + $0x46] ss:$8 sm:$0xf] %vm13_vm0, %v223_v24   ;;  %332 = vst.msk [vmem:[%s664_s1 + $0x46] ss:$8 sm:$0xf0] %vm13_vm0, %v223_v24  }
  0xae   :  { %329 = vst.msk [vmem:[%s664_s1 + $0x6] ss:$8 sm:$0xf] %vm13_vm0, %v214_v25   ;;  %330 = vst.msk [vmem:[%s664_s1 + $0x6] ss:$8 sm:$0xf0] %vm13_vm0, %v214_v25  }
  0xb0   :  { %v241_v26 = vpop.permute.xlu1 %240   ;;  %v232_v27 = vpop.permute.xlu0 %231  }
  0xb1   :  { %335 = vst.msk [vmem:[%s664_s1 + $0xc6] ss:$8 sm:$0xf] %vm13_vm0, %v241_v26   ;;  %336 = vst.msk [vmem:[%s664_s1 + $0xc6] ss:$8 sm:$0xf0] %vm13_vm0, %v241_v26  }
  0xb2   :  { %333 = vst.msk [vmem:[%s664_s1 + $0x86] ss:$8 sm:$0xf] %vm13_vm0, %v232_v27   ;;  %334 = vst.msk [vmem:[%s664_s1 + $0x86] ss:$8 sm:$0xf0] %vm13_vm0, %v232_v27  }
  0xb4   :  { %v258_v28 = vpop.permute.xlu1 %257   ;;  %v249_v29 = vpop.permute.xlu0 %248  }
  0xb5   :  { %339 = vst.msk [vmem:[%s664_s1 + $0x47] ss:$8 sm:$0xf] %vm13_vm0, %v258_v28   ;;  %340 = vst.msk [vmem:[%s664_s1 + $0x47] ss:$8 sm:$0xf0] %vm13_vm0, %v258_v28  }
  0xb6   :  { %337 = vst.msk [vmem:[%s664_s1 + $0x7] ss:$8 sm:$0xf] %vm13_vm0, %v249_v29   ;;  %338 = vst.msk [vmem:[%s664_s1 + $0x7] ss:$8 sm:$0xf0] %vm13_vm0, %v249_v29  }
  0xb8   :  { %v276_v30 = vpop.permute.xlu1 %275   ;;  %v267_v31 = vpop.permute.xlu0 %266  }
  0xb9   :  { %343 = vst.msk [vmem:[%s664_s1 + $0xc7] ss:$8 sm:$0xf] %vm13_vm0, %v276_v30   ;;  %344 = vst.msk [vmem:[%s664_s1 + $0xc7] ss:$8 sm:$0xf0] %vm13_vm0, %v276_v30  }
  0xba   :  { %341 = vst.msk [vmem:[%s664_s1 + $0x87] ss:$8 sm:$0xf] %vm13_vm0, %v267_v31   ;;  %342 = vst.msk [vmem:[%s664_s1 + $0x87] ss:$8 sm:$0xf0] %vm13_vm0, %v267_v31  }
  0xbb   :  { %282 = vsyncpa [#allocation1], 1 }

// kernel: tiny_cnn_forward.1
= control target key start
LH: loop header
LB: loop body
LE: loop exit
PB: predicated region body
PF: predicated region fallthrough
CT: control target
= control target key end

     0   :  { %10 = vsyncpa [#allocation3], 0  ;;  %s12096_s0 = inlined_call_operand.vmem [shape: f32[4,8,8,8,128], index: 0, kind: input, shape index: {}]   ;;  %s12097_s1 = inlined_call_operand.vmem [shape: f32[18], index: 1, kind: input, shape index: {}]   ;;  %s12098_s2 = inlined_call_operand.vmem [shape: f32[2], index: 2, kind: input, shape index: {}]   ;;  %s12099_s3 = inlined_call_operand.vmem [shape: f32[32], index: 3, kind: input, shape index: {}]   ;;  %s12100_s4 = inlined_call_operand.vmem [shape: f32[4], index: 4, kind: input, shape index: {}]   ;;  %s12101_s5 = inlined_call_operand.vmem [shape: f32[4,6,6,8,128], index: 5, kind: output, shape index: {}]  }
   0x1   :  { %11 = vsyncpa [#allocation5], 0  ;;  %s31_s20 = sshll.u32 %s12098_s2, 4  ;;  %s32_s20 = int_to_ptr.vmem [resolvable:$true] %s31_s20 }
   0x2   :  { %12 = vsyncpa [#allocation8], 0  ;;  %s21_s23 = sshll.u32 %s12097_s1, 4  ;;  %s5649_s24 = scalar_lea.vmem %s32_s20, 16  ;;  %s22_s23 = int_to_ptr.vmem [resolvable:$true] %s21_s23 }
   0x3   :  { %p5650_p0 = scmp.ne.s32.totalorder %s32_s20, %s5649_s24  ;;  %p5654_p1 = scmp.lt.s32.totalorder %s32_s20, %s32_s20 }
   0x4   :  { %p5655_p2 = scmp.lt.s32.totalorder %s5649_s24, %s5649_s24 }
   0x6   :  { %p5656_p3 = por %p5655_p2, %p5654_p1 }
   0x8   :  { %p5657_p4 = pnand %p5656_p3, %p5650_p0 }
   0xa   :  { %5660 = shalt.err (!%p5657_p4)
}
   0xb   :  { %s5703_s25 = smov [#allocation4]   ;;  %s5661_s26 = scalar_lea.vmem %s22_s23, 16 }
   0xc   :  { %34 = dma.vmem_to_smem %s32_s20, 16, %s5703_s25, [#allocation5]  }
   0xd   :  { %p5662_p5 = scmp.ne.s32.totalorder %s22_s23, %s5661_s26  ;;  %p5666_p6 = scmp.lt.s32.totalorder %s22_s23, %s22_s23 }
   0xe   :  { %p5667_p7 = scmp.lt.s32.totalorder %s5661_s26, %s5661_s26 }
  0x10   :  { %p5668_p8 = por %p5667_p7, %p5666_p6 }
  0x12   :  { %p5669_p9 = pnand %p5668_p8, %p5662_p5 }
  0x14   :  { %5672 = shalt.err (!%p5669_p9)
}
  0x15   :  { %s5704_s2 = smov [#allocation2]   ;;  %s41_s28 = sshll.u32 %s12099_s3, 4  ;;  %s42_s28 = int_to_ptr.vmem [resolvable:$true] %s41_s28 }
  0x16   :  { %24 = dma.vmem_to_smem %s22_s23, 16, %s5704_s2, [#allocation3]  }
  0x17   :  { %s51_s6 = sshll.u32 %s12100_s4, 4  ;;  %s5673_s7 = scalar_lea.vmem %s42_s28, 16  ;;  %s52_s6 = int_to_ptr.vmem [resolvable:$true] %s51_s6 }
  0x18   :  { %p5674_p10 = scmp.ne.s32.totalorder %s42_s28, %s5673_s7  ;;  %p5678_p11 = scmp.lt.s32.totalorder %s42_s28, %s42_s28 }
  0x19   :  { %p5679_p12 = scmp.lt.s32.totalorder %s5673_s7, %s5673_s7 }
  0x1b   :  { %p5680_p13 = por %p5679_p12, %p5678_p11 }
  0x1d   :  { %p5681_p0 = pnand %p5680_p13, %p5674_p10 }
  0x1f   :  { %5684 = shalt.err (!%p5681_p0)
}
  0x20   :  { %s5705_s8 = smov [#allocation6]   ;;  %s5685_s9 = scalar_lea.vmem %s52_s6, 16 }
  0x21   :  { %44 = dma.vmem_to_smem %s42_s28, 16, %s5705_s8, [#allocation5]  }
  0x22   :  { %p5686_p1 = scmp.ne.s32.totalorder %s52_s6, %s5685_s9  ;;  %p5690_p2 = scmp.lt.s32.totalorder %s52_s6, %s52_s6 }
  0x23   :  { %p5691_p3 = scmp.lt.s32.totalorder %s5685_s9, %s5685_s9 }
  0x25   :  { %p5692_p4 = por %p5691_p3, %p5690_p2 }
  0x27   :  { %p5693_p5 = pnand %p5692_p4, %p5686_p1 }
  0x29   :  { %5696 = shalt.err (!%p5693_p5)
}
  0x2a   :  { %s5706_s3 = smov [#allocation7]  }
  0x2b   :  { %54 = dma.vmem_to_smem %s52_s6, 16, %s5706_s3, [#allocation8]  }
  0x2c   :  { %5697 = dma.done.wait [#allocation3], 16  }
  0x2d   :  { %5698 = vsyncadd [#allocation3], 4294967280 }
  0x2e   :  { %5699 = dma.done.wait [#allocation5], 32  }
  0x2f   :  { %5700 = vsyncadd [#allocation5], 4294967264 }
  0x30   :  { %5701 = dma.done.wait [#allocation8], 16  }
  0x31   :  { %5702 = vsyncadd [#allocation8], 4294967280 }
  0x32   :  { %67 = sfence }
  0x33   :  { %s517_s4 = sld [smem:[#allocation2]]  ;;  %s5485_s10 = sld [smem:[#allocation2 + $0x1]]  ;;  %v5752_v0 = vld [vmem:[%s12096_s0] sm:$0xff]  ;;  %v5757_v1 = vld [vmem:[%s12096_s0 + $0x8] sm:$0xff]  ;;  %v5781_v5 = vld [vmem:[%s12096_s0 + $0x10] sm:$0xff] }
  0x34   :  { %s5486_s11 = sld [smem:[#allocation2 + $0x2]]  ;;  %v5762_v2 = vld [vmem:[%s12096_s0 + $0x40] sm:$0xff]  ;;  %v5767_v3 = vld [vmem:[%s12096_s0 + $0x48] sm:$0xff]  ;;  %s5769_s20 = sld [smem:[#allocation2 + $0x3]]  ;;  %v5786_v6 = vld [vmem:[%s12096_s0 + $0x50] sm:$0xff] }
  0x35   :  { %s5771_s21 = sld [smem:[#allocation2 + $0x4]]  ;;  %v5776_v4 = vld [vmem:[%s12096_s0 + $0x200] sm:$0xff]  ;;  %s5788_s1 = sld [smem:[#allocation2 + $0x5]]  ;;  %v5793_v7 = vld [vmem:[%s12096_s0 + $0x208] sm:$0xff]  ;;  %v5916_v51 = vld [vmem:[%s12096_s0 + $0x410] sm:$0xff] }
  0x36   :  { %v5798_v8 = vld [vmem:[%s12096_s0 + $0x240] sm:$0xff]  ;;  %v5803_v9 = vld [vmem:[%s12096_s0 + $0x248] sm:$0xff]  ;;  %s5807_s8 = sld [smem:[#allocation2 + $0x6]]  ;;  %s5897_s25 = sld [smem:[#allocation2 + $0x7]]  ;;  %v5929_v56 = vld [vmem:[%s12096_s0 + $0x450] sm:$0xff] }
  0x37   :  { %v5832_v19 = vld [vmem:[%s12096_s0 + $0x400] sm:$0xff]  ;;  %v5837_v20 = vld [vmem:[%s12096_s0 + $0x408] sm:$0xff]  ;;  %s5899_s26 = sld [smem:[#allocation2 + $0x8]]  ;;  %s5903_s27 = sld [smem:[#allocation2 + $0x9]] }
  0x38   :  { %v5850_v25 = vld [vmem:[%s12096_s0 + $0x440] sm:$0xff]  ;;  %v5855_v26 = vld [vmem:[%s12096_s0 + $0x448] sm:$0xff]  ;;  %s5901_s2 = sld [smem:[#allocation4]]  ;;  %s5959_s9 = sld [smem:[#allocation2 + $0xb]] }
  0x39   :  { %v5805_v10 = vstv %s517_s4  ;;  %v5817_v15 = vstv %s5485_s10  ;;  %v5860_v27 = vld [vmem:[%s12096_s0 + $0x600] sm:$0xff]  ;;  %v5873_v32 = vld [vmem:[%s12096_s0 + $0x608] sm:$0xff]  ;;  %s5973_s13 = sld [smem:[#allocation2 + $0xd]]  ;;  %s6032_s16 = sld [smem:[#allocation2 + $0xe]] }
  0x3a   :  { %v519_v11 = vmul.f32 %v5805_v10, %v5752_v0  ;;  %v520_v12 = vmul.f32 %v5805_v10, %v5757_v1  ;;  %v526_v13 = vmul.f32 %v5805_v10, %v5762_v2  ;;  %v527_v14 = vmul.f32 %v5805_v10, %v5767_v3  ;;  %12765 = vst [vmem:[#allocation12_spill] sm:$0xff] %v5817_v15  ;;  %v5878_v33 = vld [vmem:[%s12096_s0 + $0x640] sm:$0xff]  ;;  %v5883_v34 = vld [vmem:[%s12096_s0 + $0x648] sm:$0xff]  ;;  %s6034_s17 = sld [smem:[#allocation2 + $0xf]]  ;;  %s6044_s18 = sld [smem:[#allocation2 + $0x10]] }
  0x3b   :  { %v5819_v16 = vstv %s5486_s11  ;;  %v5823_v17 = vmul.f32 %v5781_v5, %v5805_v10  ;;  %v5827_v18 = vmul.f32 %v5786_v6, %v5805_v10  ;;  %v570_v21 = vmul.f32 %v5776_v4, %v5817_v15  ;;  %v5934_v57 = vld [vmem:[%s12096_s0 + $0x80] sm:$0xff]  ;;  %v5939_v58 = vld [vmem:[%s12096_s0 + $0x88] sm:$0xff]  ;;  %s5971_s11 = sld [smem:[#allocation2 + $0xc]]  ;;  %s6046_s19 = sld [smem:[#allocation2 + $0x11]] }
  0x3c   :  { %12766 = vst [vmem:[#allocation13_spill] sm:$0xff] %v5819_v16  ;;  %v571_v22 = vmul.f32 %v5793_v7, %v5817_v15  ;;  %v577_v23 = vmul.f32 %v5798_v8, %v5817_v15  ;;  %v578_v24 = vmul.f32 %v5803_v9, %v5817_v15  ;;  %v670_v28 = vmul.f32 %v5819_v16, %v5757_v1  ;;  %s6092_s22 = sld [smem:[#allocation4 + $0x1]]  ;;  %s6094_s23 = sld [smem:[#allocation6]] }
  0x3d   :  { %v671_v29 = vmul.f32 %v5781_v5, %v5819_v16  ;;  %v677_v30 = vmul.f32 %v5819_v16, %v5767_v3  ;;  %v678_v31 = vmul.f32 %v5786_v6, %v5819_v16  ;;  %v619_v35 = vadd.f32 %v570_v21, %v519_v11  ;;  %s6096_s24 = sld [smem:[#allocation6 + $0x1]]  ;;  %s9746_s3 = sld [smem:[#allocation6 + $0x8]] }
  0x3e   :  { %v620_v36 = vadd.f32 %v571_v22, %v520_v12  ;;  %v626_v37 = vadd.f32 %v577_v23, %v526_v13  ;;  %v627_v38 = vadd.f32 %v578_v24, %v527_v14  ;;  %v5886_v39 = vstv %s5769_s20  ;;  %s6130_s20 = sld [smem:[#allocation6 + $0x6]]  ;;  %s9758_s4 = sld [smem:[#allocation6 + $0xa]] }
  0x3f   :  { %12767 = vst [vmem:[#allocation14_spill] sm:$0xff] %v5886_v39  ;;  %v5889_v40 = vstv %s5771_s21  ;;  %v5892_v41 = vstv %s5788_s1  ;;  %v5895_v42 = vstv %s5807_s8  ;;  %v719_v43 = vadd.f32 %v670_v28, %v619_v35  ;;  %s5957_s8 = sld [smem:[#allocation2 + $0xa]]  ;;  %v5969_v35 = vld [vmem:[%s12096_s0 + $0x288] sm:$0xff]  ;;  %s6140_s21 = sld [smem:[#allocation6 + $0x7]] }
  0x40   :  { %12768 = vst [vmem:[#allocation15_spill] sm:$0xff] %v5889_v40  ;;  %12769 = vst [vmem:[#allocation16_spill] sm:$0xff] %v5892_v41  ;;  %v720_v44 = vadd.f32 %v671_v29, %v620_v36  ;;  %v726_v45 = vadd.f32 %v677_v30, %v626_v37  ;;  %v727_v46 = vadd.f32 %v678_v31, %v627_v38  ;;  %v5964_v31 = vld [vmem:[%s12096_s0 + $0x280] sm:$0xff]  ;;  %s6142_s1 = sld [smem:[#allocation7]]  ;;  %s9762_s12 = sld [smem:[#allocation6 + $0xb]] }
  0x41   :  { %12770 = vst [vmem:[#allocation17_spill] sm:$0xff] %v5895_v42  ;;  %v770_v47 = vmul.f32 %v5832_v19, %v5886_v39  ;;  %v771_v48 = vmul.f32 %v5837_v20, %v5886_v39  ;;  %v777_v49 = vmul.f32 %v5850_v25, %v5886_v39  ;;  %v778_v50 = vmul.f32 %v5855_v26, %v5886_v39  ;;  %s9764_s10 = sld [smem:[#allocation6 + $0xc]]  ;;  %s9779_s14 = sld [smem:[#allocation6 + $0xd]] }
  0x42   :  { %v870_v52 = vmul.f32 %v5860_v27, %v5889_v40  ;;  %v871_v53 = vmul.f32 %v5873_v32, %v5889_v40  ;;  %v877_v54 = vmul.f32 %v5878_v33, %v5889_v40  ;;  %v878_v55 = vmul.f32 %v5883_v34, %v5889_v40  ;;  %s9787_s15 = sld [smem:[#allocation6 + $0xe]]  ;;  %s10551_s29 = sld [smem:[#allocation6 + $0x17]] }
  0x43   :  { %v819_v59 = vadd.f32 %v770_v47, %v719_v43  ;;  %v820_v60 = vadd.f32 %v771_v48, %v720_v44  ;;  %v826_v61 = vadd.f32 %v777_v49, %v726_v45  ;;  %v827_v62 = vadd.f32 %v778_v50, %v727_v46  ;;  %s10549_s28 = sld [smem:[#allocation6 + $0x16]]  ;;  %s10577_s7 = sld [smem:[#allocation7 + $0x2]] }
  0x44   :  { %v970_v63 = vmul.f32 %v5837_v20, %v5892_v41  ;;  %v971_v11 = vmul.f32 %v5916_v51, %v5892_v41  ;;  %v977_v12 = vmul.f32 %v5855_v26, %v5892_v41  ;;  %v978_v13 = vmul.f32 %v5929_v56, %v5892_v41 }
  0x45   :  { %v919_v14 = vadd.f32 %v870_v52, %v819_v59  ;;  %v920_v21 = vadd.f32 %v871_v53, %v820_v60  ;;  %v926_v22 = vadd.f32 %v877_v54, %v826_v61  ;;  %v927_v23 = vadd.f32 %v878_v55, %v827_v62  ;;  %v5990_v53 = vld [vmem:[%s12096_s0 + $0x90] sm:$0xff] }
  0x46   :  { %v1070_v24 = vmul.f32 %v5895_v42, %v5762_v2  ;;  %v1071_v28 = vmul.f32 %v5895_v42, %v5767_v3  ;;  %v1077_v29 = vmul.f32 %v5934_v57, %v5895_v42  ;;  %v1078_v30 = vmul.f32 %v5939_v58, %v5895_v42 }
  0x47   :  { %v1019_v36 = vadd.f32 %v970_v63, %v919_v14  ;;  %v1020_v37 = vadd.f32 %v971_v11, %v920_v21  ;;  %v1026_v38 = vadd.f32 %v977_v12, %v926_v22  ;;  %v1027_v43 = vadd.f32 %v978_v13, %v927_v23 }
  0x48   :  { %v5976_v44 = vstv %s5897_s25  ;;  %v5979_v45 = vstv %s5899_s26  ;;  %v5982_v46 = vstv %s5901_s2  ;;  %v5985_v47 = vstv %s5903_s27  ;;  %s6098_s25 = sld [smem:[#allocation6 + $0x2]]  ;;  %s6116_s26 = sld [smem:[#allocation6 + $0x3]] }
  0x49   :  { %12771 = vst [vmem:[#allocation18_spill] sm:$0xff] %v5976_v44  ;;  %12772 = vst [vmem:[#allocation19_spill] sm:$0xff] %v5979_v45  ;;  %v1119_v48 = vadd.f32 %v1070_v24, %v1019_v36  ;;  %v1120_v49 = vadd.f32 %v1071_v28, %v1020_v37  ;;  %v1126_v50 = vadd.f32 %v1077_v29, %v1026_v38  ;;  %v6017_v38 = vstv %s5957_s8  ;;  %s6126_s2 = sld [smem:[#allocation6 + $0x4]]  ;;  %s6128_s27 = sld [smem:[#allocation6 + $0x5]] }
  0x4a   :  { %12773 = vst [vmem:[#allocation20_spill] sm:$0xff] %v5982_v46  ;;  %12774 = vst [vmem:[#allocation21_spill] sm:$0xff] %v5985_v47  ;;  %v1127_v52 = vadd.f32 %v1078_v30, %v1027_v43  ;;  %v1170_v54 = vmul.f32 %v5798_v8, %v5976_v44  ;;  %v1171_v55 = vmul.f32 %v5803_v9, %v5976_v44  ;;  %v6020_v43 = vstv %s5959_s9 }
  0x4b   :  { %v1177_v59 = vmul.f32 %v5964_v31, %v5976_v44  ;;  %v1178_v60 = vmul.f32 %v5969_v35, %v5976_v44  ;;  %v1270_v61 = vmul.f32 %v5979_v45, %v5767_v3  ;;  %v1271_v62 = vmul.f32 %v5786_v6, %v5979_v45  ;;  %12775 = vst [vmem:[#allocation22_spill] sm:$0xff] %v6017_v38 }
  0x4c   :  { %v1277_v63 = vmul.f32 %v5939_v58, %v5979_v45  ;;  %v1278_v11 = vmul.f32 %v5990_v53, %v5979_v45  ;;  %v1219_v12 = vadd.f32 %v1170_v54, %v1119_v48  ;;  %v1220_v13 = vadd.f32 %v1171_v55, %v1120_v49  ;;  %12776 = vst [vmem:[#allocation23_spill] sm:$0xff] %v6020_v43 }
  0x4d   :  { %v1226_v14 = vadd.f32 %v1177_v59, %v1126_v50  ;;  %v1227_v21 = vadd.f32 %v1178_v60, %v1127_v52  ;;  %v1470_v22 = vmul.f32 %v5985_v47, %v5752_v0  ;;  %v1471_v23 = vmul.f32 %v5985_v47, %v5757_v1 }
  0x4e   :  { %v1477_v24 = vmul.f32 %v5985_v47, %v5762_v2  ;;  %v1478_v28 = vmul.f32 %v5985_v47, %v5767_v3  ;;  %v1319_v29 = vadd.f32 %v1270_v61, %v1219_v12  ;;  %v1320_v30 = vadd.f32 %v1271_v62, %v1220_v13 }
  0x4f   :  { %v1326_v36 = vadd.f32 %v1277_v63, %v1226_v14  ;;  %v1327_v37 = vadd.f32 %v1278_v11, %v1227_v21  ;;  %v6023_v48 = vstv %s5971_s11  ;;  %v6026_v0 = vstv %s5973_s13  ;;  %s11276_s13 = sld [smem:[#allocation6 + $0x18]] }
  0x50   :  { %v1370_v49 = vadd.f32 %v5982_v46, %v1319_v29  ;;  %v1371_v50 = vadd.f32 %v5982_v46, %v1320_v30  ;;  %v1521_v55 = vmul.f32 %v5776_v4, %v6017_v38  ;;  %v1522_v59 = vmul.f32 %v5793_v7, %v6017_v38 }
  0x51   :  { %v1377_v52 = vadd.f32 %v5982_v46, %v1326_v36  ;;  %v1378_v54 = vadd.f32 %v5982_v46, %v1327_v37  ;;  %v1528_v60 = vmul.f32 %v5798_v8, %v6017_v38  ;;  %v1529_v61 = vmul.f32 %v5803_v9, %v6017_v38 }
  0x52   :  { %v6048_v62 = vmax.f32 %v1370_v49, 0.0  ;;  %v6050_v63 = vmax.f32 %v1371_v50, 0.0  ;;  %v1570_v12 = vadd.f32 %v1521_v55, %v1470_v22  ;;  %v1571_v7 = vadd.f32 %v1522_v59, %v1471_v23 }
  0x53   :  { %v6052_v11 = vmax.f32 %v1377_v52, 0.0  ;;  %v6054_v4 = vmax.f32 %v1378_v54, 0.0  ;;  %v1577_v13 = vadd.f32 %v1528_v60, %v1477_v24  ;;  %v1578_v14 = vadd.f32 %v1529_v61, %v1478_v28 }
  0x54   :  { %12777 = vst [vmem:[#allocation24_spill] sm:$0xff] %v6048_v62  ;;  %12778 = vst [vmem:[#allocation25_spill] sm:$0xff] %v6050_v63  ;;  %v1621_v21 = vmul.f32 %v6020_v43, %v5757_v1  ;;  %v1622_v29 = vmul.f32 %v5781_v5, %v6020_v43  ;;  %v1628_v30 = vmul.f32 %v6020_v43, %v5767_v3 }
  0x55   :  { %12779 = vst [vmem:[#allocation26_spill] sm:$0xff] %v6052_v11  ;;  %12780 = vst [vmem:[#allocation27_spill] sm:$0xff] %v6054_v4  ;;  %v1629_v36 = vmul.f32 %v5786_v6, %v6020_v43  ;;  %v1721_v37 = vmul.f32 %v5832_v19, %v6023_v48  ;;  %v1722_v22 = vmul.f32 %v5837_v20, %v6023_v48 }
  0x56   :  { %v1728_v1 = vmul.f32 %v5850_v25, %v6023_v48  ;;  %v1729_v23 = vmul.f32 %v5855_v26, %v6023_v48  ;;  %v1670_v24 = vadd.f32 %v1621_v21, %v1570_v12  ;;  %v1671_v28 = vadd.f32 %v1622_v29, %v1571_v7 }
  0x57   :  { %v1677_v49 = vadd.f32 %v1628_v30, %v1577_v13  ;;  %v1678_v50 = vadd.f32 %v1629_v36, %v1578_v14  ;;  %v1821_v19 = vmul.f32 %v5860_v27, %v6026_v0  ;;  %v1822_v52 = vmul.f32 %v5873_v32, %v6026_v0 }
  0x58   :  { %v1828_v54 = vmul.f32 %v5878_v33, %v6026_v0  ;;  %v1829_v25 = vmul.f32 %v5883_v34, %v6026_v0  ;;  %v1770_v55 = vadd.f32 %v1721_v37, %v1670_v24  ;;  %v1771_v59 = vadd.f32 %v1722_v22, %v1671_v28 }
  0x59   :  { %v1777_v60 = vadd.f32 %v1728_v1, %v1677_v49  ;;  %v1778_v61 = vadd.f32 %v1729_v23, %v1678_v50  ;;  %v6081_v12 = vstv %s6032_s16  ;;  %v6084_v7 = vstv %s6034_s17  ;;  %s9793_s16 = sld [smem:[#allocation6 + $0xf]]  ;;  %s5518_s17 = sld [smem:[#allocation7 + $0x1]] }
  0x5a   :  { %v6087_v13 = vstv %s6044_s18  ;;  %v6090_v27 = vstv %s6046_s19  ;;  %v1870_v32 = vadd.f32 %v1821_v19, %v1770_v55  ;;  %v1871_v33 = vadd.f32 %v1822_v52, %v1771_v59  ;;  %s11299_s18 = sld [smem:[#allocation6 + $0x1b]]  ;;  %s11301_s19 = sld [smem:[#allocation6 + $0x1c]] }
  0x5b   :  { %v1877_v14 = vadd.f32 %v1828_v54, %v1777_v60  ;;  %v1878_v34 = vadd.f32 %v1829_v25, %v1778_v61  ;;  %v1921_v21 = vmul.f32 %v5837_v20, %v6081_v12  ;;  %v1922_v29 = vmul.f32 %v5916_v51, %v6081_v12 }
  0x5c   :  { %v1928_v30 = vmul.f32 %v5855_v26, %v6081_v12  ;;  %v1929_v36 = vmul.f32 %v5929_v56, %v6081_v12  ;;  %v2021_v37 = vmul.f32 %v6084_v7, %v5762_v2  ;;  %v2022_v22 = vmul.f32 %v6084_v7, %v5767_v3 }
  0x5d   :  { %v2028_v1 = vmul.f32 %v5934_v57, %v6084_v7  ;;  %v2029_v20 = vmul.f32 %v5939_v58, %v6084_v7  ;;  %v1970_v23 = vadd.f32 %v1921_v21, %v1870_v32  ;;  %v1971_v24 = vadd.f32 %v1922_v29, %v1871_v33 }
  0x5e   :  { %v1977_v26 = vadd.f32 %v1928_v30, %v1877_v14  ;;  %v1978_v28 = vadd.f32 %v1929_v36, %v1878_v34  ;;  %v2121_v49 = vmul.f32 %v5798_v8, %v6087_v13  ;;  %v2122_v2 = vmul.f32 %v5803_v9, %v6087_v13 }
  0x5f   :  { %v2128_v50 = vmul.f32 %v5964_v31, %v6087_v13  ;;  %v2129_v57 = vmul.f32 %v5969_v35, %v6087_v13  ;;  %v2070_v19 = vadd.f32 %v2021_v37, %v1970_v23  ;;  %v2071_v52 = vadd.f32 %v2022_v22, %v1971_v24 }
  0x60   :  { %v2077_v54 = vadd.f32 %v2028_v1, %v1977_v26  ;;  %v2078_v8 = vadd.f32 %v2029_v20, %v1978_v28  ;;  %v2221_v9 = vmul.f32 %v6090_v27, %v5767_v3  ;;  %v2222_v31 = vmul.f32 %v5786_v6, %v6090_v27 }
  0x61   :  { %v2228_v35 = vmul.f32 %v5939_v58, %v6090_v27  ;;  %v2229_v25 = vmul.f32 %v5990_v53, %v6090_v27  ;;  %v2170_v55 = vadd.f32 %v2121_v49, %v2070_v19  ;;  %v2171_v59 = vadd.f32 %v2122_v2, %v2071_v52 }
  0x62   :  { %v2177_v60 = vadd.f32 %v2128_v50, %v2077_v54  ;;  %v2178_v61 = vadd.f32 %v2129_v57, %v2078_v8  ;;  %v6145_v32 = vstv %s6092_s22  ;;  %v6148_v3 = vstv %s6094_s23  ;;  %v5095_v54 = vld [vmem:[%s12096_s0 + $0x210] sm:$0xff]  ;;  %s11312_s22 = sld [smem:[#allocation6 + $0x1d]]  ;;  %s11314_s23 = sld [smem:[#allocation6 + $0x1e]] }
  0x63   :  { %12781 = vst [vmem:[#allocation28_spill] sm:$0xff] %v6145_v32  ;;  %v6151_v33 = vstv %s6096_s24  ;;  %v6154_v58 = vstv %s6098_s25  ;;  %v2270_v14 = vadd.f32 %v2221_v9, %v2170_v55  ;;  %v2271_v34 = vadd.f32 %v2222_v31, %v2171_v59  ;;  %v6191_v8 = vld [vmem:[%s12096_s0 + $0x250] sm:$0xff]  ;;  %s10509_s24 = sld [smem:[#allocation6 + $0x10]]  ;;  %s10515_s25 = sld [smem:[#allocation6 + $0x11]] }
  0x64   :  { %12782 = vst [vmem:[#allocation29_spill] sm:$0xff] %v6151_v33  ;;  %v2277_v21 = vadd.f32 %v2228_v35, %v2177_v60  ;;  %v2278_v29 = vadd.f32 %v2229_v25, %v2178_v61  ;;  %v2421_v30 = vmul.f32 %v6148_v3, %v6048_v62  ;;  %v2459_v36 = vmul.f32 %v6151_v33, %v6050_v63  ;;  %v5242_v55 = vld [vmem:[%s12096_s0 + $0x610] sm:$0xff] }
  0x65   :  { %v2533_v37 = vmul.f32 %v6154_v58, %v6052_v11  ;;  %v6163_v22 = vstv %s6116_s26  ;;  %v2321_v1 = vadd.f32 %v6145_v32, %v2270_v14  ;;  %v2322_v20 = vadd.f32 %v6145_v32, %v2271_v34  ;;  %v6216_v34 = vld [vmem:[%s12096_s0 + $0x18] sm:$0xff]  ;;  %v5396_v62 = vld [vmem:[%s12096_s0 + $0x290] sm:$0xff]  ;;  %s10521_s26 = sld [smem:[#allocation6 + $0x12]] }
  0x66   :  { %12783 = vst [vmem:[#allocation30_spill] sm:$0xff] %v6163_v22  ;;  %v2328_v23 = vadd.f32 %v6145_v32, %v2277_v21  ;;  %v2329_v24 = vadd.f32 %v6145_v32, %v2278_v29  ;;  %v2495_v26 = vadd.f32 %v2459_v36, %v2421_v30  ;;  %v2607_v28 = vmul.f32 %v6163_v22, %v6054_v4  ;;  %v5249_v21 = vld [vmem:[%s12096_s0 + $0x650] sm:$0xff]  ;;  %v6224_v30 = vld [vmem:[%s12096_s0 + $0x58] sm:$0xff] }
  0x67   :  { %v6172_v49 = vstv %s6126_s2  ;;  %v6175_v2 = vstv %s6128_s27  ;;  %v6177_v50 = vmax.f32 %v2321_v1, 0.0  ;;  %v6179_v57 = vmax.f32 %v2322_v20, 0.0  ;;  %s10523_s2 = sld [smem:[#allocation6 + $0x13]] }
  0x68   :  { %12784 = vst [vmem:[#allocation31_spill] sm:$0xff] %v6175_v2  ;;  %v6181_v19 = vmax.f32 %v2328_v23, 0.0  ;;  %v6183_v52 = vmax.f32 %v2329_v24, 0.0  ;;  %v2569_v9 = vadd.f32 %v2533_v37, %v2495_v26  ;;  %v6194_v31 = vstv %s6130_s20 }
  0x69   :  { %12785 = vst [vmem:[#allocation32_spill] sm:$0xff] %v6177_v50  ;;  %12786 = vst [vmem:[#allocation33_spill] sm:$0xff] %v6179_v57  ;;  %v6197_v35 = vstv %s6140_s21  ;;  %v6200_v25 = vstv %s6142_s1  ;;  %v2681_v59 = vmul.f32 %v6172_v49, %v6177_v50  ;;  %v2755_v60 = vmul.f32 %v6175_v2, %v6179_v57  ;;  %v6246_v50 = vld [vmem:[%s12096_s0 + $0x458] sm:$0xff]  ;;  %s10539_s21 = sld [smem:[#allocation6 + $0x14]]  ;;  %s10547_s1 = sld [smem:[#allocation6 + $0x15]] }
  0x6a   :  { %12787 = vst [vmem:[#allocation34_spill] sm:$0xff] %v6181_v19  ;;  %12788 = vst [vmem:[#allocation35_spill] sm:$0xff] %v6183_v52  ;;  %v2829_v61 = vmul.f32 %v6194_v31, %v6181_v19  ;;  %v2903_v14 = vmul.f32 %v6197_v35, %v6183_v52  ;;  %v2643_v29 = vadd.f32 %v2607_v28, %v2569_v9  ;;  %v6241_v9 = vld [vmem:[%s12096_s0 + $0x418] sm:$0xff] }
  0x6b   :  { %12789 = vst [vmem:[#allocation36_spill] sm:$0xff] %v6194_v31  ;;  %12790 = vst [vmem:[#allocation37_spill] sm:$0xff] %v6197_v35  ;;  %v572_v36 = vmul.f32 %v5095_v54, %v5817_v15  ;;  %v579_v37 = vmul.f32 %v6191_v8, %v5817_v15  ;;  %v672_v1 = vmul.f32 %v6216_v34, %v5819_v16 }
  0x6c   :  { %12791 = vst [vmem:[#allocation38_spill] sm:$0xff] %v6200_v25  ;;  %v679_v20 = vmul.f32 %v6224_v30, %v5819_v16  ;;  %v772_v23 = vmul.f32 %v5916_v51, %v5886_v39  ;;  %v779_v24 = vmul.f32 %v5929_v56, %v5886_v39  ;;  %v872_v26 = vmul.f32 %v5242_v55, %v5889_v40 }
  0x6d   :  { %v2717_v28 = vadd.f32 %v2681_v59, %v2643_v29  ;;  %v621_v19 = vadd.f32 %v572_v36, %v5823_v17  ;;  %v628_v11 = vadd.f32 %v579_v37, %v5827_v18  ;;  %v879_v59 = vmul.f32 %v5249_v21, %v5889_v40  ;;  %v6265_v17 = vld [vmem:[%s12096_s0 + $0x98] sm:$0xff] }
  0x6e   :  { %v972_v29 = vmul.f32 %v6241_v9, %v5892_v41  ;;  %v979_v35 = vmul.f32 %v6246_v50, %v5892_v41  ;;  %v1072_v2 = vmul.f32 %v5786_v6, %v5895_v42  ;;  %v1079_v32 = vmul.f32 %v5990_v53, %v5895_v42 }
  0x6f   :  { %v2791_v22 = vadd.f32 %v2755_v60, %v2717_v28  ;;  %v721_v18 = vadd.f32 %v672_v1, %v621_v19  ;;  %v728_v36 = vadd.f32 %v679_v20, %v628_v11  ;;  %v1172_v37 = vmul.f32 %v6191_v8, %v5976_v44 }
  0x70   :  { %v1179_v40 = vmul.f32 %v5396_v62, %v5976_v44  ;;  %v1272_v41 = vmul.f32 %v6224_v30, %v5979_v45  ;;  %v1279_v33 = vmul.f32 %v6265_v17, %v5979_v45  ;;  %v1472_v60 = vmul.f32 %v5781_v5, %v5985_v47 }
  0x71   :  { %v2865_v28 = vadd.f32 %v2829_v61, %v2791_v22  ;;  %v821_v42 = vadd.f32 %v772_v23, %v721_v18  ;;  %v828_v39 = vadd.f32 %v779_v24, %v728_v36  ;;  %v1479_v11 = vmul.f32 %v5786_v6, %v5985_v47 }
  0x72   :  { %v1523_v19 = vmul.f32 %v5095_v54, %v6017_v38  ;;  %v1530_v1 = vmul.f32 %v6191_v8, %v6017_v38  ;;  %v1623_v20 = vmul.f32 %v6216_v34, %v6020_v43  ;;  %v1630_v45 = vmul.f32 %v6224_v30, %v6020_v43 }
  0x73   :  { %v2939_v44 = vadd.f32 %v2903_v14, %v2865_v28  ;;  %v921_v16 = vadd.f32 %v872_v26, %v821_v42  ;;  %v928_v5 = vadd.f32 %v879_v59, %v828_v39  ;;  %v1723_v22 = vmul.f32 %v5916_v51, %v6023_v48 }
  0x74   :  { %v1572_v61 = vadd.f32 %v1523_v19, %v1472_v60  ;;  %v1579_v23 = vadd.f32 %v1530_v1, %v1479_v11  ;;  %v1730_v54 = vmul.f32 %v5929_v56, %v6023_v48  ;;  %v1823_v24 = vmul.f32 %v5242_v55, %v6026_v0  ;;  %v6337_v1 = vld [vmem:[%s12096_s0 + $0x20] sm:$0xff] }
  0x75   :  { %v2977_v18 = vadd.f32 %v6200_v25, %v2939_v44  ;;  %v1021_v36 = vadd.f32 %v972_v29, %v921_v16  ;;  %v1028_v38 = vadd.f32 %v979_v35, %v928_v5  ;;  %v1830_v47 = vmul.f32 %v5249_v21, %v6026_v0 }
  0x76   :  { %v1672_v43 = vadd.f32 %v1623_v20, %v1572_v61  ;;  %v1679_v14 = vadd.f32 %v1630_v45, %v1579_v23  ;;  %v1923_v39 = vmul.f32 %v6241_v9, %v6081_v12  ;;  %v1930_v42 = vmul.f32 %v6246_v50, %v6081_v12  ;;  %v6346_v23 = vld [vmem:[%s12096_s0 + $0x60] sm:$0xff] }
  0x77   :  { %v3013_v51 = vmax.f32 %v2977_v18, 0.0  ;;  %v1121_v26 = vadd.f32 %v1072_v2, %v1021_v36  ;;  %v1128_v59 = vadd.f32 %v1079_v32, %v1028_v38  ;;  %v2023_v56 = vmul.f32 %v5786_v6, %v6084_v7 }
  0x78   :  { %v1772_v55 = vadd.f32 %v1723_v22, %v1672_v43  ;;  %v1779_v44 = vadd.f32 %v1730_v54, %v1679_v14  ;;  %v2030_v16 = vmul.f32 %v5990_v53, %v6084_v7  ;;  %v2123_v45 = vmul.f32 %v6191_v8, %v6087_v13  ;;  %v6315_v8 = vld [vmem:[%s12096_s0 + $0x218] sm:$0xff] }
  0x79   :  { %3049 = vst [vmem:[%s12101_s5] sm:$0xff] %v3013_v51  ;;  %v1221_v35 = vadd.f32 %v1172_v37, %v1121_v26  ;;  %v1228_v21 = vadd.f32 %v1179_v40, %v1128_v59  ;;  %v2130_v2 = vmul.f32 %v5396_v62, %v6087_v13  ;;  %v2223_v38 = vmul.f32 %v6224_v30, %v6090_v27 }
  0x7a   :  { %v1872_v6 = vadd.f32 %v1823_v24, %v1772_v55  ;;  %v1879_v43 = vadd.f32 %v1830_v47, %v1779_v44  ;;  %v2230_v32 = vmul.f32 %v6265_v17, %v6090_v27  ;;  %v2422_v53 = vmul.f32 %v6148_v3, %v6050_v63  ;;  %v6324_v47 = vld [vmem:[%s12096_s0 + $0x258] sm:$0xff]  ;;  %v12792_v24 = vld [vmem:[#allocation13_spill] sm:$0xff]  ;;  %v12795_v44 = vld [vmem:[#allocation14_spill] sm:$0xff] }
  0x7b   :  { %v1321_v29 = vadd.f32 %v1272_v41, %v1221_v35  ;;  %v1328_v40 = vadd.f32 %v1279_v33, %v1228_v21  ;;  %v2534_v62 = vmul.f32 %v6154_v58, %v6054_v4  ;;  %v2682_v37 = vmul.f32 %v6172_v49, %v6179_v57  ;;  %v12796_v35 = vld [vmem:[#allocation29_spill] sm:$0xff]  ;;  %v12804_v57 = vld [vmem:[#allocation18_spill] sm:$0xff] }
  0x7c   :  { %v1972_v60 = vadd.f32 %v1923_v39, %v1872_v6  ;;  %v1979_v28 = vadd.f32 %v1930_v42, %v1879_v43  ;;  %v6328_v11 = vmul.f32 %v6194_v31, %v6183_v52  ;;  %v522_v41 = vmul.f32 %v6216_v34, %v5805_v10  ;;  %v5243_v39 = vld [vmem:[%s12096_s0 + $0x618] sm:$0xff]  ;;  %v12797_v6 = vld [vmem:[#allocation30_spill] sm:$0xff] }
  0x7d   :  { %v1372_v33 = vadd.f32 %v5982_v46, %v1321_v29  ;;  %v1379_v19 = vadd.f32 %v5982_v46, %v1328_v40  ;;  %v529_v20 = vmul.f32 %v6224_v30, %v5805_v10  ;;  %v573_v5 = vmul.f32 %v6315_v8, %v5817_v15 }
  0x7e   :  { %v2072_v22 = vadd.f32 %v2023_v56, %v1972_v60  ;;  %v2079_v61 = vadd.f32 %v2030_v16, %v1979_v28  ;;  %v580_v54 = vmul.f32 %v6324_v47, %v5817_v15  ;;  %v673_v18 = vmul.f32 %v6337_v1, %v12792_v24  ;;  %v5250_v56 = vld [vmem:[%s12096_s0 + $0x658] sm:$0xff]  ;;  %v6375_v60 = vld [vmem:[%s12096_s0 + $0x420] sm:$0xff] }
  0x7f   :  { %v6352_v36 = vmax.f32 %v1372_v33, 0.0  ;;  %v6354_v14 = vmax.f32 %v1379_v19, 0.0  ;;  %v622_v42 = vadd.f32 %v573_v5, %v522_v41  ;;  %v680_v51 = vmul.f32 %v6346_v23, %v12792_v24  ;;  %v12798_v41 = vld [vmem:[#allocation15_spill] sm:$0xff] }
  0x80   :  { %v2172_v26 = vadd.f32 %v2123_v45, %v2072_v22  ;;  %v2179_v59 = vadd.f32 %v2130_v2, %v2079_v61  ;;  %v629_v55 = vadd.f32 %v580_v54, %v529_v20  ;;  %v773_v16 = vmul.f32 %v6241_v9, %v12795_v44  ;;  %v6381_v20 = vld [vmem:[%s12096_s0 + $0x460] sm:$0xff] }
  0x81   :  { %12793 = vst [vmem:[#allocation39_spill] sm:$0xff] %v6352_v36  ;;  %12794 = vst [vmem:[#allocation40_spill] sm:$0xff] %v6354_v14  ;;  %v2460_v21 = vmul.f32 %v12796_v35, %v6352_v36  ;;  %v2608_v43 = vmul.f32 %v12797_v6, %v6354_v14  ;;  %v722_v29 = vadd.f32 %v673_v18, %v622_v42  ;;  %v12799_v61 = vld [vmem:[#allocation16_spill] sm:$0xff]  ;;  %v5397_v42 = vld [vmem:[%s12096_s0 + $0x298] sm:$0xff] }
  0x82   :  { %v780_v40 = vmul.f32 %v6246_v50, %v12795_v44  ;;  %v2272_v45 = vadd.f32 %v2223_v38, %v2172_v26  ;;  %v2279_v2 = vadd.f32 %v2230_v32, %v2179_v59  ;;  %v729_v28 = vadd.f32 %v680_v51, %v629_v55  ;;  %v12800_v32 = vld [vmem:[#allocation28_spill] sm:$0xff]  ;;  %v12801_v55 = vld [vmem:[#allocation17_spill] sm:$0xff] }
  0x83   :  { %v873_v33 = vmul.f32 %v5243_v39, %v12798_v41  ;;  %v2496_v19 = vadd.f32 %v2460_v21, %v2422_v53  ;;  %v822_v5 = vadd.f32 %v773_v16, %v722_v29  ;;  %v880_v22 = vmul.f32 %v5250_v56, %v12798_v41 }
  0x84   :  { %v973_v38 = vmul.f32 %v6375_v60, %v12799_v61  ;;  %v2323_v54 = vadd.f32 %v12800_v32, %v2272_v45  ;;  %v2330_v18 = vadd.f32 %v12800_v32, %v2279_v2  ;;  %v829_v53 = vadd.f32 %v780_v40, %v729_v28  ;;  %v12809_v32 = vld [vmem:[#allocation22_spill] sm:$0xff] }
  0x85   :  { %v980_v51 = vmul.f32 %v6381_v20, %v12799_v61  ;;  %v2570_v26 = vadd.f32 %v2534_v62, %v2496_v19  ;;  %v922_v59 = vadd.f32 %v873_v33, %v822_v5  ;;  %v1073_v16 = vmul.f32 %v6224_v30, %v12801_v55  ;;  %v6406_v62 = vld [vmem:[%s12096_s0 + $0xa0] sm:$0xff]  ;;  %v12805_v19 = vld [vmem:[#allocation19_spill] sm:$0xff] }
  0x86   :  { %v1080_v21 = vmul.f32 %v6265_v17, %v12801_v55  ;;  %v6397_v29 = vmax.f32 %v2323_v54, 0.0  ;;  %v6399_v45 = vmax.f32 %v2330_v18, 0.0  ;;  %v929_v2 = vadd.f32 %v880_v22, %v829_v53  ;;  %v12806_v54 = vld [vmem:[#allocation31_spill] sm:$0xff]  ;;  %v12807_v22 = vld [vmem:[#allocation37_spill] sm:$0xff] }
  0x87   :  { %v1173_v63 = vmul.f32 %v6324_v47, %v12804_v57  ;;  %v2644_v40 = vadd.f32 %v2608_v43, %v2570_v26  ;;  %v1022_v28 = vadd.f32 %v973_v38, %v922_v59  ;;  %v1180_v33 = vmul.f32 %v5397_v42, %v12804_v57  ;;  %v12808_v55 = vld [vmem:[#allocation21_spill] sm:$0xff] }
  0x88   :  { %12802 = vst [vmem:[#allocation41_spill] sm:$0xff] %v6397_v29  ;;  %12803 = vst [vmem:[#allocation42_spill] sm:$0xff] %v6399_v45  ;;  %v1273_v5 = vmul.f32 %v6346_v23, %v12805_v19  ;;  %v2756_v18 = vmul.f32 %v12806_v54, %v6397_v29  ;;  %v2904_v53 = vmul.f32 %v12807_v22, %v6399_v45  ;;  %v12810_v22 = vld [vmem:[#allocation23_spill] sm:$0xff] }
  0x89   :  { %v1029_v52 = vadd.f32 %v980_v51, %v929_v2  ;;  %v1280_v43 = vmul.f32 %v6406_v62, %v12805_v19  ;;  %v2718_v26 = vadd.f32 %v2682_v37, %v2644_v40  ;;  %v1122_v4 = vadd.f32 %v1073_v16, %v1022_v28 }
  0x8a   :  { %v1473_v38 = vmul.f32 %v6216_v34, %v12808_v55  ;;  %v1480_v59 = vmul.f32 %v6224_v30, %v12808_v55  ;;  %v1524_v61 = vmul.f32 %v6315_v8, %v12809_v32  ;;  %v1531_v54 = vmul.f32 %v6324_v47, %v12809_v32 }
  0x8b   :  { %v1129_v57 = vadd.f32 %v1080_v21, %v1029_v52  ;;  %v1624_v51 = vmul.f32 %v6337_v1, %v12810_v22  ;;  %v2792_v2 = vadd.f32 %v2756_v18, %v2718_v26  ;;  %v1222_v19 = vadd.f32 %v1173_v63, %v1122_v4 }
  0x8c   :  { %v1631_v37 = vmul.f32 %v6346_v23, %v12810_v22  ;;  %v1724_v34 = vmul.f32 %v6241_v9, %v6023_v48  ;;  %v1573_v40 = vadd.f32 %v1524_v61, %v1473_v38  ;;  %v1580_v52 = vadd.f32 %v1531_v54, %v1480_v59 }
  0x8d   :  { %v1229_v16 = vadd.f32 %v1180_v33, %v1129_v57  ;;  %v1731_v8 = vmul.f32 %v6246_v50, %v6023_v48  ;;  %v2866_v21 = vadd.f32 %v6328_v11, %v2792_v2  ;;  %v1322_v28 = vadd.f32 %v1273_v5, %v1222_v19 }
  0x8e   :  { %v1824_v32 = vmul.f32 %v5243_v39, %v6026_v0  ;;  %v1831_v18 = vmul.f32 %v5250_v56, %v6026_v0  ;;  %v1673_v4 = vadd.f32 %v1624_v51, %v1573_v40  ;;  %v1680_v26 = vadd.f32 %v1631_v37, %v1580_v52  ;;  %v6472_v40 = vld [vmem:[%s12096_s0 + $0x260] sm:$0xff] }
  0x8f   :  { %v1329_v63 = vadd.f32 %v1280_v43, %v1229_v16  ;;  %v1924_v22 = vmul.f32 %v6375_v60, %v6081_v12  ;;  %v2940_v9 = vadd.f32 %v2904_v53, %v2866_v21  ;;  %v1373_v57 = vadd.f32 %v5982_v46, %v1322_v28 }
  0x90   :  { %v1931_v61 = vmul.f32 %v6381_v20, %v6081_v12  ;;  %v2024_v50 = vmul.f32 %v6224_v30, %v6084_v7  ;;  %v1773_v39 = vadd.f32 %v1724_v34, %v1673_v4  ;;  %v1780_v33 = vadd.f32 %v1731_v8, %v1680_v26  ;;  %v6493_v4 = vld [vmem:[%s12096_s0 + $0x68] sm:$0xff]  ;;  %v5244_v26 = vld [vmem:[%s12096_s0 + $0x620] sm:$0xff] }
  0x91   :  { %v1380_v11 = vadd.f32 %v5982_v46, %v1329_v63  ;;  %v2031_v56 = vmul.f32 %v6265_v17, %v6084_v7  ;;  %v2978_v19 = vadd.f32 %v6200_v25, %v2940_v9  ;;  %v6447_v5 = vmax.f32 %v1373_v57, 0.0  ;;  %v6488_v63 = vld [vmem:[%s12096_s0 + $0x28] sm:$0xff] }
  0x92   :  { %v2124_v54 = vmul.f32 %v6324_v47, %v6087_v13  ;;  %v2131_v53 = vmul.f32 %v5397_v42, %v6087_v13  ;;  %v1873_v38 = vadd.f32 %v1824_v32, %v1773_v39  ;;  %v1880_v30 = vadd.f32 %v1831_v18, %v1780_v33  ;;  %v5097_v47 = vld [vmem:[%s12096_s0 + $0x220] sm:$0xff] }
  0x93   :  { %12811 = vst [vmem:[#allocation43_spill] sm:$0xff] %v6447_v5  ;;  %v6452_v43 = vmax.f32 %v1380_v11, 0.0  ;;  %v2224_v59 = vmul.f32 %v6346_v23, %v6090_v27  ;;  %v3014_v51 = vmax.f32 %v2978_v19, 0.0  ;;  %v2231_v17 = vmul.f32 %v6406_v62, %v6090_v27 }
  0x94   :  { %v2423_v2 = vmul.f32 %v6148_v3, %v6352_v36  ;;  %v2461_v37 = vmul.f32 %v12796_v35, %v6447_v5  ;;  %v1973_v42 = vadd.f32 %v1924_v22, %v1873_v38  ;;  %v1980_v32 = vadd.f32 %v1931_v61, %v1880_v30 }
  0x95   :  { %12812 = vst [vmem:[#allocation44_spill] sm:$0xff] %v6452_v43  ;;  %v2535_v34 = vmul.f32 %v6154_v58, %v6354_v14  ;;  %v2609_v16 = vmul.f32 %v12797_v6, %v6452_v43  ;;  %3050 = vst [vmem:[%s12101_s5 + $0x8] sm:$0xff] %v3014_v51  ;;  %v2683_v22 = vmul.f32 %v6172_v49, %v6397_v29 }
  0x96   :  { %v2497_v52 = vadd.f32 %v2461_v37, %v2423_v2  ;;  %v6481_v8 = vmul.f32 %v6194_v31, %v6399_v45  ;;  %v523_v21 = vmul.f32 %v6337_v1, %v5805_v10  ;;  %v2073_v28 = vadd.f32 %v2024_v50, %v1973_v42  ;;  %v5251_v50 = vld [vmem:[%s12096_s0 + $0x660] sm:$0xff] }
  0x97   :  { %v2080_v18 = vadd.f32 %v2031_v56, %v1980_v32  ;;  %v530_v9 = vmul.f32 %v6346_v23, %v5805_v10  ;;  %v574_v57 = vmul.f32 %v5097_v47, %v5817_v15  ;;  %v581_v11 = vmul.f32 %v6472_v40, %v5817_v15 }
  0x98   :  { %v2571_v61 = vadd.f32 %v2535_v34, %v2497_v52  ;;  %v674_v39 = vmul.f32 %v6488_v63, %v12792_v24  ;;  %v681_v33 = vmul.f32 %v6493_v4, %v12792_v24  ;;  %v2173_v56 = vadd.f32 %v2124_v54, %v2073_v28  ;;  %v6518_v52 = vld [vmem:[%s12096_s0 + $0x428] sm:$0xff] }
  0x99   :  { %v2180_v19 = vadd.f32 %v2131_v53, %v2080_v18  ;;  %v623_v38 = vadd.f32 %v574_v57, %v523_v21  ;;  %v774_v30 = vmul.f32 %v6375_v60, %v12795_v44  ;;  %v630_v2 = vadd.f32 %v581_v11, %v530_v9  ;;  %v6523_v54 = vld [vmem:[%s12096_s0 + $0x468] sm:$0xff]  ;;  %v5398_v53 = vld [vmem:[%s12096_s0 + $0x2a0] sm:$0xff] }
  0x9a   :  { %v2645_v51 = vadd.f32 %v2609_v16, %v2571_v61  ;;  %v781_v37 = vmul.f32 %v6381_v20, %v12795_v44  ;;  %v874_v42 = vmul.f32 %v5244_v26, %v12798_v41  ;;  %v2273_v32 = vadd.f32 %v2224_v59, %v2173_v56  ;;  %v12814_v57 = vld [vmem:[#allocation28_spill] sm:$0xff] }
  0x9b   :  { %v2280_v34 = vadd.f32 %v2231_v17, %v2180_v19  ;;  %v723_v16 = vadd.f32 %v674_v39, %v623_v38  ;;  %v881_v21 = vmul.f32 %v5251_v50, %v12798_v41  ;;  %v730_v59 = vadd.f32 %v681_v33, %v630_v2  ;;  %v12813_v17 = vld [vmem:[#allocation16_spill] sm:$0xff]  ;;  %v12815_v19 = vld [vmem:[#allocation17_spill] sm:$0xff] }
  0x9c   :  { %v2719_v28 = vadd.f32 %v2683_v22, %v2645_v51  ;;  %v974_v18 = vmul.f32 %v6518_v52, %v12813_v17  ;;  %v981_v9 = vmul.f32 %v6523_v54, %v12813_v17  ;;  %v2324_v61 = vadd.f32 %v12814_v57, %v2273_v32  ;;  %v12816_v22 = vld [vmem:[#allocation18_spill] sm:$0xff] }
  0x9d   :  { %v2331_v11 = vadd.f32 %v12814_v57, %v2280_v34  ;;  %v823_v56 = vadd.f32 %v774_v30, %v723_v16  ;;  %v1074_v29 = vmul.f32 %v6346_v23, %v12815_v19  ;;  %v830_v36 = vadd.f32 %v781_v37, %v730_v59  ;;  %v6549_v30 = vld [vmem:[%s12096_s0 + $0xa8] sm:$0xff]  ;;  %v12819_v34 = vld [vmem:[#allocation19_spill] sm:$0xff] }
  0x9e   :  { %v1081_v39 = vmul.f32 %v6406_v62, %v12815_v19  ;;  %v1174_v33 = vmul.f32 %v6472_v40, %v12816_v22  ;;  %v1181_v38 = vmul.f32 %v5398_v53, %v12816_v22  ;;  %v6542_v51 = vmax.f32 %v2324_v61, 0.0  ;;  %v12821_v22 = vld [vmem:[#allocation37_spill] sm:$0xff] }
  0x9f   :  { %v6544_v2 = vmax.f32 %v2331_v11, 0.0  ;;  %v923_v32 = vadd.f32 %v874_v42, %v823_v56  ;;  %v1274_v37 = vmul.f32 %v6493_v4, %v12819_v34  ;;  %v930_v16 = vadd.f32 %v881_v21, %v830_v36  ;;  %v12820_v11 = vld [vmem:[#allocation31_spill] sm:$0xff]  ;;  %v12822_v56 = vld [vmem:[#allocation22_spill] sm:$0xff] }
  0xa0   :  { %12817 = vst [vmem:[#allocation45_spill] sm:$0xff] %v6542_v51  ;;  %v1281_v59 = vmul.f32 %v6549_v30, %v12819_v34  ;;  %v1474_v45 = vmul.f32 %v6337_v1, %v12808_v55  ;;  %v1481_v61 = vmul.f32 %v6346_v23, %v12808_v55  ;;  %v2757_v14 = vmul.f32 %v12820_v11, %v6542_v51  ;;  %v12823_v21 = vld [vmem:[#allocation23_spill] sm:$0xff] }
  0xa1   :  { %12818 = vst [vmem:[#allocation46_spill] sm:$0xff] %v6544_v2  ;;  %v2905_v19 = vmul.f32 %v12821_v22, %v6544_v2  ;;  %v1023_v42 = vadd.f32 %v974_v18, %v923_v32  ;;  %v1525_v17 = vmul.f32 %v5097_v47, %v12822_v56  ;;  %v1030_v57 = vadd.f32 %v981_v9, %v930_v16 }
  0xa2   :  { %v1532_v36 = vmul.f32 %v6472_v40, %v12822_v56  ;;  %v1625_v34 = vmul.f32 %v6488_v63, %v12823_v21  ;;  %v1632_v1 = vmul.f32 %v6493_v4, %v12823_v21  ;;  %v2793_v55 = vadd.f32 %v2757_v14, %v2719_v28 }
  0xa3   :  { %v1123_v41 = vadd.f32 %v1074_v29, %v1023_v42  ;;  %v1574_v44 = vadd.f32 %v1525_v17, %v1474_v45  ;;  %v1725_v11 = vmul.f32 %v6375_v60, %v6023_v48  ;;  %v1130_v22 = vadd.f32 %v1081_v39, %v1030_v57 }
  0xa4   :  { %v1581_v18 = vadd.f32 %v1532_v36, %v1481_v61  ;;  %v1732_v47 = vmul.f32 %v6381_v20, %v6023_v48  ;;  %v1825_v9 = vmul.f32 %v5244_v26, %v6026_v0  ;;  %v2867_v32 = vadd.f32 %v6481_v8, %v2793_v55 }
  0xa5   :  { %v1223_v16 = vadd.f32 %v1174_v33, %v1123_v41  ;;  %v1674_v56 = vadd.f32 %v1625_v34, %v1574_v44  ;;  %v1832_v24 = vmul.f32 %v5251_v50, %v6026_v0  ;;  %v1230_v21 = vadd.f32 %v1181_v38, %v1130_v22 }
  0xa6   :  { %v1681_v14 = vadd.f32 %v1632_v1, %v1581_v18  ;;  %v1925_v29 = vmul.f32 %v6518_v52, %v6081_v12  ;;  %v1932_v60 = vmul.f32 %v6523_v54, %v6081_v12  ;;  %v2941_v45 = vadd.f32 %v2905_v19, %v2867_v32 }
  0xa7   :  { %v1323_v28 = vadd.f32 %v1274_v37, %v1223_v16  ;;  %v1774_v17 = vadd.f32 %v1725_v11, %v1674_v56  ;;  %v2025_v20 = vmul.f32 %v6346_v23, %v6084_v7  ;;  %v1330_v26 = vadd.f32 %v1281_v59, %v1230_v21  ;;  %v6613_v11 = vld [vmem:[%s12096_s0 + $0x268] sm:$0xff] }
  0xa8   :  { %v1781_v55 = vadd.f32 %v1732_v47, %v1681_v14  ;;  %v2032_v44 = vmul.f32 %v6406_v62, %v6084_v7  ;;  %v2125_v41 = vmul.f32 %v6472_v40, %v6087_v13  ;;  %v2979_v8 = vadd.f32 %v6200_v25, %v2941_v45  ;;  %v6629_v47 = vld [vmem:[%s12096_s0 + $0x30] sm:$0xff]  ;;  %v5252_v45 = vld [vmem:[%s12096_s0 + $0x668] sm:$0xff] }
  0xa9   :  { %v1374_v50 = vadd.f32 %v5982_v46, %v1323_v28  ;;  %v1874_v57 = vadd.f32 %v1825_v9, %v1774_v17  ;;  %v2132_v19 = vmul.f32 %v5398_v53, %v6087_v13  ;;  %v1381_v39 = vadd.f32 %v5982_v46, %v1330_v26  ;;  %v6602_v53 = vld [vmem:[%s12096_s0 + $0x228] sm:$0xff] }
  0xaa   :  { %v1881_v22 = vadd.f32 %v1832_v24, %v1781_v55  ;;  %v2225_v23 = vmul.f32 %v6493_v4, %v6090_v27  ;;  %v2232_v33 = vmul.f32 %v6549_v30, %v6090_v27  ;;  %v3015_v62 = vmax.f32 %v2979_v8, 0.0  ;;  %v12826_v17 = vld [vmem:[#allocation13_spill] sm:$0xff] }
  0xab   :  { %v6595_v38 = vmax.f32 %v1374_v50, 0.0  ;;  %v1974_v40 = vadd.f32 %v1925_v29, %v1874_v57  ;;  %v2424_v34 = vmul.f32 %v6148_v3, %v6447_v5  ;;  %v6604_v37 = vmax.f32 %v1381_v39, 0.0  ;;  %v6638_v29 = vld [vmem:[%s12096_s0 + $0x70] sm:$0xff]  ;;  %v12837_v5 = vld [vmem:[#allocation37_spill] sm:$0xff] }
  0xac   :  { %v1981_v24 = vadd.f32 %v1932_v60, %v1881_v22  ;;  %v2536_v59 = vmul.f32 %v6154_v58, %v6452_v43  ;;  %v2684_v61 = vmul.f32 %v6172_v49, %v6542_v51  ;;  %3051 = vst [vmem:[%s12101_s5 + $0x10] sm:$0xff] %v3015_v62  ;;  %v2832_v36 = vmul.f32 %v6194_v31, %v6544_v2  ;;  %v5245_v60 = vld [vmem:[%s12096_s0 + $0x628] sm:$0xff] }
  0xad   :  { %12824 = vst [vmem:[#allocation47_spill] sm:$0xff] %v6595_v38  ;;  %12825 = vst [vmem:[#allocation48_spill] sm:$0xff] %v6604_v37  ;;  %v2074_v42 = vadd.f32 %v2025_v20, %v1974_v40  ;;  %v2462_v56 = vmul.f32 %v12796_v35, %v6595_v38  ;;  %v524_v21 = vmul.f32 %v6488_v63, %v5805_v10  ;;  %v6659_v40 = vld [vmem:[%s12096_s0 + $0x430] sm:$0xff] }
  0xae   :  { %v2081_v1 = vadd.f32 %v2032_v44, %v1981_v24  ;;  %v2610_v18 = vmul.f32 %v12797_v6, %v6604_v37  ;;  %v531_v9 = vmul.f32 %v6493_v4, %v5805_v10  ;;  %v575_v32 = vmul.f32 %v6602_v53, %v5817_v15 }
  0xaf   :  { %v2174_v16 = vadd.f32 %v2125_v41, %v2074_v42  ;;  %v2498_v14 = vadd.f32 %v2462_v56, %v2424_v34  ;;  %v582_v28 = vmul.f32 %v6613_v11, %v5817_v15  ;;  %v675_v20 = vmul.f32 %v6629_v47, %v12826_v17  ;;  %v12827_v41 = vld [vmem:[#allocation14_spill] sm:$0xff]  ;;  %v12828_v34 = vld [vmem:[#allocation15_spill] sm:$0xff]  ;;  %v12829_v56 = vld [vmem:[#allocation28_spill] sm:$0xff] }
  0xb0   :  { %v2181_v26 = vadd.f32 %v2132_v19, %v2081_v1  ;;  %v624_v55 = vadd.f32 %v575_v32, %v524_v21  ;;  %v682_v44 = vmul.f32 %v6638_v29, %v12826_v17  ;;  %v775_v8 = vmul.f32 %v6518_v52, %v12827_v41 }
  0xb1   :  { %v2274_v50 = vadd.f32 %v2225_v23, %v2174_v16  ;;  %v2572_v57 = vadd.f32 %v2536_v59, %v2498_v14  ;;  %v631_v39 = vadd.f32 %v582_v28, %v531_v9  ;;  %v782_v22 = vmul.f32 %v6523_v54, %v12827_v41  ;;  %v6667_v23 = vld [vmem:[%s12096_s0 + $0x470] sm:$0xff]  ;;  %v12830_v9 = vld [vmem:[#allocation16_spill] sm:$0xff] }
  0xb2   :  { %v2281_v62 = vadd.f32 %v2232_v33, %v2181_v26  ;;  %v724_v19 = vadd.f32 %v675_v20, %v624_v55  ;;  %v875_v24 = vmul.f32 %v5245_v60, %v12828_v34  ;;  %v882_v42 = vmul.f32 %v5252_v45, %v12828_v34  ;;  %v5399_v33 = vld [vmem:[%s12096_s0 + $0x2a8] sm:$0xff] }
  0xb3   :  { %v2325_v21 = vadd.f32 %v12829_v56, %v2274_v50  ;;  %v2646_v1 = vadd.f32 %v2610_v18, %v2572_v57  ;;  %v731_v59 = vadd.f32 %v682_v44, %v631_v39  ;;  %v975_v32 = vmul.f32 %v6659_v40, %v12830_v9  ;;  %v12831_v18 = vld [vmem:[#allocation17_spill] sm:$0xff]  ;;  %v6688_v39 = vld [vmem:[%s12096_s0 + $0xb0] sm:$0xff] }
  0xb4   :  { %v2332_v16 = vadd.f32 %v12829_v56, %v2281_v62  ;;  %v824_v14 = vadd.f32 %v775_v8, %v724_v19  ;;  %v982_v28 = vmul.f32 %v6667_v23, %v12830_v9  ;;  %v1075_v20 = vmul.f32 %v6493_v4, %v12831_v18  ;;  %v12834_v62 = vld [vmem:[#allocation18_spill] sm:$0xff] }
  0xb5   :  { %v6679_v26 = vmax.f32 %v2325_v21, 0.0  ;;  %v2720_v55 = vadd.f32 %v2684_v61, %v2646_v1  ;;  %v831_v50 = vadd.f32 %v782_v22, %v731_v59  ;;  %v1082_v57 = vmul.f32 %v6549_v30, %v12831_v18  ;;  %v12835_v21 = vld [vmem:[#allocation31_spill] sm:$0xff] }
  0xb6   :  { %v6683_v44 = vmax.f32 %v2332_v16, 0.0  ;;  %v924_v8 = vadd.f32 %v875_v24, %v824_v14  ;;  %v1175_v19 = vmul.f32 %v6613_v11, %v12834_v62  ;;  %v1182_v51 = vmul.f32 %v5399_v33, %v12834_v62  ;;  %v12836_v1 = vld [vmem:[#allocation19_spill] sm:$0xff]  ;;  %v12838_v24 = vld [vmem:[#allocation21_spill] sm:$0xff] }
  0xb7   :  { %12832 = vst [vmem:[#allocation49_spill] sm:$0xff] %v6679_v26  ;;  %v2758_v61 = vmul.f32 %v12835_v21, %v6679_v26  ;;  %v931_v22 = vadd.f32 %v882_v42, %v831_v50  ;;  %v1275_v59 = vmul.f32 %v6638_v29, %v12836_v1  ;;  %v1282_v16 = vmul.f32 %v6688_v39, %v12836_v1  ;;  %v12839_v21 = vld [vmem:[#allocation22_spill] sm:$0xff]  ;;  %v12840_v1 = vld [vmem:[#allocation23_spill] sm:$0xff] }
  0xb8   :  { %12833 = vst [vmem:[#allocation50_spill] sm:$0xff] %v6683_v44  ;;  %v2906_v2 = vmul.f32 %v12837_v5, %v6683_v44  ;;  %v1024_v43 = vadd.f32 %v975_v32, %v924_v8  ;;  %v1475_v14 = vmul.f32 %v6488_v63, %v12838_v24  ;;  %v1482_v62 = vmul.f32 %v6493_v4, %v12838_v24 }
  0xb9   :  { %v2794_v18 = vadd.f32 %v2758_v61, %v2720_v55  ;;  %v1031_v56 = vadd.f32 %v982_v28, %v931_v22  ;;  %v1526_v42 = vmul.f32 %v6602_v53, %v12839_v21  ;;  %v1533_v50 = vmul.f32 %v6613_v11, %v12839_v21 }
  0xba   :  { %v1124_v9 = vadd.f32 %v1075_v20, %v1024_v43  ;;  %v1626_v34 = vmul.f32 %v6629_v47, %v12840_v1  ;;  %v1633_v32 = vmul.f32 %v6638_v29, %v12840_v1  ;;  %v1726_v63 = vmul.f32 %v6518_v52, %v6023_v48 }
  0xbb   :  { %v2868_v8 = vadd.f32 %v2832_v36, %v2794_v18  ;;  %v1131_v24 = vadd.f32 %v1082_v57, %v1031_v56  ;;  %v1575_v55 = vadd.f32 %v1526_v42, %v1475_v14  ;;  %v1582_v28 = vadd.f32 %v1533_v50, %v1482_v62  ;;  %v5148_v14 = vld [vmem:[%s12096_s0 + $0x38] sm:$0xff] }
  0xbc   :  { %v1224_v61 = vadd.f32 %v1175_v19, %v1124_v9  ;;  %v1733_v53 = vmul.f32 %v6523_v54, %v6023_v48  ;;  %v1826_v22 = vmul.f32 %v5245_v60, %v6026_v0  ;;  %v1833_v43 = vmul.f32 %v5252_v45, %v6026_v0 }
  0xbd   :  { %v2942_v20 = vadd.f32 %v2906_v2, %v2868_v8  ;;  %v1231_v21 = vadd.f32 %v1182_v51, %v1131_v24  ;;  %v1675_v5 = vadd.f32 %v1626_v34, %v1575_v55  ;;  %v1682_v41 = vadd.f32 %v1633_v32, %v1582_v28  ;;  %v6754_v24 = vld [vmem:[%s12096_s0 + $0x270] sm:$0xff] }
  0xbe   :  { %v1324_v1 = vadd.f32 %v1275_v59, %v1224_v61  ;;  %v1926_v52 = vmul.f32 %v6659_v40, %v6081_v12  ;;  %v1933_v36 = vmul.f32 %v6667_v23, %v6081_v12  ;;  %v2026_v56 = vmul.f32 %v6493_v4, %v6084_v7 }
  0xbf   :  { %v2980_v54 = vadd.f32 %v6200_v25, %v2942_v20  ;;  %v1331_v9 = vadd.f32 %v1282_v16, %v1231_v21  ;;  %v1775_v60 = vadd.f32 %v1726_v63, %v1675_v5  ;;  %v1782_v18 = vadd.f32 %v1733_v53, %v1682_v41  ;;  %v5099_v16 = vld [vmem:[%s12096_s0 + $0x230] sm:$0xff]  ;;  %v6770_v63 = vld [vmem:[%s12096_s0 + $0x78] sm:$0xff] }
  0xc0   :  { %v1375_v2 = vadd.f32 %v5982_v46, %v1324_v1  ;;  %v2033_v51 = vmul.f32 %v6549_v30, %v6084_v7  ;;  %v2126_v45 = vmul.f32 %v6613_v11, %v6087_v13  ;;  %v2133_v34 = vmul.f32 %v5399_v33, %v6087_v13  ;;  %v5253_v20 = vld [vmem:[%s12096_s0 + $0x670] sm:$0xff] }
  0xc1   :  { %v3016_v57 = vmax.f32 %v2980_v54, 0.0  ;;  %v1382_v62 = vadd.f32 %v5982_v46, %v1331_v9  ;;  %v1875_v19 = vadd.f32 %v1826_v22, %v1775_v60  ;;  %v1882_v4 = vadd.f32 %v1833_v43, %v1782_v18  ;;  %v5246_v43 = vld [vmem:[%s12096_s0 + $0x630] sm:$0xff]  ;;  %v5295_v60 = vld [vmem:[%s12096_s0 + $0x438] sm:$0xff] }
  0xc2   :  { %v6733_v59 = vmax.f32 %v1375_v2, 0.0  ;;  %v2226_v5 = vmul.f32 %v6638_v29, %v6090_v27  ;;  %v2233_v41 = vmul.f32 %v6688_v39, %v6090_v27  ;;  %v2425_v30 = vmul.f32 %v6148_v3, %v6595_v38  ;;  %v12843_v2 = vld [vmem:[#allocation14_spill] sm:$0xff]  ;;  %v12845_v38 = vld [vmem:[#allocation16_spill] sm:$0xff] }
  0xc3   :  { %3052 = vst [vmem:[%s12101_s5 + $0x18] sm:$0xff] %v3016_v57  ;;  %v6744_v11 = vmax.f32 %v1382_v62, 0.0  ;;  %v1975_v33 = vadd.f32 %v1926_v52, %v1875_v19  ;;  %v1982_v21 = vadd.f32 %v1933_v36, %v1882_v4  ;;  %v2537_v1 = vmul.f32 %v6154_v58, %v6604_v37  ;;  %v5302_v62 = vld [vmem:[%s12096_s0 + $0x478] sm:$0xff] }
  0xc4   :  { %12841 = vst [vmem:[#allocation51_spill] sm:$0xff] %v6733_v59  ;;  %v2463_v42 = vmul.f32 %v12796_v35, %v6733_v59  ;;  %v2685_v50 = vmul.f32 %v6172_v49, %v6679_v26  ;;  %v6765_v32 = vmul.f32 %v6194_v31, %v6683_v44  ;;  %v525_v8 = vmul.f32 %v6629_v47, %v5805_v10 }
  0xc5   :  { %12842 = vst [vmem:[#allocation52_spill] sm:$0xff] %v6744_v11  ;;  %v2075_v55 = vadd.f32 %v2026_v56, %v1975_v33  ;;  %v2082_v28 = vadd.f32 %v2033_v51, %v1982_v21  ;;  %v2611_v61 = vmul.f32 %v12797_v6, %v6744_v11  ;;  %v532_v53 = vmul.f32 %v6638_v29, %v5805_v10  ;;  %v12844_v33 = vld [vmem:[#allocation15_spill] sm:$0xff] }
  0xc6   :  { %v2499_v22 = vadd.f32 %v2463_v42, %v2425_v30  ;;  %v576_v52 = vmul.f32 %v5099_v16, %v5817_v15  ;;  %v583_v36 = vmul.f32 %v6754_v24, %v5817_v15  ;;  %v676_v56 = vmul.f32 %v5148_v14, %v12826_v17 }
  0xc7   :  { %v2175_v54 = vadd.f32 %v2126_v45, %v2075_v55  ;;  %v2182_v9 = vadd.f32 %v2133_v34, %v2082_v28  ;;  %v683_v18 = vmul.f32 %v6770_v63, %v12826_v17  ;;  %v776_v51 = vmul.f32 %v6659_v40, %v12843_v2 }
  0xc8   :  { %v2573_v57 = vadd.f32 %v2537_v1, %v2499_v22  ;;  %v625_v19 = vadd.f32 %v576_v52, %v525_v8  ;;  %v632_v4 = vadd.f32 %v583_v36, %v532_v53  ;;  %v783_v45 = vmul.f32 %v6667_v23, %v12843_v2  ;;  %v12846_v22 = vld [vmem:[#allocation28_spill] sm:$0xff]  ;;  %v12847_v53 = vld [vmem:[#allocation17_spill] sm:$0xff] }
  0xc9   :  { %v2275_v34 = vadd.f32 %v2226_v5, %v2175_v54  ;;  %v2282_v30 = vadd.f32 %v2233_v41, %v2182_v9  ;;  %v876_v21 = vmul.f32 %v5246_v43, %v12844_v33  ;;  %v883_v42 = vmul.f32 %v5253_v20, %v12844_v33  ;;  %v6811_v41 = vld [vmem:[%s12096_s0 + $0x2b0] sm:$0xff] }
  0xca   :  { %v2647_v55 = vadd.f32 %v2611_v61, %v2573_v57  ;;  %v725_v28 = vadd.f32 %v676_v56, %v625_v19  ;;  %v732_v26 = vadd.f32 %v683_v18, %v632_v4  ;;  %v976_v1 = vmul.f32 %v5295_v60, %v12845_v38  ;;  %12848 = vst [vmem:[#allocation53_spill] sm:$0xff] %v6811_v41  ;;  %v6822_v18 = vld [vmem:[%s12096_s0 + $0xb8] sm:$0xff] }
  0xcb   :  { %v2326_v44 = vadd.f32 %v12846_v22, %v2275_v34  ;;  %v2333_v37 = vadd.f32 %v12846_v22, %v2282_v30  ;;  %v983_v8 = vmul.f32 %v5302_v62, %v12845_v38  ;;  %v1076_v52 = vmul.f32 %v6638_v29, %v12847_v53  ;;  %12851 = vst [vmem:[#allocation56_spill] sm:$0xff] %v6822_v18  ;;  %v12853_v4 = vld [vmem:[#allocation19_spill] sm:$0xff]  ;;  %v12855_v30 = vld [vmem:[#allocation37_spill] sm:$0xff] }
  0xcc   :  { %v2721_v5 = vadd.f32 %v2685_v50, %v2647_v55  ;;  %v825_v61 = vadd.f32 %v776_v51, %v725_v28  ;;  %v832_v36 = vadd.f32 %v783_v45, %v732_v26  ;;  %v1083_v56 = vmul.f32 %v6688_v39, %v12847_v53  ;;  %v12852_v50 = vld [vmem:[#allocation18_spill] sm:$0xff]  ;;  %v12856_v28 = vld [vmem:[#allocation21_spill] sm:$0xff]  ;;  %v12858_v38 = vld [vmem:[#allocation23_spill] sm:$0xff] }
  0xcd   :  { %v6815_v54 = vmax.f32 %v2326_v44, 0.0  ;;  %v6817_v9 = vmax.f32 %v2333_v37, 0.0  ;;  %v1176_v57 = vmul.f32 %v6754_v24, %v12852_v50  ;;  %v1183_v19 = vmul.f32 %v6811_v41, %v12852_v50  ;;  %v12854_v44 = vld [vmem:[#allocation31_spill] sm:$0xff] }
  0xce   :  { %v925_v51 = vadd.f32 %v876_v21, %v825_v61  ;;  %v932_v26 = vadd.f32 %v883_v42, %v832_v36  ;;  %v1276_v45 = vmul.f32 %v6770_v63, %v12853_v4  ;;  %v1283_v37 = vmul.f32 %v6822_v18, %v12853_v4  ;;  %v12857_v61 = vld [vmem:[#allocation22_spill] sm:$0xff] }
  0xcf   :  { %12849 = vst [vmem:[#allocation54_spill] sm:$0xff] %v6815_v54  ;;  %12850 = vst [vmem:[#allocation55_spill] sm:$0xff] %v6817_v9  ;;  %v2759_v34 = vmul.f32 %v12854_v44, %v6815_v54  ;;  %v2907_v55 = vmul.f32 %v12855_v30, %v6817_v9  ;;  %v1476_v53 = vmul.f32 %v6629_v47, %v12856_v28 }
  0xd0   :  { %v1483_v50 = vmul.f32 %v6638_v29, %v12856_v28  ;;  %v1025_v21 = vadd.f32 %v976_v1, %v925_v51  ;;  %v1032_v42 = vadd.f32 %v983_v8, %v932_v26  ;;  %v1527_v36 = vmul.f32 %v5099_v16, %v12857_v61 }
  0xd1   :  { %v1534_v22 = vmul.f32 %v6754_v24, %v12857_v61  ;;  %v2795_v4 = vadd.f32 %v2759_v34, %v2721_v5  ;;  %v1627_v33 = vmul.f32 %v5148_v14, %v12858_v38  ;;  %v1634_v44 = vmul.f32 %v6770_v63, %v12858_v38 }
  0xd2   :  { %v1727_v30 = vmul.f32 %v6659_v40, %v6023_v48  ;;  %v1125_v47 = vadd.f32 %v1076_v52, %v1025_v21  ;;  %v1132_v2 = vadd.f32 %v1083_v56, %v1032_v42  ;;  %v1576_v17 = vadd.f32 %v1527_v36, %v1476_v53 }
  0xd3   :  { %v1583_v28 = vadd.f32 %v1534_v22, %v1483_v50  ;;  %v2869_v1 = vadd.f32 %v6765_v32, %v2795_v4  ;;  %v1734_v16 = vmul.f32 %v6667_v23, %v6023_v48  ;;  %v1827_v8 = vmul.f32 %v5246_v43, %v6026_v0  ;;  %v6869_v50 = vld [vmem:[%s12096_s0 + $0x80] sm:$0xff] }
  0xd4   :  { %v1834_v5 = vmul.f32 %v5253_v20, %v6026_v0  ;;  %v1225_v14 = vadd.f32 %v1176_v57, %v1125_v47  ;;  %v1232_v51 = vadd.f32 %v1183_v19, %v1132_v2  ;;  %v1676_v26 = vadd.f32 %v1627_v33, %v1576_v17 }
  0xd5   :  { %v1683_v34 = vadd.f32 %v1634_v44, %v1583_v28  ;;  %v2943_v38 = vadd.f32 %v2907_v55, %v2869_v1  ;;  %v1927_v40 = vmul.f32 %v5295_v60, %v6081_v12  ;;  %v1934_v52 = vmul.f32 %v5302_v62, %v6081_v12  ;;  %v6884_v44 = vld [vmem:[%s12096_s0 + $0x88] sm:$0xff] }
  0xd6   :  { %v2027_v22 = vmul.f32 %v6638_v29, %v6084_v7  ;;  %v1325_v32 = vadd.f32 %v1276_v45, %v1225_v14  ;;  %v1332_v53 = vadd.f32 %v1283_v37, %v1232_v51  ;;  %v1776_v56 = vadd.f32 %v1727_v30, %v1676_v26  ;;  %v6894_v30 = vld [vmem:[%s12096_s0 + $0x288] sm:$0xff]  ;;  %v6924_v14 = vld [vmem:[%s12096_s0 + $0x90] sm:$0xff]  ;;  %v6929_v51 = vld [vmem:[%s12096_s0 + $0x680] sm:$0xff] }
  0xd7   :  { %v1783_v23 = vadd.f32 %v1734_v16, %v1683_v34  ;;  %v2981_v43 = vadd.f32 %v6200_v25, %v2943_v38  ;;  %v2034_v20 = vmul.f32 %v6688_v39, %v6084_v7  ;;  %v2127_v17 = vmul.f32 %v6754_v24, %v6087_v13 }
  0xd8   :  { %v2134_v60 = vmul.f32 %v6811_v41, %v6087_v13  ;;  %v1376_v2 = vadd.f32 %v5982_v46, %v1325_v32  ;;  %v1383_v62 = vadd.f32 %v5982_v46, %v1332_v53  ;;  %v1876_v29 = vadd.f32 %v1827_v8, %v1776_v56  ;;  %v5205_v8 = vld [vmem:[%s12096_s0 + $0x480] sm:$0xff] }
  0xd9   :  { %v1883_v33 = vadd.f32 %v1834_v5, %v1783_v23  ;;  %v3017_v38 = vmax.f32 %v2981_v43, 0.0  ;;  %v2227_v39 = vmul.f32 %v6770_v63, %v6090_v27  ;;  %v2234_v24 = vmul.f32 %v6822_v18, %v6090_v27  ;;  %v6889_v63 = vld [vmem:[%s12096_s0 + $0x280] sm:$0xff]  ;;  %v6919_v5 = vld [vmem:[%s12096_s0 + $0x488] sm:$0xff] }
  0xda   :  { %v2426_v57 = vmul.f32 %v6148_v3, %v6733_v59  ;;  %v6877_v19 = vmax.f32 %v1376_v2, 0.0  ;;  %v6879_v4 = vmax.f32 %v1383_v62, 0.0  ;;  %v1976_v45 = vadd.f32 %v1927_v40, %v1876_v29  ;;  %v5255_v23 = vld [vmem:[%s12096_s0 + $0x688] sm:$0xff]  ;;  %v12862_v62 = vld [vmem:[#allocation14_spill] sm:$0xff] }
  0xdb   :  { %v1983_v37 = vadd.f32 %v1934_v52, %v1883_v33  ;;  %3053 = vst [vmem:[%s12101_s5 + $0x20] sm:$0xff] %v3017_v38  ;;  %v2538_v55 = vmul.f32 %v6154_v58, %v6744_v11  ;;  %v2686_v28 = vmul.f32 %v6172_v49, %v6815_v54  ;;  %v6905_v21 = vmul.f32 %v6194_v31, %v6817_v9  ;;  %v12861_v52 = vld [vmem:[#allocation13_spill] sm:$0xff]  ;;  %v12873_v54 = vld [vmem:[#allocation18_spill] sm:$0xff] }
  0xdc   :  { %12859 = vst [vmem:[#allocation57_spill] sm:$0xff] %v6877_v19  ;;  %12860 = vst [vmem:[#allocation58_spill] sm:$0xff] %v6879_v4  ;;  %v533_v42 = vmul.f32 %v5805_v10, %v6869_v50  ;;  %v2076_v36 = vadd.f32 %v2027_v22, %v1976_v45  ;;  %v2464_v1 = vmul.f32 %v12796_v35, %v6877_v19  ;;  %v6987_v19 = vld [vmem:[%s12096_s0 + $0x2c8] sm:$0xff] }
  0xdd   :  { %v2083_v47 = vadd.f32 %v2034_v20, %v1983_v37  ;;  %v2612_v16 = vmul.f32 %v12797_v6, %v6879_v4  ;;  %v534_v26 = vmul.f32 %v5805_v10, %v6884_v44  ;;  %v584_v34 = vmul.f32 %v6889_v63, %v5817_v15  ;;  %12872 = vst [vmem:[#allocation64_spill] sm:$0xff] %v6987_v19  ;;  %v12877_v4 = vld [vmem:[#allocation37_spill] sm:$0xff] }
  0xde   :  { %v585_v40 = vmul.f32 %v6894_v30, %v5817_v15  ;;  %v684_v22 = vmul.f32 %v12861_v52, %v6884_v44  ;;  %v2176_v32 = vadd.f32 %v2127_v17, %v2076_v36  ;;  %v2500_v56 = vadd.f32 %v2464_v1, %v2426_v57  ;;  %v12863_v17 = vld [vmem:[#allocation15_spill] sm:$0xff]  ;;  %v6952_v57 = vld [vmem:[%s12096_s0 + $0x490] sm:$0xff]  ;;  %v12864_v1 = vld [vmem:[#allocation16_spill] sm:$0xff] }
  0xdf   :  { %v2183_v53 = vadd.f32 %v2134_v60, %v2083_v47  ;;  %v685_v43 = vmul.f32 %v6924_v14, %v12861_v52  ;;  %v633_v20 = vadd.f32 %v584_v34, %v533_v42  ;;  %v784_v29 = vmul.f32 %v5205_v8, %v12862_v62  ;;  %v12865_v34 = vld [vmem:[#allocation28_spill] sm:$0xff]  ;;  %v12878_v9 = vld [vmem:[#allocation21_spill] sm:$0xff] }
  0xe0   :  { %v634_v2 = vadd.f32 %v585_v40, %v534_v26  ;;  %v785_v33 = vmul.f32 %v6919_v5, %v12862_v62  ;;  %v2276_v38 = vadd.f32 %v2227_v39, %v2176_v32  ;;  %v2574_v37 = vadd.f32 %v2538_v55, %v2500_v56  ;;  %v6962_v55 = vld [vmem:[%s12096_s0 + $0xc0] sm:$0xff] }
  0xe1   :  { %v2283_v45 = vadd.f32 %v2234_v24, %v2183_v53  ;;  %v884_v60 = vmul.f32 %v6929_v51, %v12863_v17  ;;  %v733_v36 = vadd.f32 %v684_v22, %v633_v20  ;;  %v885_v42 = vmul.f32 %v5255_v23, %v12863_v17  ;;  %12866 = vst [vmem:[#allocation59_spill] sm:$0xff] %v6962_v55  ;;  %v6967_v22 = vld [vmem:[%s12096_s0 + $0xc8] sm:$0xff]  ;;  %v6974_v53 = vld [vmem:[%s12096_s0 + $0x2c0] sm:$0xff] }
  0xe2   :  { %v734_v47 = vadd.f32 %v685_v43, %v634_v2  ;;  %v984_v26 = vmul.f32 %v6919_v5, %v12864_v1  ;;  %v2327_v40 = vadd.f32 %v12865_v34, %v2276_v38  ;;  %v2648_v24 = vadd.f32 %v2612_v16, %v2574_v37  ;;  %12867 = vst [vmem:[#allocation60_spill] sm:$0xff] %v6967_v22  ;;  %v12869_v43 = vld [vmem:[#allocation17_spill] sm:$0xff] }
  0xe3   :  { %v2334_v39 = vadd.f32 %v12865_v34, %v2283_v45  ;;  %v985_v32 = vmul.f32 %v6952_v57, %v12864_v1  ;;  %12868 = vst [vmem:[#allocation61_spill] sm:$0xff] %v6974_v53  ;;  %v833_v56 = vadd.f32 %v784_v29, %v733_v36  ;;  %v1084_v20 = vmul.f32 %v6962_v55, %v12869_v43 }
  0xe4   :  { %v834_v16 = vadd.f32 %v785_v33, %v734_v47  ;;  %v1085_v2 = vmul.f32 %v6967_v22, %v12869_v43  ;;  %v6980_v38 = vmax.f32 %v2327_v40, 0.0  ;;  %v2722_v37 = vadd.f32 %v2686_v28, %v2648_v24  ;;  %v6994_v33 = vld [vmem:[%s12096_s0 + $0xd0] sm:$0xff]  ;;  %v12876_v24 = vld [vmem:[#allocation31_spill] sm:$0xff] }
  0xe5   :  { %v6982_v45 = vmax.f32 %v2334_v39, 0.0  ;;  %v1184_v29 = vmul.f32 %v6974_v53, %v12873_v54  ;;  %12874 = vst [vmem:[#allocation65_spill] sm:$0xff] %v6994_v33  ;;  %v933_v36 = vadd.f32 %v884_v60, %v833_v56  ;;  %v1185_v40 = vmul.f32 %v6987_v19, %v12873_v54  ;;  %v12875_v39 = vld [vmem:[#allocation19_spill] sm:$0xff] }
  0xe6   :  { %12870 = vst [vmem:[#allocation62_spill] sm:$0xff] %v6980_v38  ;;  %v934_v47 = vadd.f32 %v885_v42, %v834_v16  ;;  %v1284_v28 = vmul.f32 %v6967_v22, %v12875_v39  ;;  %v2760_v59 = vmul.f32 %v12876_v24, %v6980_v38  ;;  %v1285_v41 = vmul.f32 %v6994_v33, %v12875_v39 }
  0xe7   :  { %12871 = vst [vmem:[#allocation63_spill] sm:$0xff] %v6982_v45  ;;  %v2908_v18 = vmul.f32 %v12877_v4, %v6982_v45  ;;  %v1484_v11 = vmul.f32 %v12878_v9, %v6869_v50  ;;  %v1033_v60 = vadd.f32 %v984_v26, %v933_v36  ;;  %v1485_v56 = vmul.f32 %v12878_v9, %v6884_v44  ;;  %v12879_v45 = vld [vmem:[#allocation23_spill] sm:$0xff] }
  0xe8   :  { %v1034_v42 = vadd.f32 %v985_v32, %v934_v47  ;;  %v1535_v16 = vmul.f32 %v6889_v63, %v12857_v61  ;;  %v2796_v31 = vadd.f32 %v2760_v59, %v2722_v37  ;;  %v1536_v38 = vmul.f32 %v6894_v30, %v12857_v61 }
  0xe9   :  { %v1635_v4 = vmul.f32 %v12879_v45, %v6884_v44  ;;  %v1636_v34 = vmul.f32 %v6924_v14, %v12879_v45  ;;  %v1133_v39 = vadd.f32 %v1084_v20, %v1033_v60  ;;  %v1735_v32 = vmul.f32 %v5205_v8, %v6023_v48 }
  0xea   :  { %v1134_v50 = vadd.f32 %v1085_v2, %v1034_v42  ;;  %v1584_v26 = vadd.f32 %v1535_v16, %v1484_v11  ;;  %v2870_v36 = vadd.f32 %v6905_v21, %v2796_v31  ;;  %v1585_v47 = vadd.f32 %v1536_v38, %v1485_v56  ;;  %v12882_v16 = vld [vmem:[#allocation26_spill] sm:$0xff] }
  0xeb   :  { %v1736_v59 = vmul.f32 %v6919_v5, %v6023_v48  ;;  %v1835_v63 = vmul.f32 %v6929_v51, %v6026_v0  ;;  %v1233_v30 = vadd.f32 %v1184_v29, %v1133_v39  ;;  %v1836_v61 = vmul.f32 %v5255_v23, %v6026_v0 }
  0xec   :  { %v1234_v37 = vadd.f32 %v1185_v40, %v1134_v50  ;;  %v1684_v44 = vadd.f32 %v1635_v4, %v1584_v26  ;;  %v2944_v45 = vadd.f32 %v2908_v18, %v2870_v36  ;;  %v1685_v20 = vadd.f32 %v1636_v34, %v1585_v47  ;;  %v5109_v26 = vld [vmem:[%s12096_s0 + $0x290] sm:$0xff] }
  0xed   :  { %v1935_v11 = vmul.f32 %v6919_v5, %v6081_v12  ;;  %v1936_v31 = vmul.f32 %v6952_v57, %v6081_v12  ;;  %v1333_v21 = vadd.f32 %v1284_v28, %v1233_v30  ;;  %v2035_v38 = vmul.f32 %v6962_v55, %v6084_v7  ;;  %v12884_v47 = vld [vmem:[#allocation34_spill] sm:$0xff] }
  0xee   :  { %v1334_v8 = vadd.f32 %v1285_v41, %v1234_v37  ;;  %v1784_v2 = vadd.f32 %v1735_v32, %v1684_v44  ;;  %v2982_v51 = vadd.f32 %v6200_v25, %v2944_v45  ;;  %v1785_v29 = vadd.f32 %v1736_v59, %v1685_v20  ;;  %v12883_v32 = vld [vmem:[#allocation27_spill] sm:$0xff]  ;;  %v5256_v37 = vld [vmem:[%s12096_s0 + $0x690] sm:$0xff] }
  0xef   :  { %v2036_v4 = vmul.f32 %v6967_v22, %v6084_v7  ;;  %v2135_v18 = vmul.f32 %v6974_v53, %v6087_v13  ;;  %v1384_v5 = vadd.f32 %v5982_v46, %v1333_v21  ;;  %v2136_v41 = vmul.f32 %v6987_v19, %v6087_v13  ;;  %v12890_v53 = vld [vmem:[#allocation28_spill] sm:$0xff] }
  0xf0   :  { %v1385_v23 = vadd.f32 %v5982_v46, %v1334_v8  ;;  %v1884_v34 = vadd.f32 %v1835_v63, %v1784_v2  ;;  %v3018_v40 = vmax.f32 %v2982_v51, 0.0  ;;  %v1885_v39 = vadd.f32 %v1836_v61, %v1785_v29  ;;  %v12885_v63 = vld [vmem:[#allocation35_spill] sm:$0xff] }
  0xf1   :  { %v2235_v45 = vmul.f32 %v6967_v22, %v6090_v27  ;;  %v2236_v28 = vmul.f32 %v6994_v33, %v6090_v27  ;;  %v7044_v60 = vmax.f32 %v1384_v5, 0.0  ;;  %v2427_v50 = vmul.f32 %v6148_v3, %v12882_v16 }
  0xf2   :  { %v7046_v42 = vmax.f32 %v1385_v23, 0.0  ;;  %v1984_v56 = vadd.f32 %v1935_v11, %v1884_v34  ;;  %3054 = vst [vmem:[%s12101_s5 + $0x28] sm:$0xff] %v3018_v40  ;;  %v1985_v61 = vadd.f32 %v1936_v31, %v1885_v39  ;;  %v2465_v36 = vmul.f32 %v12796_v35, %v12883_v32  ;;  %v7072_v31 = vld [vmem:[%s12096_s0 + $0x98] sm:$0xff] }
  0xf3   :  { %12880 = vst [vmem:[#allocation66_spill] sm:$0xff] %v7044_v60  ;;  %v2687_v59 = vmul.f32 %v6172_v49, %v12884_v47  ;;  %v2761_v30 = vmul.f32 %v12876_v24, %v12885_v63  ;;  %v2539_v20 = vmul.f32 %v6154_v58, %v7044_v60  ;;  %v535_v21 = vmul.f32 %v6924_v14, %v5805_v10  ;;  %v12889_v60 = vld [vmem:[#allocation22_spill] sm:$0xff] }
  0xf4   :  { %12881 = vst [vmem:[#allocation67_spill] sm:$0xff] %v7046_v42  ;;  %v2084_v44 = vadd.f32 %v2035_v38, %v1984_v56  ;;  %v2613_v11 = vmul.f32 %v12797_v6, %v7046_v42  ;;  %v2085_v8 = vadd.f32 %v2036_v4, %v1985_v61  ;;  %v2501_v2 = vadd.f32 %v2465_v36, %v2427_v50  ;;  %v7079_v38 = vld [vmem:[%s12096_s0 + $0x498] sm:$0xff]  ;;  %v7092_v56 = vld [vmem:[%s12096_s0 + $0x2d0] sm:$0xff] }
  0xf5   :  { %v586_v51 = vmul.f32 %v5109_v26, %v5817_v15  ;;  %v686_v29 = vmul.f32 %v7072_v31, %v12861_v52  ;;  %v786_v23 = vmul.f32 %v6952_v57, %v12862_v62  ;;  %v886_v34 = vmul.f32 %v5256_v37, %v12863_v17  ;;  %12886 = vst [vmem:[#allocation68_spill] sm:$0xff] %v7092_v56  ;;  %v7097_v50 = vld [vmem:[%s12096_s0 + $0xd8] sm:$0xff] }
  0xf6   :  { %v2184_v5 = vadd.f32 %v2135_v18, %v2084_v44  ;;  %v986_v4 = vmul.f32 %v7079_v38, %v12864_v1  ;;  %v2185_v40 = vadd.f32 %v2136_v41, %v2085_v8  ;;  %v2575_v39 = vadd.f32 %v2539_v20, %v2501_v2  ;;  %12887 = vst [vmem:[#allocation69_spill] sm:$0xff] %v7097_v50  ;;  %v12888_v41 = vld [vmem:[#allocation19_spill] sm:$0xff] }
  0xf7   :  { %v635_v18 = vadd.f32 %v586_v51, %v535_v21  ;;  %v1086_v61 = vmul.f32 %v6994_v33, %v12869_v43  ;;  %v1186_v44 = vmul.f32 %v7092_v56, %v12873_v54  ;;  %v1286_v20 = vmul.f32 %v7097_v50, %v12888_v41  ;;  %v12891_v51 = vld [vmem:[#allocation23_spill] sm:$0xff] }
  0xf8   :  { %v2284_v36 = vadd.f32 %v2235_v45, %v2184_v5  ;;  %v1486_v8 = vmul.f32 %v6924_v14, %v12878_v9  ;;  %v2285_v2 = vadd.f32 %v2236_v28, %v2185_v40  ;;  %v2649_v47 = vadd.f32 %v2613_v11, %v2575_v39 }
  0xf9   :  { %v735_v16 = vadd.f32 %v686_v29, %v635_v18  ;;  %v1537_v19 = vmul.f32 %v5109_v26, %v12889_v60  ;;  %v1637_v22 = vmul.f32 %v7072_v31, %v12891_v51  ;;  %v1737_v45 = vmul.f32 %v6952_v57, %v6023_v48 }
  0xfa   :  { %v2335_v21 = vadd.f32 %v12890_v53, %v2284_v36  ;;  %v1837_v5 = vmul.f32 %v5256_v37, %v6026_v0  ;;  %v2336_v55 = vadd.f32 %v12890_v53, %v2285_v2  ;;  %v2723_v6 = vadd.f32 %v2687_v59, %v2649_v47  ;;  %v12894_v47 = vld [vmem:[#allocation36_spill] sm:$0xff]  ;;  %v12896_v36 = vld [vmem:[#allocation37_spill] sm:$0xff] }
  0xfb   :  { %v835_v46 = vadd.f32 %v786_v23, %v735_v16  ;;  %v1586_v14 = vadd.f32 %v1537_v19, %v1486_v8  ;;  %v1937_v26 = vmul.f32 %v7079_v38, %v6081_v12  ;;  %v2037_v11 = vmul.f32 %v6994_v33, %v6084_v7  ;;  %v12895_v23 = vld [vmem:[#allocation40_spill] sm:$0xff] }
  0xfc   :  { %v7115_v28 = vmax.f32 %v2335_v21, 0.0  ;;  %v2137_v29 = vmul.f32 %v7092_v56, %v6087_v13  ;;  %v7123_v40 = vmax.f32 %v2336_v55, 0.0  ;;  %v2797_v57 = vadd.f32 %v2761_v30, %v2723_v6  ;;  %v5110_v6 = vld [vmem:[%s12096_s0 + $0x298] sm:$0xff]  ;;  %v12897_v21 = vld [vmem:[#allocation42_spill] sm:$0xff] }
  0xfd   :  { %v935_v37 = vadd.f32 %v886_v34, %v835_v46  ;;  %v1686_v39 = vadd.f32 %v1637_v22, %v1586_v14  ;;  %v2237_v19 = vmul.f32 %v7097_v50, %v6090_v27  ;;  %v2428_v59 = vmul.f32 %v6148_v3, %v12883_v32 }
  0xfe   :  { %12892 = vst [vmem:[#allocation22_spill] sm:$0xff] %v7115_v28  ;;  %12893 = vst [vmem:[#allocation70_spill] sm:$0xff] %v7123_v40  ;;  %v2835_v16 = vmul.f32 %v12894_v47, %v7115_v28  ;;  %v2466_v18 = vmul.f32 %v12796_v35, %v12895_v23  ;;  %v2909_v8 = vmul.f32 %v12896_v36, %v7123_v40 }
  0xff   :  { %v1035_v55 = vadd.f32 %v986_v4, %v935_v37  ;;  %v1786_v2 = vadd.f32 %v1737_v45, %v1686_v39  ;;  %v2540_v46 = vmul.f32 %v6154_v58, %v7046_v42  ;;  %v7142_v34 = vmul.f32 %v6172_v49, %v12885_v63  ;;  %v5257_v4 = vld [vmem:[%s12096_s0 + $0x698] sm:$0xff] }
 0x100   :  { %v2871_v22 = vadd.f32 %v2835_v16, %v2797_v57  ;;  %v2502_v30 = vadd.f32 %v2466_v18, %v2428_v59  ;;  %v7146_v14 = vmul.f32 %v12876_v24, %v12897_v21  ;;  %v7153_v39 = vmul.f32 %v12894_v47, %v7123_v40  ;;  %v7158_v57 = vld [vmem:[%s12096_s0 + $0xa0] sm:$0xff] }
 0x101   :  { %v1135_v45 = vadd.f32 %v1086_v61, %v1035_v55  ;;  %v1886_v37 = vadd.f32 %v1837_v5, %v1786_v2  ;;  %v536_v16 = vmul.f32 %v7072_v31, %v5805_v10  ;;  %v587_v63 = vmul.f32 %v5110_v6, %v5817_v15  ;;  %v7168_v2 = vld [vmem:[%s12096_s0 + $0x4a0] sm:$0xff] }
 0x102   :  { %12898 = vst [vmem:[#allocation37_spill] sm:$0xff] %v7153_v39  ;;  %v2945_v59 = vadd.f32 %v2909_v8, %v2871_v22  ;;  %v2576_v18 = vadd.f32 %v2540_v46, %v2502_v30  ;;  %v687_v61 = vmul.f32 %v7158_v57, %v12861_v52  ;;  %v787_v32 = vmul.f32 %v7079_v38, %v12862_v62  ;;  %v7177_v46 = vld [vmem:[%s12096_s0 + $0x2d8] sm:$0xff] }
 0x103   :  { %v1235_v5 = vadd.f32 %v1186_v44, %v1135_v45  ;;  %v1986_v55 = vadd.f32 %v1937_v26, %v1886_v37  ;;  %v887_v56 = vmul.f32 %v5257_v4, %v12863_v17  ;;  %12899 = vst [vmem:[#allocation71_spill] sm:$0xff] %v7177_v46  ;;  %v7182_v44 = vld [vmem:[%s12096_s0 + $0xe0] sm:$0xff]  ;;  %v636_v26 = vadd.f32 %v587_v63, %v536_v16 }
 0x104   :  { %v2983_v8 = vadd.f32 %v6200_v25, %v2945_v59  ;;  %12900 = vst [vmem:[#allocation72_spill] sm:$0xff] %v7182_v44  ;;  %v987_v22 = vmul.f32 %v7168_v2, %v12864_v1  ;;  %v1087_v30 = vmul.f32 %v7097_v50, %v12869_v43  ;;  %v1187_v59 = vmul.f32 %v7177_v46, %v12873_v54  ;;  %v12901_v16 = vld [vmem:[#allocation20_spill] sm:$0xff] }
 0x105   :  { %v1335_v45 = vadd.f32 %v1286_v20, %v1235_v5  ;;  %v2086_v37 = vadd.f32 %v2037_v11, %v1986_v55  ;;  %v1287_v40 = vmul.f32 %v7182_v44, %v12888_v41  ;;  %v736_v42 = vadd.f32 %v687_v61, %v636_v26 }
 0x106   :  { %v3019_v28 = vmax.f32 %v2983_v8, 0.0  ;;  %v1487_v33 = vmul.f32 %v7072_v31, %v12878_v9  ;;  %v1538_v63 = vmul.f32 %v5110_v6, %v12889_v60  ;;  %v1638_v20 = vmul.f32 %v7158_v57, %v12891_v51 }
 0x107   :  { %v1386_v25 = vadd.f32 %v12901_v16, %v1335_v45  ;;  %v2186_v39 = vadd.f32 %v2137_v29, %v2086_v37  ;;  %v1738_v11 = vmul.f32 %v7079_v38, %v6023_v48  ;;  %v836_v5 = vadd.f32 %v787_v32, %v736_v42 }
 0x108   :  { %3055 = vst [vmem:[%s12101_s5 + $0x30] sm:$0xff] %v3019_v28  ;;  %v1587_v61 = vadd.f32 %v1538_v63, %v1487_v33  ;;  %v1838_v55 = vmul.f32 %v5257_v4, %v6026_v0  ;;  %v1938_v31 = vmul.f32 %v7168_v2, %v6081_v12  ;;  %v2038_v8 = vmul.f32 %v7097_v50, %v6084_v7 }
 0x109   :  { %v7206_v6 = vmax.f32 %v1386_v25, 0.0  ;;  %v2286_v29 = vadd.f32 %v2237_v19, %v2186_v39  ;;  %v2138_v38 = vmul.f32 %v7177_v46, %v6087_v13  ;;  %v936_v26 = vadd.f32 %v887_v56, %v836_v5  ;;  %v12903_v25 = vld [vmem:[#allocation30_spill] sm:$0xff]  ;;  %v12904_v19 = vld [vmem:[#allocation44_spill] sm:$0xff] }
 0x10a   :  { %v1687_v45 = vadd.f32 %v1638_v20, %v1587_v61  ;;  %v2238_v42 = vmul.f32 %v7182_v44, %v6090_v27  ;;  %v2429_v33 = vmul.f32 %v6148_v3, %v12895_v23  ;;  %v2467_v4 = vmul.f32 %v12796_v35, %v12904_v19  ;;  %v5111_v56 = vld [vmem:[%s12096_s0 + $0x2a0] sm:$0xff]  ;;  %v12905_v5 = vld [vmem:[#allocation46_spill] sm:$0xff] }
 0x10b   :  { %12902 = vst [vmem:[#allocation73_spill] sm:$0xff] %v7206_v6  ;;  %v2337_v32 = vadd.f32 %v12890_v53, %v2286_v29  ;;  %v2614_v28 = vmul.f32 %v12903_v25, %v7206_v6  ;;  %v2541_v39 = vmul.f32 %v6154_v58, %v7206_v6  ;;  %v1036_v37 = vadd.f32 %v987_v22, %v936_v26  ;;  %v7239_v6 = vld [vmem:[%s12096_s0 + $0xa8] sm:$0xff] }
 0x10c   :  { %v1787_v63 = vadd.f32 %v1738_v11, %v1687_v45  ;;  %v7228_v20 = vmul.f32 %v6172_v49, %v12897_v21  ;;  %v7232_v61 = vmul.f32 %v12876_v24, %v12905_v5  ;;  %v2503_v46 = vadd.f32 %v2467_v4, %v2429_v33  ;;  %v5258_v45 = vld [vmem:[%s12096_s0 + $0x6a0] sm:$0xff] }
 0x10d   :  { %v7234_v29 = vmax.f32 %v2337_v32, 0.0  ;;  %v2650_v23 = vadd.f32 %v2614_v28, %v2576_v18  ;;  %v537_v22 = vmul.f32 %v7158_v57, %v5805_v10  ;;  %v1136_v11 = vadd.f32 %v1087_v30, %v1036_v37  ;;  %v7259_v37 = vld [vmem:[%s12096_s0 + $0x4a8] sm:$0xff] }
 0x10e   :  { %v1887_v26 = vadd.f32 %v1838_v55, %v1787_v63  ;;  %v588_v21 = vmul.f32 %v5111_v56, %v5817_v15  ;;  %v688_v18 = vmul.f32 %v7239_v6, %v12861_v52  ;;  %v2577_v28 = vadd.f32 %v2541_v39, %v2503_v46 }
 0x10f   :  { %12906 = vst [vmem:[#allocation74_spill] sm:$0xff] %v7234_v29  ;;  %v2724_v33 = vadd.f32 %v7142_v34, %v2650_v23  ;;  %v2910_v32 = vmul.f32 %v12896_v36, %v7234_v29  ;;  %v7254_v4 = vmul.f32 %v12894_v47, %v7234_v29  ;;  %v1236_v30 = vadd.f32 %v1187_v59, %v1136_v11  ;;  %v7267_v34 = vld [vmem:[%s12096_s0 + $0x2e0] sm:$0xff] }
 0x110   :  { %v1987_v55 = vadd.f32 %v1938_v31, %v1887_v26  ;;  %v637_v63 = vadd.f32 %v588_v21, %v537_v22  ;;  %v788_v50 = vmul.f32 %v7168_v2, %v12862_v62  ;;  %12908 = vst [vmem:[#allocation76_spill] sm:$0xff] %v7267_v34  ;;  %v888_v46 = vmul.f32 %v5258_v45, %v12863_v17  ;;  %v7277_v22 = vld [vmem:[%s12096_s0 + $0xe8] sm:$0xff] }
 0x111   :  { %12907 = vst [vmem:[#allocation75_spill] sm:$0xff] %v7254_v4  ;;  %v2798_v23 = vadd.f32 %v7146_v14, %v2724_v33  ;;  %v988_v59 = vmul.f32 %v7259_v37, %v12864_v1  ;;  %v1088_v31 = vmul.f32 %v7182_v44, %v12869_v43  ;;  %v1336_v39 = vadd.f32 %v1287_v40, %v1236_v30  ;;  %v12910_v26 = vld [vmem:[#allocation37_spill] sm:$0xff] }
 0x112   :  { %v2087_v21 = vadd.f32 %v2038_v8, %v1987_v55  ;;  %12909 = vst [vmem:[#allocation77_spill] sm:$0xff] %v7277_v22  ;;  %v737_v14 = vadd.f32 %v688_v18, %v637_v63  ;;  %v1188_v11 = vmul.f32 %v7267_v34, %v12873_v54  ;;  %v1288_v29 = vmul.f32 %v7277_v22, %v12888_v41 }
 0x113   :  { %v2872_v33 = vadd.f32 %v12910_v26, %v2798_v23  ;;  %v1488_v4 = vmul.f32 %v7158_v57, %v12878_v9  ;;  %v1539_v40 = vmul.f32 %v5111_v56, %v12889_v60  ;;  %v1387_v8 = vadd.f32 %v12901_v16, %v1336_v39  ;;  %v12912_v39 = vld [vmem:[#allocation38_spill] sm:$0xff] }
 0x114   :  { %v2187_v30 = vadd.f32 %v2138_v38, %v2087_v21  ;;  %v837_v55 = vadd.f32 %v788_v50, %v737_v14  ;;  %v1639_v18 = vmul.f32 %v7239_v6, %v12891_v51  ;;  %v1739_v23 = vmul.f32 %v7168_v2, %v6023_v48 }
 0x115   :  { %v2946_v63 = vadd.f32 %v2910_v32, %v2872_v33  ;;  %v1588_v43 = vadd.f32 %v1539_v40, %v1488_v4  ;;  %v1839_v26 = vmul.f32 %v5258_v45, %v6026_v0  ;;  %v7293_v41 = vmax.f32 %v1387_v8, 0.0  ;;  %v12913_v33 = vld [vmem:[#allocation48_spill] sm:$0xff] }
 0x116   :  { %v2287_v54 = vadd.f32 %v2238_v42, %v2187_v30  ;;  %v937_v57 = vadd.f32 %v888_v46, %v837_v55  ;;  %v1939_v56 = vmul.f32 %v7259_v37, %v6081_v12  ;;  %v2039_v21 = vmul.f32 %v7182_v44, %v6084_v7 }
 0x117   :  { %12911 = vst [vmem:[#allocation37_spill] sm:$0xff] %v7293_v41  ;;  %v2984_v38 = vadd.f32 %v12912_v39, %v2946_v63  ;;  %v1688_v50 = vadd.f32 %v1639_v18, %v1588_v43  ;;  %v2139_v32 = vmul.f32 %v7267_v34, %v6087_v13  ;;  %v2615_v45 = vmul.f32 %v12903_v25, %v7293_v41 }
 0x118   :  { %v2338_v2 = vadd.f32 %v12890_v53, %v2287_v54  ;;  %v1037_v4 = vadd.f32 %v988_v59, %v937_v57  ;;  %v2239_v42 = vmul.f32 %v7277_v22, %v6090_v27  ;;  %v2430_v43 = vmul.f32 %v6148_v3, %v12904_v19  ;;  %v5112_v59 = vld [vmem:[%s12096_s0 + $0x2a8] sm:$0xff]  ;;  %v12915_v57 = vld [vmem:[#allocation50_spill] sm:$0xff] }
 0x119   :  { %v3020_v46 = vmax.f32 %v2984_v38, 0.0  ;;  %v1788_v14 = vadd.f32 %v1739_v23, %v1688_v50  ;;  %v2468_v40 = vmul.f32 %v12796_v35, %v12913_v33  ;;  %v2651_v30 = vadd.f32 %v2615_v45, %v2577_v28  ;;  %v12920_v19 = vld [vmem:[#allocation18_spill] sm:$0xff] }
 0x11a   :  { %v7311_v8 = vmax.f32 %v2338_v2, 0.0  ;;  %v1137_v55 = vadd.f32 %v1088_v31, %v1037_v4  ;;  %v2542_v54 = vmul.f32 %v6154_v58, %v7293_v41  ;;  %v2690_v23 = vmul.f32 %v6172_v49, %v12905_v5  ;;  %v7368_v5 = vld [vmem:[%s12096_s0 + $0xf0] sm:$0xff] }
 0x11b   :  { %3056 = vst [vmem:[%s12101_s5 + $0x38] sm:$0xff] %v3020_v46  ;;  %v1888_v18 = vadd.f32 %v1839_v26, %v1788_v14  ;;  %v2504_v63 = vadd.f32 %v2468_v40, %v2430_v43  ;;  %v7325_v28 = vmul.f32 %v12876_v24, %v12915_v57  ;;  %v2725_v31 = vadd.f32 %v7228_v20, %v2651_v30  ;;  %v5259_v26 = vld [vmem:[%s12096_s0 + $0x6a8] sm:$0xff]  ;;  %v7340_v46 = vld [vmem:[%s12096_s0 + $0xb0] sm:$0xff] }
 0x11c   :  { %12914 = vst [vmem:[#allocation78_spill] sm:$0xff] %v7311_v8  ;;  %v2911_v38 = vmul.f32 %v12896_v36, %v7311_v8  ;;  %v1237_v50 = vadd.f32 %v1188_v11, %v1137_v55  ;;  %v7332_v2 = vmul.f32 %v12894_v47, %v7311_v8  ;;  %v538_v20 = vmul.f32 %v7239_v6, %v5805_v10  ;;  %v7349_v40 = vld [vmem:[%s12096_s0 + $0x4b0] sm:$0xff]  ;;  %v12921_v8 = vld [vmem:[#allocation19_spill] sm:$0xff] }
 0x11d   :  { %v1988_v45 = vadd.f32 %v1939_v56, %v1888_v18  ;;  %v2578_v4 = vadd.f32 %v2542_v54, %v2504_v63  ;;  %v589_v11 = vmul.f32 %v5112_v59, %v5817_v15  ;;  %v2799_v14 = vadd.f32 %v7232_v61, %v2725_v31  ;;  %v7358_v54 = vld [vmem:[%s12096_s0 + $0x2e8] sm:$0xff]  ;;  %v12917_v63 = vld [vmem:[#allocation75_spill] sm:$0xff] }
 0x11e   :  { %v1337_v43 = vadd.f32 %v1288_v29, %v1237_v50  ;;  %v689_v56 = vmul.f32 %v7340_v46, %v12861_v52  ;;  %v789_v30 = vmul.f32 %v7259_v37, %v12862_v62  ;;  %12916 = vst [vmem:[#allocation79_spill] sm:$0xff] %v7358_v54  ;;  %v889_v61 = vmul.f32 %v5259_v26, %v12863_v17 }
 0x11f   :  { %v2088_v55 = vadd.f32 %v2039_v21, %v1988_v45  ;;  %v638_v18 = vadd.f32 %v589_v11, %v538_v20  ;;  %v989_v29 = vmul.f32 %v7349_v40, %v12864_v1  ;;  %v2873_v31 = vadd.f32 %v12917_v63, %v2799_v14  ;;  %12918 = vst [vmem:[#allocation75_spill] sm:$0xff] %v7368_v5  ;;  %v12919_v21 = vld [vmem:[#allocation17_spill] sm:$0xff] }
 0x120   :  { %v1388_v50 = vadd.f32 %v12901_v16, %v1337_v43  ;;  %v1089_v45 = vmul.f32 %v7277_v22, %v12919_v21  ;;  %v1189_v20 = vmul.f32 %v7358_v54, %v12920_v19  ;;  %v1289_v41 = vmul.f32 %v7368_v5, %v12921_v8 }
 0x121   :  { %v2188_v11 = vadd.f32 %v2139_v32, %v2088_v55  ;;  %v738_v34 = vadd.f32 %v689_v56, %v638_v18  ;;  %v1489_v14 = vmul.f32 %v7239_v6, %v12878_v9  ;;  %v2947_v43 = vadd.f32 %v2911_v38, %v2873_v31 }
 0x122   :  { %v7378_v63 = vmax.f32 %v1388_v50, 0.0  ;;  %v1540_v44 = vmul.f32 %v5112_v59, %v12889_v60  ;;  %v1640_v16 = vmul.f32 %v7340_v46, %v12891_v51  ;;  %v1740_v32 = vmul.f32 %v7259_v37, %v6023_v48 }
 0x123   :  { %v2288_v21 = vadd.f32 %v2239_v42, %v2188_v11  ;;  %v838_v1 = vadd.f32 %v789_v30, %v738_v34  ;;  %v1840_v56 = vmul.f32 %v5259_v26, %v6026_v0  ;;  %v2985_v55 = vadd.f32 %v12912_v39, %v2947_v43 }
 0x124   :  { %12922 = vst [vmem:[#allocation80_spill] sm:$0xff] %v7378_v63  ;;  %v2616_v6 = vmul.f32 %v12903_v25, %v7378_v63  ;;  %v1589_v38 = vadd.f32 %v1540_v44, %v1489_v14  ;;  %v1940_v18 = vmul.f32 %v7349_v40, %v6081_v12  ;;  %v2040_v34 = vmul.f32 %v7277_v22, %v6084_v7 }
 0x125   :  { %v2339_v59 = vadd.f32 %v12890_v53, %v2288_v21  ;;  %v938_v31 = vadd.f32 %v889_v61, %v838_v1  ;;  %v2140_v37 = vmul.f32 %v7358_v54, %v6087_v13  ;;  %v3021_v42 = vmax.f32 %v2985_v55, 0.0  ;;  %v12924_v21 = vld [vmem:[#allocation52_spill] sm:$0xff] }
 0x126   :  { %v2652_v26 = vadd.f32 %v2616_v6, %v2578_v4  ;;  %v1689_v30 = vadd.f32 %v1640_v16, %v1589_v38  ;;  %v2240_v50 = vmul.f32 %v7368_v5, %v6090_v27  ;;  %v2431_v14 = vmul.f32 %v6148_v3, %v12913_v33  ;;  %v12925_v38 = vld [vmem:[#allocation55_spill] sm:$0xff] }
 0x127   :  { %v7398_v11 = vmax.f32 %v2339_v59, 0.0  ;;  %v1038_v44 = vadd.f32 %v989_v29, %v938_v31  ;;  %v2469_v1 = vmul.f32 %v12796_v35, %v12924_v21  ;;  %3057 = vst [vmem:[%s12101_s5 + $0x40] sm:$0xff] %v3021_v42  ;;  %v2543_v16 = vmul.f32 %v6154_v58, %v7378_v63  ;;  %v12933_v63 = vld [vmem:[#allocation20_spill] sm:$0xff] }
 0x128   :  { %v2726_v61 = vadd.f32 %v2690_v23, %v2652_v26  ;;  %v1789_v43 = vadd.f32 %v1740_v32, %v1689_v30  ;;  %v2691_v4 = vmul.f32 %v6172_v49, %v12915_v57  ;;  %v7415_v59 = vmul.f32 %v12876_v24, %v12925_v38  ;;  %v5260_v23 = vld [vmem:[%s12096_s0 + $0x6b0] sm:$0xff]  ;;  %v12928_v57 = vld [vmem:[#allocation56_spill] sm:$0xff] }
 0x129   :  { %12923 = vst [vmem:[#allocation81_spill] sm:$0xff] %v7398_v11  ;;  %v2912_v29 = vmul.f32 %v12896_v36, %v7398_v11  ;;  %v1138_v55 = vadd.f32 %v1089_v45, %v1038_v44  ;;  %v2505_v6 = vadd.f32 %v2469_v1, %v2431_v14  ;;  %v7423_v42 = vmul.f32 %v12894_v47, %v7398_v11  ;;  %v5309_v45 = vld [vmem:[%s12096_s0 + $0x4b8] sm:$0xff]  ;;  %v12927_v14 = vld [vmem:[#allocation53_spill] sm:$0xff] }
 0x12a   :  { %v2800_v32 = vadd.f32 %v7325_v28, %v2726_v61  ;;  %v1889_v31 = vadd.f32 %v1840_v56, %v1789_v43  ;;  %v539_v26 = vmul.f32 %v7340_v46, %v5805_v10  ;;  %v590_v1 = vmul.f32 %v12927_v14, %v5817_v15 }
 0x12b   :  { %12926 = vst [vmem:[#allocation82_spill] sm:$0xff] %v7423_v42  ;;  %v1238_v30 = vadd.f32 %v1189_v20, %v1138_v55  ;;  %v2579_v44 = vadd.f32 %v2543_v16, %v2505_v6  ;;  %v690_v28 = vmul.f32 %v12928_v57, %v12861_v52  ;;  %v790_v43 = vmul.f32 %v7349_v40, %v12862_v62  ;;  %v7441_v20 = vld [vmem:[%s12096_s0 + $0x2f0] sm:$0xff]  ;;  %v7446_v16 = vld [vmem:[%s12096_s0 + $0xf8] sm:$0xff]  ;;  %v12931_v6 = vld [vmem:[#allocation16_spill] sm:$0xff] }
 0x12c   :  { %v2874_v56 = vadd.f32 %v7332_v2, %v2800_v32  ;;  %v1989_v61 = vadd.f32 %v1940_v18, %v1889_v31  ;;  %v890_v33 = vmul.f32 %v5260_v23, %v12863_v17  ;;  %12929 = vst [vmem:[#allocation53_spill] sm:$0xff] %v7441_v20  ;;  %12930 = vst [vmem:[#allocation56_spill] sm:$0xff] %v7446_v16  ;;  %v12932_v18 = vld [vmem:[#allocation17_spill] sm:$0xff] }
 0x12d   :  { %v1338_v54 = vadd.f32 %v1289_v41, %v1238_v30  ;;  %v639_v55 = vadd.f32 %v590_v1, %v539_v26  ;;  %v990_v2 = vmul.f32 %v5309_v45, %v12931_v6  ;;  %v1090_v32 = vmul.f32 %v7368_v5, %v12932_v18 }
 0x12e   :  { %v2948_v31 = vadd.f32 %v2912_v29, %v2874_v56  ;;  %v2089_v11 = vadd.f32 %v2040_v34, %v1989_v61  ;;  %v1190_v41 = vmul.f32 %v7441_v20, %v12920_v19  ;;  %v1290_v30 = vmul.f32 %v7446_v16, %v12921_v8 }
 0x12f   :  { %v1389_v22 = vadd.f32 %v12933_v63, %v1338_v54  ;;  %v739_v17 = vadd.f32 %v690_v28, %v639_v55  ;;  %v1490_v42 = vmul.f32 %v7340_v46, %v12878_v9  ;;  %v1541_v26 = vmul.f32 %v12927_v14, %v12889_v60 }
 0x130   :  { %v2986_v1 = vadd.f32 %v12912_v39, %v2948_v31  ;;  %v2189_v18 = vadd.f32 %v2140_v37, %v2089_v11  ;;  %v1641_v34 = vmul.f32 %v12928_v57, %v12891_v51  ;;  %v1741_v29 = vmul.f32 %v7349_v40, %v6023_v48 }
 0x131   :  { %v7465_v56 = vmax.f32 %v1389_v22, 0.0  ;;  %v839_v61 = vadd.f32 %v790_v43, %v739_v17  ;;  %v1590_v54 = vadd.f32 %v1541_v26, %v1490_v42  ;;  %v1841_v28 = vmul.f32 %v5260_v23, %v6026_v0  ;;  %v12935_v23 = vld [vmem:[#allocation58_spill] sm:$0xff] }
 0x132   :  { %v3022_v55 = vmax.f32 %v2986_v1, 0.0  ;;  %v2289_v46 = vadd.f32 %v2240_v50, %v2189_v18  ;;  %v1941_v9 = vmul.f32 %v5309_v45, %v6081_v12  ;;  %v2041_v14 = vmul.f32 %v7368_v5, %v6084_v7 }
 0x133   :  { %12934 = vst [vmem:[#allocation83_spill] sm:$0xff] %v7465_v56  ;;  %v2617_v37 = vmul.f32 %v12903_v25, %v7465_v56  ;;  %v939_v57 = vadd.f32 %v890_v33, %v839_v61  ;;  %v1690_v11 = vadd.f32 %v1641_v34, %v1590_v54  ;;  %v2141_v22 = vmul.f32 %v7441_v20, %v6087_v13  ;;  %v12937_v34 = vld [vmem:[#allocation63_spill] sm:$0xff] }
 0x134   :  { %3058 = vst [vmem:[%s12101_s5 + $0x48] sm:$0xff] %v3022_v55  ;;  %v2340_v17 = vadd.f32 %v12890_v53, %v2289_v46  ;;  %v2241_v40 = vmul.f32 %v7446_v16, %v6090_v27  ;;  %v2432_v50 = vmul.f32 %v6148_v3, %v12924_v21  ;;  %v2470_v42 = vmul.f32 %v12796_v35, %v12935_v23 }
 0x135   :  { %v2653_v33 = vadd.f32 %v2617_v37, %v2579_v44  ;;  %v1039_v45 = vadd.f32 %v990_v2, %v939_v57  ;;  %v1790_v43 = vadd.f32 %v1741_v29, %v1690_v11  ;;  %v2544_v18 = vmul.f32 %v6154_v58, %v7465_v56  ;;  %v7500_v44 = vld [vmem:[%s12096_s0 + $0x4c0] sm:$0xff]  ;;  %v12938_v2 = vld [vmem:[#allocation59_spill] sm:$0xff] }
 0x136   :  { %v7487_v31 = vmax.f32 %v2340_v17, 0.0  ;;  %v2506_v26 = vadd.f32 %v2470_v42, %v2432_v50  ;;  %v7491_v1 = vmul.f32 %v6172_v49, %v12925_v38  ;;  %v7495_v61 = vmul.f32 %v12876_v24, %v12937_v34  ;;  %v7516_v42 = vld [vmem:[%s12096_s0 + $0x4c8] sm:$0xff] }
 0x137   :  { %v2727_v54 = vadd.f32 %v2691_v4, %v2653_v33  ;;  %v1139_v55 = vadd.f32 %v1090_v32, %v1039_v45  ;;  %v1890_v46 = vadd.f32 %v1841_v28, %v1790_v43  ;;  %v540_v29 = vmul.f32 %v12938_v2, %v5805_v10  ;;  %v12939_v4 = vld [vmem:[#allocation60_spill] sm:$0xff]  ;;  %v7526_v45 = vld [vmem:[%s12096_s0 + $0x6c8] sm:$0xff] }
 0x138   :  { %12936 = vst [vmem:[#allocation84_spill] sm:$0xff] %v7487_v31  ;;  %v2913_v37 = vmul.f32 %v12896_v36, %v7487_v31  ;;  %v2580_v57 = vadd.f32 %v2544_v18, %v2506_v26  ;;  %v7508_v11 = vmul.f32 %v12894_v47, %v7487_v31  ;;  %v541_v32 = vmul.f32 %v12939_v4, %v5805_v10  ;;  %v7521_v33 = vld [vmem:[%s12096_s0 + $0x6c0] sm:$0xff]  ;;  %v12940_v43 = vld [vmem:[#allocation61_spill] sm:$0xff]  ;;  %v12944_v31 = vld [vmem:[#allocation15_spill] sm:$0xff] }
 0x139   :  { %v2801_v28 = vadd.f32 %v7415_v59, %v2727_v54  ;;  %v1239_v17 = vadd.f32 %v1190_v41, %v1139_v55  ;;  %v1990_v50 = vadd.f32 %v1941_v9, %v1890_v46  ;;  %v591_v59 = vmul.f32 %v12940_v43, %v5817_v15  ;;  %v12941_v9 = vld [vmem:[#allocation64_spill] sm:$0xff]  ;;  %v12942_v26 = vld [vmem:[#allocation65_spill] sm:$0xff]  ;;  %v12943_v46 = vld [vmem:[#allocation82_spill] sm:$0xff] }
 0x13a   :  { %v592_v41 = vmul.f32 %v12941_v9, %v5817_v15  ;;  %v691_v18 = vmul.f32 %v12939_v4, %v12861_v52  ;;  %v692_v54 = vmul.f32 %v12942_v26, %v12861_v52  ;;  %v791_v55 = vmul.f32 %v7500_v44, %v12862_v62 }
 0x13b   :  { %v2875_v34 = vadd.f32 %v12943_v46, %v2801_v28  ;;  %v1339_v23 = vadd.f32 %v1290_v30, %v1239_v17  ;;  %v2090_v38 = vadd.f32 %v2041_v14, %v1990_v50  ;;  %v640_v21 = vadd.f32 %v591_v59, %v540_v29  ;;  %v7549_v30 = vld [vmem:[%s12096_s0 + $0x4d0] sm:$0xff]  ;;  %v7554_v14 = vld [vmem:[%s12096_s0 + $0x100] sm:$0xff]  ;;  %v7568_v50 = vld [vmem:[%s12096_s0 + $0x108] sm:$0xff] }
 0x13c   :  { %v641_v16 = vadd.f32 %v592_v41, %v541_v32  ;;  %v792_v20 = vmul.f32 %v7516_v42, %v12862_v62  ;;  %v891_v56 = vmul.f32 %v7521_v33, %v12944_v31  ;;  %v892_v5 = vmul.f32 %v7526_v45, %v12944_v31  ;;  %12945 = vst [vmem:[#allocation59_spill] sm:$0xff] %v7554_v14 }
 0x13d   :  { %v2949_v47 = vadd.f32 %v2913_v37, %v2875_v34  ;;  %v1390_v52 = vadd.f32 %v12933_v63, %v1339_v23  ;;  %v2190_v15 = vadd.f32 %v2141_v22, %v2090_v38  ;;  %v740_v29 = vadd.f32 %v691_v18, %v640_v21  ;;  %v12946_v23 = vld [vmem:[#allocation17_spill] sm:$0xff]  ;;  %12948 = vst [vmem:[#allocation61_spill] sm:$0xff] %v7568_v50  ;;  %v7573_v21 = vld [vmem:[%s12096_s0 + $0x300] sm:$0xff] }
 0x13e   :  { %v741_v32 = vadd.f32 %v692_v54, %v641_v16  ;;  %v991_v28 = vmul.f32 %v7516_v42, %v12931_v6  ;;  %v992_v34 = vmul.f32 %v7549_v30, %v12931_v6  ;;  %v1091_v38 = vmul.f32 %v7554_v14, %v12946_v23  ;;  %12949 = vst [vmem:[#allocation64_spill] sm:$0xff] %v7573_v21  ;;  %v7578_v16 = vld [vmem:[%s12096_s0 + $0x308] sm:$0xff] }
 0x13f   :  { %v2987_v22 = vadd.f32 %v12912_v39, %v2949_v47  ;;  %v7563_v37 = vmax.f32 %v1390_v52, 0.0  ;;  %v2290_v17 = vadd.f32 %v2241_v40, %v2190_v15  ;;  %12950 = vst [vmem:[#allocation65_spill] sm:$0xff] %v7578_v16  ;;  %v840_v59 = vadd.f32 %v791_v55, %v740_v29  ;;  %v7592_v55 = vld [vmem:[%s12096_s0 + $0x110] sm:$0xff] }
 0x140   :  { %v841_v47 = vadd.f32 %v792_v20, %v741_v32  ;;  %v1092_v15 = vmul.f32 %v7568_v50, %v12946_v23  ;;  %v1191_v52 = vmul.f32 %v7573_v21, %v12920_v19  ;;  %v1192_v40 = vmul.f32 %v7578_v16, %v12920_v19  ;;  %12951 = vst [vmem:[#allocation82_spill] sm:$0xff] %v7592_v55  ;;  %v12952_v19 = vld [vmem:[#allocation21_spill] sm:$0xff] }
 0x141   :  { %12947 = vst [vmem:[#allocation60_spill] sm:$0xff] %v7563_v37  ;;  %v3023_v41 = vmax.f32 %v2987_v22, 0.0  ;;  %v2341_v18 = vadd.f32 %v12890_v53, %v2290_v17  ;;  %v2618_v54 = vmul.f32 %v12903_v25, %v7563_v37  ;;  %v940_v20 = vadd.f32 %v891_v56, %v840_v59 }
 0x142   :  { %v941_v46 = vadd.f32 %v892_v5, %v841_v47  ;;  %v1291_v29 = vmul.f32 %v7568_v50, %v12921_v8  ;;  %v1292_v32 = vmul.f32 %v7592_v55, %v12921_v8  ;;  %v1491_v22 = vmul.f32 %v12938_v2, %v12952_v19 }
 0x143   :  { %3059 = vst [vmem:[%s12101_s5 + $0x50] sm:$0xff] %v3023_v41  ;;  %v7603_v17 = vmax.f32 %v2341_v18, 0.0  ;;  %v2654_v37 = vadd.f32 %v2618_v54, %v2580_v57  ;;  %v1040_v53 = vadd.f32 %v991_v28, %v940_v20  ;;  %v1492_v5 = vmul.f32 %v12939_v4, %v12952_v19 }
 0x144   :  { %v1041_v56 = vadd.f32 %v992_v34, %v941_v46  ;;  %v1542_v59 = vmul.f32 %v12940_v43, %v12889_v60  ;;  %v1543_v47 = vmul.f32 %v12941_v9, %v12889_v60  ;;  %v1642_v2 = vmul.f32 %v12939_v4, %v12891_v51 }
 0x145   :  { %12953 = vst [vmem:[#allocation85_spill] sm:$0xff] %v7603_v17  ;;  %v2728_v8 = vadd.f32 %v7491_v1, %v2654_v37  ;;  %v2914_v41 = vmul.f32 %v12896_v36, %v7603_v17  ;;  %v1140_v57 = vadd.f32 %v1091_v38, %v1040_v53  ;;  %v1643_v28 = vmul.f32 %v12942_v26, %v12891_v51 }
 0x146   :  { %v1141_v18 = vadd.f32 %v1092_v15, %v1041_v56  ;;  %v1591_v34 = vadd.f32 %v1542_v59, %v1491_v22  ;;  %v1592_v54 = vadd.f32 %v1543_v47, %v1492_v5  ;;  %v1742_v43 = vmul.f32 %v7500_v44, %v6023_v48 }
 0x147   :  { %v2802_v9 = vadd.f32 %v7495_v61, %v2728_v8  ;;  %v1240_v20 = vadd.f32 %v1191_v52, %v1140_v57  ;;  %v1743_v4 = vmul.f32 %v7516_v42, %v6023_v48  ;;  %v1842_v1 = vmul.f32 %v7521_v33, %v6026_v0 }
 0x148   :  { %v1241_v37 = vadd.f32 %v1192_v40, %v1141_v18  ;;  %v1691_v53 = vadd.f32 %v1642_v2, %v1591_v34  ;;  %v1692_v38 = vadd.f32 %v1643_v28, %v1592_v54  ;;  %v1843_v26 = vmul.f32 %v7526_v45, %v6026_v0  ;;  %v12956_v34 = vld [vmem:[#allocation66_spill] sm:$0xff] }
 0x149   :  { %v2876_v15 = vadd.f32 %v7508_v11, %v2802_v9  ;;  %v1340_v46 = vadd.f32 %v1291_v29, %v1240_v20  ;;  %v1942_v44 = vmul.f32 %v7516_v42, %v6081_v12  ;;  %v1943_v8 = vmul.f32 %v7549_v30, %v6081_v12  ;;  %v12957_v20 = vld [vmem:[#allocation67_spill] sm:$0xff] }
 0x14a   :  { %v1341_v61 = vadd.f32 %v1292_v32, %v1241_v37  ;;  %v1791_v52 = vadd.f32 %v1742_v43, %v1691_v53  ;;  %v1792_v22 = vadd.f32 %v1743_v4, %v1692_v38  ;;  %v2042_v33 = vmul.f32 %v7554_v14, %v6084_v7  ;;  %v91_v43 = vld [vmem:[%s12096_s0 + $0xd0] sm:$0xff] }
 0x14b   :  { %v2950_v40 = vadd.f32 %v2914_v41, %v2876_v15  ;;  %v1391_v5 = vadd.f32 %v12933_v63, %v1340_v46  ;;  %v2043_v45 = vmul.f32 %v7568_v50, %v6084_v7  ;;  %v2142_v11 = vmul.f32 %v7573_v21, %v6087_v13  ;;  %v12958_v37 = vld [vmem:[#allocation22_spill] sm:$0xff] }
 0x14c   :  { %v1392_v42 = vadd.f32 %v12933_v63, %v1341_v61  ;;  %v1891_v29 = vadd.f32 %v1842_v1, %v1791_v52  ;;  %v1892_v56 = vadd.f32 %v1843_v26, %v1792_v22  ;;  %v2143_v32 = vmul.f32 %v7578_v16, %v6087_v13  ;;  %v5263_v38 = vld [vmem:[%s12096_s0 + $0x6d0] sm:$0xff]  ;;  %v12960_v22 = vld [vmem:[#allocation12_spill] sm:$0xff] }
 0x14d   :  { %v2988_v59 = vadd.f32 %v12912_v39, %v2950_v40  ;;  %v7643_v47 = vmax.f32 %v1391_v5, 0.0  ;;  %v2242_v2 = vmul.f32 %v7568_v50, %v6090_v27  ;;  %v2243_v41 = vmul.f32 %v7592_v55, %v6090_v27  ;;  %v12961_v40 = vld [vmem:[#allocation68_spill] sm:$0xff] }
 0x14e   :  { %v7649_v57 = vmax.f32 %v1392_v42, 0.0  ;;  %v1991_v28 = vadd.f32 %v1942_v44, %v1891_v29  ;;  %v1992_v18 = vadd.f32 %v1943_v8, %v1892_v56  ;;  %v2433_v54 = vmul.f32 %v6148_v3, %v12956_v34  ;;  %v12959_v44 = vld [vmem:[#allocation70_spill] sm:$0xff]  ;;  %v12962_v42 = vld [vmem:[#allocation13_spill] sm:$0xff]  ;;  %v12967_v34 = vld [vmem:[#allocation19_spill] sm:$0xff] }
 0x14f   :  { %12954 = vst [vmem:[#allocation86_spill] sm:$0xff] %v7643_v47  ;;  %v3024_v9 = vmax.f32 %v2988_v59, 0.0  ;;  %v2471_v4 = vmul.f32 %v12796_v35, %v12957_v20  ;;  %v2545_v1 = vmul.f32 %v6154_v58, %v7643_v47  ;;  %v2693_v53 = vmul.f32 %v6172_v49, %v12958_v37  ;;  %v12963_v29 = vld [vmem:[#allocation69_spill] sm:$0xff]  ;;  %v7680_v59 = vld [vmem:[%s12096_s0 + $0x4d8] sm:$0xff] }
 0x150   :  { %12955 = vst [vmem:[#allocation87_spill] sm:$0xff] %v7649_v57  ;;  %v2091_v26 = vadd.f32 %v2042_v33, %v1991_v28  ;;  %v2092_v15 = vadd.f32 %v2043_v45, %v1992_v18  ;;  %v2619_v46 = vmul.f32 %v12903_v25, %v7649_v57  ;;  %v2767_v8 = vmul.f32 %v12876_v24, %v12959_v44 }
 0x151   :  { %3060 = vst [vmem:[%s12101_s5 + $0x58] sm:$0xff] %v3024_v9  ;;  %v2507_v61 = vadd.f32 %v2471_v4, %v2433_v54  ;;  %v542_v52 = vmul.f32 %v5805_v10, %v91_v43  ;;  %v593_v5 = vmul.f32 %v12961_v40, %v12960_v22  ;;  %v693_v33 = vmul.f32 %v12963_v29, %v12962_v42  ;;  %v7688_v9 = vld [vmem:[%s12096_s0 + $0x310] sm:$0xff] }
 0x152   :  { %v2191_v45 = vadd.f32 %v2142_v11, %v2091_v26  ;;  %v2192_v56 = vadd.f32 %v2143_v32, %v2092_v15  ;;  %v793_v28 = vmul.f32 %v7549_v30, %v12862_v62  ;;  %v893_v18 = vmul.f32 %v5263_v38, %v12944_v31  ;;  %12964 = vst [vmem:[#allocation68_spill] sm:$0xff] %v7688_v9  ;;  %v7693_v11 = vld [vmem:[%s12096_s0 + $0x118] sm:$0xff] }
 0x153   :  { %v2581_v54 = vadd.f32 %v2545_v1, %v2507_v61  ;;  %12965 = vst [vmem:[#allocation69_spill] sm:$0xff] %v7693_v11  ;;  %v642_v32 = vadd.f32 %v593_v5, %v542_v52  ;;  %v993_v4 = vmul.f32 %v7680_v59, %v12931_v6  ;;  %v1093_v26 = vmul.f32 %v7592_v55, %v12946_v23  ;;  %v12966_v1 = vld [vmem:[#allocation18_spill] sm:$0xff]  ;;  %v12968_v5 = vld [vmem:[#allocation28_spill] sm:$0xff] }
 0x154   :  { %v2291_v15 = vadd.f32 %v2242_v2, %v2191_v45  ;;  %v2292_v37 = vadd.f32 %v2243_v41, %v2192_v56  ;;  %v1193_v61 = vmul.f32 %v7688_v9, %v12966_v1  ;;  %v1293_v47 = vmul.f32 %v7693_v11, %v12967_v34 }
 0x155   :  { %v2655_v16 = vadd.f32 %v2619_v46, %v2581_v54  ;;  %v742_v21 = vadd.f32 %v693_v33, %v642_v32  ;;  %v1493_v50 = vmul.f32 %v12952_v19, %v91_v43  ;;  %v1544_v52 = vmul.f32 %v12961_v40, %v12889_v60 }
 0x156   :  { %v2342_v14 = vadd.f32 %v12968_v5, %v2291_v15  ;;  %v2343_v17 = vadd.f32 %v12968_v5, %v2292_v37  ;;  %v1644_v2 = vmul.f32 %v12963_v29, %v12891_v51  ;;  %v1744_v41 = vmul.f32 %v7549_v30, %v6023_v48 }
 0x157   :  { %v2729_v45 = vadd.f32 %v2693_v53, %v2655_v16  ;;  %v842_v56 = vadd.f32 %v793_v28, %v742_v21  ;;  %v1593_v25 = vadd.f32 %v1544_v52, %v1493_v50  ;;  %v1844_v46 = vmul.f32 %v5263_v38, %v6026_v0  ;;  %v12971_v50 = vld [vmem:[#allocation36_spill] sm:$0xff] }
 0x158   :  { %v7713_v33 = vmax.f32 %v2342_v14, 0.0  ;;  %v7715_v43 = vmax.f32 %v2343_v17, 0.0  ;;  %v1944_v40 = vmul.f32 %v7680_v59, %v6081_v12  ;;  %v2044_v37 = vmul.f32 %v7592_v55, %v6084_v7 }
 0x159   :  { %v2803_v54 = vadd.f32 %v2767_v8, %v2729_v45  ;;  %v942_v32 = vadd.f32 %v893_v18, %v842_v56  ;;  %v1693_v15 = vadd.f32 %v1644_v2, %v1593_v25  ;;  %v2144_v30 = vmul.f32 %v7688_v9, %v6087_v13  ;;  %v12972_v8 = vld [vmem:[#allocation73_spill] sm:$0xff]  ;;  %v12973_v2 = vld [vmem:[#allocation74_spill] sm:$0xff]  ;;  %v12976_v9 = vld [vmem:[#allocation72_spill] sm:$0xff] }
 0x15a   :  { %12969 = vst [vmem:[#allocation88_spill] sm:$0xff] %v7713_v33  ;;  %12970 = vst [vmem:[#allocation89_spill] sm:$0xff] %v7715_v43  ;;  %v2841_v21 = vmul.f32 %v12971_v50, %v7713_v33  ;;  %v2915_v14 = vmul.f32 %v12896_v36, %v7715_v43  ;;  %v2244_v16 = vmul.f32 %v7693_v11, %v6090_v27 }
 0x15b   :  { %v2434_v17 = vmul.f32 %v6148_v3, %v12957_v20  ;;  %v1042_v53 = vadd.f32 %v993_v4, %v942_v32  ;;  %v1793_v38 = vadd.f32 %v1744_v41, %v1693_v15  ;;  %v2472_v25 = vmul.f32 %v12796_v35, %v12972_v8  ;;  %v5264_v4 = vld [vmem:[%s12096_s0 + $0x6d8] sm:$0xff] }
 0x15c   :  { %v2546_v28 = vmul.f32 %v6154_v58, %v7649_v57  ;;  %v2877_v18 = vadd.f32 %v2841_v21, %v2803_v54  ;;  %v7737_v52 = vmul.f32 %v6172_v49, %v12959_v44  ;;  %v7741_v45 = vmul.f32 %v12876_v24, %v12973_v2  ;;  %v12975_v44 = vld [vmem:[#allocation71_spill] sm:$0xff] }
 0x15d   :  { %v7745_v56 = vmul.f32 %v12971_v50, %v7715_v43  ;;  %v1142_v41 = vadd.f32 %v1093_v26, %v1042_v53  ;;  %v1893_v32 = vadd.f32 %v1844_v46, %v1793_v38  ;;  %v2508_v15 = vadd.f32 %v2472_v25, %v2434_v17  ;;  %v7761_v26 = vld [vmem:[%s12096_s0 + $0x4e0] sm:$0xff]  ;;  %v7768_v17 = vld [vmem:[%s12096_s0 + $0x318] sm:$0xff] }
 0x15e   :  { %v543_v54 = vmul.f32 %v12963_v29, %v5805_v10  ;;  %v2951_v21 = vadd.f32 %v2915_v14, %v2877_v18  ;;  %v594_v20 = vmul.f32 %v12975_v44, %v12960_v22  ;;  %v694_v33 = vmul.f32 %v12976_v9, %v12962_v42  ;;  %12977 = vst [vmem:[#allocation71_spill] sm:$0xff] %v7768_v17 }
 0x15f   :  { %12974 = vst [vmem:[#allocation90_spill] sm:$0xff] %v7745_v56  ;;  %v794_v43 = vmul.f32 %v7680_v59, %v12862_v62  ;;  %v1242_v57 = vadd.f32 %v1193_v61, %v1142_v41  ;;  %v1993_v55 = vadd.f32 %v1944_v40, %v1893_v32  ;;  %v2582_v56 = vadd.f32 %v2546_v28, %v2508_v15  ;;  %v7773_v61 = vld [vmem:[%s12096_s0 + $0x120] sm:$0xff] }
 0x160   :  { %v894_v46 = vmul.f32 %v5264_v4, %v12944_v31  ;;  %v2989_v14 = vadd.f32 %v12912_v39, %v2951_v21  ;;  %12978 = vst [vmem:[#allocation72_spill] sm:$0xff] %v7773_v61  ;;  %v643_v40 = vadd.f32 %v594_v20, %v543_v54  ;;  %v994_v53 = vmul.f32 %v7761_v26, %v12931_v6 }
 0x161   :  { %v1094_v38 = vmul.f32 %v7693_v11, %v12946_v23  ;;  %v1342_v25 = vadd.f32 %v1293_v47, %v1242_v57  ;;  %v2093_v28 = vadd.f32 %v2044_v37, %v1993_v55  ;;  %v1194_v18 = vmul.f32 %v7768_v17, %v12966_v1 }
 0x162   :  { %v1294_v41 = vmul.f32 %v7773_v61, %v12967_v34  ;;  %v3025_v32 = vmax.f32 %v2989_v14, 0.0  ;;  %v743_v15 = vadd.f32 %v694_v33, %v643_v40  ;;  %v1494_v21 = vmul.f32 %v12963_v29, %v12952_v19 }
 0x163   :  { %v1545_v20 = vmul.f32 %v12975_v44, %v12889_v60  ;;  %v1393_v54 = vadd.f32 %v12933_v63, %v1342_v25  ;;  %v2193_v39 = vadd.f32 %v2144_v30, %v2093_v28  ;;  %v1645_v55 = vmul.f32 %v12976_v9, %v12891_v51 }
 0x164   :  { %v1745_v47 = vmul.f32 %v7680_v59, %v6023_v48  ;;  %3061 = vst [vmem:[%s12101_s5 + $0x60] sm:$0xff] %v3025_v32  ;;  %v843_v57 = vadd.f32 %v794_v43, %v743_v15  ;;  %v1845_v29 = vmul.f32 %v5264_v4, %v6026_v0  ;;  %v1945_v44 = vmul.f32 %v7761_v26, %v6081_v12  ;;  %v12980_v32 = vld [vmem:[#allocation30_spill] sm:$0xff] }
 0x165   :  { %v1594_v33 = vadd.f32 %v1545_v20, %v1494_v21  ;;  %v7798_v37 = vmax.f32 %v1393_v54, 0.0  ;;  %v2293_v30 = vadd.f32 %v2244_v16, %v2193_v39  ;;  %v2045_v14 = vmul.f32 %v7693_v11, %v6084_v7  ;;  %v12981_v39 = vld [vmem:[#allocation37_spill] sm:$0xff] }
 0x166   :  { %v2145_v59 = vmul.f32 %v7768_v17, %v6087_v13  ;;  %v943_v40 = vadd.f32 %v894_v46, %v843_v57  ;;  %v2245_v43 = vmul.f32 %v7773_v61, %v6090_v27  ;;  %v2435_v4 = vmul.f32 %v6148_v3, %v12972_v8 }
 0x167   :  { %12979 = vst [vmem:[#allocation91_spill] sm:$0xff] %v7798_v37  ;;  %v1694_v25 = vadd.f32 %v1645_v55, %v1594_v33  ;;  %v2344_v28 = vadd.f32 %v12968_v5, %v2293_v30  ;;  %v2620_v15 = vmul.f32 %v12980_v32, %v7798_v37  ;;  %v2473_v16 = vmul.f32 %v12796_v35, %v12981_v39  ;;  %v12982_v55 = vld [vmem:[#allocation78_spill] sm:$0xff] }
 0x168   :  { %v2547_v21 = vmul.f32 %v6154_v58, %v7798_v37  ;;  %v1043_v20 = vadd.f32 %v994_v53, %v943_v40  ;;  %v7817_v54 = vmul.f32 %v6172_v49, %v12973_v2  ;;  %v7821_v57 = vmul.f32 %v12876_v24, %v12982_v55  ;;  %v5265_v53 = vld [vmem:[%s12096_s0 + $0x6e0] sm:$0xff] }
 0x169   :  { %v1794_v46 = vadd.f32 %v1745_v47, %v1694_v25  ;;  %v7823_v33 = vmax.f32 %v2344_v28, 0.0  ;;  %v2656_v30 = vadd.f32 %v2620_v15, %v2582_v56  ;;  %v2509_v8 = vadd.f32 %v2473_v16, %v2435_v4  ;;  %v12984_v47 = vld [vmem:[#allocation76_spill] sm:$0xff]  ;;  %v12985_v25 = vld [vmem:[#allocation77_spill] sm:$0xff] }
 0x16a   :  { %v544_v17 = vmul.f32 %v12976_v9, %v5805_v10  ;;  %v1143_v11 = vadd.f32 %v1094_v38, %v1043_v20  ;;  %v595_v40 = vmul.f32 %v12984_v47, %v12960_v22  ;;  %v695_v2 = vmul.f32 %v12985_v25, %v12962_v42  ;;  %v7844_v16 = vld [vmem:[%s12096_s0 + $0x4e8] sm:$0xff] }
 0x16b   :  { %12983 = vst [vmem:[#allocation92_spill] sm:$0xff] %v7823_v33  ;;  %v1894_v35 = vadd.f32 %v1845_v29, %v1794_v46  ;;  %v2730_v28 = vadd.f32 %v7737_v52, %v2656_v30  ;;  %v2916_v56 = vmul.f32 %v12896_v36, %v7823_v33  ;;  %v2583_v4 = vadd.f32 %v2547_v21, %v2509_v8  ;;  %v7852_v8 = vld [vmem:[%s12096_s0 + $0x320] sm:$0xff] }
 0x16c   :  { %v7839_v38 = vmul.f32 %v12971_v50, %v7823_v33  ;;  %v1243_v29 = vadd.f32 %v1194_v18, %v1143_v11  ;;  %v644_v20 = vadd.f32 %v595_v40, %v544_v17  ;;  %v795_v46 = vmul.f32 %v7761_v26, %v12862_v62  ;;  %12986 = vst [vmem:[#allocation76_spill] sm:$0xff] %v7852_v8  ;;  %v12988_v40 = vld [vmem:[#allocation90_spill] sm:$0xff] }
 0x16d   :  { %v1994_v15 = vadd.f32 %v1945_v44, %v1894_v35  ;;  %v2804_v52 = vadd.f32 %v7741_v45, %v2730_v28  ;;  %v895_v21 = vmul.f32 %v5265_v53, %v12944_v31  ;;  %v995_v35 = vmul.f32 %v7844_v16, %v12931_v6  ;;  %v7862_v44 = vld [vmem:[%s12096_s0 + $0x128] sm:$0xff] }
 0x16e   :  { %v1095_v11 = vmul.f32 %v7773_v61, %v12946_v23  ;;  %v1343_v18 = vadd.f32 %v1294_v41, %v1243_v29  ;;  %12987 = vst [vmem:[#allocation77_spill] sm:$0xff] %v7862_v44  ;;  %v744_v45 = vadd.f32 %v695_v2, %v644_v20  ;;  %v1195_v30 = vmul.f32 %v7852_v8, %v12966_v1 }
 0x16f   :  { %v2094_v17 = vadd.f32 %v2045_v14, %v1994_v15  ;;  %v2878_v28 = vadd.f32 %v12988_v40, %v2804_v52  ;;  %v1295_v33 = vmul.f32 %v7862_v44, %v12967_v34  ;;  %v1495_v37 = vmul.f32 %v12976_v9, %v12952_v19 }
 0x170   :  { %v1546_v41 = vmul.f32 %v12984_v47, %v12889_v60  ;;  %v1394_v14 = vadd.f32 %v12933_v63, %v1343_v18  ;;  %v844_v15 = vadd.f32 %v795_v46, %v744_v45  ;;  %v1646_v2 = vmul.f32 %v12985_v25, %v12891_v51  ;;  %v12990_v18 = vld [vmem:[#allocation38_spill] sm:$0xff] }
 0x171   :  { %v2194_v29 = vadd.f32 %v2145_v59, %v2094_v17  ;;  %v2952_v20 = vadd.f32 %v2916_v56, %v2878_v28  ;;  %v1746_v52 = vmul.f32 %v7761_v26, %v6023_v48  ;;  %v1846_v40 = vmul.f32 %v5265_v53, %v6026_v0  ;;  %v12991_v28 = vld [vmem:[#allocation80_spill] sm:$0xff] }
 0x172   :  { %v1595_v1 = vadd.f32 %v1546_v41, %v1495_v37  ;;  %v7879_v34 = vmax.f32 %v1394_v14, 0.0  ;;  %v944_v19 = vadd.f32 %v895_v21, %v844_v15  ;;  %v1946_v47 = vmul.f32 %v7844_v16, %v6081_v12  ;;  %v12992_v41 = vld [vmem:[#allocation29_spill] sm:$0xff] }
 0x173   :  { %v2294_v9 = vadd.f32 %v2245_v43, %v2194_v29  ;;  %v2990_v59 = vadd.f32 %v12990_v18, %v2952_v20  ;;  %v2046_v17 = vmul.f32 %v7773_v61, %v6084_v7  ;;  %v2146_v37 = vmul.f32 %v7852_v8, %v6087_v13  ;;  %v13000_v8 = vld [vmem:[#allocation19_spill] sm:$0xff] }
 0x174   :  { %12989 = vst [vmem:[#allocation90_spill] sm:$0xff] %v7879_v34  ;;  %v1695_v46 = vadd.f32 %v1646_v2, %v1595_v1  ;;  %v2621_v53 = vmul.f32 %v12980_v32, %v7879_v34  ;;  %v1044_v56 = vadd.f32 %v995_v35, %v944_v19  ;;  %v2246_v43 = vmul.f32 %v7862_v44, %v6090_v27 }
 0x175   :  { %v2345_v26 = vadd.f32 %v12968_v5, %v2294_v9  ;;  %v3026_v21 = vmax.f32 %v2990_v59, 0.0  ;;  %v2436_v1 = vmul.f32 %v6148_v3, %v12981_v39  ;;  %v2474_v14 = vmul.f32 %v12992_v41, %v12991_v28  ;;  %v12994_v9 = vld [vmem:[#allocation81_spill] sm:$0xff] }
 0x176   :  { %v1795_v45 = vadd.f32 %v1746_v52, %v1695_v46  ;;  %v2657_v15 = vadd.f32 %v2621_v53, %v2583_v4  ;;  %v1144_v2 = vadd.f32 %v1095_v11, %v1044_v56  ;;  %v2548_v20 = vmul.f32 %v6154_v58, %v7879_v34  ;;  %v13001_v34 = vld [vmem:[#allocation21_spill] sm:$0xff] }
 0x177   :  { %v7897_v29 = vmax.f32 %v2345_v26, 0.0  ;;  %3062 = vst [vmem:[%s12101_s5 + $0x68] sm:$0xff] %v3026_v21  ;;  %v2510_v35 = vadd.f32 %v2474_v14, %v2436_v1  ;;  %v2696_v52 = vmul.f32 %v6172_v49, %v12982_v55  ;;  %v7908_v59 = vmul.f32 %v12876_v24, %v12994_v9  ;;  %v7947_v55 = vld [vmem:[%s12096_s0 + $0x130] sm:$0xff] }
 0x178   :  { %v1895_v19 = vadd.f32 %v1846_v40, %v1795_v45  ;;  %v2731_v46 = vadd.f32 %v7817_v54, %v2657_v15  ;;  %v1244_v11 = vadd.f32 %v1195_v30, %v1144_v2  ;;  %v5266_v40 = vld [vmem:[%s12096_s0 + $0x6e8] sm:$0xff]  ;;  %v545_v21 = vmul.f32 %v12985_v25, %v5805_v10  ;;  %v12995_v45 = vld [vmem:[#allocation79_spill] sm:$0xff]  ;;  %v7928_v30 = vld [vmem:[%s12096_s0 + $0x4f0] sm:$0xff] }
 0x179   :  { %12993 = vst [vmem:[#allocation93_spill] sm:$0xff] %v7897_v29  ;;  %v2917_v4 = vmul.f32 %v12896_v36, %v7897_v29  ;;  %v7915_v26 = vmul.f32 %v12971_v50, %v7897_v29  ;;  %v2584_v56 = vadd.f32 %v2548_v20, %v2510_v35  ;;  %v596_v54 = vmul.f32 %v12995_v45, %v12960_v22  ;;  %v12996_v15 = vld [vmem:[#allocation75_spill] sm:$0xff] }
 0x17a   :  { %v1995_v53 = vadd.f32 %v1946_v47, %v1895_v19  ;;  %v2805_v1 = vadd.f32 %v7821_v57, %v2731_v46  ;;  %v1344_v14 = vadd.f32 %v1295_v33, %v1244_v11  ;;  %v696_v2 = vmul.f32 %v12996_v15, %v12962_v42  ;;  %v7937_v19 = vld [vmem:[%s12096_s0 + $0x328] sm:$0xff]  ;;  %12998 = vst [vmem:[#allocation75_spill] sm:$0xff] %v7947_v55 }
 0x17b   :  { %v796_v47 = vmul.f32 %v7844_v16, %v12862_v62  ;;  %12997 = vst [vmem:[#allocation79_spill] sm:$0xff] %v7937_v19  ;;  %v645_v35 = vadd.f32 %v596_v54, %v545_v21  ;;  %v896_v57 = vmul.f32 %v5266_v40, %v12944_v31  ;;  %v996_v33 = vmul.f32 %v7928_v30, %v12931_v6 }
 0x17c   :  { %v2095_v20 = vadd.f32 %v2046_v17, %v1995_v53  ;;  %v2879_v46 = vadd.f32 %v7839_v38, %v2805_v1  ;;  %v1395_v11 = vadd.f32 %v12933_v63, %v1344_v14  ;;  %v1096_v17 = vmul.f32 %v7862_v44, %v12946_v23  ;;  %v12999_v53 = vld [vmem:[#allocation18_spill] sm:$0xff] }
 0x17d   :  { %v1196_v21 = vmul.f32 %v7937_v19, %v12999_v53  ;;  %v745_v39 = vadd.f32 %v696_v2, %v645_v35  ;;  %v1296_v29 = vmul.f32 %v7947_v55, %v13000_v8  ;;  %v1496_v38 = vmul.f32 %v12985_v25, %v13001_v34 }
 0x17e   :  { %v2195_v54 = vadd.f32 %v2146_v37, %v2095_v20  ;;  %v2953_v1 = vadd.f32 %v2917_v4, %v2879_v46  ;;  %v7957_v14 = vmax.f32 %v1395_v11, 0.0  ;;  %v1547_v61 = vmul.f32 %v12995_v45, %v12889_v60 }
 0x17f   :  { %v1647_v63 = vmul.f32 %v12996_v15, %v12891_v51  ;;  %v845_v6 = vadd.f32 %v796_v47, %v745_v39  ;;  %v1747_v37 = vmul.f32 %v7844_v16, %v6023_v48  ;;  %v1847_v2 = vmul.f32 %v5266_v40, %v6026_v0 }
 0x180   :  { %13002 = vst [vmem:[#allocation94_spill] sm:$0xff] %v7957_v14  ;;  %v2295_v23 = vadd.f32 %v2246_v43, %v2195_v54  ;;  %v2991_v20 = vadd.f32 %v12990_v18, %v2953_v1  ;;  %v2622_v25 = vmul.f32 %v12980_v32, %v7957_v14  ;;  %v1596_v4 = vadd.f32 %v1547_v61, %v1496_v38 }
 0x181   :  { %v1947_v35 = vmul.f32 %v7928_v30, %v6081_v12  ;;  %v945_v46 = vadd.f32 %v896_v57, %v845_v6  ;;  %v2047_v39 = vmul.f32 %v7862_v44, %v6084_v7  ;;  %v2147_v16 = vmul.f32 %v7937_v19, %v6087_v13 }
 0x182   :  { %v2346_v45 = vadd.f32 %v12968_v5, %v2295_v23  ;;  %v3027_v43 = vmax.f32 %v2991_v20, 0.0  ;;  %v2658_v40 = vadd.f32 %v2622_v25, %v2584_v56  ;;  %v1696_v47 = vadd.f32 %v1647_v63, %v1596_v4  ;;  %v13004_v23 = vld [vmem:[#allocation83_spill] sm:$0xff]  ;;  %v13005_v4 = vld [vmem:[#allocation84_spill] sm:$0xff] }
 0x183   :  { %v2247_v11 = vmul.f32 %v7947_v55, %v6090_v27  ;;  %v1045_v61 = vadd.f32 %v996_v33, %v945_v46  ;;  %v2437_v38 = vmul.f32 %v6148_v3, %v12991_v28  ;;  %v2475_v6 = vmul.f32 %v12992_v41, %v13004_v23 }
 0x184   :  { %v7978_v54 = vmax.f32 %v2346_v45, 0.0  ;;  %3063 = vst [vmem:[%s12101_s5 + $0x70] sm:$0xff] %v3027_v43  ;;  %v2732_v57 = vadd.f32 %v2696_v52, %v2658_v40  ;;  %v1796_v1 = vadd.f32 %v1747_v37, %v1696_v47  ;;  %v2549_v63 = vmul.f32 %v6154_v58, %v7957_v14  ;;  %v5267_v52 = vld [vmem:[%s12096_s0 + $0x6f0] sm:$0xff]  ;;  %v13013_v14 = vld [vmem:[#allocation20_spill] sm:$0xff] }
 0x185   :  { %v2697_v56 = vmul.f32 %v6172_v49, %v12994_v9  ;;  %v1145_v20 = vadd.f32 %v1096_v17, %v1045_v61  ;;  %v2511_v25 = vadd.f32 %v2475_v6, %v2437_v38  ;;  %v7995_v45 = vmul.f32 %v12876_v24, %v13005_v4  ;;  %v5316_v17 = vld [vmem:[%s12096_s0 + $0x4f8] sm:$0xff]  ;;  %v13007_v38 = vld [vmem:[#allocation53_spill] sm:$0xff]  ;;  %v13008_v9 = vld [vmem:[#allocation56_spill] sm:$0xff] }
 0x186   :  { %13003 = vst [vmem:[#allocation95_spill] sm:$0xff] %v7978_v54  ;;  %v2918_v33 = vmul.f32 %v12896_v36, %v7978_v54  ;;  %v2806_v37 = vadd.f32 %v7908_v59, %v2732_v57  ;;  %v1896_v46 = vadd.f32 %v1847_v2, %v1796_v1  ;;  %v8003_v43 = vmul.f32 %v12971_v50, %v7978_v54 }
 0x187   :  { %v546_v40 = vmul.f32 %v12996_v15, %v5805_v10  ;;  %v1245_v47 = vadd.f32 %v1196_v21, %v1145_v20  ;;  %v2585_v61 = vadd.f32 %v2549_v63, %v2511_v25  ;;  %v597_v6 = vmul.f32 %v13007_v38, %v12960_v22  ;;  %v8021_v21 = vld [vmem:[%s12096_s0 + $0x330] sm:$0xff]  ;;  %v8026_v63 = vld [vmem:[%s12096_s0 + $0x138] sm:$0xff]  ;;  %v13011_v25 = vld [vmem:[#allocation16_spill] sm:$0xff] }
 0x188   :  { %13006 = vst [vmem:[#allocation96_spill] sm:$0xff] %v8003_v43  ;;  %v697_v59 = vmul.f32 %v13008_v9, %v12962_v42  ;;  %v2880_v2 = vadd.f32 %v7915_v26, %v2806_v37  ;;  %v1996_v57 = vadd.f32 %v1947_v35, %v1896_v46  ;;  %v797_v1 = vmul.f32 %v7928_v30, %v12862_v62  ;;  %v13012_v35 = vld [vmem:[#allocation17_spill] sm:$0xff] }
 0x189   :  { %v897_v28 = vmul.f32 %v5267_v52, %v12944_v31  ;;  %v1345_v19 = vadd.f32 %v1296_v29, %v1245_v47  ;;  %13009 = vst [vmem:[#allocation53_spill] sm:$0xff] %v8021_v21  ;;  %13010 = vst [vmem:[#allocation56_spill] sm:$0xff] %v8026_v63  ;;  %v646_v20 = vadd.f32 %v597_v6, %v546_v40 }
 0x18a   :  { %v997_v26 = vmul.f32 %v5316_v17, %v13011_v25  ;;  %v1097_v37 = vmul.f32 %v7947_v55, %v13012_v35  ;;  %v2954_v46 = vadd.f32 %v2918_v33, %v2880_v2  ;;  %v2096_v54 = vadd.f32 %v2047_v39, %v1996_v57 }
 0x18b   :  { %v1197_v29 = vmul.f32 %v8021_v21, %v12999_v53  ;;  %v1297_v47 = vmul.f32 %v8026_v63, %v13000_v8  ;;  %v1396_v44 = vadd.f32 %v13013_v14, %v1345_v19  ;;  %v746_v31 = vadd.f32 %v697_v59, %v646_v20 }
 0x18c   :  { %v1497_v43 = vmul.f32 %v12996_v15, %v13001_v34  ;;  %v1548_v40 = vmul.f32 %v13007_v38, %v12889_v60  ;;  %v2992_v6 = vadd.f32 %v12990_v18, %v2954_v46  ;;  %v2196_v35 = vadd.f32 %v2147_v16, %v2096_v54 }
 0x18d   :  { %v1648_v39 = vmul.f32 %v13008_v9, %v12891_v51  ;;  %v1748_v33 = vmul.f32 %v7928_v30, %v6023_v48  ;;  %v8045_v2 = vmax.f32 %v1396_v44, 0.0  ;;  %v846_v57 = vadd.f32 %v797_v1, %v746_v31 }
 0x18e   :  { %v1597_v19 = vadd.f32 %v1548_v40, %v1497_v43  ;;  %v1848_v59 = vmul.f32 %v5267_v52, %v6026_v0  ;;  %v3028_v20 = vmax.f32 %v2992_v6, 0.0  ;;  %v2296_v15 = vadd.f32 %v2247_v11, %v2196_v35  ;;  %v13015_v52 = vld [vmem:[#allocation60_spill] sm:$0xff] }
 0x18f   :  { %13014 = vst [vmem:[#allocation97_spill] sm:$0xff] %v8045_v2  ;;  %v1948_v34 = vmul.f32 %v5316_v17, %v6081_v12  ;;  %v2048_v38 = vmul.f32 %v7947_v55, %v6084_v7  ;;  %v2623_v16 = vmul.f32 %v12980_v32, %v8045_v2  ;;  %v946_v9 = vadd.f32 %v897_v28, %v846_v57 }
 0x190   :  { %v1697_v54 = vadd.f32 %v1648_v39, %v1597_v19  ;;  %v2148_v44 = vmul.f32 %v8021_v21, %v6087_v13  ;;  %3064 = vst [vmem:[%s12101_s5 + $0x78] sm:$0xff] %v3028_v20  ;;  %v2347_v31 = vadd.f32 %v12968_v5, %v2296_v15  ;;  %v2248_v30 = vmul.f32 %v8026_v63, %v6090_v27  ;;  %v13017_v39 = vld [vmem:[#allocation85_spill] sm:$0xff] }
 0x191   :  { %v2438_v11 = vmul.f32 %v6148_v3, %v13004_v23  ;;  %v2476_v43 = vmul.f32 %v12992_v41, %v13015_v52  ;;  %v2659_v28 = vadd.f32 %v2623_v16, %v2585_v61  ;;  %v1046_v17 = vadd.f32 %v997_v26, %v946_v9  ;;  %v8080_v61 = vld [vmem:[%s12096_s0 + $0x500] sm:$0xff]  ;;  %v13018_v26 = vld [vmem:[#allocation59_spill] sm:$0xff] }
 0x192   :  { %v1797_v1 = vadd.f32 %v1748_v33, %v1697_v54  ;;  %v2550_v35 = vmul.f32 %v6154_v58, %v8045_v2  ;;  %v8067_v46 = vmax.f32 %v2347_v31, 0.0  ;;  %v8071_v6 = vmul.f32 %v6172_v49, %v13005_v4 }
 0x193   :  { %v2512_v40 = vadd.f32 %v2476_v43, %v2438_v11  ;;  %v8075_v57 = vmul.f32 %v12876_v24, %v13017_v39  ;;  %v2733_v19 = vadd.f32 %v2697_v56, %v2659_v28  ;;  %v1146_v20 = vadd.f32 %v1097_v37, %v1046_v17  ;;  %v13019_v56 = vld [vmem:[#allocation61_spill] sm:$0xff]  ;;  %v8101_v28 = vld [vmem:[%s12096_s0 + $0x700] sm:$0xff] }
 0x194   :  { %13016 = vst [vmem:[#allocation98_spill] sm:$0xff] %v8067_v46  ;;  %v1897_v15 = vadd.f32 %v1848_v59, %v1797_v1  ;;  %v547_v33 = vmul.f32 %v13018_v26, %v5805_v10  ;;  %v2919_v16 = vmul.f32 %v12896_v36, %v8067_v46  ;;  %v8088_v54 = vmul.f32 %v12971_v50, %v8067_v46  ;;  %v8096_v43 = vld [vmem:[%s12096_s0 + $0x508] sm:$0xff]  ;;  %v13020_v1 = vld [vmem:[#allocation64_spill] sm:$0xff]  ;;  %v13024_v46 = vld [vmem:[#allocation15_spill] sm:$0xff] }
 0x195   :  { %v2586_v9 = vadd.f32 %v2550_v35, %v2512_v40  ;;  %v548_v37 = vmul.f32 %v13019_v56, %v5805_v10  ;;  %v2807_v59 = vadd.f32 %v7995_v45, %v2733_v19  ;;  %v1246_v31 = vadd.f32 %v1197_v29, %v1146_v20  ;;  %v8106_v17 = vld [vmem:[%s12096_s0 + $0x708] sm:$0xff]  ;;  %v13022_v40 = vld [vmem:[#allocation82_spill] sm:$0xff] }
 0x196   :  { %v1997_v11 = vadd.f32 %v1948_v34, %v1897_v15  ;;  %v598_v45 = vmul.f32 %v13020_v1, %v12960_v22  ;;  %v13021_v34 = vld [vmem:[#allocation65_spill] sm:$0xff]  ;;  %v698_v35 = vmul.f32 %v13019_v56, %v12962_v42  ;;  %v699_v19 = vmul.f32 %v13022_v40, %v12962_v42  ;;  %v13023_v15 = vld [vmem:[#allocation96_spill] sm:$0xff] }
 0x197   :  { %v599_v29 = vmul.f32 %v13021_v34, %v12960_v22  ;;  %v798_v20 = vmul.f32 %v8080_v61, %v12862_v62  ;;  %v2881_v39 = vadd.f32 %v13023_v15, %v2807_v59  ;;  %v1346_v4 = vadd.f32 %v1297_v47, %v1246_v31  ;;  %v8129_v47 = vld [vmem:[%s12096_s0 + $0x510] sm:$0xff] }
 0x198   :  { %v2097_v52 = vadd.f32 %v2048_v38, %v1997_v11  ;;  %v647_v23 = vadd.f32 %v598_v45, %v547_v33  ;;  %v799_v21 = vmul.f32 %v8096_v43, %v12862_v62  ;;  %v898_v2 = vmul.f32 %v8101_v28, %v13024_v46  ;;  %v8134_v38 = vld [vmem:[%s12096_s0 + $0x140] sm:$0xff]  ;;  %v8148_v11 = vld [vmem:[%s12096_s0 + $0x148] sm:$0xff] }
 0x199   :  { %v648_v63 = vadd.f32 %v599_v29, %v548_v37  ;;  %v899_v55 = vmul.f32 %v8106_v17, %v13024_v46  ;;  %v2955_v50 = vadd.f32 %v2919_v16, %v2881_v39  ;;  %v1397_v42 = vadd.f32 %v13013_v14, %v1346_v4  ;;  %13025 = vst [vmem:[#allocation59_spill] sm:$0xff] %v8134_v38  ;;  %v13026_v4 = vld [vmem:[#allocation17_spill] sm:$0xff] }
 0x19a   :  { %v2197_v22 = vadd.f32 %v2148_v44, %v2097_v52  ;;  %v747_v33 = vadd.f32 %v698_v35, %v647_v23  ;;  %v998_v59 = vmul.f32 %v8096_v43, %v13011_v25  ;;  %v999_v39 = vmul.f32 %v8129_v47, %v13011_v25  ;;  %13028 = vst [vmem:[#allocation64_spill] sm:$0xff] %v8148_v11  ;;  %v8153_v23 = vld [vmem:[%s12096_s0 + $0x340] sm:$0xff] }
 0x19b   :  { %v748_v37 = vadd.f32 %v699_v19, %v648_v63  ;;  %v1098_v44 = vmul.f32 %v8134_v38, %v13026_v4  ;;  %v2993_v52 = vadd.f32 %v12990_v18, %v2955_v50  ;;  %v8143_v16 = vmax.f32 %v1397_v42, 0.0  ;;  %13029 = vst [vmem:[#allocation65_spill] sm:$0xff] %v8153_v23  ;;  %v8158_v63 = vld [vmem:[%s12096_s0 + $0x348] sm:$0xff] }
 0x19c   :  { %v2297_v31 = vadd.f32 %v2248_v30, %v2197_v22  ;;  %13030 = vst [vmem:[#allocation82_spill] sm:$0xff] %v8158_v63  ;;  %v847_v45 = vadd.f32 %v798_v20, %v747_v33  ;;  %v1099_v22 = vmul.f32 %v8148_v11, %v13026_v4  ;;  %v1198_v42 = vmul.f32 %v8153_v23, %v12999_v53  ;;  %v8172_v20 = vld [vmem:[%s12096_s0 + $0x150] sm:$0xff] }
 0x19d   :  { %13027 = vst [vmem:[#allocation61_spill] sm:$0xff] %v8143_v16  ;;  %v848_v50 = vadd.f32 %v799_v21, %v748_v37  ;;  %v1199_v30 = vmul.f32 %v8158_v63, %v12999_v53  ;;  %v3029_v29 = vmax.f32 %v2993_v52, 0.0  ;;  %v2624_v19 = vmul.f32 %v12980_v32, %v8143_v16  ;;  %13031 = vst [vmem:[#allocation96_spill] sm:$0xff] %v8172_v20  ;;  %v13032_v53 = vld [vmem:[#allocation21_spill] sm:$0xff] }
 0x19e   :  { %v2348_v35 = vadd.f32 %v12968_v5, %v2297_v31  ;;  %v947_v21 = vadd.f32 %v898_v2, %v847_v45  ;;  %v1298_v33 = vmul.f32 %v8148_v11, %v13000_v8  ;;  %v1299_v37 = vmul.f32 %v8172_v20, %v13000_v8 }
 0x19f   :  { %v948_v15 = vadd.f32 %v899_v55, %v848_v50  ;;  %v1498_v52 = vmul.f32 %v13018_v26, %v13032_v53  ;;  %3065 = vst [vmem:[%s12101_s5 + $0x80] sm:$0xff] %v3029_v29  ;;  %v2660_v16 = vadd.f32 %v2624_v19, %v2586_v9  ;;  %v1499_v55 = vmul.f32 %v13019_v56, %v13032_v53 }
 0x1a0   :  { %v8183_v31 = vmax.f32 %v2348_v35, 0.0  ;;  %v1047_v5 = vadd.f32 %v998_v59, %v947_v21  ;;  %v1549_v45 = vmul.f32 %v13020_v1, %v12889_v60  ;;  %v1550_v50 = vmul.f32 %v13021_v34, %v12889_v60 }
 0x1a1   :  { %v1048_v2 = vadd.f32 %v999_v39, %v948_v15  ;;  %v1649_v26 = vmul.f32 %v13019_v56, %v12891_v51  ;;  %v2734_v8 = vadd.f32 %v8071_v6, %v2660_v16  ;;  %v1650_v59 = vmul.f32 %v13022_v40, %v12891_v51 }
 0x1a2   :  { %13033 = vst [vmem:[#allocation99_spill] sm:$0xff] %v8183_v31  ;;  %v2920_v29 = vmul.f32 %v12896_v36, %v8183_v31  ;;  %v1147_v9 = vadd.f32 %v1098_v44, %v1047_v5  ;;  %v1598_v39 = vadd.f32 %v1549_v45, %v1498_v52  ;;  %v1599_v19 = vadd.f32 %v1550_v50, %v1499_v55 }
 0x1a3   :  { %v1148_v35 = vadd.f32 %v1099_v22, %v1048_v2  ;;  %v1749_v1 = vmul.f32 %v8080_v61, %v6023_v48  ;;  %v2808_v34 = vadd.f32 %v8075_v57, %v2734_v8  ;;  %v1750_v56 = vmul.f32 %v8096_v43, %v6023_v48 }
 0x1a4   :  { %v1247_v21 = vadd.f32 %v1198_v42, %v1147_v9  ;;  %v1849_v6 = vmul.f32 %v8101_v28, %v6026_v0  ;;  %v1698_v5 = vadd.f32 %v1649_v26, %v1598_v39  ;;  %v1699_v44 = vadd.f32 %v1650_v59, %v1599_v19  ;;  %v13036_v39 = vld [vmem:[#allocation86_spill] sm:$0xff] }
 0x1a5   :  { %v1248_v16 = vadd.f32 %v1199_v30, %v1148_v35  ;;  %v1850_v40 = vmul.f32 %v8106_v17, %v6026_v0  ;;  %v2882_v22 = vadd.f32 %v8088_v54, %v2808_v34  ;;  %v1949_v61 = vmul.f32 %v8096_v43, %v6081_v12 }
 0x1a6   :  { %v1347_v15 = vadd.f32 %v1298_v33, %v1247_v21  ;;  %v1950_v8 = vmul.f32 %v8129_v47, %v6081_v12  ;;  %v1798_v42 = vadd.f32 %v1749_v1, %v1698_v5  ;;  %v1799_v52 = vadd.f32 %v1750_v56, %v1699_v44  ;;  %v98_v1 = vld [vmem:[%s12096_s0 + $0x110] sm:$0xff]  ;;  %v13037_v21 = vld [vmem:[#allocation87_spill] sm:$0xff] }
 0x1a7   :  { %v1348_v57 = vadd.f32 %v1299_v37, %v1248_v16  ;;  %v2049_v28 = vmul.f32 %v8134_v38, %v6084_v7  ;;  %v2956_v30 = vadd.f32 %v2920_v29, %v2882_v22  ;;  %v2050_v17 = vmul.f32 %v8148_v11, %v6084_v7  ;;  %v13038_v16 = vld [vmem:[#allocation88_spill] sm:$0xff]  ;;  %v5270_v44 = vld [vmem:[%s12096_s0 + $0x710] sm:$0xff] }
 0x1a8   :  { %v1398_v55 = vadd.f32 %v13013_v14, %v1347_v15  ;;  %v2149_v54 = vmul.f32 %v8153_v23, %v6087_v13  ;;  %v1898_v33 = vadd.f32 %v1849_v6, %v1798_v42  ;;  %v1899_v2 = vadd.f32 %v1850_v40, %v1799_v52  ;;  %v13040_v52 = vld [vmem:[#allocation12_spill] sm:$0xff] }
 0x1a9   :  { %v1399_v43 = vadd.f32 %v13013_v14, %v1348_v57  ;;  %v2150_v37 = vmul.f32 %v8158_v63, %v6087_v13  ;;  %v2994_v45 = vadd.f32 %v12990_v18, %v2956_v30  ;;  %v2249_v26 = vmul.f32 %v8148_v11, %v6090_v27  ;;  %v13041_v30 = vld [vmem:[#allocation68_spill] sm:$0xff] }
 0x1aa   :  { %v8223_v50 = vmax.f32 %v1398_v55, 0.0  ;;  %v2250_v29 = vmul.f32 %v8172_v20, %v6090_v27  ;;  %v1998_v59 = vadd.f32 %v1949_v61, %v1898_v33  ;;  %v1999_v35 = vadd.f32 %v1950_v8, %v1899_v2  ;;  %v13039_v61 = vld [vmem:[#allocation89_spill] sm:$0xff] }
 0x1ab   :  { %v8229_v9 = vmax.f32 %v1399_v43, 0.0  ;;  %v2439_v19 = vmul.f32 %v6148_v3, %v13036_v39  ;;  %v3030_v34 = vmax.f32 %v2994_v45, 0.0  ;;  %v2477_v56 = vmul.f32 %v12992_v41, %v13037_v21  ;;  %v13042_v43 = vld [vmem:[#allocation13_spill] sm:$0xff]  ;;  %v8260_v45 = vld [vmem:[%s12096_s0 + $0x518] sm:$0xff] }
 0x1ac   :  { %13034 = vst [vmem:[#allocation100_spill] sm:$0xff] %v8223_v50  ;;  %v2551_v6 = vmul.f32 %v6154_v58, %v8223_v50  ;;  %v2699_v5 = vmul.f32 %v6172_v49, %v13038_v16  ;;  %v2098_v40 = vadd.f32 %v2049_v28, %v1998_v59  ;;  %v2099_v22 = vadd.f32 %v2050_v17, %v1999_v35  ;;  %v13043_v33 = vld [vmem:[#allocation69_spill] sm:$0xff]  ;;  %v13047_v39 = vld [vmem:[#allocation19_spill] sm:$0xff] }
 0x1ad   :  { %13035 = vst [vmem:[#allocation101_spill] sm:$0xff] %v8229_v9  ;;  %v2625_v15 = vmul.f32 %v12980_v32, %v8229_v9  ;;  %v2773_v8 = vmul.f32 %v12876_v24, %v13039_v61  ;;  %3066 = vst [vmem:[%s12101_s5 + $0x88] sm:$0xff] %v3030_v34  ;;  %v2513_v57 = vadd.f32 %v2477_v56, %v2439_v19  ;;  %v8268_v34 = vld [vmem:[%s12096_s0 + $0x350] sm:$0xff] }
 0x1ae   :  { %v549_v42 = vmul.f32 %v5805_v10, %v98_v1  ;;  %v600_v55 = vmul.f32 %v13041_v30, %v13040_v52  ;;  %v700_v28 = vmul.f32 %v13043_v33, %v13042_v43  ;;  %v2198_v17 = vadd.f32 %v2149_v54, %v2098_v40  ;;  %13044 = vst [vmem:[#allocation68_spill] sm:$0xff] %v8268_v34  ;;  %v8273_v54 = vld [vmem:[%s12096_s0 + $0x158] sm:$0xff] }
 0x1af   :  { %v2199_v2 = vadd.f32 %v2150_v37, %v2099_v22  ;;  %v800_v59 = vmul.f32 %v8129_v47, %v12862_v62  ;;  %v900_v35 = vmul.f32 %v5270_v44, %v13024_v46  ;;  %v2587_v19 = vadd.f32 %v2551_v6, %v2513_v57  ;;  %13045 = vst [vmem:[#allocation69_spill] sm:$0xff] %v8273_v54  ;;  %v13046_v6 = vld [vmem:[#allocation18_spill] sm:$0xff] }
 0x1b0   :  { %v649_v37 = vadd.f32 %v600_v55, %v549_v42  ;;  %v1000_v56 = vmul.f32 %v8260_v45, %v13011_v25  ;;  %v1100_v40 = vmul.f32 %v8172_v20, %v13026_v4  ;;  %v2298_v22 = vadd.f32 %v2249_v26, %v2198_v17  ;;  %v13048_v55 = vld [vmem:[#allocation28_spill] sm:$0xff] }
 0x1b1   :  { %v2299_v16 = vadd.f32 %v2250_v29, %v2199_v2  ;;  %v1200_v57 = vmul.f32 %v8268_v34, %v13046_v6  ;;  %v1300_v50 = vmul.f32 %v8273_v54, %v13047_v39  ;;  %v2661_v63 = vadd.f32 %v2625_v15, %v2587_v19 }
 0x1b2   :  { %v749_v23 = vadd.f32 %v700_v28, %v649_v37  ;;  %v1500_v11 = vmul.f32 %v13032_v53, %v98_v1  ;;  %v1551_v42 = vmul.f32 %v13041_v30, %v12889_v60  ;;  %v2349_v38 = vadd.f32 %v13048_v55, %v2298_v22 }
 0x1b3   :  { %v2350_v31 = vadd.f32 %v13048_v55, %v2299_v16  ;;  %v1651_v26 = vmul.f32 %v13043_v33, %v12891_v51  ;;  %v1751_v29 = vmul.f32 %v8129_v47, %v6023_v48  ;;  %v2735_v17 = vadd.f32 %v2699_v5, %v2661_v63 }
 0x1b4   :  { %v849_v2 = vadd.f32 %v800_v59, %v749_v23  ;;  %v1600_v32 = vadd.f32 %v1551_v42, %v1500_v11  ;;  %v1851_v15 = vmul.f32 %v5270_v44, %v6026_v0  ;;  %v8293_v28 = vmax.f32 %v2349_v38, 0.0  ;;  %v13051_v11 = vld [vmem:[#allocation36_spill] sm:$0xff] }
 0x1b5   :  { %v8295_v1 = vmax.f32 %v2350_v31, 0.0  ;;  %v1951_v30 = vmul.f32 %v8260_v45, %v6081_v12  ;;  %v2051_v16 = vmul.f32 %v8172_v20, %v6084_v7  ;;  %v2809_v19 = vadd.f32 %v2773_v8, %v2735_v17  ;;  %v13052_v8 = vld [vmem:[#allocation91_spill] sm:$0xff] }
 0x1b6   :  { %13049 = vst [vmem:[#allocation102_spill] sm:$0xff] %v8293_v28  ;;  %v949_v37 = vadd.f32 %v900_v35, %v849_v2  ;;  %v1700_v22 = vadd.f32 %v1651_v26, %v1600_v32  ;;  %v2151_v47 = vmul.f32 %v8268_v34, %v6087_v13  ;;  %v2847_v23 = vmul.f32 %v13051_v11, %v8293_v28  ;;  %v13053_v26 = vld [vmem:[#allocation92_spill] sm:$0xff] }
 0x1b7   :  { %13050 = vst [vmem:[#allocation103_spill] sm:$0xff] %v8295_v1  ;;  %v2921_v38 = vmul.f32 %v12896_v36, %v8295_v1  ;;  %v2251_v63 = vmul.f32 %v8273_v54, %v6090_v27  ;;  %v2440_v31 = vmul.f32 %v6148_v3, %v13037_v21  ;;  %v2478_v32 = vmul.f32 %v12992_v41, %v13052_v8  ;;  %v13056_v34 = vld [vmem:[#allocation72_spill] sm:$0xff] }
 0x1b8   :  { %v1049_v5 = vadd.f32 %v1000_v56, %v949_v37  ;;  %v1800_v44 = vadd.f32 %v1751_v29, %v1700_v22  ;;  %v2552_v59 = vmul.f32 %v6154_v58, %v8229_v9  ;;  %v2883_v35 = vadd.f32 %v2847_v23, %v2809_v19  ;;  %v5271_v56 = vld [vmem:[%s12096_s0 + $0x718] sm:$0xff] }
 0x1b9   :  { %v8317_v42 = vmul.f32 %v6172_v49, %v13039_v61  ;;  %v8321_v17 = vmul.f32 %v12876_v24, %v13053_v26  ;;  %v8325_v2 = vmul.f32 %v13051_v11, %v8295_v1  ;;  %v2514_v22 = vadd.f32 %v2478_v32, %v2440_v31  ;;  %v13055_v61 = vld [vmem:[#allocation71_spill] sm:$0xff] }
 0x1ba   :  { %v1149_v29 = vadd.f32 %v1100_v40, %v1049_v5  ;;  %v1900_v37 = vadd.f32 %v1851_v15, %v1800_v44  ;;  %v550_v19 = vmul.f32 %v13043_v33, %v5805_v10  ;;  %v2957_v23 = vadd.f32 %v2921_v38, %v2883_v35  ;;  %v8341_v40 = vld [vmem:[%s12096_s0 + $0x520] sm:$0xff]  ;;  %v8348_v31 = vld [vmem:[%s12096_s0 + $0x358] sm:$0xff] }
 0x1bb   :  { %13054 = vst [vmem:[#allocation104_spill] sm:$0xff] %v8325_v2  ;;  %v601_v21 = vmul.f32 %v13055_v61, %v13040_v52  ;;  %v701_v28 = vmul.f32 %v13056_v34, %v13042_v43  ;;  %v801_v1 = vmul.f32 %v8260_v45, %v12862_v62  ;;  %v2588_v2 = vadd.f32 %v2552_v59, %v2514_v22 }
 0x1bc   :  { %v1249_v9 = vadd.f32 %v1200_v57, %v1149_v29  ;;  %v2000_v20 = vadd.f32 %v1951_v30, %v1900_v37  ;;  %v901_v15 = vmul.f32 %v5271_v56, %v13024_v46  ;;  %v2995_v38 = vadd.f32 %v12990_v18, %v2957_v23  ;;  %13057 = vst [vmem:[#allocation71_spill] sm:$0xff] %v8348_v31  ;;  %v8353_v57 = vld [vmem:[%s12096_s0 + $0x160] sm:$0xff] }
 0x1bd   :  { %13058 = vst [vmem:[#allocation72_spill] sm:$0xff] %v8353_v57  ;;  %v650_v30 = vadd.f32 %v601_v21, %v550_v19  ;;  %v1001_v5 = vmul.f32 %v8341_v40, %v13011_v25  ;;  %v1101_v44 = vmul.f32 %v8273_v54, %v13026_v4  ;;  %v1201_v35 = vmul.f32 %v8348_v31, %v13046_v6 }
 0x1be   :  { %v1349_v32 = vadd.f32 %v1300_v50, %v1249_v9  ;;  %v2100_v59 = vadd.f32 %v2051_v16, %v2000_v20  ;;  %v1301_v29 = vmul.f32 %v8353_v57, %v13047_v39  ;;  %v3031_v37 = vmax.f32 %v2995_v38, 0.0 }
 0x1bf   :  { %v750_v22 = vadd.f32 %v701_v28, %v650_v30  ;;  %v1501_v23 = vmul.f32 %v13043_v33, %v13032_v53  ;;  %v1552_v21 = vmul.f32 %v13055_v61, %v12889_v60  ;;  %v1652_v20 = vmul.f32 %v13056_v34, %v12891_v51 }
 0x1c0   :  { %v1400_v19 = vadd.f32 %v13013_v14, %v1349_v32  ;;  %v2200_v18 = vadd.f32 %v2151_v47, %v2100_v59  ;;  %v1752_v50 = vmul.f32 %v8260_v45, %v6023_v48  ;;  %3067 = vst [vmem:[%s12101_s5 + $0x90] sm:$0xff] %v3031_v37  ;;  %v1852_v33 = vmul.f32 %v5271_v56, %v6026_v0  ;;  %v13060_v37 = vld [vmem:[#allocation30_spill] sm:$0xff] }
 0x1c1   :  { %v850_v9 = vadd.f32 %v801_v1, %v750_v22  ;;  %v1601_v28 = vadd.f32 %v1552_v21, %v1501_v23  ;;  %v1952_v61 = vmul.f32 %v8341_v40, %v6081_v12  ;;  %v2052_v38 = vmul.f32 %v8273_v54, %v6084_v7 }
 0x1c2   :  { %v8378_v16 = vmax.f32 %v1400_v19, 0.0  ;;  %v2300_v47 = vadd.f32 %v2251_v63, %v2200_v18  ;;  %v2152_v45 = vmul.f32 %v8348_v31, %v6087_v13  ;;  %v2252_v1 = vmul.f32 %v8353_v57, %v6090_v27  ;;  %v13061_v18 = vld [vmem:[#allocation90_spill] sm:$0xff] }
 0x1c3   :  { %v950_v30 = vadd.f32 %v901_v15, %v850_v9  ;;  %v1701_v32 = vadd.f32 %v1652_v20, %v1601_v28  ;;  %v2441_v56 = vmul.f32 %v6148_v3, %v13052_v8  ;;  %v2479_v63 = vmul.f32 %v12992_v41, %v13061_v18  ;;  %v13062_v20 = vld [vmem:[#allocation93_spill] sm:$0xff] }
 0x1c4   :  { %13059 = vst [vmem:[#allocation105_spill] sm:$0xff] %v8378_v16  ;;  %v2351_v59 = vadd.f32 %v13048_v55, %v2300_v47  ;;  %v2626_v22 = vmul.f32 %v13060_v37, %v8378_v16  ;;  %v2553_v23 = vmul.f32 %v6154_v58, %v8378_v16  ;;  %v8397_v19 = vmul.f32 %v6172_v49, %v13053_v26 }
 0x1c5   :  { %v1050_v21 = vadd.f32 %v1001_v5, %v950_v30  ;;  %v1801_v15 = vadd.f32 %v1752_v50, %v1701_v32  ;;  %v8401_v9 = vmul.f32 %v12876_v24, %v13062_v20  ;;  %v2515_v8 = vadd.f32 %v2479_v63, %v2441_v56  ;;  %v5272_v5 = vld [vmem:[%s12096_s0 + $0x720] sm:$0xff]  ;;  %v13065_v32 = vld [vmem:[#allocation77_spill] sm:$0xff] }
 0x1c6   :  { %v8403_v28 = vmax.f32 %v2351_v59, 0.0  ;;  %v2662_v47 = vadd.f32 %v2626_v22, %v2588_v2  ;;  %v551_v31 = vmul.f32 %v13056_v34, %v5805_v10  ;;  %v13064_v50 = vld [vmem:[#allocation76_spill] sm:$0xff]  ;;  %v702_v26 = vmul.f32 %v13065_v32, %v13042_v43  ;;  %v8424_v63 = vld [vmem:[%s12096_s0 + $0x528] sm:$0xff] }
 0x1c7   :  { %v1150_v54 = vadd.f32 %v1101_v44, %v1050_v21  ;;  %v1901_v41 = vadd.f32 %v1852_v33, %v1801_v15  ;;  %v602_v30 = vmul.f32 %v13064_v50, %v13040_v52  ;;  %v2589_v56 = vadd.f32 %v2553_v23, %v2515_v8  ;;  %v8432_v8 = vld [vmem:[%s12096_s0 + $0x360] sm:$0xff] }
 0x1c8   :  { %13063 = vst [vmem:[#allocation106_spill] sm:$0xff] %v8403_v28  ;;  %v2736_v59 = vadd.f32 %v8317_v42, %v2662_v47  ;;  %v2922_v2 = vmul.f32 %v12896_v36, %v8403_v28  ;;  %v8419_v44 = vmul.f32 %v13051_v11, %v8403_v28  ;;  %v802_v15 = vmul.f32 %v8341_v40, %v12862_v62 }
 0x1c9   :  { %v1250_v33 = vadd.f32 %v1201_v35, %v1150_v54  ;;  %v2001_v22 = vadd.f32 %v1952_v61, %v1901_v41  ;;  %v651_v21 = vadd.f32 %v602_v30, %v551_v31  ;;  %13066 = vst [vmem:[#allocation76_spill] sm:$0xff] %v8432_v8  ;;  %v902_v23 = vmul.f32 %v5272_v5, %v13024_v46  ;;  %v8442_v61 = vld [vmem:[%s12096_s0 + $0x168] sm:$0xff]  ;;  %v13068_v30 = vld [vmem:[#allocation104_spill] sm:$0xff] }
 0x1ca   :  { %v2810_v42 = vadd.f32 %v8321_v17, %v2736_v59  ;;  %v1002_v41 = vmul.f32 %v8424_v63, %v13011_v25  ;;  %v1102_v54 = vmul.f32 %v8353_v57, %v13026_v4  ;;  %13067 = vst [vmem:[#allocation77_spill] sm:$0xff] %v8442_v61  ;;  %v1202_v47 = vmul.f32 %v8432_v8, %v13046_v6 }
 0x1cb   :  { %v1350_v35 = vadd.f32 %v1301_v29, %v1250_v33  ;;  %v2101_v31 = vadd.f32 %v2052_v38, %v2001_v22  ;;  %v751_v17 = vadd.f32 %v702_v26, %v651_v21  ;;  %v1302_v28 = vmul.f32 %v8442_v61, %v13047_v39 }
 0x1cc   :  { %v2884_v59 = vadd.f32 %v13068_v30, %v2810_v42  ;;  %v1502_v16 = vmul.f32 %v13056_v34, %v13032_v53  ;;  %v1553_v29 = vmul.f32 %v13064_v50, %v12889_v60  ;;  %v1653_v26 = vmul.f32 %v13065_v32, %v12891_v51 }
 0x1cd   :  { %v1401_v38 = vadd.f32 %v13013_v14, %v1350_v35  ;;  %v2201_v33 = vadd.f32 %v2152_v45, %v2101_v31  ;;  %v851_v22 = vadd.f32 %v802_v15, %v751_v17  ;;  %v1753_v42 = vmul.f32 %v8341_v40, %v6023_v48  ;;  %v13070_v35 = vld [vmem:[#allocation38_spill] sm:$0xff] }
 0x1ce   :  { %v2958_v21 = vadd.f32 %v2922_v2, %v2884_v59  ;;  %v1602_v6 = vadd.f32 %v1553_v29, %v1502_v16  ;;  %v1853_v30 = vmul.f32 %v5272_v5, %v6026_v0  ;;  %v1953_v50 = vmul.f32 %v8424_v63, %v6081_v12  ;;  %v13071_v59 = vld [vmem:[#allocation94_spill] sm:$0xff]  ;;  %v13072_v29 = vld [vmem:[#allocation29_spill] sm:$0xff] }
 0x1cf   :  { %v8459_v39 = vmax.f32 %v1401_v38, 0.0  ;;  %v2301_v34 = vadd.f32 %v2252_v1, %v2201_v33  ;;  %v951_v53 = vadd.f32 %v902_v23, %v851_v22  ;;  %v2053_v31 = vmul.f32 %v8353_v57, %v6084_v7 }
 0x1d0   :  { %v2996_v45 = vadd.f32 %v13070_v35, %v2958_v21  ;;  %v1702_v15 = vadd.f32 %v1653_v26, %v1602_v6  ;;  %v2153_v16 = vmul.f32 %v8432_v8, %v6087_v13  ;;  %v2253_v1 = vmul.f32 %v8442_v61, %v6090_v27  ;;  %v13080_v8 = vld [vmem:[#allocation19_spill] sm:$0xff] }
 0x1d1   :  { %13069 = vst [vmem:[#allocation104_spill] sm:$0xff] %v8459_v39  ;;  %v2352_v40 = vadd.f32 %v13048_v55, %v2301_v34  ;;  %v2627_v5 = vmul.f32 %v13060_v37, %v8459_v39  ;;  %v1051_v2 = vadd.f32 %v1002_v41, %v951_v53  ;;  %v2442_v6 = vmul.f32 %v6148_v3, %v13061_v18  ;;  %v13074_v34 = vld [vmem:[#allocation95_spill] sm:$0xff] }
 0x1d2   :  { %v3032_v23 = vmax.f32 %v2996_v45, 0.0  ;;  %v1802_v17 = vadd.f32 %v1753_v42, %v1702_v15  ;;  %v2480_v38 = vmul.f32 %v13072_v29, %v13071_v59  ;;  %v2554_v21 = vmul.f32 %v6154_v58, %v8459_v39  ;;  %v13081_v39 = vld [vmem:[#allocation21_spill] sm:$0xff] }
 0x1d3   :  { %v8477_v33 = vmax.f32 %v2352_v40, 0.0  ;;  %v2663_v22 = vadd.f32 %v2627_v5, %v2589_v56  ;;  %v1151_v26 = vadd.f32 %v1102_v54, %v1051_v2  ;;  %v2702_v42 = vmul.f32 %v6172_v49, %v13062_v20  ;;  %v8527_v20 = vld [vmem:[%s12096_s0 + $0x170] sm:$0xff] }
 0x1d4   :  { %3068 = vst [vmem:[%s12101_s5 + $0x98] sm:$0xff] %v3032_v23  ;;  %v1902_v53 = vadd.f32 %v1853_v30, %v1802_v17  ;;  %v2516_v41 = vadd.f32 %v2480_v38, %v2442_v6  ;;  %v8488_v45 = vmul.f32 %v12876_v24, %v13074_v34  ;;  %v5273_v30 = vld [vmem:[%s12096_s0 + $0x728] sm:$0xff]  ;;  %v552_v23 = vmul.f32 %v13065_v32, %v5805_v10  ;;  %v13075_v17 = vld [vmem:[#allocation79_spill] sm:$0xff] }
 0x1d5   :  { %13073 = vst [vmem:[#allocation107_spill] sm:$0xff] %v8477_v33  ;;  %v2737_v15 = vadd.f32 %v8397_v19, %v2663_v22  ;;  %v2923_v56 = vmul.f32 %v12896_v36, %v8477_v33  ;;  %v1251_v54 = vadd.f32 %v1202_v47, %v1151_v26  ;;  %v8495_v40 = vmul.f32 %v13051_v11, %v8477_v33  ;;  %v8508_v47 = vld [vmem:[%s12096_s0 + $0x530] sm:$0xff]  ;;  %v13076_v22 = vld [vmem:[#allocation75_spill] sm:$0xff] }
 0x1d6   :  { %v2002_v5 = vadd.f32 %v1953_v50, %v1902_v53  ;;  %v2590_v2 = vadd.f32 %v2554_v21, %v2516_v41  ;;  %v603_v19 = vmul.f32 %v13075_v17, %v13040_v52  ;;  %v703_v26 = vmul.f32 %v13076_v22, %v13042_v43  ;;  %v8517_v53 = vld [vmem:[%s12096_s0 + $0x368] sm:$0xff]  ;;  %13078 = vst [vmem:[#allocation75_spill] sm:$0xff] %v8527_v20 }
 0x1d7   :  { %v2811_v6 = vadd.f32 %v8401_v9, %v2737_v15  ;;  %v1351_v38 = vadd.f32 %v1302_v28, %v1251_v54  ;;  %v803_v50 = vmul.f32 %v8424_v63, %v12862_v62  ;;  %13077 = vst [vmem:[#allocation79_spill] sm:$0xff] %v8517_v53  ;;  %v903_v9 = vmul.f32 %v5273_v30, %v13024_v46 }
 0x1d8   :  { %v2102_v21 = vadd.f32 %v2053_v31, %v2002_v5  ;;  %v652_v41 = vadd.f32 %v603_v19, %v552_v23  ;;  %v1003_v28 = vmul.f32 %v8508_v47, %v13011_v25  ;;  %v1103_v31 = vmul.f32 %v8442_v61, %v13026_v4  ;;  %v13079_v5 = vld [vmem:[#allocation18_spill] sm:$0xff] }
 0x1d9   :  { %v2885_v15 = vadd.f32 %v8419_v44, %v2811_v6  ;;  %v1402_v54 = vadd.f32 %v13013_v14, %v1351_v38  ;;  %v1203_v23 = vmul.f32 %v8517_v53, %v13079_v5  ;;  %v1303_v33 = vmul.f32 %v8527_v20, %v13080_v8 }
 0x1da   :  { %v2202_v19 = vadd.f32 %v2153_v16, %v2102_v21  ;;  %v752_v18 = vadd.f32 %v703_v26, %v652_v41  ;;  %v1503_v44 = vmul.f32 %v13065_v32, %v13081_v39  ;;  %v1554_v57 = vmul.f32 %v13075_v17, %v12889_v60 }
 0x1db   :  { %v2959_v6 = vadd.f32 %v2923_v56, %v2885_v15  ;;  %v8537_v38 = vmax.f32 %v1402_v54, 0.0  ;;  %v1654_v14 = vmul.f32 %v13076_v22, %v12891_v51  ;;  %v1754_v16 = vmul.f32 %v8424_v63, %v6023_v48 }
 0x1dc   :  { %v2302_v4 = vadd.f32 %v2253_v1, %v2202_v19  ;;  %v852_v25 = vadd.f32 %v803_v50, %v752_v18  ;;  %v1854_v26 = vmul.f32 %v5273_v30, %v6026_v0  ;;  %v1603_v56 = vadd.f32 %v1554_v57, %v1503_v44 }
 0x1dd   :  { %13082 = vst [vmem:[#allocation108_spill] sm:$0xff] %v8537_v38  ;;  %v2997_v21 = vadd.f32 %v13070_v35, %v2959_v6  ;;  %v2628_v32 = vmul.f32 %v13060_v37, %v8537_v38  ;;  %v1954_v41 = vmul.f32 %v8508_v47, %v6081_v12  ;;  %v2054_v18 = vmul.f32 %v8442_v61, %v6084_v7 }
 0x1de   :  { %v2353_v17 = vadd.f32 %v13048_v55, %v2302_v4  ;;  %v952_v15 = vadd.f32 %v903_v9, %v852_v25  ;;  %v2154_v63 = vmul.f32 %v8517_v53, %v6087_v13  ;;  %v1703_v50 = vadd.f32 %v1654_v14, %v1603_v56  ;;  %v13084_v4 = vld [vmem:[#allocation97_spill] sm:$0xff]  ;;  %v13085_v56 = vld [vmem:[#allocation98_spill] sm:$0xff] }
 0x1df   :  { %v3033_v1 = vmax.f32 %v2997_v21, 0.0  ;;  %v2664_v30 = vadd.f32 %v2628_v32, %v2590_v2  ;;  %v2254_v54 = vmul.f32 %v8527_v20, %v6090_v27  ;;  %v2443_v44 = vmul.f32 %v6148_v3, %v13071_v59 }
 0x1e0   :  { %v8558_v19 = vmax.f32 %v2353_v17, 0.0  ;;  %v1052_v57 = vadd.f32 %v1003_v28, %v952_v15  ;;  %v2481_v25 = vmul.f32 %v13072_v29, %v13084_v4  ;;  %v1803_v6 = vadd.f32 %v1754_v16, %v1703_v50 }
 0x1e1   :  { %3069 = vst [vmem:[%s12101_s5 + $0xa0] sm:$0xff] %v3033_v1  ;;  %v2738_v9 = vadd.f32 %v2702_v42, %v2664_v30  ;;  %v2555_v14 = vmul.f32 %v6154_v58, %v8537_v38  ;;  %v2703_v2 = vmul.f32 %v6172_v49, %v13074_v34  ;;  %v8575_v17 = vmul.f32 %v12876_v24, %v13085_v56  ;;  %v5274_v42 = vld [vmem:[%s12096_s0 + $0x730] sm:$0xff]  ;;  %v13088_v34 = vld [vmem:[#allocation56_spill] sm:$0xff] }
 0x1e2   :  { %13083 = vst [vmem:[#allocation109_spill] sm:$0xff] %v8558_v19  ;;  %v2924_v28 = vmul.f32 %v12896_v36, %v8558_v19  ;;  %v1152_v21 = vadd.f32 %v1103_v31, %v1052_v57  ;;  %v2517_v32 = vadd.f32 %v2481_v25, %v2443_v44  ;;  %v1903_v15 = vadd.f32 %v1854_v26, %v1803_v6  ;;  %v5323_v31 = vld [vmem:[%s12096_s0 + $0x538] sm:$0xff]  ;;  %v13087_v44 = vld [vmem:[#allocation53_spill] sm:$0xff]  ;;  %v13093_v38 = vld [vmem:[#allocation20_spill] sm:$0xff] }
 0x1e3   :  { %v2812_v16 = vadd.f32 %v8488_v45, %v2738_v9  ;;  %v8583_v1 = vmul.f32 %v13051_v11, %v8558_v19  ;;  %v553_v30 = vmul.f32 %v13076_v22, %v5805_v10  ;;  %v604_v25 = vmul.f32 %v13087_v44, %v13040_v52 }
 0x1e4   :  { %v1252_v50 = vadd.f32 %v1203_v23, %v1152_v21  ;;  %v2591_v57 = vadd.f32 %v2555_v14, %v2517_v32  ;;  %v704_v45 = vmul.f32 %v13088_v34, %v13042_v43  ;;  %v2003_v9 = vadd.f32 %v1954_v41, %v1903_v15  ;;  %v8601_v23 = vld [vmem:[%s12096_s0 + $0x370] sm:$0xff]  ;;  %v8606_v14 = vld [vmem:[%s12096_s0 + $0x178] sm:$0xff]  ;;  %v13091_v32 = vld [vmem:[#allocation16_spill] sm:$0xff] }
 0x1e5   :  { %13086 = vst [vmem:[#allocation110_spill] sm:$0xff] %v8583_v1  ;;  %v2886_v26 = vadd.f32 %v8495_v40, %v2812_v16  ;;  %v804_v6 = vmul.f32 %v8508_v47, %v12862_v62  ;;  %v904_v59 = vmul.f32 %v5274_v42, %v13024_v46  ;;  %13089 = vst [vmem:[#allocation53_spill] sm:$0xff] %v8601_v23  ;;  %v13092_v41 = vld [vmem:[#allocation17_spill] sm:$0xff] }
 0x1e6   :  { %v1352_v53 = vadd.f32 %v1303_v33, %v1252_v50  ;;  %13090 = vst [vmem:[#allocation56_spill] sm:$0xff] %v8606_v14  ;;  %v653_v21 = vadd.f32 %v604_v25, %v553_v30  ;;  %v1004_v40 = vmul.f32 %v5323_v31, %v13091_v32  ;;  %v1104_v16 = vmul.f32 %v8527_v20, %v13092_v41 }
 0x1e7   :  { %v2960_v15 = vadd.f32 %v2924_v28, %v2886_v26  ;;  %v2103_v19 = vadd.f32 %v2054_v18, %v2003_v9  ;;  %v1204_v33 = vmul.f32 %v8601_v23, %v13079_v5  ;;  %v1304_v50 = vmul.f32 %v8606_v14, %v13080_v8 }
 0x1e8   :  { %v1403_v61 = vadd.f32 %v13093_v38, %v1352_v53  ;;  %v753_v46 = vadd.f32 %v704_v45, %v653_v21  ;;  %v1504_v1 = vmul.f32 %v13076_v22, %v13081_v39  ;;  %v1555_v30 = vmul.f32 %v13087_v44, %v12889_v60 }
 0x1e9   :  { %v2998_v25 = vadd.f32 %v13070_v35, %v2960_v15  ;;  %v2203_v41 = vadd.f32 %v2154_v63, %v2103_v19  ;;  %v1655_v18 = vmul.f32 %v13088_v34, %v12891_v51  ;;  %v1755_v28 = vmul.f32 %v8508_v47, %v6023_v48 }
 0x1ea   :  { %v8625_v26 = vmax.f32 %v1403_v61, 0.0  ;;  %v853_v9 = vadd.f32 %v804_v6, %v753_v46  ;;  %v1604_v53 = vadd.f32 %v1555_v30, %v1504_v1  ;;  %v1855_v45 = vmul.f32 %v5274_v42, %v6026_v0  ;;  %v13095_v42 = vld [vmem:[#allocation61_spill] sm:$0xff] }
 0x1eb   :  { %v3034_v21 = vmax.f32 %v2998_v25, 0.0  ;;  %v2303_v22 = vadd.f32 %v2254_v54, %v2203_v41  ;;  %v1955_v39 = vmul.f32 %v5323_v31, %v6081_v12  ;;  %v2055_v44 = vmul.f32 %v8527_v20, %v6084_v7 }
 0x1ec   :  { %13094 = vst [vmem:[#allocation111_spill] sm:$0xff] %v8625_v26  ;;  %v2629_v63 = vmul.f32 %v13060_v37, %v8625_v26  ;;  %v953_v34 = vadd.f32 %v904_v59, %v853_v9  ;;  %v1704_v19 = vadd.f32 %v1655_v18, %v1604_v53  ;;  %v2155_v61 = vmul.f32 %v8601_v23, %v6087_v13  ;;  %v13097_v18 = vld [vmem:[#allocation99_spill] sm:$0xff] }
 0x1ed   :  { %3070 = vst [vmem:[%s12101_s5 + $0xa8] sm:$0xff] %v3034_v21  ;;  %v2354_v46 = vadd.f32 %v13048_v55, %v2303_v22  ;;  %v2255_v47 = vmul.f32 %v8606_v14, %v6090_v27  ;;  %v2444_v54 = vmul.f32 %v6148_v3, %v13084_v4  ;;  %v2482_v1 = vmul.f32 %v13072_v29, %v13095_v42 }
 0x1ee   :  { %v2665_v59 = vadd.f32 %v2629_v63, %v2591_v57  ;;  %v1053_v31 = vadd.f32 %v1004_v40, %v953_v34  ;;  %v1804_v6 = vadd.f32 %v1755_v28, %v1704_v19  ;;  %v2556_v41 = vmul.f32 %v6154_v58, %v8625_v26  ;;  %v8660_v57 = vld [vmem:[%s12096_s0 + $0x540] sm:$0xff]  ;;  %v13098_v40 = vld [vmem:[#allocation59_spill] sm:$0xff] }
 0x1ef   :  { %v8647_v15 = vmax.f32 %v2354_v46, 0.0  ;;  %v2518_v30 = vadd.f32 %v2482_v1, %v2444_v54  ;;  %v8651_v25 = vmul.f32 %v6172_v49, %v13085_v56  ;;  %v8655_v9 = vmul.f32 %v12876_v24, %v13097_v18  ;;  %v8676_v1 = vld [vmem:[%s12096_s0 + $0x548] sm:$0xff] }
 0x1f0   :  { %v2739_v53 = vadd.f32 %v2703_v2, %v2665_v59  ;;  %v1153_v21 = vadd.f32 %v1104_v16, %v1053_v31  ;;  %v1904_v22 = vadd.f32 %v1855_v45, %v1804_v6  ;;  %v554_v28 = vmul.f32 %v13098_v40, %v5805_v10  ;;  %v13099_v2 = vld [vmem:[#allocation64_spill] sm:$0xff]  ;;  %v8686_v31 = vld [vmem:[%s12096_s0 + $0x748] sm:$0xff] }
 0x1f1   :  { %13096 = vst [vmem:[#allocation112_spill] sm:$0xff] %v8647_v15  ;;  %v2925_v63 = vmul.f32 %v12896_v36, %v8647_v15  ;;  %v2592_v34 = vadd.f32 %v2556_v41, %v2518_v30  ;;  %v8668_v19 = vmul.f32 %v13051_v11, %v8647_v15  ;;  %v555_v16 = vmul.f32 %v13099_v2, %v5805_v10  ;;  %v8681_v59 = vld [vmem:[%s12096_s0 + $0x740] sm:$0xff]  ;;  %v13100_v6 = vld [vmem:[#allocation65_spill] sm:$0xff]  ;;  %v13104_v15 = vld [vmem:[#allocation15_spill] sm:$0xff] }
 0x1f2   :  { %v2813_v45 = vadd.f32 %v8575_v17, %v2739_v53  ;;  %v1253_v46 = vadd.f32 %v1204_v33, %v1153_v21  ;;  %v2004_v54 = vadd.f32 %v1955_v39, %v1904_v22  ;;  %v605_v17 = vmul.f32 %v13100_v6, %v13040_v52  ;;  %v13101_v39 = vld [vmem:[#allocation82_spill] sm:$0xff]  ;;  %v13102_v30 = vld [vmem:[#allocation96_spill] sm:$0xff] }
 0x1f3   :  { %v606_v33 = vmul.f32 %v13101_v39, %v13040_v52  ;;  %v705_v41 = vmul.f32 %v13099_v2, %v13042_v43  ;;  %v706_v53 = vmul.f32 %v13102_v30, %v13042_v43  ;;  %v805_v21 = vmul.f32 %v8660_v57, %v12862_v62  ;;  %v13103_v22 = vld [vmem:[#allocation110_spill] sm:$0xff] }
 0x1f4   :  { %v2887_v18 = vadd.f32 %v13103_v22, %v2813_v45  ;;  %v1353_v42 = vadd.f32 %v1304_v50, %v1253_v46  ;;  %v2104_v56 = vadd.f32 %v2055_v44, %v2004_v54  ;;  %v654_v4 = vadd.f32 %v605_v17, %v554_v28  ;;  %v8709_v50 = vld [vmem:[%s12096_s0 + $0x550] sm:$0xff]  ;;  %v8714_v44 = vld [vmem:[%s12096_s0 + $0x180] sm:$0xff]  ;;  %v8728_v54 = vld [vmem:[%s12096_s0 + $0x188] sm:$0xff] }
 0x1f5   :  { %v655_v14 = vadd.f32 %v606_v33, %v555_v16  ;;  %v806_v23 = vmul.f32 %v8676_v1, %v12862_v62  ;;  %v905_v26 = vmul.f32 %v8681_v59, %v13104_v15  ;;  %v906_v20 = vmul.f32 %v8686_v31, %v13104_v15  ;;  %13105 = vst [vmem:[#allocation59_spill] sm:$0xff] %v8714_v44 }
 0x1f6   :  { %v2961_v11 = vadd.f32 %v2925_v63, %v2887_v18  ;;  %v1404_v43 = vadd.f32 %v13093_v38, %v1353_v42  ;;  %v2204_v52 = vadd.f32 %v2155_v61, %v2104_v56  ;;  %v754_v28 = vadd.f32 %v705_v41, %v654_v4  ;;  %v13106_v42 = vld [vmem:[#allocation17_spill] sm:$0xff]  ;;  %13108 = vst [vmem:[#allocation65_spill] sm:$0xff] %v8728_v54  ;;  %v8733_v4 = vld [vmem:[%s12096_s0 + $0x380] sm:$0xff] }
 0x1f7   :  { %v755_v16 = vadd.f32 %v706_v53, %v655_v14  ;;  %v1005_v45 = vmul.f32 %v8676_v1, %v13091_v32  ;;  %v1006_v18 = vmul.f32 %v8709_v50, %v13091_v32  ;;  %v1105_v56 = vmul.f32 %v8714_v44, %v13106_v42  ;;  %13109 = vst [vmem:[#allocation82_spill] sm:$0xff] %v8733_v4  ;;  %v8738_v14 = vld [vmem:[%s12096_s0 + $0x388] sm:$0xff] }
 0x1f8   :  { %v2999_v61 = vadd.f32 %v13070_v35, %v2961_v11  ;;  %v8723_v63 = vmax.f32 %v1404_v43, 0.0  ;;  %v2304_v46 = vadd.f32 %v2255_v47, %v2204_v52  ;;  %13110 = vst [vmem:[#allocation96_spill] sm:$0xff] %v8738_v14  ;;  %v854_v17 = vadd.f32 %v805_v21, %v754_v28  ;;  %v8752_v21 = vld [vmem:[%s12096_s0 + $0x190] sm:$0xff] }
 0x1f9   :  { %v855_v11 = vadd.f32 %v806_v23, %v755_v16  ;;  %v1106_v52 = vmul.f32 %v8728_v54, %v13106_v42  ;;  %v1205_v43 = vmul.f32 %v8733_v4, %v13079_v5  ;;  %v1206_v47 = vmul.f32 %v8738_v14, %v13079_v5  ;;  %13111 = vst [vmem:[#allocation110_spill] sm:$0xff] %v8752_v21  ;;  %v13112_v5 = vld [vmem:[#allocation21_spill] sm:$0xff] }
 0x1fa   :  { %13107 = vst [vmem:[#allocation64_spill] sm:$0xff] %v8723_v63  ;;  %v3035_v33 = vmax.f32 %v2999_v61, 0.0  ;;  %v2355_v41 = vadd.f32 %v13048_v55, %v2304_v46  ;;  %v2630_v53 = vmul.f32 %v13060_v37, %v8723_v63  ;;  %v954_v23 = vadd.f32 %v905_v26, %v854_v17 }
 0x1fb   :  { %v955_v22 = vadd.f32 %v906_v20, %v855_v11  ;;  %v1305_v28 = vmul.f32 %v8728_v54, %v13080_v8  ;;  %v1306_v16 = vmul.f32 %v8752_v21, %v13080_v8  ;;  %v1505_v61 = vmul.f32 %v13098_v40, %v13112_v5 }
 0x1fc   :  { %3071 = vst [vmem:[%s12101_s5 + $0xb0] sm:$0xff] %v3035_v33  ;;  %v8763_v46 = vmax.f32 %v2355_v41, 0.0  ;;  %v2666_v63 = vadd.f32 %v2630_v53, %v2592_v34  ;;  %v1054_v55 = vadd.f32 %v1005_v45, %v954_v23  ;;  %v1506_v20 = vmul.f32 %v13099_v2, %v13112_v5 }
 0x1fd   :  { %v1055_v26 = vadd.f32 %v1006_v18, %v955_v22  ;;  %v1556_v17 = vmul.f32 %v13100_v6, %v12889_v60  ;;  %v1557_v11 = vmul.f32 %v13101_v39, %v12889_v60  ;;  %v1656_v40 = vmul.f32 %v13099_v2, %v12891_v51 }
 0x1fe   :  { %13113 = vst [vmem:[#allocation113_spill] sm:$0xff] %v8763_v46  ;;  %v2740_v8 = vadd.f32 %v8651_v25, %v2666_v63  ;;  %v2926_v33 = vmul.f32 %v12896_v36, %v8763_v46  ;;  %v1154_v34 = vadd.f32 %v1105_v56, %v1054_v55  ;;  %v1657_v45 = vmul.f32 %v13102_v30, %v12891_v51 }
 0x1ff   :  { %v1155_v41 = vadd.f32 %v1106_v52, %v1055_v26  ;;  %v1605_v18 = vadd.f32 %v1556_v17, %v1505_v61  ;;  %v1606_v53 = vadd.f32 %v1557_v11, %v1506_v20  ;;  %v1756_v6 = vmul.f32 %v8660_v57, %v6023_v48 }
 0x200   :  { %v2814_v39 = vadd.f32 %v8655_v9, %v2740_v8  ;;  %v1254_v23 = vadd.f32 %v1205_v43, %v1154_v34  ;;  %v1757_v2 = vmul.f32 %v8676_v1, %v6023_v48  ;;  %v1856_v25 = vmul.f32 %v8681_v59, %v6026_v0 }
 0x201   :  { %v1255_v63 = vadd.f32 %v1206_v47, %v1155_v41  ;;  %v1705_v55 = vadd.f32 %v1656_v40, %v1605_v18  ;;  %v1706_v56 = vadd.f32 %v1657_v45, %v1606_v53  ;;  %v1857_v30 = vmul.f32 %v8686_v31, %v6026_v0  ;;  %v13116_v18 = vld [vmem:[#allocation100_spill] sm:$0xff] }
 0x202   :  { %v2888_v52 = vadd.f32 %v8668_v19, %v2814_v39  ;;  %v1354_v22 = vadd.f32 %v1305_v28, %v1254_v23  ;;  %v1956_v57 = vmul.f32 %v8676_v1, %v6081_v12  ;;  %v1957_v8 = vmul.f32 %v8709_v50, %v6081_v12  ;;  %v13117_v23 = vld [vmem:[#allocation101_spill] sm:$0xff] }
 0x203   :  { %v1355_v9 = vadd.f32 %v1306_v16, %v1255_v63  ;;  %v1805_v43 = vadd.f32 %v1756_v6, %v1705_v55  ;;  %v1806_v61 = vadd.f32 %v1757_v2, %v1706_v56  ;;  %v2056_v59 = vmul.f32 %v8714_v44, %v6084_v7  ;;  %v105_v6 = vld [vmem:[%s12096_s0 + $0x150] sm:$0xff] }
 0x204   :  { %v2962_v47 = vadd.f32 %v2926_v33, %v2888_v52  ;;  %v1405_v20 = vadd.f32 %v13093_v38, %v1354_v22  ;;  %v2057_v31 = vmul.f32 %v8728_v54, %v6084_v7  ;;  %v2156_v19 = vmul.f32 %v8733_v4, %v6087_v13  ;;  %v13118_v63 = vld [vmem:[#allocation102_spill] sm:$0xff] }
 0x205   :  { %v1406_v1 = vadd.f32 %v13093_v38, %v1355_v9  ;;  %v1905_v28 = vadd.f32 %v1856_v25, %v1805_v43  ;;  %v1906_v26 = vadd.f32 %v1857_v30, %v1806_v61  ;;  %v2157_v16 = vmul.f32 %v8738_v14, %v6087_v13  ;;  %v5277_v56 = vld [vmem:[%s12096_s0 + $0x750] sm:$0xff]  ;;  %v13120_v61 = vld [vmem:[#allocation12_spill] sm:$0xff] }
 0x206   :  { %v3000_v17 = vadd.f32 %v13070_v35, %v2962_v47  ;;  %v8803_v11 = vmax.f32 %v1405_v20, 0.0  ;;  %v2256_v40 = vmul.f32 %v8728_v54, %v6090_v27  ;;  %v2257_v33 = vmul.f32 %v8752_v21, %v6090_v27  ;;  %v13121_v47 = vld [vmem:[#allocation68_spill] sm:$0xff] }
 0x207   :  { %v8809_v34 = vmax.f32 %v1406_v1, 0.0  ;;  %v2005_v45 = vadd.f32 %v1956_v57, %v1905_v28  ;;  %v2006_v41 = vadd.f32 %v1957_v8, %v1906_v26  ;;  %v2445_v53 = vmul.f32 %v6148_v3, %v13116_v18  ;;  %v13119_v57 = vld [vmem:[#allocation103_spill] sm:$0xff]  ;;  %v13122_v1 = vld [vmem:[#allocation13_spill] sm:$0xff] }
 0x208   :  { %13114 = vst [vmem:[#allocation114_spill] sm:$0xff] %v8803_v11  ;;  %v3036_v39 = vmax.f32 %v3000_v17, 0.0  ;;  %v2483_v2 = vmul.f32 %v13072_v29, %v13117_v23  ;;  %v2557_v25 = vmul.f32 %v6154_v58, %v8803_v11  ;;  %v2705_v55 = vmul.f32 %v6172_v49, %v13118_v63  ;;  %v13123_v28 = vld [vmem:[#allocation69_spill] sm:$0xff]  ;;  %v8840_v17 = vld [vmem:[%s12096_s0 + $0x558] sm:$0xff] }
 0x209   :  { %13115 = vst [vmem:[#allocation115_spill] sm:$0xff] %v8809_v34  ;;  %v2105_v30 = vadd.f32 %v2056_v59, %v2005_v45  ;;  %v2106_v52 = vadd.f32 %v2057_v31, %v2006_v41  ;;  %v2631_v22 = vmul.f32 %v13060_v37, %v8809_v34  ;;  %v2779_v8 = vmul.f32 %v12876_v24, %v13119_v57  ;;  %v13127_v18 = vld [vmem:[#allocation19_spill] sm:$0xff] }
 0x20a   :  { %3072 = vst [vmem:[%s12101_s5 + $0xb8] sm:$0xff] %v3036_v39  ;;  %v2519_v9 = vadd.f32 %v2483_v2, %v2445_v53  ;;  %v556_v43 = vmul.f32 %v5805_v10, %v105_v6  ;;  %v607_v20 = vmul.f32 %v13121_v47, %v13120_v61  ;;  %v707_v59 = vmul.f32 %v13123_v28, %v13122_v1  ;;  %v8848_v39 = vld [vmem:[%s12096_s0 + $0x390] sm:$0xff] }
 0x20b   :  { %v2205_v31 = vadd.f32 %v2156_v19, %v2105_v30  ;;  %v2206_v26 = vadd.f32 %v2157_v16, %v2106_v52  ;;  %v807_v45 = vmul.f32 %v8709_v50, %v12862_v62  ;;  %v907_v41 = vmul.f32 %v5277_v56, %v13104_v15  ;;  %13124 = vst [vmem:[#allocation12_spill] sm:$0xff] %v8848_v39  ;;  %v8853_v19 = vld [vmem:[%s12096_s0 + $0x198] sm:$0xff] }
 0x20c   :  { %v2593_v53 = vadd.f32 %v2557_v25, %v2519_v9  ;;  %13125 = vst [vmem:[#allocation68_spill] sm:$0xff] %v8853_v19  ;;  %v656_v16 = vadd.f32 %v607_v20, %v556_v43  ;;  %v1007_v2 = vmul.f32 %v8840_v17, %v13091_v32  ;;  %v1107_v30 = vmul.f32 %v8752_v21, %v13106_v42  ;;  %v13126_v25 = vld [vmem:[#allocation18_spill] sm:$0xff]  ;;  %v13128_v20 = vld [vmem:[#allocation28_spill] sm:$0xff] }
 0x20d   :  { %v2305_v52 = vadd.f32 %v2256_v40, %v2205_v31  ;;  %v2306_v63 = vadd.f32 %v2257_v33, %v2206_v26  ;;  %v1207_v9 = vmul.f32 %v8848_v39, %v13126_v25  ;;  %v1307_v11 = vmul.f32 %v8853_v19, %v13127_v18 }
 0x20e   :  { %v2667_v14 = vadd.f32 %v2631_v22, %v2593_v53  ;;  %v756_v4 = vadd.f32 %v707_v59, %v656_v16  ;;  %v1507_v54 = vmul.f32 %v13112_v5, %v105_v6  ;;  %v1558_v43 = vmul.f32 %v13121_v47, %v12889_v60 }
 0x20f   :  { %v2356_v44 = vadd.f32 %v13128_v20, %v2305_v52  ;;  %v2357_v46 = vadd.f32 %v13128_v20, %v2306_v63  ;;  %v1658_v40 = vmul.f32 %v13123_v28, %v12891_v51  ;;  %v1758_v33 = vmul.f32 %v8709_v50, %v6023_v48 }
 0x210   :  { %v2741_v31 = vadd.f32 %v2705_v55, %v2667_v14  ;;  %v856_v26 = vadd.f32 %v807_v45, %v756_v4  ;;  %v1607_v37 = vadd.f32 %v1558_v43, %v1507_v54  ;;  %v1858_v22 = vmul.f32 %v5277_v56, %v6026_v0  ;;  %v13131_v54 = vld [vmem:[#allocation36_spill] sm:$0xff] }
 0x211   :  { %v8873_v59 = vmax.f32 %v2356_v44, 0.0  ;;  %v8875_v6 = vmax.f32 %v2357_v46, 0.0  ;;  %v1958_v47 = vmul.f32 %v8840_v17, %v6081_v12  ;;  %v2058_v63 = vmul.f32 %v8752_v21, %v6084_v7 }
 0x212   :  { %v2815_v53 = vadd.f32 %v2779_v8, %v2741_v31  ;;  %v956_v16 = vadd.f32 %v907_v41, %v856_v26  ;;  %v1707_v52 = vadd.f32 %v1658_v40, %v1607_v37  ;;  %v2158_v50 = vmul.f32 %v8848_v39, %v6087_v13  ;;  %v13132_v8 = vld [vmem:[#allocation105_spill] sm:$0xff]  ;;  %v13133_v40 = vld [vmem:[#allocation106_spill] sm:$0xff] }
 0x213   :  { %13129 = vst [vmem:[#allocation69_spill] sm:$0xff] %v8873_v59  ;;  %13130 = vst [vmem:[#allocation28_spill] sm:$0xff] %v8875_v6  ;;  %v2853_v4 = vmul.f32 %v13131_v54, %v8873_v59  ;;  %v2927_v44 = vmul.f32 %v12896_v36, %v8875_v6  ;;  %v2258_v14 = vmul.f32 %v8853_v19, %v6090_v27  ;;  %v13136_v59 = vld [vmem:[#allocation72_spill] sm:$0xff] }
 0x214   :  { %v2446_v46 = vmul.f32 %v6148_v3, %v13117_v23  ;;  %v1056_v55 = vadd.f32 %v1007_v2, %v956_v16  ;;  %v1807_v56 = vadd.f32 %v1758_v33, %v1707_v52  ;;  %v2484_v37 = vmul.f32 %v13072_v29, %v13132_v8  ;;  %v5278_v2 = vld [vmem:[%s12096_s0 + $0x758] sm:$0xff] }
 0x215   :  { %v2558_v45 = vmul.f32 %v6154_v58, %v8809_v34  ;;  %v2889_v41 = vadd.f32 %v2853_v4, %v2815_v53  ;;  %v8897_v43 = vmul.f32 %v6172_v49, %v13119_v57  ;;  %v8901_v31 = vmul.f32 %v12876_v24, %v13133_v40  ;;  %v13135_v57 = vld [vmem:[#allocation71_spill] sm:$0xff] }
 0x216   :  { %v8905_v26 = vmul.f32 %v13131_v54, %v8875_v6  ;;  %v1156_v33 = vadd.f32 %v1107_v30, %v1056_v55  ;;  %v1907_v16 = vadd.f32 %v1858_v22, %v1807_v56  ;;  %v2520_v52 = vadd.f32 %v2484_v37, %v2446_v46  ;;  %v8921_v30 = vld [vmem:[%s12096_s0 + $0x560] sm:$0xff]  ;;  %v8928_v46 = vld [vmem:[%s12096_s0 + $0x398] sm:$0xff] }
 0x217   :  { %v557_v53 = vmul.f32 %v13123_v28, %v5805_v10  ;;  %v2963_v4 = vadd.f32 %v2927_v44, %v2889_v41  ;;  %v608_v23 = vmul.f32 %v13135_v57, %v13120_v61  ;;  %v708_v39 = vmul.f32 %v13136_v59, %v13122_v1  ;;  %13137 = vst [vmem:[#allocation71_spill] sm:$0xff] %v8928_v46 }
 0x218   :  { %13134 = vst [vmem:[#allocation116_spill] sm:$0xff] %v8905_v26  ;;  %v808_v6 = vmul.f32 %v8840_v17, %v12862_v62  ;;  %v1256_v34 = vadd.f32 %v1207_v9, %v1156_v33  ;;  %v2007_v21 = vadd.f32 %v1958_v47, %v1907_v16  ;;  %v2594_v26 = vadd.f32 %v2558_v45, %v2520_v52  ;;  %v8933_v9 = vld [vmem:[%s12096_s0 + $0x1a0] sm:$0xff] }
 0x219   :  { %v908_v22 = vmul.f32 %v5278_v2, %v13104_v15  ;;  %v3001_v44 = vadd.f32 %v13070_v35, %v2963_v4  ;;  %13138 = vst [vmem:[#allocation72_spill] sm:$0xff] %v8933_v9  ;;  %v657_v47 = vadd.f32 %v608_v23, %v557_v53  ;;  %v1008_v55 = vmul.f32 %v8921_v30, %v13091_v32 }
 0x21a   :  { %v1108_v56 = vmul.f32 %v8853_v19, %v13106_v42  ;;  %v1356_v37 = vadd.f32 %v1307_v11, %v1256_v34  ;;  %v2107_v45 = vadd.f32 %v2058_v63, %v2007_v21  ;;  %v1208_v41 = vmul.f32 %v8928_v46, %v13126_v25 }
 0x21b   :  { %v1308_v33 = vmul.f32 %v8933_v9, %v13127_v18  ;;  %v3037_v16 = vmax.f32 %v3001_v44, 0.0  ;;  %v757_v52 = vadd.f32 %v708_v39, %v657_v47  ;;  %v1508_v4 = vmul.f32 %v13123_v28, %v13112_v5 }
 0x21c   :  { %v1559_v23 = vmul.f32 %v13135_v57, %v12889_v60  ;;  %v1407_v53 = vadd.f32 %v13093_v38, %v1356_v37  ;;  %v2207_v35 = vadd.f32 %v2158_v50, %v2107_v45  ;;  %v1659_v21 = vmul.f32 %v13136_v59, %v12891_v51 }
 0x21d   :  { %v1759_v11 = vmul.f32 %v8840_v17, %v6023_v48  ;;  %3073 = vst [vmem:[%s12101_s5 + $0xc0] sm:$0xff] %v3037_v16  ;;  %v857_v34 = vadd.f32 %v808_v6, %v757_v52  ;;  %v1859_v28 = vmul.f32 %v5278_v2, %v6026_v0  ;;  %v1959_v57 = vmul.f32 %v8921_v30, %v6081_v12  ;;  %v13140_v16 = vld [vmem:[#allocation30_spill] sm:$0xff] }
 0x21e   :  { %v1608_v39 = vadd.f32 %v1559_v23, %v1508_v4  ;;  %v8958_v63 = vmax.f32 %v1407_v53, 0.0  ;;  %v2307_v50 = vadd.f32 %v2258_v14, %v2207_v35  ;;  %v2059_v44 = vmul.f32 %v8853_v19, %v6084_v7  ;;  %v13141_v35 = vld [vmem:[#allocation104_spill] sm:$0xff] }
 0x21f   :  { %v2159_v17 = vmul.f32 %v8928_v46, %v6087_v13  ;;  %v957_v47 = vadd.f32 %v908_v22, %v857_v34  ;;  %v2259_v6 = vmul.f32 %v8933_v9, %v6090_v27  ;;  %v2447_v2 = vmul.f32 %v6148_v3, %v13132_v8 }
 0x220   :  { %13139 = vst [vmem:[#allocation117_spill] sm:$0xff] %v8958_v63  ;;  %v1708_v37 = vadd.f32 %v1659_v21, %v1608_v39  ;;  %v2358_v45 = vadd.f32 %v13128_v20, %v2307_v50  ;;  %v2632_v52 = vmul.f32 %v13140_v16, %v8958_v63  ;;  %v2485_v14 = vmul.f32 %v13072_v29, %v13141_v35  ;;  %v13142_v21 = vld [vmem:[#allocation107_spill] sm:$0xff] }
 0x221   :  { %v2559_v4 = vmul.f32 %v6154_v58, %v8958_v63  ;;  %v1057_v23 = vadd.f32 %v1008_v55, %v957_v47  ;;  %v8977_v53 = vmul.f32 %v6172_v49, %v13133_v40  ;;  %v8981_v34 = vmul.f32 %v12876_v24, %v13142_v21  ;;  %v5279_v55 = vld [vmem:[%s12096_s0 + $0x760] sm:$0xff] }
 0x222   :  { %v1808_v22 = vadd.f32 %v1759_v11, %v1708_v37  ;;  %v8983_v39 = vmax.f32 %v2358_v45, 0.0  ;;  %v2668_v50 = vadd.f32 %v2632_v52, %v2594_v26  ;;  %v2521_v8 = vadd.f32 %v2485_v14, %v2447_v2  ;;  %v13144_v11 = vld [vmem:[#allocation76_spill] sm:$0xff]  ;;  %v13145_v37 = vld [vmem:[#allocation77_spill] sm:$0xff] }
 0x223   :  { %v558_v46 = vmul.f32 %v13136_v59, %v5805_v10  ;;  %v1157_v19 = vadd.f32 %v1108_v56, %v1057_v23  ;;  %v609_v47 = vmul.f32 %v13144_v11, %v13120_v61  ;;  %v709_v40 = vmul.f32 %v13145_v37, %v13122_v1  ;;  %v9004_v14 = vld [vmem:[%s12096_s0 + $0x568] sm:$0xff] }
 0x224   :  { %13143 = vst [vmem:[#allocation30_spill] sm:$0xff] %v8983_v39  ;;  %v1908_v29 = vadd.f32 %v1859_v28, %v1808_v22  ;;  %v2742_v45 = vadd.f32 %v8897_v43, %v2668_v50  ;;  %v2928_v26 = vmul.f32 %v12896_v36, %v8983_v39  ;;  %v2595_v2 = vadd.f32 %v2559_v4, %v2521_v8  ;;  %v9012_v8 = vld [vmem:[%s12096_s0 + $0x3a0] sm:$0xff] }
 0x225   :  { %v8999_v56 = vmul.f32 %v13131_v54, %v8983_v39  ;;  %v1257_v28 = vadd.f32 %v1208_v41, %v1157_v19  ;;  %v658_v23 = vadd.f32 %v609_v47, %v558_v46  ;;  %v809_v22 = vmul.f32 %v8921_v30, %v12862_v62  ;;  %13146 = vst [vmem:[#allocation76_spill] sm:$0xff] %v9012_v8  ;;  %v13148_v47 = vld [vmem:[#allocation116_spill] sm:$0xff] }
 0x226   :  { %v2008_v52 = vadd.f32 %v1959_v57, %v1908_v29  ;;  %v2816_v43 = vadd.f32 %v8901_v31, %v2742_v45  ;;  %v909_v4 = vmul.f32 %v5279_v55, %v13104_v15  ;;  %v1009_v29 = vmul.f32 %v9004_v14, %v13091_v32  ;;  %v9022_v57 = vld [vmem:[%s12096_s0 + $0x1a8] sm:$0xff] }
 0x227   :  { %v1109_v19 = vmul.f32 %v8933_v9, %v13106_v42  ;;  %v1357_v41 = vadd.f32 %v1308_v33, %v1257_v28  ;;  %13147 = vst [vmem:[#allocation77_spill] sm:$0xff] %v9022_v57  ;;  %v758_v31 = vadd.f32 %v709_v40, %v658_v23  ;;  %v1209_v50 = vmul.f32 %v9012_v8, %v13126_v25 }
 0x228   :  { %v2108_v46 = vadd.f32 %v2059_v44, %v2008_v52  ;;  %v2890_v45 = vadd.f32 %v13148_v47, %v2816_v43  ;;  %v1309_v39 = vmul.f32 %v9022_v57, %v13127_v18  ;;  %v1509_v63 = vmul.f32 %v13136_v59, %v13112_v5 }
 0x229   :  { %v1560_v33 = vmul.f32 %v13144_v11, %v12889_v60  ;;  %v1408_v44 = vadd.f32 %v13093_v38, %v1357_v41  ;;  %v858_v52 = vadd.f32 %v809_v22, %v758_v31  ;;  %v1660_v40 = vmul.f32 %v13145_v37, %v12891_v51  ;;  %v13150_v41 = vld [vmem:[#allocation38_spill] sm:$0xff] }
 0x22a   :  { %v2208_v28 = vadd.f32 %v2159_v17, %v2108_v46  ;;  %v2964_v23 = vadd.f32 %v2928_v26, %v2890_v45  ;;  %v1760_v43 = vmul.f32 %v8921_v30, %v6023_v48  ;;  %v1860_v47 = vmul.f32 %v5279_v55, %v6026_v0  ;;  %v13151_v45 = vld [vmem:[#allocation108_spill] sm:$0xff] }
 0x22b   :  { %v1609_v25 = vadd.f32 %v1560_v33, %v1509_v63  ;;  %v9039_v18 = vmax.f32 %v1408_v44, 0.0  ;;  %v958_v5 = vadd.f32 %v909_v4, %v858_v52  ;;  %v1960_v11 = vmul.f32 %v9004_v14, %v6081_v12  ;;  %v13152_v33 = vld [vmem:[#allocation29_spill] sm:$0xff] }
 0x22c   :  { %v2308_v59 = vadd.f32 %v2259_v6, %v2208_v28  ;;  %v3002_v17 = vadd.f32 %v13150_v41, %v2964_v23  ;;  %v2060_v46 = vmul.f32 %v8933_v9, %v6084_v7  ;;  %v2160_v63 = vmul.f32 %v9012_v8, %v6087_v13 }
 0x22d   :  { %13149 = vst [vmem:[#allocation116_spill] sm:$0xff] %v9039_v18  ;;  %v1709_v22 = vadd.f32 %v1660_v40, %v1609_v25  ;;  %v2633_v55 = vmul.f32 %v13140_v16, %v9039_v18  ;;  %v1058_v26 = vadd.f32 %v1009_v29, %v958_v5  ;;  %v2260_v6 = vmul.f32 %v9022_v57, %v6090_v27 }
 0x22e   :  { %v2359_v30 = vadd.f32 %v13128_v20, %v2308_v59  ;;  %v3038_v4 = vmax.f32 %v3002_v17, 0.0  ;;  %v2448_v25 = vmul.f32 %v6148_v3, %v13141_v35  ;;  %v2486_v44 = vmul.f32 %v13152_v33, %v13151_v45  ;;  %v13154_v59 = vld [vmem:[#allocation109_spill] sm:$0xff] }
 0x22f   :  { %v1809_v31 = vadd.f32 %v1760_v43, %v1709_v22  ;;  %v2669_v52 = vadd.f32 %v2633_v55, %v2595_v2  ;;  %v1158_v40 = vadd.f32 %v1109_v19, %v1058_v26  ;;  %v2560_v23 = vmul.f32 %v6154_v58, %v9039_v18  ;;  %v13161_v18 = vld [vmem:[#allocation21_spill] sm:$0xff] }
 0x230   :  { %v9057_v28 = vmax.f32 %v2359_v30, 0.0  ;;  %3074 = vst [vmem:[%s12101_s5 + $0xc8] sm:$0xff] %v3038_v4  ;;  %v2522_v29 = vadd.f32 %v2486_v44, %v2448_v25  ;;  %v2708_v43 = vmul.f32 %v6172_v49, %v13142_v21  ;;  %v9068_v17 = vmul.f32 %v12876_v24, %v13154_v59  ;;  %v9107_v21 = vld [vmem:[%s12096_s0 + $0x1b0] sm:$0xff] }
 0x231   :  { %v1909_v5 = vadd.f32 %v1860_v47, %v1809_v31  ;;  %v2743_v22 = vadd.f32 %v8977_v53, %v2669_v52  ;;  %v1258_v19 = vadd.f32 %v1209_v50, %v1158_v40  ;;  %v5280_v47 = vld [vmem:[%s12096_s0 + $0x768] sm:$0xff]  ;;  %v559_v4 = vmul.f32 %v13145_v37, %v5805_v10  ;;  %v13155_v31 = vld [vmem:[#allocation79_spill] sm:$0xff]  ;;  %v9088_v50 = vld [vmem:[%s12096_s0 + $0x570] sm:$0xff] }
 0x232   :  { %13153 = vst [vmem:[#allocation29_spill] sm:$0xff] %v9057_v28  ;;  %v2929_v2 = vmul.f32 %v12896_v36, %v9057_v28  ;;  %v9075_v30 = vmul.f32 %v13131_v54, %v9057_v28  ;;  %v2596_v26 = vadd.f32 %v2560_v23, %v2522_v29  ;;  %v610_v53 = vmul.f32 %v13155_v31, %v13120_v61  ;;  %v13156_v52 = vld [vmem:[#allocation75_spill] sm:$0xff] }
 0x233   :  { %v2009_v55 = vadd.f32 %v1960_v11, %v1909_v5  ;;  %v2817_v25 = vadd.f32 %v8981_v34, %v2743_v22  ;;  %v1358_v44 = vadd.f32 %v1309_v39, %v1258_v19  ;;  %v710_v40 = vmul.f32 %v13156_v52, %v13122_v1  ;;  %v9097_v5 = vld [vmem:[%s12096_s0 + $0x3a8] sm:$0xff]  ;;  %13158 = vst [vmem:[#allocation75_spill] sm:$0xff] %v9107_v21  ;;  %v13160_v28 = vld [vmem:[#allocation19_spill] sm:$0xff] }
 0x234   :  { %v810_v11 = vmul.f32 %v9004_v14, %v12862_v62  ;;  %13157 = vst [vmem:[#allocation79_spill] sm:$0xff] %v9097_v5  ;;  %v659_v29 = vadd.f32 %v610_v53, %v559_v4  ;;  %v910_v34 = vmul.f32 %v5280_v47, %v13104_v15  ;;  %v1010_v39 = vmul.f32 %v9088_v50, %v13091_v32 }
 0x235   :  { %v2109_v23 = vadd.f32 %v2060_v46, %v2009_v55  ;;  %v2891_v22 = vadd.f32 %v8999_v56, %v2817_v25  ;;  %v1409_v19 = vadd.f32 %v13093_v38, %v1358_v44  ;;  %v1110_v46 = vmul.f32 %v9022_v57, %v13106_v42  ;;  %v13159_v55 = vld [vmem:[#allocation18_spill] sm:$0xff] }
 0x236   :  { %v1210_v4 = vmul.f32 %v9097_v5, %v13159_v55  ;;  %v759_v35 = vadd.f32 %v710_v40, %v659_v29  ;;  %v1310_v8 = vmul.f32 %v9107_v21, %v13160_v28  ;;  %v1510_v56 = vmul.f32 %v13145_v37, %v13161_v18 }
 0x237   :  { %v2209_v53 = vadd.f32 %v2160_v63, %v2109_v23  ;;  %v2965_v25 = vadd.f32 %v2929_v2, %v2891_v22  ;;  %v9117_v44 = vmax.f32 %v1409_v19, 0.0  ;;  %v1561_v9 = vmul.f32 %v13155_v31, %v12889_v60 }
 0x238   :  { %v1661_v38 = vmul.f32 %v13156_v52, %v12891_v51  ;;  %v859_v32 = vadd.f32 %v810_v11, %v759_v35  ;;  %v1761_v63 = vmul.f32 %v9004_v14, %v6023_v48  ;;  %v1861_v40 = vmul.f32 %v5280_v47, %v6026_v0 }
 0x239   :  { %13162 = vst [vmem:[#allocation18_spill] sm:$0xff] %v9117_v44  ;;  %v2309_v42 = vadd.f32 %v2260_v6, %v2209_v53  ;;  %v3003_v23 = vadd.f32 %v13150_v41, %v2965_v25  ;;  %v2634_v37 = vmul.f32 %v13140_v16, %v9117_v44  ;;  %v1610_v2 = vadd.f32 %v1561_v9, %v1510_v56 }
 0x23a   :  { %v1961_v29 = vmul.f32 %v9088_v50, %v6081_v12  ;;  %v959_v22 = vadd.f32 %v910_v34, %v859_v32  ;;  %v2061_v35 = vmul.f32 %v9022_v57, %v6084_v7  ;;  %v2161_v14 = vmul.f32 %v9097_v5, %v6087_v13 }
 0x23b   :  { %v2360_v31 = vadd.f32 %v13128_v20, %v2309_v42  ;;  %v3039_v6 = vmax.f32 %v3003_v23, 0.0  ;;  %v2670_v47 = vadd.f32 %v2634_v37, %v2596_v26  ;;  %v1710_v11 = vadd.f32 %v1661_v38, %v1610_v2  ;;  %v13164_v42 = vld [vmem:[#allocation111_spill] sm:$0xff]  ;;  %v13165_v2 = vld [vmem:[#allocation112_spill] sm:$0xff] }
 0x23c   :  { %v2261_v19 = vmul.f32 %v9107_v21, %v6090_v27  ;;  %v1059_v9 = vadd.f32 %v1010_v39, %v959_v22  ;;  %v2449_v56 = vmul.f32 %v6148_v3, %v13151_v45  ;;  %v2487_v32 = vmul.f32 %v13152_v33, %v13164_v42 }
 0x23d   :  { %v9138_v53 = vmax.f32 %v2360_v31, 0.0  ;;  %3075 = vst [vmem:[%s12101_s5 + $0xd0] sm:$0xff] %v3039_v6  ;;  %v2744_v34 = vadd.f32 %v2708_v43, %v2670_v47  ;;  %v1810_v25 = vadd.f32 %v1761_v63, %v1710_v11  ;;  %v2561_v38 = vmul.f32 %v6154_v58, %v9117_v44  ;;  %v5281_v43 = vld [vmem:[%s12096_s0 + $0x770] sm:$0xff]  ;;  %v13173_v44 = vld [vmem:[#allocation20_spill] sm:$0xff] }
 0x23e   :  { %v2709_v26 = vmul.f32 %v6172_v49, %v13154_v59  ;;  %v1159_v23 = vadd.f32 %v1110_v46, %v1059_v9  ;;  %v2523_v37 = vadd.f32 %v2487_v32, %v2449_v56  ;;  %v9155_v31 = vmul.f32 %v12876_v24, %v13165_v2  ;;  %v5330_v46 = vld [vmem:[%s12096_s0 + $0x578] sm:$0xff]  ;;  %v13167_v56 = vld [vmem:[#allocation53_spill] sm:$0xff]  ;;  %v13168_v59 = vld [vmem:[#allocation56_spill] sm:$0xff] }
 0x23f   :  { %13163 = vst [vmem:[#allocation118_spill] sm:$0xff] %v9138_v53  ;;  %v2930_v39 = vmul.f32 %v12896_v36, %v9138_v53  ;;  %v2818_v63 = vadd.f32 %v9068_v17, %v2744_v34  ;;  %v1910_v22 = vadd.f32 %v1861_v40, %v1810_v25  ;;  %v9163_v6 = vmul.f32 %v13131_v54, %v9138_v53 }
 0x240   :  { %v560_v47 = vmul.f32 %v13156_v52, %v5805_v10  ;;  %v1259_v11 = vadd.f32 %v1210_v4, %v1159_v23  ;;  %v2597_v9 = vadd.f32 %v2561_v38, %v2523_v37  ;;  %v611_v32 = vmul.f32 %v13167_v56, %v13120_v61  ;;  %v9181_v4 = vld [vmem:[%s12096_s0 + $0x3b0] sm:$0xff]  ;;  %v9186_v38 = vld [vmem:[%s12096_s0 + $0x1b8] sm:$0xff]  ;;  %v13171_v37 = vld [vmem:[#allocation16_spill] sm:$0xff] }
 0x241   :  { %13166 = vst [vmem:[#allocation119_spill] sm:$0xff] %v9163_v6  ;;  %v711_v17 = vmul.f32 %v13168_v59, %v13122_v1  ;;  %v2892_v40 = vadd.f32 %v9075_v30, %v2818_v63  ;;  %v2010_v34 = vadd.f32 %v1961_v29, %v1910_v22  ;;  %v811_v25 = vmul.f32 %v9088_v50, %v12862_v62  ;;  %v13172_v29 = vld [vmem:[#allocation17_spill] sm:$0xff] }
 0x242   :  { %v911_v45 = vmul.f32 %v5281_v43, %v13104_v15  ;;  %v1359_v5 = vadd.f32 %v1310_v8, %v1259_v11  ;;  %13169 = vst [vmem:[#allocation53_spill] sm:$0xff] %v9181_v4  ;;  %13170 = vst [vmem:[#allocation56_spill] sm:$0xff] %v9186_v38  ;;  %v660_v23 = vadd.f32 %v611_v32, %v560_v47 }
 0x243   :  { %v1011_v30 = vmul.f32 %v5330_v46, %v13171_v37  ;;  %v1111_v63 = vmul.f32 %v9107_v21, %v13172_v29  ;;  %v2966_v22 = vadd.f32 %v2930_v39, %v2892_v40  ;;  %v2110_v53 = vadd.f32 %v2061_v35, %v2010_v34 }
 0x244   :  { %v1211_v8 = vmul.f32 %v9181_v4, %v13159_v55  ;;  %v1311_v11 = vmul.f32 %v9186_v38, %v13160_v28  ;;  %v1410_v57 = vadd.f32 %v13173_v44, %v1359_v5  ;;  %v760_v15 = vadd.f32 %v711_v17, %v660_v23 }
 0x245   :  { %v1511_v6 = vmul.f32 %v13156_v52, %v13161_v18  ;;  %v1562_v47 = vmul.f32 %v13167_v56, %v12889_v60  ;;  %v3004_v32 = vadd.f32 %v13150_v41, %v2966_v22  ;;  %v2210_v29 = vadd.f32 %v2161_v14, %v2110_v53 }
 0x246   :  { %v1662_v35 = vmul.f32 %v13168_v59, %v12891_v51  ;;  %v1762_v39 = vmul.f32 %v9088_v50, %v6023_v48  ;;  %v9205_v40 = vmax.f32 %v1410_v57, 0.0  ;;  %v860_v34 = vadd.f32 %v811_v25, %v760_v15 }
 0x247   :  { %v1611_v5 = vadd.f32 %v1562_v47, %v1511_v6  ;;  %v1862_v17 = vmul.f32 %v5281_v43, %v6026_v0  ;;  %v3040_v23 = vmax.f32 %v3004_v32, 0.0  ;;  %v2310_v52 = vadd.f32 %v2261_v19, %v2210_v29  ;;  %v13175_v43 = vld [vmem:[#allocation64_spill] sm:$0xff] }
 0x248   :  { %13174 = vst [vmem:[#allocation20_spill] sm:$0xff] %v9205_v40  ;;  %v1962_v18 = vmul.f32 %v5330_v46, %v6081_v12  ;;  %v2062_v56 = vmul.f32 %v9107_v21, %v6084_v7  ;;  %v2635_v14 = vmul.f32 %v13140_v16, %v9205_v40  ;;  %v960_v59 = vadd.f32 %v911_v45, %v860_v34  ;;  %v13184_v21 = vld [vmem:[#allocation15_spill] sm:$0xff] }
 0x249   :  { %v1711_v53 = vadd.f32 %v1662_v35, %v1611_v5  ;;  %v2162_v57 = vmul.f32 %v9181_v4, %v6087_v13  ;;  %3076 = vst [vmem:[%s12101_s5 + $0xd8] sm:$0xff] %v3040_v23  ;;  %v2361_v15 = vadd.f32 %v13128_v20, %v2310_v52  ;;  %v2262_v50 = vmul.f32 %v9186_v38, %v6090_v27  ;;  %v13177_v35 = vld [vmem:[#allocation113_spill] sm:$0xff]  ;;  %v9287_v4 = vld [vmem:[%s12096_s0 + $0x590] sm:$0xff] }
 0x24a   :  { %v2450_v19 = vmul.f32 %v6148_v3, %v13164_v42  ;;  %v2488_v6 = vmul.f32 %v13152_v33, %v13175_v43  ;;  %v2671_v45 = vadd.f32 %v2635_v14, %v2597_v9  ;;  %v1060_v46 = vadd.f32 %v1011_v30, %v960_v59  ;;  %v9240_v9 = vld [vmem:[%s12096_s0 + $0x580] sm:$0xff]  ;;  %v13178_v30 = vld [vmem:[#allocation59_spill] sm:$0xff] }
 0x24b   :  { %v1811_v25 = vadd.f32 %v1762_v39, %v1711_v53  ;;  %v2562_v29 = vmul.f32 %v6154_v58, %v9205_v40  ;;  %v9227_v22 = vmax.f32 %v2361_v15, 0.0  ;;  %v9231_v32 = vmul.f32 %v6172_v49, %v13165_v2  ;;  %v9282_v42 = vld [vmem:[%s12096_s0 + $0x1c0] sm:$0xff] }
 0x24c   :  { %v2524_v47 = vadd.f32 %v2488_v6, %v2450_v19  ;;  %v9235_v34 = vmul.f32 %v12876_v24, %v13177_v35  ;;  %v2745_v5 = vadd.f32 %v2709_v26, %v2671_v45  ;;  %v1160_v23 = vadd.f32 %v1111_v63, %v1060_v46  ;;  %v13179_v26 = vld [vmem:[#allocation65_spill] sm:$0xff]  ;;  %v9261_v45 = vld [vmem:[%s12096_s0 + $0x780] sm:$0xff] }
 0x24d   :  { %13176 = vst [vmem:[#allocation120_spill] sm:$0xff] %v9227_v22  ;;  %v1911_v52 = vadd.f32 %v1862_v17, %v1811_v25  ;;  %v561_v39 = vmul.f32 %v13178_v30, %v5805_v10  ;;  %v2931_v14 = vmul.f32 %v12896_v36, %v9227_v22  ;;  %v9248_v53 = vmul.f32 %v13131_v54, %v9227_v22  ;;  %v9256_v6 = vld [vmem:[%s12096_s0 + $0x588] sm:$0xff]  ;;  %v13180_v25 = vld [vmem:[#allocation82_spill] sm:$0xff] }
 0x24e   :  { %v2598_v59 = vadd.f32 %v2562_v29, %v2524_v47  ;;  %v562_v63 = vmul.f32 %v13179_v26, %v5805_v10  ;;  %v2819_v17 = vadd.f32 %v9155_v31, %v2745_v5  ;;  %v1260_v15 = vadd.f32 %v1211_v8, %v1160_v23  ;;  %v9266_v46 = vld [vmem:[%s12096_s0 + $0x788] sm:$0xff]  ;;  %v13182_v47 = vld [vmem:[#allocation110_spill] sm:$0xff] }
 0x24f   :  { %v2011_v19 = vadd.f32 %v1962_v18, %v1911_v52  ;;  %v612_v31 = vmul.f32 %v13180_v25, %v13120_v61  ;;  %v13181_v18 = vld [vmem:[#allocation96_spill] sm:$0xff]  ;;  %v712_v29 = vmul.f32 %v13179_v26, %v13122_v1  ;;  %v713_v5 = vmul.f32 %v13182_v47, %v13122_v1  ;;  %v13183_v52 = vld [vmem:[#allocation119_spill] sm:$0xff] }
 0x250   :  { %v613_v8 = vmul.f32 %v13181_v18, %v13120_v61  ;;  %v812_v23 = vmul.f32 %v9240_v9, %v12862_v62  ;;  %v2893_v35 = vadd.f32 %v13183_v52, %v2819_v17  ;;  %v1360_v2 = vadd.f32 %v1311_v11, %v1260_v15 }
 0x251   :  { %v2111_v43 = vadd.f32 %v2062_v56, %v2011_v19  ;;  %v661_v38 = vadd.f32 %v612_v31, %v561_v39  ;;  %v813_v40 = vmul.f32 %v9256_v6, %v12862_v62  ;;  %v912_v17 = vmul.f32 %v9261_v45, %v13184_v21  ;;  %v9299_v39 = vld [vmem:[%s12096_s0 + $0x1c8] sm:$0xff] }
 0x252   :  { %v662_v22 = vadd.f32 %v613_v8, %v562_v63  ;;  %v913_v11 = vmul.f32 %v9266_v46, %v13184_v21  ;;  %v2967_v56 = vadd.f32 %v2931_v14, %v2893_v35  ;;  %v1411_v15 = vadd.f32 %v13173_v44, %v1360_v2  ;;  %v9304_v63 = vld [vmem:[%s12096_s0 + $0x3c0] sm:$0xff]  ;;  %v9309_v31 = vld [vmem:[%s12096_s0 + $0x3c8] sm:$0xff] }
 0x253   :  { %v2211_v19 = vadd.f32 %v2162_v57, %v2111_v43  ;;  %v761_v8 = vadd.f32 %v712_v29, %v661_v38  ;;  %v1012_v2 = vmul.f32 %v9256_v6, %v13171_v37  ;;  %v1013_v57 = vmul.f32 %v9287_v4, %v13171_v37  ;;  %v13185_v43 = vld [vmem:[#allocation17_spill] sm:$0xff] }
 0x254   :  { %v762_v35 = vadd.f32 %v713_v5, %v662_v22  ;;  %v1112_v14 = vmul.f32 %v9282_v42, %v13185_v43  ;;  %v3005_v52 = vadd.f32 %v13150_v41, %v2967_v56  ;;  %v9318_v54 = vmax.f32 %v1411_v15, 0.0 }
 0x255   :  { %v2311_v21 = vadd.f32 %v2262_v50, %v2211_v19  ;;  %v861_v62 = vadd.f32 %v812_v23, %v761_v8  ;;  %v1113_v38 = vmul.f32 %v9299_v39, %v13185_v43  ;;  %v1212_v22 = vmul.f32 %v9304_v63, %v13159_v55  ;;  %v9332_v50 = vld [vmem:[%s12096_s0 + $0x1d0] sm:$0xff]  ;;  %v13187_v8 = vld [vmem:[#allocation21_spill] sm:$0xff] }
 0x256   :  { %13186 = vst [vmem:[#allocation59_spill] sm:$0xff] %v9318_v54  ;;  %v862_v24 = vadd.f32 %v813_v40, %v762_v35  ;;  %v1213_v29 = vmul.f32 %v9309_v31, %v13159_v55  ;;  %v3041_v5 = vmax.f32 %v3005_v52, 0.0  ;;  %v2636_v56 = vmul.f32 %v13140_v16, %v9318_v54 }
 0x257   :  { %v2362_v37 = vadd.f32 %v13128_v20, %v2311_v21  ;;  %v961_v40 = vadd.f32 %v912_v17, %v861_v62  ;;  %v1312_v15 = vmul.f32 %v9299_v39, %v13160_v28  ;;  %v1313_v19 = vmul.f32 %v9332_v50, %v13160_v28 }
 0x258   :  { %v962_v23 = vadd.f32 %v913_v11, %v862_v24  ;;  %v1512_v35 = vmul.f32 %v13178_v30, %v13187_v8  ;;  %3077 = vst [vmem:[%s12101_s5 + $0xe0] sm:$0xff] %v3041_v5  ;;  %v2672_v52 = vadd.f32 %v2636_v56, %v2598_v59  ;;  %v1513_v62 = vmul.f32 %v13179_v26, %v13187_v8 }
 0x259   :  { %v9343_v21 = vmax.f32 %v2362_v37, 0.0  ;;  %v1061_v54 = vadd.f32 %v1012_v2, %v961_v40  ;;  %v1563_v17 = vmul.f32 %v13180_v25, %v12889_v60  ;;  %v1564_v11 = vmul.f32 %v13181_v18, %v12889_v60 }
 0x25a   :  { %v1062_v24 = vadd.f32 %v1013_v57, %v962_v23  ;;  %v1663_v30 = vmul.f32 %v13179_v26, %v12891_v51  ;;  %v2746_v28 = vadd.f32 %v9231_v32, %v2672_v52  ;;  %v1664_v2 = vmul.f32 %v13182_v47, %v12891_v51 }
 0x25b   :  { %13188 = vst [vmem:[#allocation65_spill] sm:$0xff] %v9343_v21  ;;  %v2932_v37 = vmul.f32 %v12896_v36, %v9343_v21  ;;  %v1161_v59 = vadd.f32 %v1112_v14, %v1061_v54  ;;  %v1612_v57 = vadd.f32 %v1563_v17, %v1512_v35  ;;  %v1613_v56 = vadd.f32 %v1564_v11, %v1513_v62 }
 0x25c   :  { %v1162_v5 = vadd.f32 %v1113_v38, %v1062_v24  ;;  %v1763_v25 = vmul.f32 %v9240_v9, %v6023_v48  ;;  %v2820_v18 = vadd.f32 %v9235_v34, %v2746_v28  ;;  %v1764_v26 = vmul.f32 %v9256_v6, %v6023_v48 }
 0x25d   :  { %v1261_v40 = vadd.f32 %v1212_v22, %v1161_v59  ;;  %v1863_v32 = vmul.f32 %v9261_v45, %v6026_v0  ;;  %v1712_v54 = vadd.f32 %v1663_v30, %v1612_v57  ;;  %v1713_v14 = vadd.f32 %v1664_v2, %v1613_v56  ;;  %v13191_v59 = vld [vmem:[#allocation114_spill] sm:$0xff] }
 0x25e   :  { %v1262_v23 = vadd.f32 %v1213_v29, %v1162_v5  ;;  %v1864_v47 = vmul.f32 %v9266_v46, %v6026_v0  ;;  %v2894_v38 = vadd.f32 %v9248_v53, %v2820_v18  ;;  %v1963_v9 = vmul.f32 %v9256_v6, %v6081_v12  ;;  %v112_v5 = vld [vmem:[%s12096_s0 + $0x190] sm:$0xff] }
 0x25f   :  { %v1361_v35 = vadd.f32 %v1312_v15, %v1261_v40  ;;  %v1812_v34 = vadd.f32 %v1763_v25, %v1712_v54  ;;  %v1813_v22 = vadd.f32 %v1764_v26, %v1713_v14  ;;  %v1964_v52 = vmul.f32 %v9287_v4, %v6081_v12  ;;  %v13192_v25 = vld [vmem:[#allocation115_spill] sm:$0xff]  ;;  %v13193_v14 = vld [vmem:[#allocation12_spill] sm:$0xff] }
 0x260   :  { %v1362_v28 = vadd.f32 %v1313_v19, %v1262_v23  ;;  %v2968_v62 = vadd.f32 %v2932_v37, %v2894_v38  ;;  %v2063_v29 = vmul.f32 %v9282_v42, %v6084_v7  ;;  %v2064_v15 = vmul.f32 %v9299_v39, %v6084_v7  ;;  %v5284_v23 = vld [vmem:[%s12096_s0 + $0x790] sm:$0xff]  ;;  %v13194_v38 = vld [vmem:[#allocation68_spill] sm:$0xff] }
 0x261   :  { %v1412_v45 = vadd.f32 %v13173_v44, %v1361_v35  ;;  %v1912_v24 = vadd.f32 %v1863_v32, %v1812_v34  ;;  %v1913_v53 = vadd.f32 %v1864_v47, %v1813_v22  ;;  %v2163_v17 = vmul.f32 %v9304_v63, %v6087_v13  ;;  %v13195_v34 = vld [vmem:[#allocation69_spill] sm:$0xff] }
 0x262   :  { %v1413_v46 = vadd.f32 %v13173_v44, %v1362_v28  ;;  %v3006_v6 = vadd.f32 %v13150_v41, %v2968_v62  ;;  %v2164_v11 = vmul.f32 %v9309_v31, %v6087_v13  ;;  %v2451_v2 = vmul.f32 %v6148_v3, %v13191_v59  ;;  %v13197_v62 = vld [vmem:[#allocation31_spill] sm:$0xff] }
 0x263   :  { %v9379_v19 = vmax.f32 %v1412_v45, 0.0  ;;  %v2012_v42 = vadd.f32 %v1963_v9, %v1912_v24  ;;  %v2013_v37 = vadd.f32 %v1964_v52, %v1913_v53  ;;  %v2263_v56 = vmul.f32 %v9299_v39, %v6090_v27  ;;  %v13196_v52 = vld [vmem:[#allocation28_spill] sm:$0xff]  ;;  %v5431_v24 = vld [vmem:[%s12096_s0 + $0x3d0] sm:$0xff] }
 0x264   :  { %v9385_v30 = vmax.f32 %v1413_v46, 0.0  ;;  %v3042_v57 = vmax.f32 %v3006_v6, 0.0  ;;  %v2489_v63 = vmul.f32 %v13152_v33, %v13192_v25  ;;  %v2264_v26 = vmul.f32 %v9332_v50, %v6090_v27  ;;  %v9420_v46 = vld [vmem:[%s12096_s0 + $0x598] sm:$0xff] }
 0x265   :  { %13189 = vst [vmem:[#allocation82_spill] sm:$0xff] %v9379_v19  ;;  %v2563_v31 = vmul.f32 %v6154_v58, %v9379_v19  ;;  %v2112_v18 = vadd.f32 %v2063_v29, %v2012_v42  ;;  %v2113_v40 = vadd.f32 %v2064_v15, %v2013_v37  ;;  %v563_v54 = vmul.f32 %v5805_v10, %v112_v5  ;;  %v13198_v15 = vld [vmem:[#allocation14_spill] sm:$0xff] }
 0x266   :  { %13190 = vst [vmem:[#allocation96_spill] sm:$0xff] %v9385_v30  ;;  %v2637_v32 = vmul.f32 %v13140_v16, %v9385_v30  ;;  %3078 = vst [vmem:[%s12101_s5 + $0xe8] sm:$0xff] %v3042_v57  ;;  %v2525_v39 = vadd.f32 %v2489_v63, %v2451_v2  ;;  %v614_v47 = vmul.f32 %v13193_v14, %v13120_v61  ;;  %v13200_v2 = vld [vmem:[#allocation16_spill] sm:$0xff] }
 0x267   :  { %v714_v35 = vmul.f32 %v13194_v38, %v13122_v1  ;;  %v2212_v9 = vadd.f32 %v2163_v17, %v2112_v18  ;;  %v2213_v28 = vadd.f32 %v2164_v11, %v2113_v40  ;;  %v2711_v22 = vmul.f32 %v6172_v49, %v13195_v34  ;;  %v13199_v17 = vld [vmem:[#allocation15_spill] sm:$0xff] }
 0x268   :  { %v2785_v45 = vmul.f32 %v13197_v62, %v13196_v52  ;;  %v2599_v29 = vadd.f32 %v2563_v31, %v2525_v39  ;;  %v663_v53 = vadd.f32 %v614_v47, %v563_v54  ;;  %v814_v6 = vmul.f32 %v9287_v4, %v13198_v15 }
 0x269   :  { %v914_v11 = vmul.f32 %v5284_v23, %v13199_v17  ;;  %v2312_v42 = vadd.f32 %v2263_v56, %v2212_v9  ;;  %v2313_v37 = vadd.f32 %v2264_v26, %v2213_v28  ;;  %v1014_v57 = vmul.f32 %v9420_v46, %v13200_v2 }
 0x26a   :  { %v1114_v63 = vmul.f32 %v9332_v50, %v13185_v43  ;;  %v2673_v31 = vadd.f32 %v2637_v32, %v2599_v29  ;;  %v763_v18 = vadd.f32 %v714_v35, %v663_v53  ;;  %v1514_v40 = vmul.f32 %v13187_v8, %v112_v5  ;;  %v9443_v32 = vld [vmem:[%s12096_s0 + $0x1d8] sm:$0xff] }
 0x26b   :  { %v1565_v39 = vmul.f32 %v13193_v14, %v12889_v60  ;;  %v2363_v54 = vadd.f32 %v13128_v20, %v2312_v42  ;;  %v2364_v47 = vadd.f32 %v13128_v20, %v2313_v37  ;;  %v1214_v56 = vmul.f32 %v5431_v24, %v13159_v55  ;;  %v13203_v53 = vld [vmem:[#allocation19_spill] sm:$0xff] }
 0x26c   :  { %v1665_v26 = vmul.f32 %v13194_v38, %v12891_v51  ;;  %v2747_v9 = vadd.f32 %v2711_v22, %v2673_v31  ;;  %v863_v35 = vadd.f32 %v814_v6, %v763_v18  ;;  %v1765_v14 = vmul.f32 %v9287_v4, %v6023_v48  ;;  %v13204_v6 = vld [vmem:[#allocation36_spill] sm:$0xff] }
 0x26d   :  { %v1614_v5 = vadd.f32 %v1565_v39, %v1514_v40  ;;  %v9447_v28 = vmax.f32 %v2363_v54, 0.0  ;;  %v9449_v29 = vmax.f32 %v2364_v47, 0.0  ;;  %v1314_v42 = vmul.f32 %v9443_v32, %v13203_v53 }
 0x26e   :  { %v1865_v37 = vmul.f32 %v5284_v23, %v6026_v0  ;;  %v2821_v22 = vadd.f32 %v2785_v45, %v2747_v9  ;;  %v963_v31 = vadd.f32 %v914_v11, %v863_v35  ;;  %v1965_v34 = vmul.f32 %v9420_v46, %v6081_v12  ;;  %v13205_v11 = vld [vmem:[#allocation117_spill] sm:$0xff] }
 0x26f   :  { %13201 = vst [vmem:[#allocation110_spill] sm:$0xff] %v9447_v28  ;;  %13202 = vst [vmem:[#allocation119_spill] sm:$0xff] %v9449_v29  ;;  %v1714_v19 = vadd.f32 %v1665_v26, %v1614_v5  ;;  %v2859_v18 = vmul.f32 %v13204_v6, %v9447_v28  ;;  %v2933_v4 = vmul.f32 %v12896_v36, %v9449_v29 }
 0x270   :  { %v2065_v40 = vmul.f32 %v9332_v50, %v6084_v7  ;;  %v2452_v39 = vmul.f32 %v6148_v3, %v13192_v25  ;;  %v1063_v54 = vadd.f32 %v1014_v57, %v963_v31  ;;  %v2165_v45 = vmul.f32 %v5431_v24, %v6087_v13 }
 0x271   :  { %v1814_v23 = vadd.f32 %v1765_v14, %v1714_v19  ;;  %v2490_v47 = vmul.f32 %v13152_v33, %v13205_v11  ;;  %v2895_v26 = vadd.f32 %v2859_v18, %v2821_v22  ;;  %v2265_v9 = vmul.f32 %v9443_v32, %v6090_v27  ;;  %v5285_v19 = vld [vmem:[%s12096_s0 + $0x798] sm:$0xff]  ;;  %v13206_v22 = vld [vmem:[#allocation30_spill] sm:$0xff] }
 0x272   :  { %v2564_v35 = vmul.f32 %v6154_v58, %v9385_v30  ;;  %v9473_v50 = vmul.f32 %v6172_v49, %v13196_v52  ;;  %v1163_v5 = vadd.f32 %v1114_v63, %v1063_v54  ;;  %v564_v24 = vmul.f32 %v13194_v38, %v5805_v10  ;;  %v13207_v18 = vld [vmem:[#allocation71_spill] sm:$0xff]  ;;  %v13208_v52 = vld [vmem:[#allocation72_spill] sm:$0xff] }
 0x273   :  { %v1914_v28 = vadd.f32 %v1865_v37, %v1814_v23  ;;  %v2526_v57 = vadd.f32 %v2490_v47, %v2452_v39  ;;  %v2969_v14 = vadd.f32 %v2933_v4, %v2895_v26  ;;  %v9482_v31 = vmul.f32 %v13197_v62, %v13206_v22  ;;  %v9498_v26 = vld [vmem:[%s12096_s0 + $0x5a0] sm:$0xff] }
 0x274   :  { %v615_v30 = vmul.f32 %v13207_v18, %v13120_v61  ;;  %v715_v63 = vmul.f32 %v13208_v52, %v13122_v1  ;;  %v1263_v37 = vadd.f32 %v1214_v56, %v1163_v5  ;;  %v9490_v54 = vmul.f32 %v13204_v6, %v9449_v29  ;;  %v5432_v56 = vld [vmem:[%s12096_s0 + $0x3d8] sm:$0xff] }
 0x275   :  { %v2014_v39 = vadd.f32 %v1965_v34, %v1914_v28  ;;  %v815_v23 = vmul.f32 %v9420_v46, %v13198_v15  ;;  %v3007_v4 = vadd.f32 %v13150_v41, %v2969_v14  ;;  %v2600_v47 = vadd.f32 %v2564_v35, %v2526_v57 }
 0x276   :  { %v664_v34 = vadd.f32 %v615_v30, %v564_v24  ;;  %v915_v28 = vmul.f32 %v5285_v19, %v13199_v17  ;;  %v1363_v5 = vadd.f32 %v1314_v42, %v1263_v37  ;;  %v1015_v25 = vmul.f32 %v9498_v26, %v13200_v2  ;;  %v9516_v42 = vld [vmem:[%s12096_s0 + $0x1e0] sm:$0xff] }
 0x277   :  { %v2114_v29 = vadd.f32 %v2065_v40, %v2014_v39  ;;  %v1115_v35 = vmul.f32 %v9443_v32, %v13185_v43  ;;  %v3043_v57 = vmax.f32 %v3007_v4, 0.0  ;;  %v1515_v59 = vmul.f32 %v13194_v38, %v13187_v8 }
 0x278   :  { %v764_v14 = vadd.f32 %v715_v63, %v664_v34  ;;  %v1566_v21 = vmul.f32 %v13207_v18, %v12889_v60  ;;  %v1414_v30 = vadd.f32 %v13173_v44, %v1363_v5  ;;  %v1215_v40 = vmul.f32 %v5432_v56, %v13159_v55 }
 0x279   :  { %v2214_v24 = vadd.f32 %v2165_v45, %v2114_v29  ;;  %v1666_v37 = vmul.f32 %v13208_v52, %v12891_v51  ;;  %3079 = vst [vmem:[%s12101_s5 + $0xf0] sm:$0xff] %v3043_v57  ;;  %v1315_v18 = vmul.f32 %v9516_v42, %v13203_v53  ;;  %v1766_v29 = vmul.f32 %v9420_v46, %v6023_v48 }
 0x27a   :  { %v864_v38 = vadd.f32 %v815_v23, %v764_v14  ;;  %v1615_v63 = vadd.f32 %v1566_v21, %v1515_v59  ;;  %v9528_v45 = vmax.f32 %v1414_v30, 0.0  ;;  %v1866_v4 = vmul.f32 %v5285_v19, %v6026_v0 }
 0x27b   :  { %v2314_v39 = vadd.f32 %v2265_v9, %v2214_v24  ;;  %v1966_v34 = vmul.f32 %v9498_v26, %v6081_v12  ;;  %v2066_v23 = vmul.f32 %v9443_v32, %v6084_v7  ;;  %v2453_v57 = vmul.f32 %v6148_v3, %v13205_v11  ;;  %v13210_v9 = vld [vmem:[#allocation116_spill] sm:$0xff] }
 0x27c   :  { %13209 = vst [vmem:[#allocation17_spill] sm:$0xff] %v9528_v45  ;;  %v964_v5 = vadd.f32 %v915_v28, %v864_v38  ;;  %v1715_v41 = vadd.f32 %v1666_v37, %v1615_v63  ;;  %v2638_v59 = vmul.f32 %v13140_v16, %v9528_v45  ;;  %v2166_v46 = vmul.f32 %v5432_v56, %v6087_v13 }
 0x27d   :  { %v2365_v21 = vadd.f32 %v13128_v20, %v2314_v39  ;;  %v2491_v19 = vmul.f32 %v13152_v33, %v13210_v9  ;;  %v2266_v28 = vmul.f32 %v9516_v42, %v6090_v27  ;;  %v2565_v32 = vmul.f32 %v6154_v58, %v9528_v45 }
 0x27e   :  { %v1064_v14 = vadd.f32 %v1015_v25, %v964_v5  ;;  %v1815_v30 = vadd.f32 %v1766_v29, %v1715_v41  ;;  %v2674_v37 = vadd.f32 %v2638_v59, %v2600_v47  ;;  %v565_v63 = vmul.f32 %v13208_v52, %v5805_v10  ;;  %v5286_v25 = vld [vmem:[%s12096_s0 + $0x7a0] sm:$0xff]  ;;  %v13213_v5 = vld [vmem:[#allocation77_spill] sm:$0xff] }
 0x27f   :  { %v9547_v24 = vmax.f32 %v2365_v21, 0.0  ;;  %v2527_v38 = vadd.f32 %v2491_v19, %v2453_v57  ;;  %v13212_v41 = vld [vmem:[#allocation76_spill] sm:$0xff]  ;;  %v716_v11 = vmul.f32 %v13213_v5, %v13122_v1  ;;  %v2713_v57 = vmul.f32 %v6172_v49, %v13206_v22 }
 0x280   :  { %v1164_v39 = vadd.f32 %v1115_v35, %v1064_v14  ;;  %v1915_v56 = vadd.f32 %v1866_v4, %v1815_v30  ;;  %v616_v29 = vmul.f32 %v13212_v41, %v13120_v61  ;;  %v2748_v21 = vadd.f32 %v9473_v50, %v2674_v37  ;;  %v13214_v35 = vld [vmem:[#allocation29_spill] sm:$0xff] }
 0x281   :  { %13211 = vst [vmem:[#allocation21_spill] sm:$0xff] %v9547_v24  ;;  %v2934_v47 = vmul.f32 %v12896_v36, %v9547_v24  ;;  %v2787_v4 = vmul.f32 %v13197_v62, %v13214_v35  ;;  %v816_v30 = vmul.f32 %v9498_v26, %v13198_v15  ;;  %v2601_v1 = vadd.f32 %v2565_v32, %v2527_v38  ;;  %v9575_v37 = vld [vmem:[%s12096_s0 + $0x5a8] sm:$0xff] }
 0x282   :  { %v1264_v59 = vadd.f32 %v1215_v40, %v1164_v39  ;;  %v2015_v19 = vadd.f32 %v1966_v34, %v1915_v56  ;;  %v665_v14 = vadd.f32 %v616_v29, %v565_v63  ;;  %v2822_v45 = vadd.f32 %v9482_v31, %v2748_v21  ;;  %v5433_v63 = vld [vmem:[%s12096_s0 + $0x3e0] sm:$0xff] }
 0x283   :  { %v9570_v50 = vmul.f32 %v13204_v6, %v9547_v24  ;;  %v916_v22 = vmul.f32 %v5286_v25, %v13199_v17  ;;  %v1016_v31 = vmul.f32 %v9575_v37, %v13200_v2  ;;  %v1116_v38 = vmul.f32 %v9516_v42, %v13185_v43 }
 0x284   :  { %v1364_v40 = vadd.f32 %v1315_v18, %v1264_v59  ;;  %v2115_v34 = vadd.f32 %v2066_v23, %v2015_v19  ;;  %v765_v39 = vadd.f32 %v716_v11, %v665_v14  ;;  %v2896_v32 = vadd.f32 %v9490_v54, %v2822_v45  ;;  %v9596_v54 = vld [vmem:[%s12096_s0 + $0x1e8] sm:$0xff] }
 0x285   :  { %v1516_v56 = vmul.f32 %v13208_v52, %v13187_v8  ;;  %v1567_v18 = vmul.f32 %v13212_v41, %v12889_v60  ;;  %v1667_v11 = vmul.f32 %v13213_v5, %v12891_v51  ;;  %v1216_v45 = vmul.f32 %v5433_v63, %v13159_v55 }
 0x286   :  { %v1415_v23 = vadd.f32 %v13173_v44, %v1364_v40  ;;  %v2215_v29 = vadd.f32 %v2166_v46, %v2115_v34  ;;  %v865_v21 = vadd.f32 %v816_v30, %v765_v39  ;;  %v2970_v59 = vadd.f32 %v2934_v47, %v2896_v32  ;;  %v13216_v40 = vld [vmem:[#allocation38_spill] sm:$0xff] }
 0x287   :  { %v1616_v19 = vadd.f32 %v1567_v18, %v1516_v56  ;;  %v1767_v52 = vmul.f32 %v9498_v26, %v6023_v48  ;;  %v1316_v30 = vmul.f32 %v9596_v54, %v13203_v53  ;;  %v1867_v39 = vmul.f32 %v5286_v25, %v6026_v0 }
 0x288   :  { %v9601_v41 = vmax.f32 %v1415_v23, 0.0  ;;  %v2315_v14 = vadd.f32 %v2266_v28, %v2215_v29  ;;  %v965_v46 = vadd.f32 %v916_v22, %v865_v21  ;;  %v3008_v47 = vadd.f32 %v13216_v40, %v2970_v59  ;;  %v13217_v21 = vld [vmem:[#allocation18_spill] sm:$0xff] }
 0x289   :  { %v1716_v34 = vadd.f32 %v1667_v11, %v1616_v19  ;;  %v1967_v32 = vmul.f32 %v9575_v37, %v6081_v12  ;;  %v2067_v22 = vmul.f32 %v9516_v42, %v6084_v7  ;;  %v2454_v29 = vmul.f32 %v6148_v3, %v13210_v9 }
 0x28a   :  { %13215 = vst [vmem:[#allocation12_spill] sm:$0xff] %v9601_v41  ;;  %v2366_v56 = vadd.f32 %v13128_v20, %v2315_v14  ;;  %v2639_v26 = vmul.f32 %v13140_v16, %v9601_v41  ;;  %v1065_v18 = vadd.f32 %v1016_v31, %v965_v46  ;;  %v3044_v28 = vmax.f32 %v3008_v47, 0.0 }
 0x28b   :  { %v1816_v23 = vadd.f32 %v1767_v52, %v1716_v34  ;;  %v2492_v25 = vmul.f32 %v13152_v33, %v13217_v21  ;;  %v2167_v14 = vmul.f32 %v5433_v63, %v6087_v13  ;;  %v2267_v42 = vmul.f32 %v9596_v54, %v6090_v27 }
 0x28c   :  { %v9618_v11 = vmax.f32 %v2366_v56, 0.0  ;;  %v2675_v59 = vadd.f32 %v2639_v26, %v2601_v1  ;;  %v1165_v19 = vadd.f32 %v1116_v38, %v1065_v18  ;;  %3080 = vst [vmem:[%s12101_s5 + $0xf8] sm:$0xff] %v3044_v28  ;;  %v2566_v46 = vmul.f32 %v6154_v58, %v9601_v41  ;;  %v13219_v38 = vld [vmem:[#allocation118_spill] sm:$0xff] }
 0x28d   :  { %v1916_v31 = vadd.f32 %v1867_v39, %v1816_v23  ;;  %v2528_v52 = vadd.f32 %v2492_v25, %v2454_v29  ;;  %v2714_v1 = vmul.f32 %v6172_v49, %v13214_v35  ;;  %v2788_v63 = vmul.f32 %v13197_v62, %v13219_v38  ;;  %v5287_v39 = vld [vmem:[%s12096_s0 + $0x7a8] sm:$0xff] }
 0x28e   :  { %13218 = vst [vmem:[#allocation68_spill] sm:$0xff] %v9618_v11  ;;  %v2749_v47 = vadd.f32 %v2713_v57, %v2675_v59  ;;  %v1265_v34 = vadd.f32 %v1216_v45, %v1165_v19  ;;  %v2935_v56 = vmul.f32 %v12896_v36, %v9618_v11  ;;  %v566_v18 = vmul.f32 %v13213_v5, %v5805_v10  ;;  %v13220_v57 = vld [vmem:[#allocation79_spill] sm:$0xff]  ;;  %v13221_v25 = vld [vmem:[#allocation13_spill] sm:$0xff] }
 0x28f   :  { %v2016_v26 = vadd.f32 %v1967_v32, %v1916_v31  ;;  %v617_v45 = vmul.f32 %v13220_v57, %v13120_v61  ;;  %v2862_v29 = vmul.f32 %v13204_v6, %v9618_v11  ;;  %v13222_v59 = vld [vmem:[#allocation75_spill] sm:$0xff]  ;;  %v2602_v32 = vadd.f32 %v2566_v46, %v2528_v52  ;;  %v9648_v31 = vld [vmem:[%s12096_s0 + $0x5b0] sm:$0xff] }
 0x290   :  { %v2823_v28 = vadd.f32 %v2787_v4, %v2749_v47  ;;  %v1365_v23 = vadd.f32 %v1316_v30, %v1265_v34  ;;  %v717_v19 = vmul.f32 %v13222_v59, %v13221_v25  ;;  %v817_v35 = vmul.f32 %v9575_v37, %v13198_v15  ;;  %v5434_v47 = vld [vmem:[%s12096_s0 + $0x3e8] sm:$0xff] }
 0x291   :  { %v2116_v41 = vadd.f32 %v2067_v22, %v2016_v26  ;;  %v666_v24 = vadd.f32 %v617_v45, %v566_v18  ;;  %v917_v22 = vmul.f32 %v5287_v39, %v13199_v17  ;;  %v1017_v52 = vmul.f32 %v9648_v31, %v13200_v2 }
 0x292   :  { %v2897_v4 = vadd.f32 %v9570_v50, %v2823_v28  ;;  %v1416_v30 = vadd.f32 %v13173_v44, %v1365_v23  ;;  %v1117_v26 = vmul.f32 %v9596_v54, %v13185_v43  ;;  %v1517_v18 = vmul.f32 %v13213_v5, %v13187_v8  ;;  %v9669_v28 = vld [vmem:[%s12096_s0 + $0x1f0] sm:$0xff] }
 0x293   :  { %v2216_v46 = vadd.f32 %v2167_v14, %v2116_v41  ;;  %v766_v34 = vadd.f32 %v717_v19, %v666_v24  ;;  %v1568_v23 = vmul.f32 %v13220_v57, %v12889_v60  ;;  %v1668_v24 = vmul.f32 %v13222_v59, %v12891_v51 }
 0x294   :  { %v2971_v50 = vadd.f32 %v2935_v56, %v2897_v4  ;;  %v9664_v45 = vmax.f32 %v1416_v30, 0.0  ;;  %v1217_v19 = vmul.f32 %v5434_v47, %v13159_v55  ;;  %v1317_v5 = vmul.f32 %v9669_v28, %v13203_v53 }
 0x295   :  { %v2316_v41 = vadd.f32 %v2267_v42, %v2216_v46  ;;  %v866_v14 = vadd.f32 %v817_v35, %v766_v34  ;;  %v1617_v30 = vadd.f32 %v1568_v23, %v1517_v18  ;;  %v1768_v11 = vmul.f32 %v9575_v37, %v6023_v48  ;;  %v13224_v23 = vld [vmem:[#allocation20_spill] sm:$0xff] }
 0x296   :  { %13223 = vst [vmem:[#allocation31_spill] sm:$0xff] %v9664_v45  ;;  %v3009_v56 = vadd.f32 %v13216_v40, %v2971_v50  ;;  %v2640_v4 = vmul.f32 %v13140_v16, %v9664_v45  ;;  %v1868_v42 = vmul.f32 %v5287_v39, %v6026_v0  ;;  %v1968_v35 = vmul.f32 %v9648_v31, %v6081_v12 }
 0x297   :  { %v2367_v57 = vadd.f32 %v13128_v20, %v2316_v41  ;;  %v966_v9 = vadd.f32 %v917_v22, %v866_v14  ;;  %v1717_v53 = vadd.f32 %v1668_v24, %v1617_v30  ;;  %v2068_v50 = vmul.f32 %v9596_v54, %v6084_v7  ;;  %v13227_v30 = vld [vmem:[#allocation53_spill] sm:$0xff] }
 0x298   :  { %v3045_v46 = vmax.f32 %v3009_v56, 0.0  ;;  %v2676_v34 = vadd.f32 %v2640_v4, %v2602_v32  ;;  %v2168_v18 = vmul.f32 %v5434_v47, %v6087_v13  ;;  %v2455_v37 = vmul.f32 %v6148_v3, %v13217_v21 }
 0x299   :  { %v1066_v51 = vadd.f32 %v1017_v52, %v966_v9  ;;  %v2493_v22 = vmul.f32 %v13152_v33, %v13224_v23  ;;  %v9697_v39 = vmax.f32 %v2367_v57, 0.0  ;;  %v1817_v24 = vadd.f32 %v1768_v11, %v1717_v53  ;;  %v5288_v53 = vld [vmem:[%s12096_s0 + $0x7b0] sm:$0xff] }
 0x29a   :  { %3081 = vst [vmem:[%s12101_s5 + $0x100] sm:$0xff] %v3045_v46  ;;  %v2750_v32 = vadd.f32 %v2714_v1, %v2676_v34  ;;  %v2567_v54 = vmul.f32 %v6154_v58, %v9664_v45  ;;  %v2268_v47 = vmul.f32 %v9669_v28, %v6090_v27  ;;  %v9705_v41 = vmul.f32 %v6172_v49, %v13219_v38  ;;  %v13226_v1 = vld [vmem:[#allocation120_spill] sm:$0xff] }
 0x29b   :  { %13225 = vst [vmem:[#allocation14_spill] sm:$0xff] %v9697_v39  ;;  %v1166_v9 = vadd.f32 %v1117_v26, %v1066_v51  ;;  %v2529_v52 = vadd.f32 %v2493_v22, %v2455_v37  ;;  %v2936_v56 = vmul.f32 %v12896_v36, %v9697_v39  ;;  %v1917_v4 = vadd.f32 %v1868_v42, %v1817_v24  ;;  %v13228_v42 = vld [vmem:[#allocation56_spill] sm:$0xff] }
 0x29c   :  { %v2824_v14 = vadd.f32 %v2788_v63, %v2750_v32  ;;  %v567_v51 = vmul.f32 %v13222_v59, %v5805_v10  ;;  %v9716_v26 = vmul.f32 %v13197_v62, %v13226_v1  ;;  %v5337_v63 = vld [vmem:[%s12096_s0 + $0x5b8] sm:$0xff]  ;;  %v618_v57 = vmul.f32 %v13227_v30, %v13120_v61  ;;  %v5435_v32 = vld [vmem:[%s12096_s0 + $0x3f0] sm:$0xff] }
 0x29d   :  { %v1266_v11 = vadd.f32 %v1217_v19, %v1166_v9  ;;  %v718_v46 = vmul.f32 %v13228_v42, %v13221_v25  ;;  %v2017_v37 = vadd.f32 %v1968_v35, %v1917_v4  ;;  %v2603_v22 = vadd.f32 %v2567_v54, %v2529_v52 }
 0x29e   :  { %v2898_v34 = vadd.f32 %v2862_v29, %v2824_v14  ;;  %v9727_v10 = vmul.f32 %v13204_v6, %v9697_v39  ;;  %v667_v24 = vadd.f32 %v618_v57, %v567_v51  ;;  %v818_v9 = vmul.f32 %v9648_v31, %v13198_v15 }
 0x29f   :  { %v1366_v19 = vadd.f32 %v1317_v5, %v1266_v11  ;;  %v918_v61 = vmul.f32 %v5288_v53, %v13199_v17  ;;  %v2117_v25 = vadd.f32 %v2068_v50, %v2017_v37  ;;  %v1018_v29 = vmul.f32 %v5337_v63, %v13200_v2  ;;  %v5484_v5 = vld [vmem:[%s12096_s0 + $0x1f8] sm:$0xff]  ;;  %s9756_s0 = sld [smem:[#allocation6 + $0x9]] }
 0x2a0   :  { %v2972_v45 = vadd.f32 %v2936_v56, %v2898_v34  ;;  %v1118_v35 = vmul.f32 %v9669_v28, %v13185_v43  ;;  %v767_v52 = vadd.f32 %v718_v46, %v667_v24  ;;  %v1518_v14 = vmul.f32 %v13222_v59, %v13187_v8  ;;  %v13229_v50 = vld [vmem:[#allocation23_spill] sm:$0xff] }
 0x2a1   :  { %v1417_v54 = vadd.f32 %v13173_v44, %v1366_v19  ;;  %v1569_v15 = vmul.f32 %v13227_v30, %v12889_v60  ;;  %v2217_v2 = vadd.f32 %v2168_v18, %v2117_v25  ;;  %v1218_v43 = vmul.f32 %v5435_v32, %v13159_v55 }
 0x2a2   :  { %v3010_v17 = vadd.f32 %v13216_v40, %v2972_v45  ;;  %v1669_v56 = vmul.f32 %v13228_v42, %v13229_v50  ;;  %v867_v51 = vadd.f32 %v818_v9, %v767_v52  ;;  %v1769_v8 = vmul.f32 %v9648_v31, %v6023_v48  ;;  %v13231_v45 = vld [vmem:[#allocation19_spill] sm:$0xff]  ;;  %v13237_v50 = vld [vmem:[#allocation26_spill] sm:$0xff] }
 0x2a3   :  { %v9752_v4 = vmax.f32 %v1417_v54, 0.0  ;;  %v1618_v11 = vadd.f32 %v1569_v15, %v1518_v14  ;;  %v2317_v59 = vadd.f32 %v2268_v47, %v2217_v2  ;;  %v1318_v18 = vmul.f32 %v5484_v5, %v13231_v45 }
 0x2a4   :  { %v3046_v60 = vmax.f32 %v3010_v17, 0.0  ;;  %v1869_v55 = vmul.f32 %v5288_v53, %v6026_v0  ;;  %v967_v57 = vadd.f32 %v918_v61, %v867_v51  ;;  %v1969_v48 = vmul.f32 %v5337_v63, %v6081_v12  ;;  %v13232_v53 = vld [vmem:[#allocation59_spill] sm:$0xff]  ;;  %v13235_v61 = vld [vmem:[#allocation24_spill] sm:$0xff] }
 0x2a5   :  { %13230 = vst [vmem:[#allocation15_spill] sm:$0xff] %v9752_v4  ;;  %v2641_v30 = vmul.f32 %v13140_v16, %v9752_v4  ;;  %v1718_v42 = vadd.f32 %v1669_v56, %v1618_v11  ;;  %v2368_v31 = vadd.f32 %v13128_v20, %v2317_v59  ;;  %v2069_v0 = vmul.f32 %v9669_v28, %v6084_v7  ;;  %v13238_v51 = vld [vmem:[#allocation27_spill] sm:$0xff] }
 0x2a6   :  { %3082 = vst [vmem:[%s12101_s5 + $0x108] sm:$0xff] %v3046_v60  ;;  %v2456_v47 = vmul.f32 %v6148_v3, %v13224_v23  ;;  %v2494_v46 = vmul.f32 %v13152_v33, %v13232_v53  ;;  %v1067_v12 = vadd.f32 %v1018_v29, %v967_v57  ;;  %v2169_v37 = vmul.f32 %v5435_v32, %v6087_v13  ;;  %v13240_v57 = vld [vmem:[#allocation33_spill] sm:$0xff] }
 0x2a7   :  { %v2677_v34 = vadd.f32 %v2641_v30, %v2603_v22  ;;  %v1818_v63 = vadd.f32 %v1769_v8, %v1718_v42  ;;  %v9782_v19 = vmax.f32 %v2368_v31, 0.0  ;;  %v2269_v24 = vmul.f32 %v5484_v5, %v6090_v27  ;;  %v13236_v5 = vld [vmem:[#allocation25_spill] sm:$0xff] }
 0x2a8   :  { %v2530_v9 = vadd.f32 %v2494_v46, %v2456_v47  ;;  %v2568_v7 = vmul.f32 %v6154_v58, %v9752_v4  ;;  %v1167_v33 = vadd.f32 %v1118_v35, %v1067_v12  ;;  %v9791_v22 = vstv %s9746_s3  ;;  %v13234_v58 = vld [vmem:[#allocation65_spill] sm:$0xff]  ;;  %v13242_v12 = vld [vmem:[#allocation39_spill] sm:$0xff] }
 0x2a9   :  { %13233 = vst [vmem:[#allocation16_spill] sm:$0xff] %v9782_v19  ;;  %v2751_v3 = vadd.f32 %v9705_v41, %v2677_v34  ;;  %v1918_v28 = vadd.f32 %v1869_v55, %v1818_v63  ;;  %v2937_v13 = vmul.f32 %v12896_v36, %v9782_v19  ;;  %v2716_v27 = vmul.f32 %v6172_v49, %v13226_v1  ;;  %v13239_v55 = vld [vmem:[#allocation32_spill] sm:$0xff] }
 0x2aa   :  { %v2790_v32 = vmul.f32 %v13197_v62, %v13234_v58  ;;  %v3087_v41 = vmul.f32 %v9791_v22, %v13235_v61  ;;  %v1267_v29 = vadd.f32 %v1218_v43, %v1167_v33  ;;  %v9805_v54 = vstv %s9756_s0  ;;  %v13243_v33 = vld [vmem:[#allocation34_spill] sm:$0xff] }
 0x2ab   :  { %v2825_v25 = vadd.f32 %v9716_v26, %v2751_v3  ;;  %v2018_v35 = vadd.f32 %v1969_v48, %v1918_v28  ;;  %v3125_v52 = vmul.f32 %v9805_v54, %v13236_v5  ;;  %v9810_v14 = vstv %s9758_s4 }
 0x2ac   :  { %v9813_v49 = vstv %s9762_s12  ;;  %v9816_v15 = vstv %s9764_s10  ;;  %v1367_v17 = vadd.f32 %v1318_v18, %v1267_v29  ;;  %v3199_v26 = vmul.f32 %v9810_v14, %v13237_v50 }
 0x2ad   :  { %v2899_v62 = vadd.f32 %v9727_v10, %v2825_v25  ;;  %v2118_v2 = vadd.f32 %v2069_v0, %v2018_v35  ;;  %v2604_v43 = vadd.f32 %v2568_v7, %v2530_v9  ;;  %v3161_v56 = vadd.f32 %v3125_v52, %v3087_v41  ;;  %v13244_v41 = vld [vmem:[#allocation40_spill] sm:$0xff]  ;;  %v13246_v35 = vld [vmem:[#allocation35_spill] sm:$0xff] }
 0x2ae   :  { %v3273_v11 = vmul.f32 %v9813_v49, %v13238_v51  ;;  %v9824_v8 = vstv %s9779_s14  ;;  %v1418_v59 = vadd.f32 %v13173_v44, %v1367_v17  ;;  %v2864_v10 = vmul.f32 %v13204_v6, %v9782_v19  ;;  %s11284_s14 = sld [smem:[#allocation6 + $0x19]] }
 0x2af   :  { %v2973_v60 = vadd.f32 %v2937_v13, %v2899_v62  ;;  %v2218_v45 = vadd.f32 %v2169_v37, %v2118_v2  ;;  %v3235_v18 = vadd.f32 %v3199_v26, %v3161_v56  ;;  %v3347_v30 = vmul.f32 %v9816_v15, %v13239_v55  ;;  %v13247_v2 = vld [vmem:[#allocation41_spill] sm:$0xff] }
 0x2b0   :  { %v3421_v42 = vmul.f32 %v9824_v8, %v13240_v57  ;;  %v9834_v48 = vstv %s9787_s15  ;;  %v9837_v0 = vmax.f32 %v1418_v59, 0.0  ;;  %v9840_v46 = vstv %s9793_s16  ;;  %v13248_v59 = vld [vmem:[#allocation43_spill] sm:$0xff]  ;;  %s11286_s15 = sld [smem:[#allocation6 + $0x1a]] }
 0x2b1   :  { %v3011_v31 = vadd.f32 %v13216_v40, %v2973_v60  ;;  %v2318_v47 = vadd.f32 %v2269_v24, %v2218_v45  ;;  %v3309_v44 = vadd.f32 %v3273_v11, %v3235_v18  ;;  %v9842_v34 = vstv %s5518_s17 }
 0x2b2   :  { %13241 = vst [vmem:[#allocation36_spill] sm:$0xff] %v9837_v0  ;;  %v3088_v6 = vmul.f32 %v9791_v22, %v13236_v5  ;;  %v3126_v63 = vmul.f32 %v9805_v54, %v13242_v12  ;;  %v2642_v7 = vmul.f32 %v13140_v16, %v9837_v0  ;;  %v3200_v24 = vmul.f32 %v9810_v14, %v13238_v51 }
 0x2b3   :  { %v3047_v37 = vmax.f32 %v3011_v31, 0.0  ;;  %v2369_v9 = vadd.f32 %v13128_v20, %v2318_v47  ;;  %v3383_v3 = vadd.f32 %v3347_v30, %v3309_v44  ;;  %v3495_v28 = vmul.f32 %v9834_v48, %v13243_v33  ;;  %v13249_v31 = vld [vmem:[#allocation42_spill] sm:$0xff] }
 0x2b4   :  { %v3162_v13 = vadd.f32 %v3126_v63, %v3088_v6  ;;  %v3274_v25 = vmul.f32 %v9813_v49, %v13244_v41  ;;  %v2678_v20 = vadd.f32 %v2642_v7, %v2604_v43  ;;  %v3569_v16 = vmul.f32 %v9840_v46, %v13246_v35 }
 0x2b5   :  { %3083 = vst [vmem:[%s12101_s5 + $0x110] sm:$0xff] %v3047_v37  ;;  %v9860_v29 = vmax.f32 %v2369_v9, 0.0  ;;  %v3348_v52 = vmul.f32 %v9816_v15, %v13240_v57  ;;  %v3457_v62 = vadd.f32 %v3421_v42, %v3383_v3  ;;  %v3422_v26 = vmul.f32 %v9824_v8, %v13247_v2  ;;  %v13266_v57 = vld [vmem:[#allocation67_spill] sm:$0xff] }
 0x2b6   :  { %v3236_v17 = vadd.f32 %v3200_v24, %v3162_v13  ;;  %v3089_v56 = vmul.f32 %v9791_v22, %v13242_v12  ;;  %v2752_v11 = vadd.f32 %v2716_v27, %v2678_v20  ;;  %v3496_v60 = vmul.f32 %v9834_v48, %v13246_v35  ;;  %v13250_v27 = vld [vmem:[#allocation44_spill] sm:$0xff]  ;;  %v13251_v24 = vld [vmem:[#allocation45_spill] sm:$0xff] }
 0x2b7   :  { %13245 = vst [vmem:[#allocation71_spill] sm:$0xff] %v9860_v29  ;;  %v3127_v43 = vmul.f32 %v9805_v54, %v13248_v59  ;;  %v3201_v45 = vmul.f32 %v9810_v14, %v13244_v41  ;;  %v2938_v18 = vmul.f32 %v12896_v36, %v9860_v29  ;;  %v3531_v30 = vadd.f32 %v3495_v28, %v3457_v62 }
 0x2b8   :  { %v3310_v42 = vadd.f32 %v3274_v25, %v3236_v17  ;;  %v3570_v47 = vmul.f32 %v9840_v46, %v13249_v31  ;;  %v2826_v44 = vadd.f32 %v2790_v32, %v2752_v11  ;;  %v3275_v63 = vmul.f32 %v9813_v49, %v13250_v27  ;;  %v13252_v25 = vld [vmem:[#allocation47_spill] sm:$0xff] }
 0x2b9   :  { %v3163_v6 = vadd.f32 %v3127_v43, %v3089_v56  ;;  %v3349_v37 = vmul.f32 %v9816_v15, %v13247_v2  ;;  %v3605_v9 = vadd.f32 %v3569_v16, %v3531_v30  ;;  %v3423_v3 = vmul.f32 %v9824_v8, %v13251_v24 }
 0x2ba   :  { %v3384_v7 = vadd.f32 %v3348_v52, %v3310_v42  ;;  %v3090_v36 = vmul.f32 %v9791_v22, %v13248_v59  ;;  %v2900_v28 = vadd.f32 %v2864_v10, %v2826_v44  ;;  %v3128_v32 = vmul.f32 %v9805_v54, %v13252_v25  ;;  %v13253_v52 = vld [vmem:[#allocation46_spill] sm:$0xff]  ;;  %v13254_v10 = vld [vmem:[#allocation48_spill] sm:$0xff]  ;;  %v13255_v59 = vld [vmem:[#allocation49_spill] sm:$0xff] }
 0x2bb   :  { %v3237_v13 = vadd.f32 %v3201_v45, %v3163_v6  ;;  %v3202_v20 = vmul.f32 %v9810_v14, %v13250_v27  ;;  %v3643_v62 = vadd.f32 %v9842_v34, %v3605_v9  ;;  %v3497_v16 = vmul.f32 %v9834_v48, %v13249_v31 }
 0x2bc   :  { %v3458_v17 = vadd.f32 %v3422_v26, %v3384_v7  ;;  %v3571_v56 = vmul.f32 %v9840_v46, %v13253_v52  ;;  %v2974_v11 = vadd.f32 %v2938_v18, %v2900_v28  ;;  %v3164_v30 = vadd.f32 %v3128_v32, %v3090_v36  ;;  %v13256_v36 = vld [vmem:[#allocation51_spill] sm:$0xff] }
 0x2bd   :  { %v3311_v43 = vadd.f32 %v3275_v63, %v3237_v13  ;;  %v3276_v45 = vmul.f32 %v9813_v49, %v13254_v10  ;;  %v3679_v42 = vmax.f32 %v3643_v62, 0.0  ;;  %v3350_v6 = vmul.f32 %v9816_v15, %v13251_v24 }
 0x2be   :  { %v3532_v44 = vadd.f32 %v3496_v60, %v3458_v17  ;;  %v3424_v26 = vmul.f32 %v9824_v8, %v13255_v59  ;;  %v3012_v9 = vadd.f32 %v13216_v40, %v2974_v11  ;;  %v3238_v2 = vadd.f32 %v3202_v20, %v3164_v30  ;;  %v13257_v20 = vld [vmem:[#allocation50_spill] sm:$0xff] }
 0x2bf   :  { %v3385_v7 = vadd.f32 %v3349_v37, %v3311_v43  ;;  %v3091_v18 = vmul.f32 %v9791_v22, %v13252_v25  ;;  %5519 = vst [vmem:[%s12101_s5 + $0x120] sm:$0xff] %v3679_v42  ;;  %v3498_v60 = vmul.f32 %v9834_v48, %v13253_v52  ;;  %v3129_v28 = vmul.f32 %v9805_v54, %v13256_v36  ;;  %v13258_v43 = vld [vmem:[#allocation52_spill] sm:$0xff] }
 0x2c0   :  { %v3606_v63 = vadd.f32 %v3570_v47, %v3532_v44  ;;  %v3203_v13 = vmul.f32 %v9810_v14, %v13254_v10  ;;  %v3048_v40 = vmax.f32 %v3012_v9, 0.0  ;;  %v3312_v32 = vadd.f32 %v3276_v45, %v3238_v2 }
 0x2c1   :  { %v3459_v37 = vadd.f32 %v3423_v3, %v3385_v7  ;;  %v3572_v62 = vmul.f32 %v9840_v46, %v13257_v20  ;;  %v3165_v11 = vadd.f32 %v3129_v28, %v3091_v18  ;;  %v3277_v47 = vmul.f32 %v9813_v49, %v13258_v43  ;;  %v13259_v3 = vld [vmem:[#allocation54_spill] sm:$0xff]  ;;  %v13260_v18 = vld [vmem:[#allocation57_spill] sm:$0xff] }
 0x2c2   :  { %v3644_v17 = vadd.f32 %v9842_v34, %v3606_v63  ;;  %v3351_v30 = vmul.f32 %v9816_v15, %v13255_v59  ;;  %3084 = vst [vmem:[%s12101_s5 + $0x118] sm:$0xff] %v3048_v40  ;;  %v3386_v44 = vadd.f32 %v3350_v6, %v3312_v32  ;;  %v3425_v2 = vmul.f32 %v9824_v8, %v13259_v3  ;;  %v13261_v6 = vld [vmem:[#allocation55_spill] sm:$0xff]  ;;  %v13262_v32 = vld [vmem:[#allocation58_spill] sm:$0xff] }
 0x2c3   :  { %v3533_v42 = vadd.f32 %v3497_v16, %v3459_v37  ;;  %v3092_v45 = vmul.f32 %v9791_v22, %v13256_v36  ;;  %v3239_v7 = vadd.f32 %v3203_v13, %v3165_v11  ;;  %v3130_v63 = vmul.f32 %v9805_v54, %v13260_v18 }
 0x2c4   :  { %v3680_v9 = vmax.f32 %v3644_v17, 0.0  ;;  %v3204_v28 = vmul.f32 %v9810_v14, %v13258_v43  ;;  %v3460_v25 = vadd.f32 %v3424_v26, %v3386_v44  ;;  %v3499_v16 = vmul.f32 %v9834_v48, %v13257_v20 }
 0x2c5   :  { %v3607_v59 = vadd.f32 %v3571_v56, %v3533_v42  ;;  %v3573_v40 = vmul.f32 %v9840_v46, %v13261_v6  ;;  %v3313_v37 = vadd.f32 %v3277_v47, %v3239_v7  ;;  %v3166_v13 = vadd.f32 %v3130_v63, %v3092_v45  ;;  %v13263_v42 = vld [vmem:[#allocation62_spill] sm:$0xff] }
 0x2c6   :  { %5520 = vst [vmem:[%s12101_s5 + $0x128] sm:$0xff] %v3680_v9  ;;  %v3278_v17 = vmul.f32 %v9813_v49, %v13262_v32  ;;  %v3352_v11 = vmul.f32 %v9816_v15, %v13259_v3  ;;  %v3534_v26 = vadd.f32 %v3498_v60, %v3460_v25  ;;  %v3426_v44 = vmul.f32 %v9824_v8, %v13263_v42  ;;  %v13264_v45 = vld [vmem:[#allocation66_spill] sm:$0xff]  ;;  %v13265_v25 = vld [vmem:[#allocation63_spill] sm:$0xff] }
 0x2c7   :  { %v3645_v56 = vadd.f32 %v9842_v34, %v3607_v59  ;;  %v3093_v18 = vmul.f32 %v9791_v22, %v13237_v50  ;;  %v3387_v36 = vadd.f32 %v3351_v30, %v3313_v37  ;;  %v3240_v24 = vadd.f32 %v3204_v28, %v3166_v13 }
 0x2c8   :  { %v3131_v47 = vmul.f32 %v9805_v54, %v13238_v51  ;;  %v3205_v9 = vmul.f32 %v9810_v14, %v13264_v45  ;;  %v3608_v63 = vadd.f32 %v3572_v62, %v3534_v26  ;;  %v3500_v59 = vmul.f32 %v9834_v48, %v13261_v6 }
 0x2c9   :  { %v3681_v7 = vmax.f32 %v3645_v56, 0.0  ;;  %v3574_v60 = vmul.f32 %v9840_v46, %v13265_v25  ;;  %v3461_v42 = vadd.f32 %v3425_v2, %v3387_v36  ;;  %v3314_v3 = vadd.f32 %v3278_v17, %v3240_v24  ;;  %v13267_v56 = vld [vmem:[#allocation22_spill] sm:$0xff] }
 0x2ca   :  { %v3167_v12 = vadd.f32 %v3131_v47, %v3093_v18  ;;  %v3279_v30 = vmul.f32 %v9813_v49, %v13266_v57  ;;  %v3646_v28 = vadd.f32 %v9842_v34, %v3608_v63  ;;  %v3353_v62 = vmul.f32 %v9816_v15, %v13243_v33 }
 0x2cb   :  { %5521 = vst [vmem:[%s12101_s5 + $0x130] sm:$0xff] %v3681_v7  ;;  %v3427_v37 = vmul.f32 %v9824_v8, %v13246_v35  ;;  %v3094_v36 = vmul.f32 %v9791_v22, %v13238_v51  ;;  %v3535_v24 = vadd.f32 %v3499_v16, %v3461_v42  ;;  %v3388_v2 = vadd.f32 %v3352_v11, %v3314_v3  ;;  %v13268_v7 = vld [vmem:[#allocation73_spill] sm:$0xff] }
 0x2cc   :  { %v3241_v18 = vadd.f32 %v3205_v9, %v3167_v12  ;;  %v3132_v13 = vmul.f32 %v9805_v54, %v13244_v41  ;;  %v3682_v17 = vmax.f32 %v3646_v28, 0.0  ;;  %v3501_v26 = vmul.f32 %v9834_v48, %v13267_v56  ;;  %v13269_v12 = vld [vmem:[#allocation70_spill] sm:$0xff] }
 0x2cd   :  { %v3206_v47 = vmul.f32 %v9810_v14, %v13266_v57  ;;  %v3280_v63 = vmul.f32 %v9813_v49, %v13268_v7  ;;  %v3609_v33 = vadd.f32 %v3573_v40, %v3535_v24  ;;  %v3462_v55 = vadd.f32 %v3426_v44, %v3388_v2 }
 0x2ce   :  { %v3315_v50 = vadd.f32 %v3279_v30, %v3241_v18  ;;  %v3168_v51 = vadd.f32 %v3132_v13, %v3094_v36  ;;  %5522 = vst [vmem:[%s12101_s5 + $0x138] sm:$0xff] %v3682_v17  ;;  %v3575_v3 = vmul.f32 %v9840_v46, %v13269_v12  ;;  %v3354_v16 = vmul.f32 %v9816_v15, %v13246_v35  ;;  %v13270_v36 = vld [vmem:[#allocation74_spill] sm:$0xff] }
 0x2cf   :  { %v3428_v11 = vmul.f32 %v9824_v8, %v13249_v31  ;;  %v3095_v42 = vmul.f32 %v9791_v22, %v13244_v41  ;;  %v3647_v40 = vadd.f32 %v9842_v34, %v3609_v33  ;;  %v3536_v44 = vadd.f32 %v3500_v59, %v3462_v55  ;;  %v13271_v55 = vld [vmem:[#allocation37_spill] sm:$0xff] }
 0x2d0   :  { %v3389_v9 = vadd.f32 %v3353_v62, %v3315_v50  ;;  %v3242_v30 = vadd.f32 %v3206_v47, %v3168_v51  ;;  %v3502_v28 = vmul.f32 %v9834_v48, %v13269_v12  ;;  %v3576_v24 = vmul.f32 %v9840_v46, %v13270_v36 }
 0x2d1   :  { %v3133_v2 = vmul.f32 %v9805_v54, %v13250_v27  ;;  %v3207_v18 = vmul.f32 %v9810_v14, %v13268_v7  ;;  %v3683_v13 = vmax.f32 %v3647_v40, 0.0  ;;  %v3610_v17 = vadd.f32 %v3574_v60, %v3536_v44 }
 0x2d2   :  { %v3463_v41 = vadd.f32 %v3427_v37, %v3389_v9  ;;  %v3316_v35 = vadd.f32 %v3280_v63, %v3242_v30  ;;  %v3281_v50 = vmul.f32 %v9813_v49, %v13271_v55  ;;  %v3355_v51 = vmul.f32 %v9816_v15, %v13249_v31 }
 0x2d3   :  { %v3169_v33 = vadd.f32 %v3133_v2, %v3095_v42  ;;  %v3429_v59 = vmul.f32 %v9824_v8, %v13253_v52  ;;  %5523 = vst [vmem:[%s12101_s5 + $0x140] sm:$0xff] %v3683_v13  ;;  %v3648_v62 = vadd.f32 %v9842_v34, %v3610_v17  ;;  %v3096_v37 = vmul.f32 %v9791_v22, %v13250_v27  ;;  %v13272_v13 = vld [vmem:[#allocation78_spill] sm:$0xff] }
 0x2d4   :  { %v3537_v47 = vadd.f32 %v3501_v26, %v3463_v41  ;;  %v3390_v60 = vadd.f32 %v3354_v16, %v3316_v35  ;;  %v3503_v42 = vmul.f32 %v9834_v48, %v13270_v36  ;;  %v3134_v40 = vmul.f32 %v9805_v54, %v13254_v10  ;;  %v13273_v16 = vld [vmem:[#allocation80_spill] sm:$0xff] }
 0x2d5   :  { %v3243_v63 = vadd.f32 %v3207_v18, %v3169_v33  ;;  %v3208_v44 = vmul.f32 %v9810_v14, %v13271_v55  ;;  %v3684_v9 = vmax.f32 %v3648_v62, 0.0  ;;  %v3577_v41 = vmul.f32 %v9840_v46, %v13272_v13 }
 0x2d6   :  { %v3611_v30 = vadd.f32 %v3575_v3, %v3537_v47  ;;  %v3464_v2 = vadd.f32 %v3428_v11, %v3390_v60  ;;  %v3170_v26 = vadd.f32 %v3134_v40, %v3096_v37  ;;  %v3282_v18 = vmul.f32 %v9813_v49, %v13273_v16 }
 0x2d7   :  { %v3317_v35 = vadd.f32 %v3281_v50, %v3243_v63  ;;  %v3356_v17 = vmul.f32 %v9816_v15, %v13253_v52  ;;  %5524 = vst [vmem:[%s12101_s5 + $0x148] sm:$0xff] %v3684_v9  ;;  %v3430_v3 = vmul.f32 %v9824_v8, %v13257_v20  ;;  %v3097_v11 = vmul.f32 %v9791_v22, %v13254_v10  ;;  %v13275_v10 = vld [vmem:[#allocation83_spill] sm:$0xff] }
 0x2d8   :  { %v3649_v33 = vadd.f32 %v9842_v34, %v3611_v30  ;;  %v3538_v62 = vadd.f32 %v3502_v28, %v3464_v2  ;;  %v3244_v47 = vadd.f32 %v3208_v44, %v3170_v26  ;;  %v3135_v60 = vmul.f32 %v9805_v54, %v13258_v43  ;;  %v13274_v28 = vld [vmem:[#allocation81_spill] sm:$0xff] }
 0x2d9   :  { %v3391_v50 = vadd.f32 %v3355_v51, %v3317_v35  ;;  %v3209_v37 = vmul.f32 %v9810_v14, %v13273_v16  ;;  %v3504_v9 = vmul.f32 %v9834_v48, %v13272_v13  ;;  %v3578_v30 = vmul.f32 %v9840_v46, %v13274_v28 }
 0x2da   :  { %v3685_v63 = vmax.f32 %v3649_v33, 0.0  ;;  %v3612_v40 = vadd.f32 %v3576_v24, %v3538_v62  ;;  %v3318_v52 = vadd.f32 %v3282_v18, %v3244_v47  ;;  %v3171_v27 = vadd.f32 %v3135_v60, %v3097_v11  ;;  %v13276_v60 = vld [vmem:[#allocation60_spill] sm:$0xff] }
 0x2db   :  { %v3465_v2 = vadd.f32 %v3429_v59, %v3391_v50  ;;  %v3283_v51 = vmul.f32 %v9813_v49, %v13275_v10  ;;  %v3357_v24 = vmul.f32 %v9816_v15, %v13257_v20  ;;  %v3431_v35 = vmul.f32 %v9824_v8, %v13261_v6 }
 0x2dc   :  { %5525 = vst [vmem:[%s12101_s5 + $0x150] sm:$0xff] %v3685_v63  ;;  %v3650_v44 = vadd.f32 %v9842_v34, %v3612_v40  ;;  %v3098_v59 = vmul.f32 %v9791_v22, %v13258_v43  ;;  %v3392_v18 = vadd.f32 %v3356_v17, %v3318_v52  ;;  %v3245_v33 = vadd.f32 %v3209_v37, %v3171_v27  ;;  %v13277_v27 = vld [vmem:[#allocation84_spill] sm:$0xff] }
 0x2dd   :  { %v3539_v26 = vadd.f32 %v3503_v42, %v3465_v2  ;;  %v3136_v62 = vmul.f32 %v9805_v54, %v13262_v32  ;;  %v3505_v50 = vmul.f32 %v9834_v48, %v13274_v28  ;;  %v3210_v47 = vmul.f32 %v9810_v14, %v13275_v10 }
 0x2de   :  { %v3686_v11 = vmax.f32 %v3650_v44, 0.0  ;;  %v3284_v63 = vmul.f32 %v9813_v49, %v13276_v60  ;;  %v3466_v20 = vadd.f32 %v3430_v3, %v3392_v18  ;;  %v3319_v31 = vadd.f32 %v3283_v51, %v3245_v33  ;;  %v13279_v33 = vld [vmem:[#allocation86_spill] sm:$0xff] }
 0x2df   :  { %v3613_v40 = vadd.f32 %v3577_v41, %v3539_v26  ;;  %v3172_v43 = vadd.f32 %v3136_v62, %v3098_v59  ;;  %v3579_v52 = vmul.f32 %v9840_v46, %v13277_v27  ;;  %v3358_v42 = vmul.f32 %v9816_v15, %v13261_v6  ;;  %v13278_v59 = vld [vmem:[#allocation85_spill] sm:$0xff] }
 0x2e0   :  { %5526 = vst [vmem:[%s12101_s5 + $0x158] sm:$0xff] %v3686_v11  ;;  %v3432_v17 = vmul.f32 %v9824_v8, %v13265_v25  ;;  %v3099_v37 = vmul.f32 %v9791_v22, %v13264_v45  ;;  %v3540_v3 = vadd.f32 %v3504_v9, %v3466_v20  ;;  %v3393_v2 = vadd.f32 %v3357_v24, %v3319_v31  ;;  %v13280_v20 = vld [vmem:[#allocation87_spill] sm:$0xff] }
 0x2e1   :  { %v3651_v41 = vadd.f32 %v9842_v34, %v3613_v40  ;;  %v3246_v51 = vadd.f32 %v3210_v47, %v3172_v43  ;;  %v3506_v44 = vmul.f32 %v9834_v48, %v13277_v27  ;;  %v3580_v26 = vmul.f32 %v9840_v46, %v13278_v59 }
 0x2e2   :  { %v3137_v18 = vmul.f32 %v9805_v54, %v13266_v57  ;;  %v3211_v62 = vmul.f32 %v9810_v14, %v13279_v33  ;;  %v3614_v25 = vadd.f32 %v3578_v30, %v3540_v3  ;;  %v3467_v45 = vadd.f32 %v3431_v35, %v3393_v2 }
 0x2e3   :  { %v3687_v11 = vmax.f32 %v3651_v41, 0.0  ;;  %v3320_v32 = vadd.f32 %v3284_v63, %v3246_v51  ;;  %v3285_v31 = vmul.f32 %v9813_v49, %v13280_v20  ;;  %v3359_v43 = vmul.f32 %v9816_v15, %v13267_v56  ;;  %v13282_v56 = vld [vmem:[#allocation89_spill] sm:$0xff] }
 0x2e4   :  { %v3173_v40 = vadd.f32 %v3137_v18, %v3099_v37  ;;  %v3433_v9 = vmul.f32 %v9824_v8, %v13269_v12  ;;  %v3652_v24 = vadd.f32 %v9842_v34, %v3614_v25  ;;  %v3541_v47 = vadd.f32 %v3505_v50, %v3467_v45  ;;  %v13281_v37 = vld [vmem:[#allocation88_spill] sm:$0xff]  ;;  %v13283_v50 = vld [vmem:[#allocation91_spill] sm:$0xff] }
 0x2e5   :  { %5527 = vst [vmem:[%s12101_s5 + $0x160] sm:$0xff] %v3687_v11  ;;  %v3394_v30 = vadd.f32 %v3358_v42, %v3320_v32  ;;  %v3100_v35 = vmul.f32 %v9791_v22, %v13266_v57  ;;  %v3507_v41 = vmul.f32 %v9834_v48, %v13281_v37  ;;  %v3138_v3 = vmul.f32 %v9805_v54, %v13268_v7 }
 0x2e6   :  { %v3247_v63 = vadd.f32 %v3211_v62, %v3173_v40  ;;  %v3212_v2 = vmul.f32 %v9810_v14, %v13280_v20  ;;  %v3688_v51 = vmax.f32 %v3652_v24, 0.0  ;;  %v3615_v18 = vadd.f32 %v3579_v52, %v3541_v47 }
 0x2e7   :  { %v3468_v11 = vadd.f32 %v3432_v17, %v3394_v30  ;;  %v3581_v45 = vmul.f32 %v9840_v46, %v13282_v56  ;;  %v3174_v25 = vadd.f32 %v3138_v3, %v3100_v35  ;;  %v3286_v42 = vmul.f32 %v9813_v49, %v13283_v50 }
 0x2e8   :  { %v3321_v32 = vadd.f32 %v3285_v31, %v3247_v63  ;;  %v3360_v62 = vmul.f32 %v9816_v15, %v13269_v12  ;;  %5528 = vst [vmem:[%s12101_s5 + $0x168] sm:$0xff] %v3688_v51  ;;  %v3653_v40 = vadd.f32 %v9842_v34, %v3615_v18  ;;  %v3434_v52 = vmul.f32 %v9824_v8, %v13270_v36 }
 0x2e9   :  { %v3542_v24 = vadd.f32 %v3506_v44, %v3468_v11  ;;  %v3101_v17 = vmul.f32 %v9791_v22, %v13268_v7  ;;  %v3248_v47 = vadd.f32 %v3212_v2, %v3174_v25  ;;  %v3139_v30 = vmul.f32 %v9805_v54, %v13271_v55  ;;  %v13284_v44 = vld [vmem:[#allocation92_spill] sm:$0xff]  ;;  %v13285_v7 = vld [vmem:[#allocation90_spill] sm:$0xff] }
 0x2ea   :  { %v3395_v31 = vadd.f32 %v3359_v43, %v3321_v32  ;;  %v3213_v35 = vmul.f32 %v9810_v14, %v13283_v50  ;;  %v3689_v63 = vmax.f32 %v3653_v40, 0.0  ;;  %v3508_v51 = vmul.f32 %v9834_v48, %v13282_v56 }
 0x2eb   :  { %v3616_v3 = vadd.f32 %v3580_v26, %v3542_v24  ;;  %v3582_v18 = vmul.f32 %v9840_v46, %v13284_v44  ;;  %v3322_v12 = vadd.f32 %v3286_v42, %v3248_v47  ;;  %v3175_v57 = vadd.f32 %v3139_v30, %v3101_v17  ;;  %v13286_v30 = vld [vmem:[#allocation94_spill] sm:$0xff] }
 0x2ec   :  { %v3469_v11 = vadd.f32 %v3433_v9, %v3395_v31  ;;  %v3287_v43 = vmul.f32 %v9813_v49, %v13285_v7  ;;  %5529 = vst [vmem:[%s12101_s5 + $0x170] sm:$0xff] %v3689_v63  ;;  %v3361_v26 = vmul.f32 %v9816_v15, %v13270_v36  ;;  %v3435_v32 = vmul.f32 %v9824_v8, %v13272_v13 }
 0x2ed   :  { %v3654_v2 = vadd.f32 %v9842_v34, %v3616_v3  ;;  %v3102_v9 = vmul.f32 %v9791_v22, %v13271_v55  ;;  %v3396_v42 = vadd.f32 %v3360_v62, %v3322_v12  ;;  %v3249_v40 = vadd.f32 %v3213_v35, %v3175_v57  ;;  %v13287_v57 = vld [vmem:[#allocation93_spill] sm:$0xff] }
 0x2ee   :  { %v3543_v25 = vadd.f32 %v3507_v41, %v3469_v11  ;;  %v3140_v24 = vmul.f32 %v9805_v54, %v13273_v16  ;;  %v3509_v31 = vmul.f32 %v9834_v48, %v13284_v44  ;;  %v3214_v47 = vmul.f32 %v9810_v14, %v13285_v7 }
 0x2ef   :  { %v3690_v17 = vmax.f32 %v3654_v2, 0.0  ;;  %v3288_v63 = vmul.f32 %v9813_v49, %v13286_v30  ;;  %v3470_v36 = vadd.f32 %v3434_v52, %v3396_v42  ;;  %v3323_v6 = vadd.f32 %v3287_v43, %v3249_v40 }
 0x2f0   :  { %v3617_v3 = vadd.f32 %v3581_v45, %v3543_v25  ;;  %v3176_v55 = vadd.f32 %v3140_v24, %v3102_v9  ;;  %v3583_v12 = vmul.f32 %v9840_v46, %v13287_v57  ;;  %v3362_v41 = vmul.f32 %v9816_v15, %v13272_v13  ;;  %v13288_v9 = vld [vmem:[#allocation95_spill] sm:$0xff] }
 0x2f1   :  { %5530 = vst [vmem:[%s12101_s5 + $0x178] sm:$0xff] %v3690_v17  ;;  %v3436_v62 = vmul.f32 %v9824_v8, %v13274_v28  ;;  %v3103_v35 = vmul.f32 %v9791_v22, %v13273_v16  ;;  %v3544_v52 = vadd.f32 %v3508_v51, %v3470_v36  ;;  %v3397_v11 = vadd.f32 %v3361_v26, %v3323_v6  ;;  %v13289_v36 = vld [vmem:[#allocation97_spill] sm:$0xff] }
 0x2f2   :  { %v3655_v45 = vadd.f32 %v9842_v34, %v3617_v3  ;;  %v3250_v43 = vadd.f32 %v3214_v47, %v3176_v55  ;;  %v3510_v2 = vmul.f32 %v9834_v48, %v13287_v57  ;;  %v3584_v25 = vmul.f32 %v9840_v46, %v13288_v9 }
 0x2f3   :  { %v3141_v42 = vmul.f32 %v9805_v54, %v13275_v10  ;;  %v3215_v40 = vmul.f32 %v9810_v14, %v13286_v30  ;;  %v3618_v17 = vadd.f32 %v3582_v18, %v3544_v52  ;;  %v3471_v16 = vadd.f32 %v3435_v32, %v3397_v11 }
 0x2f4   :  { %v3691_v24 = vmax.f32 %v3655_v45, 0.0  ;;  %v3324_v13 = vadd.f32 %v3288_v63, %v3250_v43  ;;  %v3289_v6 = vmul.f32 %v9813_v49, %v13289_v36  ;;  %v3363_v55 = vmul.f32 %v9816_v15, %v13274_v28 }
 0x2f5   :  { %v3177_v3 = vadd.f32 %v3141_v42, %v3103_v35  ;;  %v3437_v51 = vmul.f32 %v9824_v8, %v13277_v27  ;;  %v3656_v26 = vadd.f32 %v9842_v34, %v3618_v17  ;;  %v3545_v47 = vadd.f32 %v3509_v31, %v3471_v16 }
 0x2f6   :  { %5531 = vst [vmem:[%s12101_s5 + $0x180] sm:$0xff] %v3691_v24  ;;  %v3398_v18 = vadd.f32 %v3362_v41, %v3324_v13  ;;  %v3104_v32 = vmul.f32 %v9791_v22, %v13275_v10  ;;  %v3511_v35 = vmul.f32 %v9834_v48, %v13288_v9  ;;  %v3142_v45 = vmul.f32 %v9805_v54, %v13276_v60  ;;  %v13290_v24 = vld [vmem:[#allocation98_spill] sm:$0xff]  ;;  %v13291_v41 = vld [vmem:[#allocation61_spill] sm:$0xff] }
 0x2f7   :  { %v3251_v63 = vadd.f32 %v3215_v40, %v3177_v3  ;;  %v3216_v52 = vmul.f32 %v9810_v14, %v13289_v36  ;;  %v3692_v11 = vmax.f32 %v3656_v26, 0.0  ;;  %v3619_v43 = vadd.f32 %v3583_v12, %v3545_v47 }
 0x2f8   :  { %v3472_v42 = vadd.f32 %v3436_v62, %v3398_v18  ;;  %v3585_v16 = vmul.f32 %v9840_v46, %v13290_v24  ;;  %v3178_v31 = vadd.f32 %v3142_v45, %v3104_v32  ;;  %v3290_v40 = vmul.f32 %v9813_v49, %v13291_v41  ;;  %v13292_v32 = vld [vmem:[#allocation100_spill] sm:$0xff] }
 0x2f9   :  { %v3325_v13 = vadd.f32 %v3289_v6, %v3251_v63  ;;  %v3364_v17 = vmul.f32 %v9816_v15, %v13277_v27  ;;  %5532 = vst [vmem:[%s12101_s5 + $0x188] sm:$0xff] %v3692_v11  ;;  %v3657_v3 = vadd.f32 %v9842_v34, %v3619_v43  ;;  %v3438_v12 = vmul.f32 %v9824_v8, %v13278_v59 }
 0x2fa   :  { %v3546_v26 = vadd.f32 %v3510_v2, %v3472_v42  ;;  %v3105_v62 = vmul.f32 %v9791_v22, %v13279_v33  ;;  %v3252_v47 = vadd.f32 %v3216_v52, %v3178_v31  ;;  %v3143_v18 = vmul.f32 %v9805_v54, %v13280_v20  ;;  %v13293_v2 = vld [vmem:[#allocation99_spill] sm:$0xff]  ;;  %v13294_v33 = vld [vmem:[#allocation101_spill] sm:$0xff] }
 0x2fb   :  { %v3399_v6 = vadd.f32 %v3363_v55, %v3325_v13  ;;  %v3217_v63 = vmul.f32 %v9810_v14, %v13292_v32  ;;  %v3693_v45 = vmax.f32 %v3657_v3, 0.0  ;;  %v3512_v11 = vmul.f32 %v9834_v48, %v13290_v24 }
 0x2fc   :  { %v3620_v60 = vadd.f32 %v3584_v25, %v3546_v26  ;;  %v3586_v43 = vmul.f32 %v9840_v46, %v13293_v2  ;;  %v3326_v59 = vadd.f32 %v3290_v40, %v3252_v47  ;;  %v3179_v27 = vadd.f32 %v3143_v18, %v3105_v62  ;;  %v13296_v18 = vld [vmem:[#allocation105_spill] sm:$0xff] }
 0x2fd   :  { %v3473_v42 = vadd.f32 %v3437_v51, %v3399_v6  ;;  %v3291_v55 = vmul.f32 %v9813_v49, %v13294_v33  ;;  %5533 = vst [vmem:[%s12101_s5 + $0x190] sm:$0xff] %v3693_v45  ;;  %v3365_v25 = vmul.f32 %v9816_v15, %v13281_v37  ;;  %v3439_v13 = vmul.f32 %v9824_v8, %v13282_v56  ;;  %v13295_v6 = vld [vmem:[#allocation102_spill] sm:$0xff] }
 0x2fe   :  { %v3658_v52 = vadd.f32 %v9842_v34, %v3620_v60  ;;  %v3106_v51 = vmul.f32 %v9791_v22, %v13280_v20  ;;  %v3400_v40 = vadd.f32 %v3364_v17, %v3326_v59  ;;  %v3253_v3 = vadd.f32 %v3217_v63, %v3179_v27  ;;  %v13297_v27 = vld [vmem:[#allocation103_spill] sm:$0xff] }
 0x2ff   :  { %v3547_v31 = vadd.f32 %v3511_v35, %v3473_v42  ;;  %v3144_v26 = vmul.f32 %v9805_v54, %v13283_v50  ;;  %v3513_v47 = vmul.f32 %v9834_v48, %v13295_v6  ;;  %v3218_v60 = vmul.f32 %v9810_v14, %v13294_v33 }
 0x300   :  { %v3694_v62 = vmax.f32 %v3658_v52, 0.0  ;;  %v3292_v45 = vmul.f32 %v9813_v49, %v13296_v18  ;;  %v3474_v28 = vadd.f32 %v3438_v12, %v3400_v40  ;;  %v3327_v10 = vadd.f32 %v3291_v55, %v3253_v3 }
 0x301   :  { %v3621_v37 = vadd.f32 %v3585_v16, %v3547_v31  ;;  %v3180_v20 = vadd.f32 %v3144_v26, %v3106_v51  ;;  %v3587_v59 = vmul.f32 %v9840_v46, %v13297_v27  ;;  %v3366_v35 = vmul.f32 %v9816_v15, %v13282_v56  ;;  %v13298_v51 = vld [vmem:[#allocation106_spill] sm:$0xff] }
 0x302   :  { %5534 = vst [vmem:[%s12101_s5 + $0x198] sm:$0xff] %v3694_v62  ;;  %v3440_v17 = vmul.f32 %v9824_v8, %v13284_v44  ;;  %v3107_v63 = vmul.f32 %v9791_v22, %v13283_v50  ;;  %v3548_v12 = vadd.f32 %v3512_v11, %v3474_v28  ;;  %v3401_v42 = vadd.f32 %v3365_v25, %v3327_v10  ;;  %v13299_v28 = vld [vmem:[#allocation104_spill] sm:$0xff] }
 0x303   :  { %v3659_v16 = vadd.f32 %v9842_v34, %v3621_v37  ;;  %v3254_v55 = vadd.f32 %v3218_v60, %v3180_v20  ;;  %v3514_v52 = vmul.f32 %v9834_v48, %v13297_v27  ;;  %v3588_v31 = vmul.f32 %v9840_v46, %v13298_v51 }
 0x304   :  { %v3145_v40 = vmul.f32 %v9805_v54, %v13285_v7  ;;  %v3219_v3 = vmul.f32 %v9810_v14, %v13296_v18  ;;  %v3622_v62 = vadd.f32 %v3586_v43, %v3548_v12  ;;  %v3475_v50 = vadd.f32 %v3439_v13, %v3401_v42 }
 0x305   :  { %v3695_v26 = vmax.f32 %v3659_v16, 0.0  ;;  %v3328_v56 = vadd.f32 %v3292_v45, %v3254_v55  ;;  %v3293_v10 = vmul.f32 %v9813_v49, %v13299_v28  ;;  %v3367_v20 = vmul.f32 %v9816_v15, %v13284_v44 }
 0x306   :  { %v3181_v37 = vadd.f32 %v3145_v40, %v3107_v63  ;;  %v3441_v11 = vmul.f32 %v9824_v8, %v13287_v57  ;;  %v3660_v25 = vadd.f32 %v9842_v34, %v3622_v62  ;;  %v3549_v60 = vadd.f32 %v3513_v47, %v3475_v50 }
 0x307   :  { %5535 = vst [vmem:[%s12101_s5 + $0x1a0] sm:$0xff] %v3695_v26  ;;  %v3402_v43 = vadd.f32 %v3366_v35, %v3328_v56  ;;  %v3108_v13 = vmul.f32 %v9791_v22, %v13285_v7  ;;  %v3515_v63 = vmul.f32 %v9834_v48, %v13298_v51  ;;  %v3146_v16 = vmul.f32 %v9805_v54, %v13286_v30  ;;  %v13300_v26 = vld [vmem:[#allocation107_spill] sm:$0xff]  ;;  %v13301_v35 = vld [vmem:[#allocation108_spill] sm:$0xff] }
 0x308   :  { %v3255_v45 = vadd.f32 %v3219_v3, %v3181_v37  ;;  %v3220_v12 = vmul.f32 %v9810_v14, %v13299_v28  ;;  %v3696_v42 = vmax.f32 %v3660_v25, 0.0  ;;  %v3623_v55 = vadd.f32 %v3587_v59, %v3549_v60 }
 0x309   :  { %v3476_v40 = vadd.f32 %v3440_v17, %v3402_v43  ;;  %v3589_v50 = vmul.f32 %v9840_v46, %v13300_v26  ;;  %v3182_v47 = vadd.f32 %v3146_v16, %v3108_v13  ;;  %v3294_v3 = vmul.f32 %v9813_v49, %v13301_v35 }
 0x30a   :  { %v3329_v56 = vadd.f32 %v3293_v10, %v3255_v45  ;;  %v3368_v62 = vmul.f32 %v9816_v15, %v13287_v57  ;;  %5536 = vst [vmem:[%s12101_s5 + $0x1a8] sm:$0xff] %v3696_v42  ;;  %v3661_v37 = vadd.f32 %v9842_v34, %v3623_v55  ;;  %v3442_v59 = vmul.f32 %v9824_v8, %v13288_v9 }
 0x30b   :  { %v3550_v25 = vadd.f32 %v3514_v52, %v3476_v40  ;;  %v3109_v17 = vmul.f32 %v9791_v22, %v13286_v30  ;;  %v3256_v60 = vadd.f32 %v3220_v12, %v3182_v47  ;;  %v3147_v43 = vmul.f32 %v9805_v54, %v13289_v36  ;;  %v13302_v52 = vld [vmem:[#allocation109_spill] sm:$0xff]  ;;  %v13303_v30 = vld [vmem:[#allocation111_spill] sm:$0xff] }
 0x30c   :  { %v3403_v10 = vadd.f32 %v3367_v20, %v3329_v56  ;;  %v3221_v13 = vmul.f32 %v9810_v14, %v13301_v35  ;;  %v3697_v45 = vmax.f32 %v3661_v37, 0.0  ;;  %v3516_v42 = vmul.f32 %v9834_v48, %v13300_v26 }
 0x30d   :  { %v3624_v16 = vadd.f32 %v3588_v31, %v3550_v25  ;;  %v3590_v55 = vmul.f32 %v9840_v46, %v13302_v52  ;;  %v3330_v57 = vadd.f32 %v3294_v3, %v3256_v60  ;;  %v3183_v44 = vadd.f32 %v3147_v43, %v3109_v17  ;;  %v13304_v43 = vld [vmem:[#allocation64_spill] sm:$0xff] }
 0x30e   :  { %v3477_v40 = vadd.f32 %v3441_v11, %v3403_v10  ;;  %v3295_v20 = vmul.f32 %v9813_v49, %v13303_v30  ;;  %5537 = vst [vmem:[%s12101_s5 + $0x1b0] sm:$0xff] %v3697_v45  ;;  %v3369_v31 = vmul.f32 %v9816_v15, %v13288_v9  ;;  %v3443_v56 = vmul.f32 %v9824_v8, %v13290_v24 }
 0x30f   :  { %v3662_v12 = vadd.f32 %v9842_v34, %v3624_v16  ;;  %v3110_v11 = vmul.f32 %v9791_v22, %v13289_v36  ;;  %v3404_v3 = vadd.f32 %v3368_v62, %v3330_v57  ;;  %v3257_v37 = vadd.f32 %v3221_v13, %v3183_v44  ;;  %v13305_v44 = vld [vmem:[#allocation112_spill] sm:$0xff] }
 0x310   :  { %v3551_v47 = vadd.f32 %v3515_v63, %v3477_v40  ;;  %v3148_v25 = vmul.f32 %v9805_v54, %v13291_v41  ;;  %v3517_v10 = vmul.f32 %v9834_v48, %v13302_v52  ;;  %v3222_v60 = vmul.f32 %v9810_v14, %v13303_v30 }
 0x311   :  { %v3698_v17 = vmax.f32 %v3662_v12, 0.0  ;;  %v3296_v45 = vmul.f32 %v9813_v49, %v13304_v43  ;;  %v3478_v9 = vadd.f32 %v3442_v59, %v3404_v3  ;;  %v3331_v7 = vadd.f32 %v3295_v20, %v3257_v37  ;;  %v13307_v37 = vld [vmem:[#allocation114_spill] sm:$0xff] }
 0x312   :  { %v3625_v16 = vadd.f32 %v3589_v50, %v3551_v47  ;;  %v3184_v36 = vadd.f32 %v3148_v25, %v3110_v11  ;;  %v3591_v57 = vmul.f32 %v9840_v46, %v13305_v44  ;;  %v3370_v63 = vmul.f32 %v9816_v15, %v13290_v24  ;;  %v13306_v11 = vld [vmem:[#allocation113_spill] sm:$0xff] }
 0x313   :  { %5538 = vst [vmem:[%s12101_s5 + $0x1b8] sm:$0xff] %v3698_v17  ;;  %v3444_v62 = vmul.f32 %v9824_v8, %v13293_v2  ;;  %v3111_v13 = vmul.f32 %v9791_v22, %v13292_v32  ;;  %v3552_v59 = vadd.f32 %v3516_v42, %v3478_v9  ;;  %v3405_v40 = vadd.f32 %v3369_v31, %v3331_v7  ;;  %v13308_v9 = vld [vmem:[#allocation115_spill] sm:$0xff] }
 0x314   :  { %v3663_v50 = vadd.f32 %v9842_v34, %v3625_v16  ;;  %v3258_v20 = vadd.f32 %v3222_v60, %v3184_v36  ;;  %v3518_v12 = vmul.f32 %v9834_v48, %v13305_v44  ;;  %v3592_v47 = vmul.f32 %v9840_v46, %v13306_v11 }
 0x315   :  { %v3149_v3 = vmul.f32 %v9805_v54, %v13294_v33  ;;  %v3223_v25 = vmul.f32 %v9810_v14, %v13307_v37  ;;  %v3626_v2 = vadd.f32 %v3590_v55, %v3552_v59  ;;  %v3479_v32 = vadd.f32 %v3443_v56, %v3405_v40 }
 0x316   :  { %v3699_v17 = vmax.f32 %v3663_v50, 0.0  ;;  %v3332_v41 = vadd.f32 %v3296_v45, %v3258_v20  ;;  %v3297_v7 = vmul.f32 %v9813_v49, %v13308_v9  ;;  %v3371_v36 = vmul.f32 %v9816_v15, %v13295_v6  ;;  %v13310_v6 = vld [vmem:[#allocation28_spill] sm:$0xff] }
 0x317   :  { %v3185_v16 = vadd.f32 %v3149_v3, %v3111_v13  ;;  %v3445_v42 = vmul.f32 %v9824_v8, %v13297_v27  ;;  %v3664_v31 = vadd.f32 %v9842_v34, %v3626_v2  ;;  %v3553_v60 = vadd.f32 %v3517_v10, %v3479_v32  ;;  %v13309_v13 = vld [vmem:[#allocation69_spill] sm:$0xff] }
 0x318   :  { %5539 = vst [vmem:[%s12101_s5 + $0x1c0] sm:$0xff] %v3699_v17  ;;  %v3406_v55 = vadd.f32 %v3370_v63, %v3332_v41  ;;  %v3112_v56 = vmul.f32 %v9791_v22, %v13294_v33  ;;  %v3519_v50 = vmul.f32 %v9834_v48, %v13309_v13  ;;  %v3150_v59 = vmul.f32 %v9805_v54, %v13296_v18  ;;  %v13311_v10 = vld [vmem:[#allocation117_spill] sm:$0xff] }
 0x319   :  { %v3259_v45 = vadd.f32 %v3223_v25, %v3185_v16  ;;  %v3224_v40 = vmul.f32 %v9810_v14, %v13308_v9  ;;  %v3700_v20 = vmax.f32 %v3664_v31, 0.0  ;;  %v3627_v3 = vadd.f32 %v3591_v57, %v3553_v60 }
 0x31a   :  { %v3480_v17 = vadd.f32 %v3444_v62, %v3406_v55  ;;  %v3593_v32 = vmul.f32 %v9840_v46, %v13310_v6  ;;  %v3186_v2 = vadd.f32 %v3150_v59, %v3112_v56  ;;  %v3298_v63 = vmul.f32 %v9813_v49, %v13311_v10 }
 0x31b   :  { %v3333_v41 = vadd.f32 %v3297_v7, %v3259_v45  ;;  %v3372_v25 = vmul.f32 %v9816_v15, %v13297_v27  ;;  %5540 = vst [vmem:[%s12101_s5 + $0x1c8] sm:$0xff] %v3700_v20  ;;  %v3665_v16 = vadd.f32 %v9842_v34, %v3627_v3  ;;  %v3446_v57 = vmul.f32 %v9824_v8, %v13298_v51 }
 0x31c   :  { %v3554_v31 = vadd.f32 %v3518_v12, %v3480_v17  ;;  %v3113_v62 = vmul.f32 %v9791_v22, %v13296_v18  ;;  %v3260_v60 = vadd.f32 %v3224_v40, %v3186_v2  ;;  %v3151_v55 = vmul.f32 %v9805_v54, %v13299_v28  ;;  %v13312_v12 = vld [vmem:[#allocation30_spill] sm:$0xff]  ;;  %v13313_v18 = vld [vmem:[#allocation116_spill] sm:$0xff] }
 0x31d   :  { %v3407_v7 = vadd.f32 %v3371_v36, %v3333_v41  ;;  %v3225_v56 = vmul.f32 %v9810_v14, %v13311_v10  ;;  %v3701_v45 = vmax.f32 %v3665_v16, 0.0  ;;  %v3520_v20 = vmul.f32 %v9834_v48, %v13310_v6 }
 0x31e   :  { %v3628_v59 = vadd.f32 %v3592_v47, %v3554_v31  ;;  %v3594_v3 = vmul.f32 %v9840_v46, %v13312_v12  ;;  %v3334_v27 = vadd.f32 %v3298_v63, %v3260_v60  ;;  %v3187_v33 = vadd.f32 %v3151_v55, %v3113_v62 }
 0x31f   :  { %v3481_v17 = vadd.f32 %v3445_v42, %v3407_v7  ;;  %v3299_v36 = vmul.f32 %v9813_v49, %v13313_v18  ;;  %5541 = vst [vmem:[%s12101_s5 + $0x1d0] sm:$0xff] %v3701_v45  ;;  %v3373_v47 = vmul.f32 %v9816_v15, %v13298_v51  ;;  %v3447_v41 = vmul.f32 %v9824_v8, %v13300_v26 }
 0x320   :  { %v3666_v40 = vadd.f32 %v9842_v34, %v3628_v59  ;;  %v3114_v42 = vmul.f32 %v9791_v22, %v13299_v28  ;;  %v3408_v63 = vadd.f32 %v3372_v25, %v3334_v27  ;;  %v3261_v16 = vadd.f32 %v3225_v56, %v3187_v33  ;;  %v13314_v33 = vld [vmem:[#allocation29_spill] sm:$0xff] }
 0x321   :  { %v3555_v2 = vadd.f32 %v3519_v50, %v3481_v17  ;;  %v3152_v31 = vmul.f32 %v9805_v54, %v13301_v35  ;;  %v3521_v7 = vmul.f32 %v9834_v48, %v13312_v12  ;;  %v3226_v60 = vmul.f32 %v9810_v14, %v13313_v18 }
 0x322   :  { %v3702_v62 = vmax.f32 %v3666_v40, 0.0  ;;  %v3300_v55 = vmul.f32 %v9813_v49, %v13217_v21  ;;  %v3482_v59 = vadd.f32 %v3446_v57, %v3408_v63  ;;  %v3335_v51 = vadd.f32 %v3299_v36, %v3261_v16 }
 0x323   :  { %v3629_v45 = vadd.f32 %v3593_v32, %v3555_v2  ;;  %v3188_v28 = vadd.f32 %v3152_v31, %v3114_v42  ;;  %v3595_v27 = vmul.f32 %v9840_v46, %v13314_v33  ;;  %v3374_v50 = vmul.f32 %v9816_v15, %v13300_v26 }
 0x324   :  { %5542 = vst [vmem:[%s12101_s5 + $0x1d8] sm:$0xff] %v3702_v62  ;;  %v3448_v25 = vmul.f32 %v9824_v8, %v13302_v52  ;;  %v3115_v56 = vmul.f32 %v9791_v22, %v13301_v35  ;;  %v3556_v57 = vadd.f32 %v3520_v20, %v3482_v59  ;;  %v3409_v17 = vadd.f32 %v3373_v47, %v3335_v51 }
 0x325   :  { %v3667_v32 = vadd.f32 %v9842_v34, %v3629_v45  ;;  %v3262_v36 = vadd.f32 %v3226_v60, %v3188_v28  ;;  %v3522_v40 = vmul.f32 %v9834_v48, %v13314_v33  ;;  %v3596_v42 = vmul.f32 %v9840_v46, %v13219_v38 }
 0x326   :  { %v3153_v2 = vmul.f32 %v9805_v54, %v13303_v30  ;;  %v3227_v63 = vmul.f32 %v9810_v14, %v13217_v21  ;;  %v3630_v31 = vadd.f32 %v3594_v3, %v3556_v57  ;;  %v3483_v62 = vadd.f32 %v3447_v41, %v3409_v17 }
 0x327   :  { %v3703_v16 = vmax.f32 %v3667_v32, 0.0  ;;  %v3336_v35 = vadd.f32 %v3300_v55, %v3262_v36  ;;  %v3301_v51 = vmul.f32 %v9813_v49, %v13224_v23  ;;  %v3375_v28 = vmul.f32 %v9816_v15, %v13302_v52 }
 0x328   :  { %v3189_v45 = vadd.f32 %v3153_v2, %v3115_v56  ;;  %v3449_v20 = vmul.f32 %v9824_v8, %v13305_v44  ;;  %v3668_v47 = vadd.f32 %v9842_v34, %v3630_v31  ;;  %v3557_v60 = vadd.f32 %v3521_v7, %v3483_v62 }
 0x329   :  { %5543 = vst [vmem:[%s12101_s5 + $0x1e0] sm:$0xff] %v3703_v16  ;;  %v3410_v3 = vadd.f32 %v3374_v50, %v3336_v35  ;;  %v3116_v41 = vmul.f32 %v9791_v22, %v13303_v30  ;;  %v3523_v59 = vmul.f32 %v9834_v48, %v13219_v38  ;;  %v3154_v56 = vmul.f32 %v9805_v54, %v13304_v43 }
 0x32a   :  { %v3263_v55 = vadd.f32 %v3227_v63, %v3189_v45  ;;  %v3228_v32 = vmul.f32 %v9810_v14, %v13224_v23  ;;  %v3704_v57 = vmax.f32 %v3668_v47, 0.0  ;;  %v3631_v17 = vadd.f32 %v3595_v27, %v3557_v60  ;;  %v13315_v47 = vld [vmem:[#allocation82_spill] sm:$0xff] }
 0x32b   :  { %v3484_v36 = vadd.f32 %v3448_v25, %v3410_v3  ;;  %v3597_v7 = vmul.f32 %v9840_v46, %v13226_v1  ;;  %v3190_v50 = vadd.f32 %v3154_v56, %v3116_v41  ;;  %v3302_v2 = vmul.f32 %v9813_v49, %v13232_v53 }
 0x32c   :  { %v3337_v35 = vadd.f32 %v3301_v51, %v3263_v55  ;;  %v3376_v63 = vmul.f32 %v9816_v15, %v13305_v44  ;;  %5544 = vst [vmem:[%s12101_s5 + $0x1e8] sm:$0xff] %v3704_v57  ;;  %v3669_v16 = vadd.f32 %v9842_v34, %v3631_v17  ;;  %v3450_v27 = vmul.f32 %v9824_v8, %v13306_v11 }
 0x32d   :  { %v3558_v31 = vadd.f32 %v3522_v40, %v3484_v36  ;;  %v3117_v25 = vmul.f32 %v9791_v22, %v13307_v37  ;;  %v3264_v45 = vadd.f32 %v3228_v32, %v3190_v50  ;;  %v3155_v51 = vmul.f32 %v9805_v54, %v13308_v9  ;;  %v13316_v36 = vld [vmem:[#allocation96_spill] sm:$0xff] }
 0x32e   :  { %v3411_v62 = vadd.f32 %v3375_v28, %v3337_v35  ;;  %v3229_v60 = vmul.f32 %v9810_v14, %v13315_v47  ;;  %v3705_v3 = vmax.f32 %v3669_v16, 0.0  ;;  %v3524_v55 = vmul.f32 %v9834_v48, %v13226_v1 }
 0x32f   :  { %v3632_v41 = vadd.f32 %v3596_v42, %v3558_v31  ;;  %v3598_v40 = vmul.f32 %v9840_v46, %v13234_v58  ;;  %v3338_v57 = vadd.f32 %v3302_v2, %v3264_v45  ;;  %v3191_v17 = vadd.f32 %v3155_v51, %v3117_v25 }
 0x330   :  { %v3485_v56 = vadd.f32 %v3449_v20, %v3411_v62  ;;  %v3303_v28 = vmul.f32 %v9813_v49, %v13316_v36  ;;  %5545 = vst [vmem:[%s12101_s5 + $0x1f0] sm:$0xff] %v3705_v3  ;;  %v3377_v42 = vmul.f32 %v9816_v15, %v13309_v13  ;;  %v3451_v35 = vmul.f32 %v9824_v8, %v13310_v6  ;;  %v13317_v62 = vld [vmem:[#allocation110_spill] sm:$0xff]  ;;  %v13318_v3 = vld [vmem:[#allocation17_spill] sm:$0xff] }
 0x331   :  { %v3670_v32 = vadd.f32 %v9842_v34, %v3632_v41  ;;  %v3118_v20 = vmul.f32 %v9791_v22, %v13308_v9  ;;  %v3412_v2 = vadd.f32 %v3376_v63, %v3338_v57  ;;  %v3265_v16 = vadd.f32 %v3229_v60, %v3191_v17 }
 0x332   :  { %v3559_v50 = vadd.f32 %v3523_v59, %v3485_v56  ;;  %v3156_v31 = vmul.f32 %v9805_v54, %v13311_v10  ;;  %v3525_v45 = vmul.f32 %v9834_v48, %v13317_v62  ;;  %v3230_v51 = vmul.f32 %v9810_v14, %v13316_v36  ;;  %v13319_v59 = vld [vmem:[#allocation119_spill] sm:$0xff] }
 0x333   :  { %v3706_v25 = vmax.f32 %v3670_v32, 0.0  ;;  %v3304_v41 = vmul.f32 %v9813_v49, %v13318_v3  ;;  %v3486_v13 = vadd.f32 %v3450_v27, %v3412_v2  ;;  %v3339_v11 = vadd.f32 %v3303_v28, %v3265_v16 }
 0x334   :  { %v3633_v47 = vadd.f32 %v3597_v7, %v3559_v50  ;;  %v3192_v9 = vadd.f32 %v3156_v31, %v3118_v20  ;;  %v3599_v63 = vmul.f32 %v9840_v46, %v13319_v59  ;;  %v3378_v60 = vmul.f32 %v9816_v15, %v13310_v6  ;;  %v13320_v20 = vld [vmem:[#allocation21_spill] sm:$0xff] }
 0x335   :  { %5546 = vst [vmem:[%s12101_s5 + $0x1f8] sm:$0xff] %v3706_v25  ;;  %v3452_v56 = vmul.f32 %v9824_v8, %v13312_v12  ;;  %v3119_v57 = vmul.f32 %v9791_v22, %v13311_v10  ;;  %v3560_v27 = vadd.f32 %v3524_v55, %v3486_v13  ;;  %v3413_v17 = vadd.f32 %v3377_v42, %v3339_v11  ;;  %v13321_v13 = vld [vmem:[#allocation12_spill] sm:$0xff] }
 0x336   :  { %v3671_v7 = vadd.f32 %v9842_v34, %v3633_v47  ;;  %v3266_v28 = vadd.f32 %v3230_v51, %v3192_v9  ;;  %v3526_v32 = vmul.f32 %v9834_v48, %v13319_v59  ;;  %v3600_v50 = vmul.f32 %v9840_v46, %v13320_v20 }
 0x337   :  { %v3157_v2 = vmul.f32 %v9805_v54, %v13313_v18  ;;  %v3231_v16 = vmul.f32 %v9810_v14, %v13318_v3  ;;  %v3634_v25 = vadd.f32 %v3598_v40, %v3560_v27  ;;  %v3487_v62 = vadd.f32 %v3451_v35, %v3413_v17 }
 0x338   :  { %v3707_v31 = vmax.f32 %v3671_v7, 0.0  ;;  %v3340_v36 = vadd.f32 %v3304_v41, %v3266_v28  ;;  %v3305_v11 = vmul.f32 %v9813_v49, %v13321_v13  ;;  %v3379_v9 = vmul.f32 %v9816_v15, %v13312_v12 }
 0x339   :  { %v3193_v47 = vadd.f32 %v3157_v2, %v3119_v57  ;;  %v3453_v55 = vmul.f32 %v9824_v8, %v13314_v33  ;;  %v3672_v42 = vadd.f32 %v9842_v34, %v3634_v25  ;;  %v3561_v51 = vadd.f32 %v3525_v45, %v3487_v62 }
 0x33a   :  { %5547 = vst [vmem:[%s12101_s5 + $0x200] sm:$0xff] %v3707_v31  ;;  %v3414_v40 = vadd.f32 %v3378_v60, %v3340_v36  ;;  %v3120_v35 = vmul.f32 %v9791_v22, %v13313_v18  ;;  %v3527_v57 = vmul.f32 %v9834_v48, %v13320_v20  ;;  %v3158_v7 = vmul.f32 %v9805_v54, %v13217_v21  ;;  %v13322_v31 = vld [vmem:[#allocation68_spill] sm:$0xff]  ;;  %v13323_v60 = vld [vmem:[#allocation31_spill] sm:$0xff] }
 0x33b   :  { %v3267_v41 = vadd.f32 %v3231_v16, %v3193_v47  ;;  %v3232_v27 = vmul.f32 %v9810_v14, %v13321_v13  ;;  %v3708_v17 = vmax.f32 %v3672_v42, 0.0  ;;  %v3635_v28 = vadd.f32 %v3599_v63, %v3561_v51 }
 0x33c   :  { %v3488_v2 = vadd.f32 %v3452_v56, %v3414_v40  ;;  %v3601_v62 = vmul.f32 %v9840_v46, %v13322_v31  ;;  %v3194_v45 = vadd.f32 %v3158_v7, %v3120_v35  ;;  %v3306_v16 = vmul.f32 %v9813_v49, %v13323_v60 }
 0x33d   :  { %v3341_v36 = vadd.f32 %v3305_v11, %v3267_v41  ;;  %v3380_v25 = vmul.f32 %v9816_v15, %v13314_v33  ;;  %5548 = vst [vmem:[%s12101_s5 + $0x208] sm:$0xff] %v3708_v17  ;;  %v3673_v47 = vadd.f32 %v9842_v34, %v3635_v28  ;;  %v3454_v63 = vmul.f32 %v9824_v8, %v13219_v38 }
 0x33e   :  { %v3562_v42 = vadd.f32 %v3526_v32, %v3488_v2  ;;  %v3121_v56 = vmul.f32 %v9791_v22, %v13217_v21  ;;  %v3268_v51 = vadd.f32 %v3232_v27, %v3194_v45  ;;  %v3159_v40 = vmul.f32 %v9805_v54, %v13224_v23 }
 0x33f   :  { %v3415_v11 = vadd.f32 %v3379_v9, %v3341_v36  ;;  %v3233_v35 = vmul.f32 %v9810_v14, %v13323_v60  ;;  %v3709_v41 = vmax.f32 %v3673_v47, 0.0  ;;  %v3528_v7 = vmul.f32 %v9834_v48, %v13322_v31 }
 0x340   :  { %v3636_v32 = vadd.f32 %v3600_v50, %v3562_v42  ;;  %v3602_v17 = vmul.f32 %v9840_v46, %v9697_v39  ;;  %v3342_v27 = vadd.f32 %v3306_v16, %v3268_v51  ;;  %v3195_v28 = vadd.f32 %v3159_v40, %v3121_v56 }
 0x341   :  { %v3489_v9 = vadd.f32 %v3453_v55, %v3415_v11  ;;  %v3307_v2 = vmul.f32 %v9813_v49, %v9752_v4  ;;  %5549 = vst [vmem:[%s12101_s5 + $0x210] sm:$0xff] %v3709_v41  ;;  %v3381_v36 = vmul.f32 %v9816_v15, %v13219_v38  ;;  %v3455_v45 = vmul.f32 %v9824_v8, %v13226_v1 }
 0x342   :  { %v3674_v50 = vadd.f32 %v9842_v34, %v3636_v32  ;;  %v3122_v55 = vmul.f32 %v9791_v22, %v13224_v23  ;;  %v3416_v47 = vadd.f32 %v3380_v25, %v3342_v27  ;;  %v3269_v42 = vadd.f32 %v3233_v35, %v3195_v28 }
 0x343   :  { %v3563_v16 = vadd.f32 %v3527_v57, %v3489_v9  ;;  %v3160_v56 = vmul.f32 %v9805_v54, %v13232_v53  ;;  %v3529_v51 = vmul.f32 %v9834_v48, %v9697_v39  ;;  %v3234_v40 = vmul.f32 %v9810_v14, %v9752_v4 }
 0x344   :  { %v3710_v11 = vmax.f32 %v3674_v50, 0.0  ;;  %v3308_v41 = vmul.f32 %v9813_v49, %v9837_v0  ;;  %v3490_v54 = vadd.f32 %v3454_v63, %v3416_v47  ;;  %v3343_v57 = vadd.f32 %v3307_v2, %v3269_v42  ;;  %v13332_v0 = vld [vmem:[#allocation41_spill] sm:$0xff] }
 0x345   :  { %v3637_v22 = vadd.f32 %v3601_v62, %v3563_v16  ;;  %v3196_v25 = vadd.f32 %v3160_v56, %v3122_v55  ;;  %v3603_v14 = vmul.f32 %v9840_v46, %v9782_v19  ;;  %v3382_v49 = vmul.f32 %v9816_v15, %v13226_v1  ;;  %v13324_v56 = vld [vmem:[#allocation26_spill] sm:$0xff] }
 0x346   :  { %5550 = vst [vmem:[%s12101_s5 + $0x218] sm:$0xff] %v3710_v11  ;;  %v3456_v62 = vmul.f32 %v9824_v8, %v13234_v58  ;;  %v10563_v35 = vstv %s10509_s24  ;;  %v3564_v32 = vadd.f32 %v3528_v7, %v3490_v54  ;;  %v3417_v9 = vadd.f32 %v3381_v36, %v3343_v57  ;;  %v13342_v58 = vld [vmem:[#allocation52_spill] sm:$0xff]  ;;  %v13348_v1 = vld [vmem:[#allocation62_spill] sm:$0xff]  ;;  %s11322_s24 = sld [smem:[#allocation6 + $0x1f]] }
 0x347   :  { %v3675_v63 = vadd.f32 %v9842_v34, %v3637_v22  ;;  %v3270_v27 = vadd.f32 %v3234_v40, %v3196_v25  ;;  %v3754_v28 = vmul.f32 %v10563_v35, %v13235_v61  ;;  %v10569_v2 = vstv %s10515_s25  ;;  %v13325_v22 = vld [vmem:[#allocation27_spill] sm:$0xff] }
 0x348   :  { %v10572_v50 = vstv %s10521_s26  ;;  %v10575_v55 = vstv %s10523_s2  ;;  %v3638_v8 = vadd.f32 %v3602_v17, %v3564_v32  ;;  %v3491_v16 = vadd.f32 %v3455_v45, %v3417_v9  ;;  %s11341_s2 = sld [smem:[#allocation7 + $0x3]] }
 0x349   :  { %v3711_v15 = vmax.f32 %v3675_v63, 0.0  ;;  %v3344_v7 = vadd.f32 %v3308_v41, %v3270_v27  ;;  %v3530_v36 = vmul.f32 %v9834_v48, %v9782_v19  ;;  %v3604_v47 = vmul.f32 %v9840_v46, %v9860_v29  ;;  %v13335_v19 = vld [vmem:[#allocation44_spill] sm:$0xff] }
 0x34a   :  { %v3792_v42 = vmul.f32 %v10569_v2, %v13236_v5  ;;  %v3866_v11 = vmul.f32 %v10572_v50, %v13324_v56  ;;  %v3676_v17 = vadd.f32 %v9842_v34, %v3638_v8  ;;  %v3565_v45 = vadd.f32 %v3529_v51, %v3491_v16  ;;  %v13328_v8 = vld [vmem:[#allocation34_spill] sm:$0xff] }
 0x34b   :  { %5551 = vst [vmem:[%s12101_s5 + $0x220] sm:$0xff] %v3711_v15  ;;  %v3418_v40 = vadd.f32 %v3382_v49, %v3344_v7  ;;  %v10592_v41 = vstv %s10539_s21  ;;  %v3940_v46 = vmul.f32 %v10575_v55, %v13325_v22  ;;  %v10597_v54 = vstv %s10547_s1  ;;  %v13326_v15 = vld [vmem:[#allocation32_spill] sm:$0xff]  ;;  %v13327_v49 = vld [vmem:[#allocation33_spill] sm:$0xff] }
 0x34c   :  { %v3828_v48 = vadd.f32 %v3792_v42, %v3754_v28  ;;  %v10600_v57 = vstv %s10549_s28  ;;  %v3712_v25 = vmax.f32 %v3676_v17, 0.0  ;;  %v3639_v63 = vadd.f32 %v3603_v14, %v3565_v45  ;;  %v13329_v42 = vld [vmem:[#allocation39_spill] sm:$0xff] }
 0x34d   :  { %v3492_v32 = vadd.f32 %v3456_v62, %v3418_v40  ;;  %v10603_v9 = vstv %s10551_s29  ;;  %v4014_v51 = vmul.f32 %v10592_v41, %v13326_v15  ;;  %v4088_v28 = vmul.f32 %v10597_v54, %v13327_v49  ;;  %v13330_v45 = vld [vmem:[#allocation35_spill] sm:$0xff] }
 0x34e   :  { %v3902_v27 = vadd.f32 %v3866_v11, %v3828_v48  ;;  %v4162_v16 = vmul.f32 %v10600_v57, %v13328_v8  ;;  %5552 = vst [vmem:[%s12101_s5 + $0x228] sm:$0xff] %v3712_v25  ;;  %v3677_v7 = vadd.f32 %v9842_v34, %v3639_v63  ;;  %v3755_v62 = vmul.f32 %v10563_v35, %v13236_v5  ;;  %v13331_v63 = vld [vmem:[#allocation40_spill] sm:$0xff] }
 0x34f   :  { %v3566_v14 = vadd.f32 %v3530_v36, %v3492_v32  ;;  %v3793_v11 = vmul.f32 %v10569_v2, %v13329_v42  ;;  %v4236_v40 = vmul.f32 %v10603_v9, %v13330_v45  ;;  %v10622_v48 = vstv %s10577_s7 }
 0x350   :  { %v3976_v17 = vadd.f32 %v3940_v46, %v3902_v27  ;;  %v3867_v29 = vmul.f32 %v10572_v50, %v13325_v22  ;;  %v3713_v15 = vmax.f32 %v3677_v7, 0.0  ;;  %v3941_v36 = vmul.f32 %v10575_v55, %v13331_v63 }
 0x351   :  { %v3640_v25 = vadd.f32 %v3604_v47, %v3566_v14  ;;  %v3829_v61 = vadd.f32 %v3793_v11, %v3755_v62  ;;  %v4015_v5 = vmul.f32 %v10592_v41, %v13327_v49  ;;  %v4089_v46 = vmul.f32 %v10597_v54, %v13332_v0  ;;  %v13333_v14 = vld [vmem:[#allocation43_spill] sm:$0xff]  ;;  %v13334_v49 = vld [vmem:[#allocation42_spill] sm:$0xff] }
 0x352   :  { %v4050_v32 = vadd.f32 %v4014_v51, %v3976_v17  ;;  %v3756_v27 = vmul.f32 %v10563_v35, %v13329_v42  ;;  %5553 = vst [vmem:[%s12101_s5 + $0x230] sm:$0xff] %v3713_v15  ;;  %v3794_v62 = vmul.f32 %v10569_v2, %v13333_v14  ;;  %v3868_v51 = vmul.f32 %v10572_v50, %v13331_v63 }
 0x353   :  { %v3678_v47 = vadd.f32 %v9842_v34, %v3640_v25  ;;  %v3903_v7 = vadd.f32 %v3867_v29, %v3829_v61  ;;  %v4163_v17 = vmul.f32 %v10600_v57, %v13330_v45  ;;  %v4237_v42 = vmul.f32 %v10603_v9, %v13334_v49  ;;  %v13336_v25 = vld [vmem:[#allocation45_spill] sm:$0xff] }
 0x354   :  { %v4124_v11 = vadd.f32 %v4088_v28, %v4050_v32  ;;  %v3942_v39 = vmul.f32 %v10575_v55, %v13335_v19  ;;  %v3830_v34 = vadd.f32 %v3794_v62, %v3756_v27  ;;  %v4016_v61 = vmul.f32 %v10592_v41, %v13332_v0  ;;  %v13337_v32 = vld [vmem:[#allocation47_spill] sm:$0xff]  ;;  %v13338_v62 = vld [vmem:[#allocation46_spill] sm:$0xff] }
 0x355   :  { %v3714_v15 = vmax.f32 %v3678_v47, 0.0  ;;  %v3977_v4 = vadd.f32 %v3941_v36, %v3903_v7  ;;  %v4090_v60 = vmul.f32 %v10597_v54, %v13336_v25  ;;  %v3757_v28 = vmul.f32 %v10563_v35, %v13333_v14  ;;  %v13339_v14 = vld [vmem:[#allocation48_spill] sm:$0xff] }
 0x356   :  { %v4198_v29 = vadd.f32 %v4162_v16, %v4124_v11  ;;  %v3795_v31 = vmul.f32 %v10569_v2, %v13337_v32  ;;  %v3904_v36 = vadd.f32 %v3868_v51, %v3830_v34  ;;  %v4164_v27 = vmul.f32 %v10600_v57, %v13334_v49 }
 0x357   :  { %5554 = vst [vmem:[%s12101_s5 + $0x238] sm:$0xff] %v3714_v15  ;;  %v4051_v47 = vadd.f32 %v4015_v5, %v3977_v4  ;;  %v3869_v16 = vmul.f32 %v10572_v50, %v13335_v19  ;;  %v4238_v11 = vmul.f32 %v10603_v9, %v13338_v62  ;;  %v3943_v13 = vmul.f32 %v10575_v55, %v13339_v14  ;;  %v13340_v5 = vld [vmem:[#allocation49_spill] sm:$0xff] }
 0x358   :  { %v4272_v7 = vadd.f32 %v4236_v40, %v4198_v29  ;;  %v3831_v0 = vadd.f32 %v3795_v31, %v3757_v28  ;;  %v3978_v3 = vadd.f32 %v3942_v39, %v3904_v36  ;;  %v4017_v4 = vmul.f32 %v10592_v41, %v13336_v25  ;;  %v13341_v29 = vld [vmem:[#allocation51_spill] sm:$0xff] }
 0x359   :  { %v4125_v20 = vadd.f32 %v4089_v46, %v4051_v47  ;;  %v4091_v51 = vmul.f32 %v10597_v54, %v13340_v5  ;;  %v3758_v40 = vmul.f32 %v10563_v35, %v13337_v32  ;;  %v3796_v31 = vmul.f32 %v10569_v2, %v13341_v29  ;;  %v13343_v32 = vld [vmem:[#allocation50_spill] sm:$0xff] }
 0x35a   :  { %v4310_v15 = vadd.f32 %v10622_v48, %v4272_v7  ;;  %v3905_v34 = vadd.f32 %v3869_v16, %v3831_v0  ;;  %v4052_v59 = vadd.f32 %v4016_v61, %v3978_v3  ;;  %v4165_v39 = vmul.f32 %v10600_v57, %v13338_v62  ;;  %v13344_v61 = vld [vmem:[#allocation54_spill] sm:$0xff] }
 0x35b   :  { %v4199_v28 = vadd.f32 %v4163_v17, %v4125_v20  ;;  %v3870_v46 = vmul.f32 %v10572_v50, %v13339_v14  ;;  %v3832_v25 = vadd.f32 %v3796_v31, %v3758_v40  ;;  %v3944_v0 = vmul.f32 %v10575_v55, %v13342_v58 }
 0x35c   :  { %v4346_v47 = vmax.f32 %v4310_v15, 0.0  ;;  %v3979_v36 = vadd.f32 %v3943_v13, %v3905_v34  ;;  %v4126_v7 = vadd.f32 %v4090_v60, %v4052_v59  ;;  %v4239_v53 = vmul.f32 %v10603_v9, %v13343_v32 }
 0x35d   :  { %v4273_v16 = vadd.f32 %v4237_v42, %v4199_v28  ;;  %v4018_v3 = vmul.f32 %v10592_v41, %v13340_v5  ;;  %v3906_v17 = vadd.f32 %v3870_v46, %v3832_v25  ;;  %v4092_v13 = vmul.f32 %v10597_v54, %v13344_v61  ;;  %v13345_v42 = vld [vmem:[#allocation57_spill] sm:$0xff] }
 0x35e   :  { %5564 = vst [vmem:[%s12101_s5 + $0x240] sm:$0xff] %v4346_v47  ;;  %v4053_v20 = vadd.f32 %v4017_v4, %v3979_v36  ;;  %v3759_v15 = vmul.f32 %v10563_v35, %v13341_v29  ;;  %v4200_v60 = vadd.f32 %v4164_v27, %v4126_v7  ;;  %v3797_v34 = vmul.f32 %v10569_v2, %v13345_v42  ;;  %v13346_v4 = vld [vmem:[#allocation55_spill] sm:$0xff]  ;;  %v13347_v29 = vld [vmem:[#allocation58_spill] sm:$0xff] }
 0x35f   :  { %v4311_v59 = vadd.f32 %v10622_v48, %v4273_v16  ;;  %v3871_v40 = vmul.f32 %v10572_v50, %v13342_v58  ;;  %v3980_v28 = vadd.f32 %v3944_v0, %v3906_v17  ;;  %v4166_v25 = vmul.f32 %v10600_v57, %v13343_v32 }
 0x360   :  { %v4127_v31 = vadd.f32 %v4091_v51, %v4053_v20  ;;  %v4240_v46 = vmul.f32 %v10603_v9, %v13346_v4  ;;  %v4274_v36 = vadd.f32 %v4238_v11, %v4200_v60  ;;  %v3833_v5 = vadd.f32 %v3797_v34, %v3759_v15 }
 0x361   :  { %v4347_v47 = vmax.f32 %v4311_v59, 0.0  ;;  %v3945_v27 = vmul.f32 %v10575_v55, %v13347_v29  ;;  %v4054_v7 = vadd.f32 %v4018_v3, %v3980_v28  ;;  %v4019_v42 = vmul.f32 %v10592_v41, %v13344_v61  ;;  %v13349_v59 = vld [vmem:[#allocation66_spill] sm:$0xff] }
 0x362   :  { %v4201_v16 = vadd.f32 %v4165_v39, %v4127_v31  ;;  %v4093_v51 = vmul.f32 %v10597_v54, %v13348_v1  ;;  %v4312_v0 = vadd.f32 %v10622_v48, %v4274_v36  ;;  %v3907_v20 = vadd.f32 %v3871_v40, %v3833_v5  ;;  %v13351_v1 = vld [vmem:[#allocation63_spill] sm:$0xff] }
 0x363   :  { %5565 = vst [vmem:[%s12101_s5 + $0x248] sm:$0xff] %v4347_v47  ;;  %v3760_v11 = vmul.f32 %v10563_v35, %v13324_v56  ;;  %v3798_v39 = vmul.f32 %v10569_v2, %v13325_v22  ;;  %v4128_v17 = vadd.f32 %v4092_v13, %v4054_v7  ;;  %v4167_v15 = vmul.f32 %v10600_v57, %v13346_v4  ;;  %v13350_v47 = vld [vmem:[#allocation67_spill] sm:$0xff] }
 0x364   :  { %v4275_v3 = vadd.f32 %v4239_v53, %v4201_v16  ;;  %v3872_v60 = vmul.f32 %v10572_v50, %v13349_v59  ;;  %v4348_v34 = vmax.f32 %v4312_v0, 0.0  ;;  %v3981_v31 = vadd.f32 %v3945_v27, %v3907_v20 }
 0x365   :  { %v3834_v28 = vadd.f32 %v3798_v39, %v3760_v11  ;;  %v3946_v5 = vmul.f32 %v10575_v55, %v13350_v47  ;;  %v4202_v36 = vadd.f32 %v4166_v25, %v4128_v17  ;;  %v4241_v61 = vmul.f32 %v10603_v9, %v13351_v1  ;;  %v13352_v17 = vld [vmem:[#allocation22_spill] sm:$0xff] }
 0x366   :  { %v4313_v40 = vadd.f32 %v10622_v48, %v4275_v3  ;;  %v4020_v53 = vmul.f32 %v10592_v41, %v13328_v8  ;;  %5566 = vst [vmem:[%s12101_s5 + $0x250] sm:$0xff] %v4348_v34  ;;  %v4055_v13 = vadd.f32 %v4019_v42, %v3981_v31  ;;  %v4094_v27 = vmul.f32 %v10597_v54, %v13330_v45 }
 0x367   :  { %v3908_v16 = vadd.f32 %v3872_v60, %v3834_v28  ;;  %v3761_v7 = vmul.f32 %v10563_v35, %v13325_v22  ;;  %v4276_v25 = vadd.f32 %v4240_v46, %v4202_v36  ;;  %v3799_v20 = vmul.f32 %v10569_v2, %v13331_v63  ;;  %v13353_v60 = vld [vmem:[#allocation70_spill] sm:$0xff]  ;;  %v13354_v28 = vld [vmem:[#allocation73_spill] sm:$0xff] }
 0x368   :  { %v4349_v0 = vmax.f32 %v4313_v40, 0.0  ;;  %v3873_v11 = vmul.f32 %v10572_v50, %v13350_v47  ;;  %v4129_v39 = vadd.f32 %v4093_v51, %v4055_v13  ;;  %v4168_v42 = vmul.f32 %v10600_v57, %v13352_v17 }
 0x369   :  { %v3982_v3 = vadd.f32 %v3946_v5, %v3908_v16  ;;  %v4242_v34 = vmul.f32 %v10603_v9, %v13353_v60  ;;  %v4314_v46 = vadd.f32 %v10622_v48, %v4276_v25  ;;  %v3835_v31 = vadd.f32 %v3799_v20, %v3761_v7 }
 0x36a   :  { %5567 = vst [vmem:[%s12101_s5 + $0x258] sm:$0xff] %v4349_v0  ;;  %v3947_v40 = vmul.f32 %v10575_v55, %v13354_v28  ;;  %v4021_v51 = vmul.f32 %v10592_v41, %v13330_v45  ;;  %v4203_v5 = vadd.f32 %v4167_v15, %v4129_v39  ;;  %v4095_v13 = vmul.f32 %v10597_v54, %v13334_v49 }
 0x36b   :  { %v4056_v36 = vadd.f32 %v4020_v53, %v3982_v3  ;;  %v3762_v16 = vmul.f32 %v10563_v35, %v13331_v63  ;;  %v4350_v8 = vmax.f32 %v4314_v46, 0.0  ;;  %v3909_v22 = vadd.f32 %v3873_v11, %v3835_v31  ;;  %v13355_v53 = vld [vmem:[#allocation74_spill] sm:$0xff]  ;;  %v13356_v46 = vld [vmem:[#allocation37_spill] sm:$0xff] }
 0x36c   :  { %v3800_v0 = vmul.f32 %v10569_v2, %v13335_v19  ;;  %v3874_v7 = vmul.f32 %v10572_v50, %v13354_v28  ;;  %v4277_v25 = vadd.f32 %v4241_v61, %v4203_v5  ;;  %v4169_v15 = vmul.f32 %v10600_v57, %v13353_v60 }
 0x36d   :  { %v4130_v20 = vadd.f32 %v4094_v27, %v4056_v36  ;;  %v4243_v39 = vmul.f32 %v10603_v9, %v13355_v53  ;;  %5568 = vst [vmem:[%s12101_s5 + $0x260] sm:$0xff] %v4350_v8  ;;  %v3983_v3 = vadd.f32 %v3947_v40, %v3909_v22  ;;  %v3948_v31 = vmul.f32 %v10575_v55, %v13356_v46 }
 0x36e   :  { %v3836_v11 = vadd.f32 %v3800_v0, %v3762_v16  ;;  %v4022_v63 = vmul.f32 %v10592_v41, %v13334_v49  ;;  %v4315_v61 = vadd.f32 %v10622_v48, %v4277_v25  ;;  %v4096_v5 = vmul.f32 %v10597_v54, %v13338_v62 }
 0x36f   :  { %v4204_v27 = vadd.f32 %v4168_v42, %v4130_v20  ;;  %v3763_v36 = vmul.f32 %v10563_v35, %v13335_v19  ;;  %v4057_v45 = vadd.f32 %v4021_v51, %v3983_v3  ;;  %v3801_v22 = vmul.f32 %v10569_v2, %v13339_v14  ;;  %v13357_v42 = vld [vmem:[#allocation78_spill] sm:$0xff]  ;;  %v13358_v19 = vld [vmem:[#allocation80_spill] sm:$0xff] }
 0x370   :  { %v3910_v56 = vadd.f32 %v3874_v7, %v3836_v11  ;;  %v3875_v8 = vmul.f32 %v10572_v50, %v13356_v46  ;;  %v4351_v40 = vmax.f32 %v4315_v61, 0.0  ;;  %v4170_v0 = vmul.f32 %v10600_v57, %v13355_v53 }
 0x371   :  { %v4278_v16 = vadd.f32 %v4242_v34, %v4204_v27  ;;  %v4244_v25 = vmul.f32 %v10603_v9, %v13357_v42  ;;  %v4131_v20 = vadd.f32 %v4095_v13, %v4057_v45  ;;  %v3837_v23 = vadd.f32 %v3801_v22, %v3763_v36  ;;  %v13359_v22 = vld [vmem:[#allocation83_spill] sm:$0xff] }
 0x372   :  { %v3984_v49 = vadd.f32 %v3948_v31, %v3910_v56  ;;  %v3949_v51 = vmul.f32 %v10575_v55, %v13358_v19  ;;  %5569 = vst [vmem:[%s12101_s5 + $0x268] sm:$0xff] %v4351_v40  ;;  %v4023_v34 = vmul.f32 %v10592_v41, %v13338_v62  ;;  %v4097_v3 = vmul.f32 %v10597_v54, %v13343_v32 }
 0x373   :  { %v4316_v7 = vadd.f32 %v10622_v48, %v4278_v16  ;;  %v3764_v45 = vmul.f32 %v10563_v35, %v13339_v14  ;;  %v4205_v56 = vadd.f32 %v4169_v15, %v4131_v20  ;;  %v3911_v11 = vadd.f32 %v3875_v8, %v3837_v23  ;;  %v13360_v23 = vld [vmem:[#allocation81_spill] sm:$0xff] }
 0x374   :  { %v4058_v13 = vadd.f32 %v4022_v63, %v3984_v49  ;;  %v3802_v31 = vmul.f32 %v10569_v2, %v13342_v58  ;;  %v4171_v27 = vmul.f32 %v10600_v57, %v13357_v42  ;;  %v3876_v36 = vmul.f32 %v10572_v50, %v13358_v19 }
 0x375   :  { %v4352_v61 = vmax.f32 %v4316_v7, 0.0  ;;  %v3950_v40 = vmul.f32 %v10575_v55, %v13359_v22  ;;  %v4279_v16 = vadd.f32 %v4243_v39, %v4205_v56  ;;  %v3985_v38 = vadd.f32 %v3949_v51, %v3911_v11 }
 0x376   :  { %v4132_v62 = vadd.f32 %v4096_v5, %v4058_v13  ;;  %v3838_v14 = vadd.f32 %v3802_v31, %v3764_v45  ;;  %v4245_v49 = vmul.f32 %v10603_v9, %v13360_v23  ;;  %v4024_v63 = vmul.f32 %v10592_v41, %v13343_v32  ;;  %v13361_v45 = vld [vmem:[#allocation84_spill] sm:$0xff] }
 0x377   :  { %5570 = vst [vmem:[%s12101_s5 + $0x270] sm:$0xff] %v4352_v61  ;;  %v4098_v15 = vmul.f32 %v10597_v54, %v13346_v4  ;;  %v3765_v8 = vmul.f32 %v10563_v35, %v13342_v58  ;;  %v4317_v39 = vadd.f32 %v10622_v48, %v4279_v16  ;;  %v4059_v20 = vadd.f32 %v4023_v34, %v3985_v38 }
 0x378   :  { %v4206_v5 = vadd.f32 %v4170_v0, %v4132_v62  ;;  %v3912_v51 = vadd.f32 %v3876_v36, %v3838_v14  ;;  %v4172_v7 = vmul.f32 %v10600_v57, %v13360_v23  ;;  %v4246_v56 = vmul.f32 %v10603_v9, %v13361_v45  ;;  %v13362_v62 = vld [vmem:[#allocation60_spill] sm:$0xff] }
 0x379   :  { %v3803_v13 = vmul.f32 %v10569_v2, %v13347_v29  ;;  %v3877_v11 = vmul.f32 %v10572_v50, %v13359_v22  ;;  %v4353_v31 = vmax.f32 %v4317_v39, 0.0  ;;  %v4133_v32 = vadd.f32 %v4097_v3, %v4059_v20 }
 0x37a   :  { %v4280_v61 = vadd.f32 %v4244_v25, %v4206_v5  ;;  %v3986_v58 = vadd.f32 %v3950_v40, %v3912_v51  ;;  %v3951_v38 = vmul.f32 %v10575_v55, %v13362_v62  ;;  %v4025_v14 = vmul.f32 %v10592_v41, %v13346_v4  ;;  %v13363_v5 = vld [vmem:[#allocation86_spill] sm:$0xff] }
 0x37b   :  { %v3839_v16 = vadd.f32 %v3803_v13, %v3765_v8  ;;  %v4099_v0 = vmul.f32 %v10597_v54, %v13351_v1  ;;  %5571 = vst [vmem:[%s12101_s5 + $0x278] sm:$0xff] %v4353_v31  ;;  %v4207_v36 = vadd.f32 %v4171_v27, %v4133_v32  ;;  %v3766_v3 = vmul.f32 %v10563_v35, %v13349_v59  ;;  %v13364_v1 = vld [vmem:[#allocation85_spill] sm:$0xff] }
 0x37c   :  { %v4318_v34 = vadd.f32 %v10622_v48, %v4280_v61  ;;  %v4060_v25 = vadd.f32 %v4024_v63, %v3986_v58  ;;  %v4173_v8 = vmul.f32 %v10600_v57, %v13361_v45  ;;  %v3804_v39 = vmul.f32 %v10569_v2, %v13350_v47  ;;  %v13365_v63 = vld [vmem:[#allocation87_spill] sm:$0xff] }
 0x37d   :  { %v3913_v40 = vadd.f32 %v3877_v11, %v3839_v16  ;;  %v3878_v20 = vmul.f32 %v10572_v50, %v13363_v5  ;;  %v4281_v13 = vadd.f32 %v4245_v49, %v4207_v36  ;;  %v4247_v32 = vmul.f32 %v10603_v9, %v13364_v1 }
 0x37e   :  { %v4354_v51 = vmax.f32 %v4318_v34, 0.0  ;;  %v4134_v31 = vadd.f32 %v4098_v15, %v4060_v25  ;;  %v3840_v27 = vadd.f32 %v3804_v39, %v3766_v3  ;;  %v3952_v11 = vmul.f32 %v10575_v55, %v13365_v63 }
 0x37f   :  { %v3987_v58 = vadd.f32 %v3951_v38, %v3913_v40  ;;  %v4026_v61 = vmul.f32 %v10592_v41, %v13352_v17  ;;  %v4319_v16 = vadd.f32 %v10622_v48, %v4281_v13  ;;  %v4100_v49 = vmul.f32 %v10597_v54, %v13353_v60 }
 0x380   :  { %5572 = vst [vmem:[%s12101_s5 + $0x280] sm:$0xff] %v4354_v51  ;;  %v4208_v34 = vadd.f32 %v4172_v7, %v4134_v31  ;;  %v3767_v15 = vmul.f32 %v10563_v35, %v13350_v47  ;;  %v3914_v36 = vadd.f32 %v3878_v20, %v3840_v27  ;;  %v3805_v25 = vmul.f32 %v10569_v2, %v13354_v28  ;;  %v13366_v51 = vld [vmem:[#allocation88_spill] sm:$0xff]  ;;  %v13367_v7 = vld [vmem:[#allocation89_spill] sm:$0xff]  ;;  %v13368_v47 = vld [vmem:[#allocation91_spill] sm:$0xff] }
 0x381   :  { %v4061_v38 = vadd.f32 %v4025_v14, %v3987_v58  ;;  %v3879_v3 = vmul.f32 %v10572_v50, %v13365_v63  ;;  %v4355_v40 = vmax.f32 %v4319_v16, 0.0  ;;  %v4174_v13 = vmul.f32 %v10600_v57, %v13366_v51 }
 0x382   :  { %v4282_v39 = vadd.f32 %v4246_v56, %v4208_v34  ;;  %v4248_v31 = vmul.f32 %v10603_v9, %v13367_v7  ;;  %v3988_v59 = vadd.f32 %v3952_v11, %v3914_v36  ;;  %v3841_v4 = vadd.f32 %v3805_v25, %v3767_v15  ;;  %v13369_v25 = vld [vmem:[#allocation90_spill] sm:$0xff] }
 0x383   :  { %v4135_v17 = vadd.f32 %v4099_v0, %v4061_v38  ;;  %v3953_v14 = vmul.f32 %v10575_v55, %v13368_v47  ;;  %5573 = vst [vmem:[%s12101_s5 + $0x288] sm:$0xff] %v4355_v40  ;;  %v4027_v56 = vmul.f32 %v10592_v41, %v13353_v60  ;;  %v4101_v58 = vmul.f32 %v10597_v54, %v13355_v53 }
 0x384   :  { %v4320_v20 = vadd.f32 %v10622_v48, %v4282_v39  ;;  %v3768_v0 = vmul.f32 %v10563_v35, %v13354_v28  ;;  %v4062_v11 = vadd.f32 %v4026_v61, %v3988_v59  ;;  %v3915_v16 = vadd.f32 %v3879_v3, %v3841_v4  ;;  %v13370_v4 = vld [vmem:[#allocation92_spill] sm:$0xff] }
 0x385   :  { %v4209_v27 = vadd.f32 %v4173_v8, %v4135_v17  ;;  %v3806_v34 = vmul.f32 %v10569_v2, %v13356_v46  ;;  %v4175_v38 = vmul.f32 %v10600_v57, %v13367_v7  ;;  %v3880_v36 = vmul.f32 %v10572_v50, %v13368_v47 }
 0x386   :  { %v4356_v15 = vmax.f32 %v4320_v20, 0.0  ;;  %v3954_v40 = vmul.f32 %v10575_v55, %v13369_v25  ;;  %v4136_v60 = vadd.f32 %v4100_v49, %v4062_v11  ;;  %v3989_v29 = vadd.f32 %v3953_v14, %v3915_v16 }
 0x387   :  { %v4283_v39 = vadd.f32 %v4247_v32, %v4209_v27  ;;  %v3842_v28 = vadd.f32 %v3806_v34, %v3768_v0  ;;  %v4249_v59 = vmul.f32 %v10603_v9, %v13370_v4  ;;  %v4028_v17 = vmul.f32 %v10592_v41, %v13355_v53  ;;  %v13371_v0 = vld [vmem:[#allocation93_spill] sm:$0xff] }
 0x388   :  { %5574 = vst [vmem:[%s12101_s5 + $0x290] sm:$0xff] %v4356_v15  ;;  %v4102_v8 = vmul.f32 %v10597_v54, %v13357_v42  ;;  %v3769_v61 = vmul.f32 %v10563_v35, %v13356_v46  ;;  %v4210_v49 = vadd.f32 %v4174_v13, %v4136_v60  ;;  %v4063_v3 = vadd.f32 %v4027_v56, %v3989_v29  ;;  %v13372_v60 = vld [vmem:[#allocation94_spill] sm:$0xff] }
 0x389   :  { %v4321_v32 = vadd.f32 %v10622_v48, %v4283_v39  ;;  %v3916_v14 = vadd.f32 %v3880_v36, %v3842_v28  ;;  %v4176_v20 = vmul.f32 %v10600_v57, %v13370_v4  ;;  %v4250_v27 = vmul.f32 %v10603_v9, %v13371_v0 }
 0x38a   :  { %v3807_v11 = vmul.f32 %v10569_v2, %v13358_v19  ;;  %v3881_v16 = vmul.f32 %v10572_v50, %v13369_v25  ;;  %v4284_v15 = vadd.f32 %v4248_v31, %v4210_v49  ;;  %v4137_v53 = vadd.f32 %v4101_v58, %v4063_v3 }
 0x38b   :  { %v4357_v34 = vmax.f32 %v4321_v32, 0.0  ;;  %v3990_v46 = vadd.f32 %v3954_v40, %v3916_v14  ;;  %v3955_v29 = vmul.f32 %v10575_v55, %v13372_v60  ;;  %v4029_v28 = vmul.f32 %v10592_v41, %v13357_v42 }
 0x38c   :  { %v3843_v39 = vadd.f32 %v3807_v11, %v3769_v61  ;;  %v4103_v13 = vmul.f32 %v10597_v54, %v13360_v23  ;;  %v4322_v56 = vadd.f32 %v10622_v48, %v4284_v15  ;;  %v4211_v36 = vadd.f32 %v4175_v38, %v4137_v53 }
 0x38d   :  { %5575 = vst [vmem:[%s12101_s5 + $0x298] sm:$0xff] %v4357_v34  ;;  %v4064_v31 = vadd.f32 %v4028_v17, %v3990_v46  ;;  %v3770_v58 = vmul.f32 %v10563_v35, %v13358_v19  ;;  %v4177_v61 = vmul.f32 %v10600_v57, %v13371_v0  ;;  %v3808_v32 = vmul.f32 %v10569_v2, %v13359_v22  ;;  %v13373_v34 = vld [vmem:[#allocation95_spill] sm:$0xff]  ;;  %v13374_v17 = vld [vmem:[#allocation97_spill] sm:$0xff] }
 0x38e   :  { %v3917_v40 = vadd.f32 %v3881_v16, %v3843_v39  ;;  %v3882_v49 = vmul.f32 %v10572_v50, %v13372_v60  ;;  %v4358_v3 = vmax.f32 %v4322_v56, 0.0  ;;  %v4285_v14 = vadd.f32 %v4249_v59, %v4211_v36 }
 0x38f   :  { %v4138_v11 = vadd.f32 %v4102_v8, %v4064_v31  ;;  %v4251_v53 = vmul.f32 %v10603_v9, %v13373_v34  ;;  %v3844_v38 = vadd.f32 %v3808_v32, %v3770_v58  ;;  %v3956_v16 = vmul.f32 %v10575_v55, %v13374_v17 }
 0x390   :  { %v3991_v46 = vadd.f32 %v3955_v29, %v3917_v40  ;;  %v4030_v15 = vmul.f32 %v10592_v41, %v13360_v23  ;;  %5576 = vst [vmem:[%s12101_s5 + $0x2a0] sm:$0xff] %v4358_v3  ;;  %v4323_v39 = vadd.f32 %v10622_v48, %v4285_v14  ;;  %v4104_v59 = vmul.f32 %v10597_v54, %v13361_v45 }
 0x391   :  { %v4212_v56 = vadd.f32 %v4176_v20, %v4138_v11  ;;  %v3771_v8 = vmul.f32 %v10563_v35, %v13359_v22  ;;  %v3918_v36 = vadd.f32 %v3882_v49, %v3844_v38  ;;  %v3809_v31 = vmul.f32 %v10569_v2, %v13362_v62  ;;  %v13375_v22 = vld [vmem:[#allocation61_spill] sm:$0xff] }
 0x392   :  { %v4065_v29 = vadd.f32 %v4029_v28, %v3991_v46  ;;  %v3883_v58 = vmul.f32 %v10572_v50, %v13374_v17  ;;  %v4359_v40 = vmax.f32 %v4323_v39, 0.0  ;;  %v4178_v3 = vmul.f32 %v10600_v57, %v13373_v34 }
 0x393   :  { %v4286_v32 = vadd.f32 %v4250_v27, %v4212_v56  ;;  %v4252_v20 = vmul.f32 %v10603_v9, %v13290_v24  ;;  %v3992_v11 = vadd.f32 %v3956_v16, %v3918_v36  ;;  %v3845_v23 = vadd.f32 %v3809_v31, %v3771_v8  ;;  %v13376_v36 = vld [vmem:[#allocation100_spill] sm:$0xff] }
 0x394   :  { %v4139_v14 = vadd.f32 %v4103_v13, %v4065_v29  ;;  %v3957_v28 = vmul.f32 %v10575_v55, %v13375_v22  ;;  %5577 = vst [vmem:[%s12101_s5 + $0x2a8] sm:$0xff] %v4359_v40  ;;  %v4031_v27 = vmul.f32 %v10592_v41, %v13361_v45  ;;  %v4105_v46 = vmul.f32 %v10597_v54, %v13364_v1  ;;  %v13377_v40 = vld [vmem:[#allocation101_spill] sm:$0xff] }
 0x395   :  { %v4324_v49 = vadd.f32 %v10622_v48, %v4286_v32  ;;  %v3772_v13 = vmul.f32 %v10563_v35, %v13363_v5  ;;  %v4066_v16 = vadd.f32 %v4030_v15, %v3992_v11  ;;  %v3919_v39 = vadd.f32 %v3883_v58, %v3845_v23  ;;  %v13378_v23 = vld [vmem:[#allocation99_spill] sm:$0xff] }
 0x396   :  { %v4213_v38 = vadd.f32 %v4177_v61, %v4139_v14  ;;  %v3810_v56 = vmul.f32 %v10569_v2, %v13365_v63  ;;  %v4179_v29 = vmul.f32 %v10600_v57, %v13290_v24  ;;  %v3884_v31 = vmul.f32 %v10572_v50, %v13376_v36 }
 0x397   :  { %v4360_v8 = vmax.f32 %v4324_v49, 0.0  ;;  %v3958_v32 = vmul.f32 %v10575_v55, %v13377_v40  ;;  %v4140_v62 = vadd.f32 %v4104_v59, %v4066_v16  ;;  %v3993_v45 = vadd.f32 %v3957_v28, %v3919_v39  ;;  %v13379_v49 = vld [vmem:[#allocation102_spill] sm:$0xff] }
 0x398   :  { %v4287_v1 = vadd.f32 %v4251_v53, %v4213_v38  ;;  %v3846_v5 = vadd.f32 %v3810_v56, %v3772_v13  ;;  %v4253_v61 = vmul.f32 %v10603_v9, %v13378_v23  ;;  %v4032_v15 = vmul.f32 %v10592_v41, %v13366_v51  ;;  %v13380_v38 = vld [vmem:[#allocation103_spill] sm:$0xff] }
 0x399   :  { %5578 = vst [vmem:[%s12101_s5 + $0x2b0] sm:$0xff] %v4360_v8  ;;  %v4106_v58 = vmul.f32 %v10597_v54, %v13367_v7  ;;  %v3773_v14 = vmul.f32 %v10563_v35, %v13365_v63  ;;  %v4214_v59 = vadd.f32 %v4178_v3, %v4140_v62  ;;  %v4067_v11 = vadd.f32 %v4031_v27, %v3993_v45  ;;  %v13381_v62 = vld [vmem:[#allocation105_spill] sm:$0xff] }
 0x39a   :  { %v4325_v53 = vadd.f32 %v10622_v48, %v4287_v1  ;;  %v3920_v28 = vadd.f32 %v3884_v31, %v3846_v5  ;;  %v4180_v13 = vmul.f32 %v10600_v57, %v13379_v49  ;;  %v4254_v16 = vmul.f32 %v10603_v9, %v13380_v38 }
 0x39b   :  { %v3811_v39 = vmul.f32 %v10569_v2, %v13368_v47  ;;  %v3885_v56 = vmul.f32 %v10572_v50, %v13377_v40  ;;  %v4288_v51 = vadd.f32 %v4252_v20, %v4214_v59  ;;  %v4141_v63 = vadd.f32 %v4105_v46, %v4067_v11 }
 0x39c   :  { %v4361_v8 = vmax.f32 %v4325_v53, 0.0  ;;  %v3994_v42 = vadd.f32 %v3958_v32, %v3920_v28  ;;  %v3959_v45 = vmul.f32 %v10575_v55, %v13381_v62  ;;  %v4033_v5 = vmul.f32 %v10592_v41, %v13367_v7 }
 0x39d   :  { %v3847_v1 = vadd.f32 %v3811_v39, %v3773_v14  ;;  %v4107_v3 = vmul.f32 %v10597_v54, %v13370_v4  ;;  %v4326_v27 = vadd.f32 %v10622_v48, %v4288_v51  ;;  %v4215_v31 = vadd.f32 %v4179_v29, %v4141_v63  ;;  %v13383_v29 = vld [vmem:[#allocation104_spill] sm:$0xff] }
 0x39e   :  { %5579 = vst [vmem:[%s12101_s5 + $0x2b8] sm:$0xff] %v4361_v8  ;;  %v4068_v20 = vadd.f32 %v4032_v15, %v3994_v42  ;;  %v3774_v46 = vmul.f32 %v10563_v35, %v13368_v47  ;;  %v4181_v14 = vmul.f32 %v10600_v57, %v13380_v38  ;;  %v3812_v53 = vmul.f32 %v10569_v2, %v13369_v25  ;;  %v13382_v8 = vld [vmem:[#allocation106_spill] sm:$0xff] }
 0x39f   :  { %v3921_v32 = vadd.f32 %v3885_v56, %v3847_v1  ;;  %v3886_v59 = vmul.f32 %v10572_v50, %v13381_v62  ;;  %v4362_v11 = vmax.f32 %v4326_v27, 0.0  ;;  %v4289_v28 = vadd.f32 %v4253_v61, %v4215_v31 }
 0x3a0   :  { %v4142_v39 = vadd.f32 %v4106_v58, %v4068_v20  ;;  %v4255_v63 = vmul.f32 %v10603_v9, %v13382_v8  ;;  %v3848_v51 = vadd.f32 %v3812_v53, %v3774_v46  ;;  %v3960_v15 = vmul.f32 %v10575_v55, %v13383_v29 }
 0x3a1   :  { %v3995_v42 = vadd.f32 %v3959_v45, %v3921_v32  ;;  %v4034_v56 = vmul.f32 %v10592_v41, %v13370_v4  ;;  %5580 = vst [vmem:[%s12101_s5 + $0x2c0] sm:$0xff] %v4362_v11  ;;  %v4327_v1 = vadd.f32 %v10622_v48, %v4289_v28  ;;  %v4108_v61 = vmul.f32 %v10597_v54, %v13371_v0 }
 0x3a2   :  { %v4216_v27 = vadd.f32 %v4180_v13, %v4142_v39  ;;  %v3775_v58 = vmul.f32 %v10563_v35, %v13369_v25  ;;  %v3922_v31 = vadd.f32 %v3886_v59, %v3848_v51  ;;  %v3813_v20 = vmul.f32 %v10569_v2, %v13372_v60  ;;  %v13384_v25 = vld [vmem:[#allocation108_spill] sm:$0xff] }
 0x3a3   :  { %v4069_v45 = vadd.f32 %v4033_v5, %v3995_v42  ;;  %v3887_v46 = vmul.f32 %v10572_v50, %v13383_v29  ;;  %v4363_v32 = vmax.f32 %v4327_v1, 0.0  ;;  %v4182_v11 = vmul.f32 %v10600_v57, %v13382_v8 }
 0x3a4   :  { %v4290_v53 = vadd.f32 %v4254_v16, %v4216_v27  ;;  %v4256_v13 = vmul.f32 %v10603_v9, %v13300_v26  ;;  %v3996_v39 = vadd.f32 %v3960_v15, %v3922_v31  ;;  %v3849_v4 = vadd.f32 %v3813_v20, %v3775_v58 }
 0x3a5   :  { %v4143_v28 = vadd.f32 %v4107_v3, %v4069_v45  ;;  %v3961_v5 = vmul.f32 %v10575_v55, %v13384_v25  ;;  %5581 = vst [vmem:[%s12101_s5 + $0x2c8] sm:$0xff] %v4363_v32  ;;  %v4035_v16 = vmul.f32 %v10592_v41, %v13371_v0  ;;  %v4109_v42 = vmul.f32 %v10597_v54, %v13373_v34 }
 0x3a6   :  { %v4328_v59 = vadd.f32 %v10622_v48, %v4290_v53  ;;  %v3776_v3 = vmul.f32 %v10563_v35, %v13372_v60  ;;  %v4070_v15 = vadd.f32 %v4034_v56, %v3996_v39  ;;  %v3923_v1 = vadd.f32 %v3887_v46, %v3849_v4 }
 0x3a7   :  { %v4217_v51 = vadd.f32 %v4181_v14, %v4143_v28  ;;  %v3814_v27 = vmul.f32 %v10569_v2, %v13374_v17  ;;  %v4183_v45 = vmul.f32 %v10600_v57, %v13300_v26  ;;  %v3888_v31 = vmul.f32 %v10572_v50, %v13384_v25 }
 0x3a8   :  { %v4364_v58 = vmax.f32 %v4328_v59, 0.0  ;;  %v3962_v20 = vmul.f32 %v10575_v55, %v13303_v30  ;;  %v4144_v53 = vadd.f32 %v4108_v61, %v4070_v15  ;;  %v3997_v0 = vadd.f32 %v3961_v5, %v3923_v1 }
 0x3a9   :  { %v4291_v32 = vadd.f32 %v4255_v63, %v4217_v51  ;;  %v3850_v60 = vadd.f32 %v3814_v27, %v3776_v3  ;;  %v4257_v4 = vmul.f32 %v10603_v9, %v13302_v52  ;;  %v4036_v14 = vmul.f32 %v10592_v41, %v13373_v34 }
 0x3aa   :  { %5582 = vst [vmem:[%s12101_s5 + $0x2d0] sm:$0xff] %v4364_v58  ;;  %v4110_v56 = vmul.f32 %v10597_v54, %v13290_v24  ;;  %v3777_v46 = vmul.f32 %v10563_v35, %v13374_v17  ;;  %v4218_v61 = vadd.f32 %v4182_v11, %v4144_v53  ;;  %v4071_v28 = vadd.f32 %v4035_v16, %v3997_v0 }
 0x3ab   :  { %v4329_v63 = vadd.f32 %v10622_v48, %v4291_v32  ;;  %v3924_v39 = vadd.f32 %v3888_v31, %v3850_v60  ;;  %v4184_v5 = vmul.f32 %v10600_v57, %v13302_v52  ;;  %v4258_v59 = vmul.f32 %v10603_v9, %v13305_v44 }
 0x3ac   :  { %v3815_v3 = vmul.f32 %v10569_v2, %v13375_v22  ;;  %v3889_v51 = vmul.f32 %v10572_v50, %v13303_v30  ;;  %v4292_v1 = vadd.f32 %v4256_v13, %v4218_v61  ;;  %v4145_v27 = vadd.f32 %v4109_v42, %v4071_v28 }
 0x3ad   :  { %v4365_v15 = vmax.f32 %v4329_v63, 0.0  ;;  %v3998_v58 = vadd.f32 %v3962_v20, %v3924_v39  ;;  %v3963_v0 = vmul.f32 %v10575_v55, %v13304_v43  ;;  %v4037_v60 = vmul.f32 %v10592_v41, %v13290_v24 }
 0x3ae   :  { %v3851_v32 = vadd.f32 %v3815_v3, %v3777_v46  ;;  %v4111_v11 = vmul.f32 %v10597_v54, %v13378_v23  ;;  %v4330_v16 = vadd.f32 %v10622_v48, %v4292_v1  ;;  %v4219_v31 = vadd.f32 %v4183_v45, %v4145_v27  ;;  %v13385_v3 = vld [vmem:[#allocation113_spill] sm:$0xff]  ;;  %v13386_v1 = vld [vmem:[#allocation115_spill] sm:$0xff] }
 0x3af   :  { %5583 = vst [vmem:[%s12101_s5 + $0x2d8] sm:$0xff] %v4365_v15  ;;  %v4072_v13 = vadd.f32 %v4036_v14, %v3998_v58  ;;  %v3778_v42 = vmul.f32 %v10563_v35, %v13376_v36  ;;  %v4185_v53 = vmul.f32 %v10600_v57, %v13305_v44  ;;  %v3816_v46 = vmul.f32 %v10569_v2, %v13377_v40 }
 0x3b0   :  { %v3925_v20 = vadd.f32 %v3889_v51, %v3851_v32  ;;  %v3890_v63 = vmul.f32 %v10572_v50, %v13307_v37  ;;  %v4366_v61 = vmax.f32 %v4330_v16, 0.0  ;;  %v4293_v28 = vadd.f32 %v4257_v4, %v4219_v31 }
 0x3b1   :  { %v4146_v39 = vadd.f32 %v4110_v56, %v4072_v13  ;;  %v4259_v45 = vmul.f32 %v10603_v9, %v13385_v3  ;;  %v3852_v15 = vadd.f32 %v3816_v46, %v3778_v42  ;;  %v3964_v51 = vmul.f32 %v10575_v55, %v13386_v1  ;;  %v13387_v46 = vld [vmem:[#allocation69_spill] sm:$0xff] }
 0x3b2   :  { %v3999_v14 = vadd.f32 %v3963_v0, %v3925_v20  ;;  %v4038_v27 = vmul.f32 %v10592_v41, %v13379_v49  ;;  %5584 = vst [vmem:[%s12101_s5 + $0x2e0] sm:$0xff] %v4366_v61  ;;  %v4331_v58 = vadd.f32 %v10622_v48, %v4293_v28  ;;  %v4112_v4 = vmul.f32 %v10597_v54, %v13380_v38 }
 0x3b3   :  { %v4220_v32 = vadd.f32 %v4184_v5, %v4146_v39  ;;  %v3779_v56 = vmul.f32 %v10563_v35, %v13377_v40  ;;  %v3926_v16 = vadd.f32 %v3890_v63, %v3852_v15  ;;  %v3817_v31 = vmul.f32 %v10569_v2, %v13381_v62 }
 0x3b4   :  { %v4073_v0 = vadd.f32 %v4037_v60, %v3999_v14  ;;  %v3891_v13 = vmul.f32 %v10572_v50, %v13386_v1  ;;  %v4367_v42 = vmax.f32 %v4331_v58, 0.0  ;;  %v4186_v61 = vmul.f32 %v10600_v57, %v13387_v46 }
 0x3b5   :  { %v4294_v20 = vadd.f32 %v4258_v59, %v4220_v32  ;;  %v4260_v5 = vmul.f32 %v10603_v9, %v13310_v6  ;;  %v4000_v39 = vadd.f32 %v3964_v51, %v3926_v16  ;;  %v3853_v49 = vadd.f32 %v3817_v31, %v3779_v56 }
 0x3b6   :  { %v4147_v28 = vadd.f32 %v4111_v11, %v4073_v0  ;;  %v3965_v60 = vmul.f32 %v10575_v55, %v13311_v10  ;;  %5585 = vst [vmem:[%s12101_s5 + $0x2e8] sm:$0xff] %v4367_v42  ;;  %v4039_v59 = vmul.f32 %v10592_v41, %v13380_v38  ;;  %v4113_v14 = vmul.f32 %v10597_v54, %v13382_v8 }
 0x3b7   :  { %v4332_v63 = vadd.f32 %v10622_v48, %v4294_v20  ;;  %v3780_v11 = vmul.f32 %v10563_v35, %v13381_v62  ;;  %v4074_v51 = vadd.f32 %v4038_v27, %v4000_v39  ;;  %v3927_v58 = vadd.f32 %v3891_v13, %v3853_v49 }
 0x3b8   :  { %v4221_v15 = vadd.f32 %v4185_v53, %v4147_v28  ;;  %v3818_v32 = vmul.f32 %v10569_v2, %v13383_v29  ;;  %v4187_v0 = vmul.f32 %v10600_v57, %v13310_v6  ;;  %v3892_v16 = vmul.f32 %v10572_v50, %v13311_v10 }
 0x3b9   :  { %v4368_v56 = vmax.f32 %v4332_v63, 0.0  ;;  %v3966_v31 = vmul.f32 %v10575_v55, %v13313_v18  ;;  %v4148_v20 = vadd.f32 %v4112_v4, %v4074_v51  ;;  %v4001_v38 = vadd.f32 %v3965_v60, %v3927_v58 }
 0x3ba   :  { %v4295_v42 = vadd.f32 %v4259_v45, %v4221_v15  ;;  %v3854_v62 = vadd.f32 %v3818_v32, %v3780_v11  ;;  %v4261_v49 = vmul.f32 %v10603_v9, %v13312_v12  ;;  %v4040_v53 = vmul.f32 %v10592_v41, %v13382_v8 }
 0x3bb   :  { %5586 = vst [vmem:[%s12101_s5 + $0x2f0] sm:$0xff] %v4368_v56  ;;  %v4114_v27 = vmul.f32 %v10597_v54, %v13300_v26  ;;  %v3781_v13 = vmul.f32 %v10563_v35, %v13383_v29  ;;  %v4222_v4 = vadd.f32 %v4186_v61, %v4148_v20  ;;  %v4075_v28 = vadd.f32 %v4039_v59, %v4001_v38 }
 0x3bc   :  { %v4333_v45 = vadd.f32 %v10622_v48, %v4295_v42  ;;  %v3928_v39 = vadd.f32 %v3892_v16, %v3854_v62  ;;  %v4188_v60 = vmul.f32 %v10600_v57, %v13312_v12  ;;  %v4262_v63 = vmul.f32 %v10603_v9, %v13314_v33 }
 0x3bd   :  { %v3819_v11 = vmul.f32 %v10569_v2, %v13384_v25  ;;  %v3893_v15 = vmul.f32 %v10572_v50, %v13313_v18  ;;  %v4296_v58 = vadd.f32 %v4260_v5, %v4222_v4  ;;  %v4149_v32 = vadd.f32 %v4113_v14, %v4075_v28 }
 0x3be   :  { %v4369_v51 = vmax.f32 %v4333_v45, 0.0  ;;  %v4002_v56 = vadd.f32 %v3966_v31, %v3928_v39  ;;  %v3967_v38 = vmul.f32 %v10575_v55, %v13217_v21  ;;  %v4041_v62 = vmul.f32 %v10592_v41, %v13300_v26 }
 0x3bf   :  { %v3855_v42 = vadd.f32 %v3819_v11, %v3781_v13  ;;  %v4115_v61 = vmul.f32 %v10597_v54, %v13302_v52  ;;  %v4334_v59 = vadd.f32 %v10622_v48, %v4296_v58  ;;  %v4223_v16 = vadd.f32 %v4187_v0, %v4149_v32  ;;  %v13388_v11 = vld [vmem:[#allocation118_spill] sm:$0xff]  ;;  %v13389_v58 = vld [vmem:[#allocation20_spill] sm:$0xff] }
 0x3c0   :  { %5587 = vst [vmem:[%s12101_s5 + $0x2f8] sm:$0xff] %v4369_v51  ;;  %v4076_v5 = vadd.f32 %v4040_v53, %v4002_v56  ;;  %v3782_v14 = vmul.f32 %v10563_v35, %v13384_v25  ;;  %v4189_v20 = vmul.f32 %v10600_v57, %v13314_v33  ;;  %v3820_v13 = vmul.f32 %v10569_v2, %v13303_v30 }
 0x3c1   :  { %v3929_v31 = vadd.f32 %v3893_v15, %v3855_v42  ;;  %v3894_v45 = vmul.f32 %v10572_v50, %v13217_v21  ;;  %v4370_v4 = vmax.f32 %v4334_v59, 0.0  ;;  %v4297_v28 = vadd.f32 %v4261_v49, %v4223_v16 }
 0x3c2   :  { %v4150_v39 = vadd.f32 %v4114_v27, %v4076_v5  ;;  %v4263_v0 = vmul.f32 %v10603_v9, %v13388_v11  ;;  %v3856_v51 = vadd.f32 %v3820_v13, %v3782_v14  ;;  %v3968_v15 = vmul.f32 %v10575_v55, %v13389_v58 }
 0x3c3   :  { %v4003_v53 = vadd.f32 %v3967_v38, %v3929_v31  ;;  %v4042_v32 = vmul.f32 %v10592_v41, %v13302_v52  ;;  %5588 = vst [vmem:[%s12101_s5 + $0x300] sm:$0xff] %v4370_v4  ;;  %v4335_v56 = vadd.f32 %v10622_v48, %v4297_v28  ;;  %v4116_v49 = vmul.f32 %v10597_v54, %v13305_v44 }
 0x3c4   :  { %v4224_v42 = vadd.f32 %v4188_v60, %v4150_v39  ;;  %v3783_v27 = vmul.f32 %v10563_v35, %v13303_v30  ;;  %v3930_v59 = vadd.f32 %v3894_v45, %v3856_v51  ;;  %v3821_v16 = vmul.f32 %v10569_v2, %v13304_v43  ;;  %v13390_v60 = vld [vmem:[#allocation120_spill] sm:$0xff]  ;;  %v13391_v30 = vld [vmem:[#allocation59_spill] sm:$0xff] }
 0x3c5   :  { %v4077_v38 = vadd.f32 %v4041_v62, %v4003_v53  ;;  %v3895_v5 = vmul.f32 %v10572_v50, %v13389_v58  ;;  %v4371_v14 = vmax.f32 %v4335_v56, 0.0  ;;  %v4190_v13 = vmul.f32 %v10600_v57, %v13388_v11 }
 0x3c6   :  { %v4298_v31 = vadd.f32 %v4262_v63, %v4224_v42  ;;  %v4264_v4 = vmul.f32 %v10603_v9, %v13390_v60  ;;  %v4004_v39 = vadd.f32 %v3968_v15, %v3930_v59  ;;  %v3857_v52 = vadd.f32 %v3821_v16, %v3783_v27  ;;  %v13392_v59 = vld [vmem:[#allocation82_spill] sm:$0xff] }
 0x3c7   :  { %v4151_v28 = vadd.f32 %v4115_v61, %v4077_v38  ;;  %v3969_v62 = vmul.f32 %v10575_v55, %v13391_v30  ;;  %5589 = vst [vmem:[%s12101_s5 + $0x308] sm:$0xff] %v4371_v14  ;;  %v4043_v63 = vmul.f32 %v10592_v41, %v13305_v44  ;;  %v4117_v53 = vmul.f32 %v10597_v54, %v13385_v3  ;;  %v13393_v14 = vld [vmem:[#allocation96_spill] sm:$0xff] }
 0x3c8   :  { %v4336_v45 = vadd.f32 %v10622_v48, %v4298_v31  ;;  %v3784_v61 = vmul.f32 %v10563_v35, %v13307_v37  ;;  %v4078_v15 = vadd.f32 %v4042_v32, %v4004_v39  ;;  %v3931_v56 = vadd.f32 %v3895_v5, %v3857_v52  ;;  %v13394_v52 = vld [vmem:[#allocation65_spill] sm:$0xff] }
 0x3c9   :  { %v4225_v51 = vadd.f32 %v4189_v20, %v4151_v28  ;;  %v3822_v42 = vmul.f32 %v10569_v2, %v13386_v1  ;;  %v4191_v38 = vmul.f32 %v10600_v57, %v13390_v60  ;;  %v3896_v16 = vmul.f32 %v10572_v50, %v13392_v59 }
 0x3ca   :  { %v4372_v27 = vmax.f32 %v4336_v45, 0.0  ;;  %v3970_v31 = vmul.f32 %v10575_v55, %v13393_v14  ;;  %v4152_v43 = vadd.f32 %v4116_v49, %v4078_v15  ;;  %v4005_v44 = vadd.f32 %v3969_v62, %v3931_v56  ;;  %v13395_v45 = vld [vmem:[#allocation110_spill] sm:$0xff] }
 0x3cb   :  { %v4299_v3 = vadd.f32 %v4263_v0, %v4225_v51  ;;  %v3858_v37 = vadd.f32 %v3822_v42, %v3784_v61  ;;  %v4265_v20 = vmul.f32 %v10603_v9, %v13394_v52  ;;  %v4044_v32 = vmul.f32 %v10592_v41, %v13387_v46  ;;  %v13396_v51 = vld [vmem:[#allocation119_spill] sm:$0xff] }
 0x3cc   :  { %5590 = vst [vmem:[%s12101_s5 + $0x310] sm:$0xff] %v4372_v27  ;;  %v4118_v5 = vmul.f32 %v10597_v54, %v13310_v6  ;;  %v3785_v28 = vmul.f32 %v10563_v35, %v13386_v1  ;;  %v4226_v49 = vadd.f32 %v4190_v13, %v4152_v43  ;;  %v4079_v39 = vadd.f32 %v4043_v63, %v4005_v44  ;;  %v13397_v43 = vld [vmem:[#allocation17_spill] sm:$0xff] }
 0x3cd   :  { %v4337_v0 = vadd.f32 %v10622_v48, %v4299_v3  ;;  %v3932_v62 = vadd.f32 %v3896_v16, %v3858_v37  ;;  %v4192_v61 = vmul.f32 %v10600_v57, %v13395_v45  ;;  %v4266_v15 = vmul.f32 %v10603_v9, %v13396_v51  ;;  %v13401_v45 = vld [vmem:[#allocation31_spill] sm:$0xff] }
 0x3ce   :  { %v3823_v56 = vmul.f32 %v10569_v2, %v13311_v10  ;;  %v3897_v42 = vmul.f32 %v10572_v50, %v13393_v14  ;;  %v4300_v59 = vadd.f32 %v4264_v4, %v4226_v49  ;;  %v4153_v46 = vadd.f32 %v4117_v53, %v4079_v39 }
 0x3cf   :  { %v4373_v27 = vmax.f32 %v4337_v0, 0.0  ;;  %v4006_v1 = vadd.f32 %v3970_v31, %v3932_v62  ;;  %v3971_v44 = vmul.f32 %v10575_v55, %v13397_v43  ;;  %v4045_v37 = vmul.f32 %v10592_v41, %v13310_v6 }
 0x3d0   :  { %v3859_v3 = vadd.f32 %v3823_v56, %v3785_v28  ;;  %v4119_v13 = vmul.f32 %v10597_v54, %v13312_v12  ;;  %v4338_v63 = vadd.f32 %v10622_v48, %v4300_v59  ;;  %v4227_v16 = vadd.f32 %v4191_v38, %v4153_v46  ;;  %v13399_v59 = vld [vmem:[#allocation12_spill] sm:$0xff] }
 0x3d1   :  { %5591 = vst [vmem:[%s12101_s5 + $0x318] sm:$0xff] %v4373_v27  ;;  %v4080_v4 = vadd.f32 %v4044_v32, %v4006_v1  ;;  %v3786_v53 = vmul.f32 %v10563_v35, %v13311_v10  ;;  %v4193_v28 = vmul.f32 %v10600_v57, %v13396_v51  ;;  %v3824_v0 = vmul.f32 %v10569_v2, %v13313_v18  ;;  %v13398_v27 = vld [vmem:[#allocation21_spill] sm:$0xff] }
 0x3d2   :  { %v3933_v31 = vadd.f32 %v3897_v42, %v3859_v3  ;;  %v3898_v49 = vmul.f32 %v10572_v50, %v13397_v43  ;;  %v4374_v39 = vmax.f32 %v4338_v63, 0.0  ;;  %v4301_v62 = vadd.f32 %v4265_v20, %v4227_v16 }
 0x3d3   :  { %v4154_v56 = vadd.f32 %v4118_v5, %v4080_v4  ;;  %v4267_v46 = vmul.f32 %v10603_v9, %v13398_v27  ;;  %v3860_v38 = vadd.f32 %v3824_v0, %v3786_v53  ;;  %v3972_v32 = vmul.f32 %v10575_v55, %v13399_v59 }
 0x3d4   :  { %v4007_v1 = vadd.f32 %v3971_v44, %v3933_v31  ;;  %v4046_v42 = vmul.f32 %v10592_v41, %v13312_v12  ;;  %5592 = vst [vmem:[%s12101_s5 + $0x320] sm:$0xff] %v4374_v39  ;;  %v4339_v3 = vadd.f32 %v10622_v48, %v4301_v62  ;;  %v4120_v20 = vmul.f32 %v10597_v54, %v13314_v33 }
 0x3d5   :  { %v4228_v63 = vadd.f32 %v4192_v61, %v4154_v56  ;;  %v3787_v5 = vmul.f32 %v10563_v35, %v13313_v18  ;;  %v3934_v16 = vadd.f32 %v3898_v49, %v3860_v38  ;;  %v3825_v4 = vmul.f32 %v10569_v2, %v13217_v21  ;;  %v13400_v61 = vld [vmem:[#allocation68_spill] sm:$0xff]  ;;  %v13429_v18 = vld [vmem:[#allocation57_spill] sm:$0xff] }
 0x3d6   :  { %v4081_v44 = vadd.f32 %v4045_v37, %v4007_v1  ;;  %v3899_v53 = vmul.f32 %v10572_v50, %v13399_v59  ;;  %v4375_v31 = vmax.f32 %v4339_v3, 0.0  ;;  %v4194_v39 = vmul.f32 %v10600_v57, %v13398_v27  ;;  %v13420_v27 = vld [vmem:[#allocation44_spill] sm:$0xff] }
 0x3d7   :  { %v4302_v0 = vadd.f32 %v4266_v15, %v4228_v63  ;;  %v4268_v62 = vmul.f32 %v10603_v9, %v13400_v61  ;;  %v4008_v43 = vadd.f32 %v3972_v32, %v3934_v16  ;;  %v3861_v51 = vadd.f32 %v3825_v4, %v3787_v5  ;;  %v13402_v4 = vld [vmem:[#allocation15_spill] sm:$0xff] }
 0x3d8   :  { %v4155_v56 = vadd.f32 %v4119_v13, %v4081_v44  ;;  %v3973_v37 = vmul.f32 %v10575_v55, %v13401_v45  ;;  %5593 = vst [vmem:[%s12101_s5 + $0x328] sm:$0xff] %v4375_v31  ;;  %v4047_v15 = vmul.f32 %v10592_v41, %v13314_v33  ;;  %v4121_v1 = vmul.f32 %v10597_v54, %v13388_v11 }
 0x3d9   :  { %v4340_v49 = vadd.f32 %v10622_v48, %v4302_v0  ;;  %v3788_v13 = vmul.f32 %v10563_v35, %v13217_v21  ;;  %v4082_v32 = vadd.f32 %v4046_v42, %v4008_v43  ;;  %v3935_v3 = vadd.f32 %v3899_v53, %v3861_v51  ;;  %v13403_v53 = vld [vmem:[#allocation14_spill] sm:$0xff] }
 0x3da   :  { %v4229_v38 = vadd.f32 %v4193_v28, %v4155_v56  ;;  %v3826_v63 = vmul.f32 %v10569_v2, %v13389_v58  ;;  %v4195_v44 = vmul.f32 %v10600_v57, %v13400_v61  ;;  %v3900_v16 = vmul.f32 %v10572_v50, %v13401_v45 }
 0x3db   :  { %v4376_v5 = vmax.f32 %v4340_v49, 0.0  ;;  %v3974_v31 = vmul.f32 %v10575_v55, %v13402_v4  ;;  %v4156_v43 = vadd.f32 %v4120_v20, %v4082_v32  ;;  %v4009_v28 = vadd.f32 %v3973_v37, %v3935_v3  ;;  %v13404_v32 = vld [vmem:[#allocation16_spill] sm:$0xff] }
 0x3dc   :  { %v4303_v51 = vadd.f32 %v4267_v46, %v4229_v38  ;;  %v3862_v42 = vadd.f32 %v3826_v63, %v3788_v13  ;;  %v4269_v0 = vmul.f32 %v10603_v9, %v13403_v53  ;;  %v4048_v56 = vmul.f32 %v10592_v41, %v13388_v11 }
 0x3dd   :  { %5594 = vst [vmem:[%s12101_s5 + $0x330] sm:$0xff] %v4376_v5  ;;  %v4122_v49 = vmul.f32 %v10597_v54, %v13390_v60  ;;  %v3789_v61 = vmul.f32 %v10563_v35, %v13389_v58  ;;  %v4230_v20 = vadd.f32 %v4194_v39, %v4156_v43  ;;  %v4083_v37 = vadd.f32 %v4047_v15, %v4009_v28  ;;  %v13405_v43 = vld [vmem:[#allocation36_spill] sm:$0xff] }
 0x3de   :  { %v4341_v46 = vadd.f32 %v10622_v48, %v4303_v51  ;;  %v3936_v13 = vadd.f32 %v3900_v16, %v3862_v42  ;;  %v4196_v38 = vmul.f32 %v10600_v57, %v13403_v53  ;;  %v4270_v3 = vmul.f32 %v10603_v9, %v13404_v32  ;;  %v13406_v42 = vld [vmem:[#allocation24_spill] sm:$0xff] }
 0x3df   :  { %v3827_v63 = vmul.f32 %v10569_v2, %v13391_v30  ;;  %v3901_v35 = vmul.f32 %v10572_v50, %v13402_v4  ;;  %v4304_v51 = vadd.f32 %v4268_v62, %v4230_v20  ;;  %v4157_v39 = vadd.f32 %v4121_v1, %v4083_v37 }
 0x3e0   :  { %v4377_v5 = vmax.f32 %v4341_v46, 0.0  ;;  %v4010_v15 = vadd.f32 %v3974_v31, %v3936_v13  ;;  %v3975_v28 = vmul.f32 %v10575_v55, %v13405_v43  ;;  %v4049_v2 = vmul.f32 %v10592_v41, %v13390_v60  ;;  %v13421_v60 = vld [vmem:[#allocation47_spill] sm:$0xff] }
 0x3e1   :  { %v3863_v16 = vadd.f32 %v3827_v63, %v3789_v61  ;;  %v4123_v50 = vmul.f32 %v10597_v54, %v13394_v52  ;;  %v4342_v62 = vadd.f32 %v10622_v48, %v4304_v51  ;;  %v4231_v61 = vadd.f32 %v4195_v44, %v4157_v39  ;;  %v13407_v63 = vld [vmem:[#allocation25_spill] sm:$0xff] }
 0x3e2   :  { %5595 = vst [vmem:[%s12101_s5 + $0x338] sm:$0xff] %v4377_v5  ;;  %v4084_v1 = vadd.f32 %v4048_v56, %v4010_v15  ;;  %v11329_v31 = vstv %s11276_s13  ;;  %v11334_v46 = vstv %s11284_s14  ;;  %v11337_v54 = vstv %s11286_s15  ;;  %v13408_v56 = vld [vmem:[#allocation26_spill] sm:$0xff] }
 0x3e3   :  { %v3937_v55 = vadd.f32 %v3901_v35, %v3863_v16  ;;  %v4421_v41 = vmul.f32 %v11329_v31, %v13406_v42  ;;  %v4378_v20 = vmax.f32 %v4342_v62, 0.0  ;;  %v4305_v37 = vadd.f32 %v4269_v0, %v4231_v61  ;;  %v13409_v16 = vld [vmem:[#allocation27_spill] sm:$0xff] }
 0x3e4   :  { %v4158_v13 = vadd.f32 %v4122_v49, %v4084_v1  ;;  %v4459_v5 = vmul.f32 %v11334_v46, %v13407_v63  ;;  %v4533_v35 = vmul.f32 %v11337_v54, %v13408_v56  ;;  %v11346_v51 = vstv %s11299_s18  ;;  %v13410_v1 = vld [vmem:[#allocation32_spill] sm:$0xff] }
 0x3e5   :  { %v4011_v44 = vadd.f32 %v3975_v28, %v3937_v55  ;;  %v11349_v39 = vstv %s11301_s19  ;;  %5596 = vst [vmem:[%s12101_s5 + $0x340] sm:$0xff] %v4378_v20  ;;  %v4343_v0 = vadd.f32 %v10622_v48, %v4305_v37  ;;  %v4607_v28 = vmul.f32 %v11346_v51, %v13409_v16 }
 0x3e6   :  { %v4232_v49 = vadd.f32 %v4196_v38, %v4158_v13  ;;  %v4495_v15 = vadd.f32 %v4459_v5, %v4421_v41  ;;  %v4197_v61 = vmul.f32 %v10600_v57, %v13404_v32  ;;  %v4681_v55 = vmul.f32 %v11349_v39, %v13410_v1  ;;  %v13411_v41 = vld [vmem:[#allocation71_spill] sm:$0xff]  ;;  %v13412_v5 = vld [vmem:[#allocation33_spill] sm:$0xff] }
 0x3e7   :  { %v4085_v62 = vadd.f32 %v4049_v2, %v4011_v44  ;;  %v11362_v42 = vstv %s11312_s22  ;;  %v4379_v43 = vmax.f32 %v4343_v0, 0.0  ;;  %v11365_v20 = vstv %s11314_s23 }
 0x3e8   :  { %v4306_v53 = vadd.f32 %v4270_v3, %v4232_v49  ;;  %v4569_v4 = vadd.f32 %v4533_v35, %v4495_v15  ;;  %v4271_v37 = vmul.f32 %v10603_v9, %v13411_v41  ;;  %v11370_v13 = vstv %s11322_s24  ;;  %v13414_v9 = vld [vmem:[#allocation39_spill] sm:$0xff] }
 0x3e9   :  { %v4159_v38 = vadd.f32 %v4123_v50, %v4085_v62  ;;  %5597 = vst [vmem:[%s12101_s5 + $0x348] sm:$0xff] %v4379_v43  ;;  %v4755_v3 = vmul.f32 %v11362_v42, %v13412_v5  ;;  %v4422_v44 = vmul.f32 %v11329_v31, %v13407_v63  ;;  %v13413_v50 = vld [vmem:[#allocation34_spill] sm:$0xff]  ;;  %v4460_v49 = vmul.f32 %v11334_v46, %v13414_v9  ;;  %v13416_v63 = vld [vmem:[#allocation40_spill] sm:$0xff] }
 0x3ea   :  { %v4344_v57 = vadd.f32 %v10622_v48, %v4306_v53  ;;  %v4643_v2 = vadd.f32 %v4607_v28, %v4569_v4  ;;  %v4829_v0 = vmul.f32 %v11365_v20, %v13413_v50  ;;  %v4534_v15 = vmul.f32 %v11337_v54, %v13409_v16  ;;  %v13415_v53 = vld [vmem:[#allocation35_spill] sm:$0xff] }
 0x3eb   :  { %v4233_v35 = vadd.f32 %v4197_v61, %v4159_v38  ;;  %v4903_v4 = vmul.f32 %v11370_v13, %v13415_v53  ;;  %v11389_v28 = vstv %s11341_s2  ;;  %v4496_v41 = vadd.f32 %v4460_v49, %v4422_v44  ;;  %v13418_v49 = vld [vmem:[#allocation41_spill] sm:$0xff] }
 0x3ec   :  { %v4380_v43 = vmax.f32 %v4344_v57, 0.0  ;;  %v4717_v62 = vadd.f32 %v4681_v55, %v4643_v2  ;;  %v4608_v61 = vmul.f32 %v11346_v51, %v13416_v63  ;;  %v4682_v38 = vmul.f32 %v11349_v39, %v13412_v5  ;;  %v13417_v57 = vld [vmem:[#allocation43_spill] sm:$0xff] }
 0x3ed   :  { %v4307_v1 = vadd.f32 %v4271_v37, %v4233_v35  ;;  %v4423_v55 = vmul.f32 %v11329_v31, %v13414_v9  ;;  %v4461_v2 = vmul.f32 %v11334_v46, %v13417_v57  ;;  %v4535_v37 = vmul.f32 %v11337_v54, %v13416_v63 }
 0x3ee   :  { %5598 = vst [vmem:[%s12101_s5 + $0x350] sm:$0xff] %v4380_v43  ;;  %v4791_v32 = vadd.f32 %v4755_v3, %v4717_v62  ;;  %v4570_v35 = vadd.f32 %v4534_v15, %v4496_v41  ;;  %v4756_v5 = vmul.f32 %v11362_v42, %v13418_v49  ;;  %v4830_v45 = vmul.f32 %v11365_v20, %v13415_v53  ;;  %v13419_v3 = vld [vmem:[#allocation42_spill] sm:$0xff] }
 0x3ef   :  { %v4345_v44 = vadd.f32 %v10622_v48, %v4307_v1  ;;  %v4904_v62 = vmul.f32 %v11370_v13, %v13419_v3  ;;  %v4497_v9 = vadd.f32 %v4461_v2, %v4423_v55  ;;  %v4609_v59 = vmul.f32 %v11346_v51, %v13420_v27 }
 0x3f0   :  { %v4865_v43 = vadd.f32 %v4829_v0, %v4791_v32  ;;  %v4644_v52 = vadd.f32 %v4608_v61, %v4570_v35  ;;  %v4683_v48 = vmul.f32 %v11349_v39, %v13418_v49  ;;  %v4424_v41 = vmul.f32 %v11329_v31, %v13417_v57  ;;  %v13422_v61 = vld [vmem:[#allocation45_spill] sm:$0xff]  ;;  %v13423_v57 = vld [vmem:[#allocation46_spill] sm:$0xff] }
 0x3f1   :  { %v4381_v14 = vmax.f32 %v4345_v44, 0.0  ;;  %v4571_v1 = vadd.f32 %v4535_v37, %v4497_v9  ;;  %v4462_v32 = vmul.f32 %v11334_v46, %v13421_v60  ;;  %v4536_v0 = vmul.f32 %v11337_v54, %v13420_v27 }
 0x3f2   :  { %v4939_v15 = vadd.f32 %v4903_v4, %v4865_v43  ;;  %v4718_v55 = vadd.f32 %v4682_v38, %v4644_v52  ;;  %v4757_v2 = vmul.f32 %v11362_v42, %v13422_v61  ;;  %v4831_v44 = vmul.f32 %v11365_v20, %v13419_v3  ;;  %v13424_v43 = vld [vmem:[#allocation48_spill] sm:$0xff]  ;;  %v13425_v38 = vld [vmem:[#allocation51_spill] sm:$0xff] }
 0x3f3   :  { %5599 = vst [vmem:[%s12101_s5 + $0x358] sm:$0xff] %v4381_v14  ;;  %v4905_v4 = vmul.f32 %v11370_v13, %v13423_v57  ;;  %v4645_v35 = vadd.f32 %v4609_v59, %v4571_v1  ;;  %v4498_v49 = vadd.f32 %v4462_v32, %v4424_v41  ;;  %v4610_v9 = vmul.f32 %v11346_v51, %v13424_v43  ;;  %v13427_v32 = vld [vmem:[#allocation52_spill] sm:$0xff] }
 0x3f4   :  { %v4977_v37 = vadd.f32 %v11389_v28, %v4939_v15  ;;  %v4792_v30 = vadd.f32 %v4756_v5, %v4718_v55  ;;  %v4684_v14 = vmul.f32 %v11349_v39, %v13422_v61  ;;  %v4425_v52 = vmul.f32 %v11329_v31, %v13421_v60  ;;  %v13426_v15 = vld [vmem:[#allocation49_spill] sm:$0xff] }
 0x3f5   :  { %v4463_v11 = vmul.f32 %v11334_v46, %v13425_v38  ;;  %v4719_v21 = vadd.f32 %v4683_v48, %v4645_v35  ;;  %v4572_v33 = vadd.f32 %v4536_v0, %v4498_v49  ;;  %v4537_v59 = vmul.f32 %v11337_v54, %v13424_v43  ;;  %v13428_v0 = vld [vmem:[#allocation50_spill] sm:$0xff] }
 0x3f6   :  { %v5013_v58 = vmax.f32 %v4977_v37, 0.0  ;;  %v4866_v41 = vadd.f32 %v4830_v45, %v4792_v30  ;;  %v4758_v1 = vmul.f32 %v11362_v42, %v13426_v15  ;;  %v4611_v55 = vmul.f32 %v11346_v51, %v13427_v32 }
 0x3f7   :  { %v4499_v5 = vadd.f32 %v4463_v11, %v4425_v52  ;;  %v4793_v60 = vadd.f32 %v4757_v2, %v4719_v21  ;;  %v4646_v61 = vadd.f32 %v4610_v9, %v4572_v33  ;;  %v4832_v48 = vmul.f32 %v11365_v20, %v13423_v57  ;;  %v13430_v9 = vld [vmem:[#allocation54_spill] sm:$0xff] }
 0x3f8   :  { %5609 = vst [vmem:[%s12101_s5 + $0x360] sm:$0xff] %v5013_v58  ;;  %v4906_v37 = vmul.f32 %v11370_v13, %v13428_v0  ;;  %v4940_v30 = vadd.f32 %v4904_v62, %v4866_v41  ;;  %v4685_v11 = vmul.f32 %v11349_v39, %v13426_v15  ;;  %v4426_v35 = vmul.f32 %v11329_v31, %v13425_v38 }
 0x3f9   :  { %v4573_v45 = vadd.f32 %v4537_v59, %v4499_v5  ;;  %v4867_v49 = vadd.f32 %v4831_v44, %v4793_v60  ;;  %v4720_v52 = vadd.f32 %v4684_v14, %v4646_v61  ;;  %v4464_v21 = vmul.f32 %v11334_v46, %v13429_v18  ;;  %v13431_v44 = vld [vmem:[#allocation58_spill] sm:$0xff]  ;;  %v13432_v60 = vld [vmem:[#allocation55_spill] sm:$0xff] }
 0x3fa   :  { %v4538_v33 = vmul.f32 %v11337_v54, %v13427_v32  ;;  %v4978_v58 = vadd.f32 %v11389_v28, %v4940_v30  ;;  %v4759_v62 = vmul.f32 %v11362_v42, %v13430_v9  ;;  %v4833_v59 = vmul.f32 %v11365_v20, %v13428_v0 }
 0x3fb   :  { %v4647_v2 = vadd.f32 %v4611_v55, %v4573_v45  ;;  %v4941_v41 = vadd.f32 %v4905_v4, %v4867_v49  ;;  %v4794_v15 = vadd.f32 %v4758_v1, %v4720_v52  ;;  %v4500_v38 = vadd.f32 %v4464_v21, %v4426_v35  ;;  %v13433_v35 = vld [vmem:[#allocation62_spill] sm:$0xff] }
 0x3fc   :  { %v4612_v14 = vmul.f32 %v11346_v51, %v13431_v44  ;;  %v5014_v5 = vmax.f32 %v4978_v58, 0.0  ;;  %v4907_v61 = vmul.f32 %v11370_v13, %v13432_v60  ;;  %v4686_v55 = vmul.f32 %v11349_v39, %v13430_v9  ;;  %v13434_v52 = vld [vmem:[#allocation66_spill] sm:$0xff]  ;;  %v13435_v9 = vld [vmem:[#allocation63_spill] sm:$0xff] }
 0x3fd   :  { %v4721_v18 = vadd.f32 %v4685_v11, %v4647_v2  ;;  %v4979_v30 = vadd.f32 %v11389_v28, %v4941_v41  ;;  %v4868_v45 = vadd.f32 %v4832_v48, %v4794_v15  ;;  %v4574_v12 = vadd.f32 %v4538_v33, %v4500_v38  ;;  %v13436_v15 = vld [vmem:[#allocation67_spill] sm:$0xff] }
 0x3fe   :  { %v4427_v4 = vmul.f32 %v11329_v31, %v13408_v56  ;;  %5610 = vst [vmem:[%s12101_s5 + $0x368] sm:$0xff] %v5014_v5  ;;  %v4760_v11 = vmul.f32 %v11362_v42, %v13433_v35  ;;  %v4465_v49 = vmul.f32 %v11334_v46, %v13409_v16  ;;  %v4539_v21 = vmul.f32 %v11337_v54, %v13434_v52 }
 0x3ff   :  { %v4795_v1 = vadd.f32 %v4759_v62, %v4721_v18  ;;  %v5015_v58 = vmax.f32 %v4979_v30, 0.0  ;;  %v4942_v48 = vadd.f32 %v4906_v37, %v4868_v45  ;;  %v4648_v33 = vadd.f32 %v4612_v14, %v4574_v12 }
 0x400   :  { %v4834_v56 = vmul.f32 %v11365_v20, %v13432_v60  ;;  %v4908_v41 = vmul.f32 %v11370_v13, %v13435_v9  ;;  %v4501_v62 = vadd.f32 %v4465_v49, %v4427_v4  ;;  %v4613_v38 = vmul.f32 %v11346_v51, %v13436_v15 }
 0x401   :  { %v4869_v2 = vadd.f32 %v4833_v59, %v4795_v1  ;;  %5611 = vst [vmem:[%s12101_s5 + $0x370] sm:$0xff] %v5015_v58  ;;  %v4980_v5 = vadd.f32 %v11389_v28, %v4942_v48  ;;  %v4722_v18 = vadd.f32 %v4686_v55, %v4648_v33  ;;  %v4687_v12 = vmul.f32 %v11349_v39, %v13413_v50  ;;  %v13437_v55 = vld [vmem:[#allocation22_spill] sm:$0xff] }
 0x402   :  { %v4428_v37 = vmul.f32 %v11329_v31, %v13409_v16  ;;  %v4575_v14 = vadd.f32 %v4539_v21, %v4501_v62  ;;  %v4466_v30 = vmul.f32 %v11334_v46, %v13416_v63  ;;  %v4540_v45 = vmul.f32 %v11337_v54, %v13436_v15  ;;  %v13439_v33 = vld [vmem:[#allocation70_spill] sm:$0xff] }
 0x403   :  { %v4943_v59 = vadd.f32 %v4907_v61, %v4869_v2  ;;  %v5016_v4 = vmax.f32 %v4980_v5, 0.0  ;;  %v4796_v1 = vadd.f32 %v4760_v11, %v4722_v18  ;;  %v4761_v35 = vmul.f32 %v11362_v42, %v13415_v53  ;;  %v13438_v61 = vld [vmem:[#allocation73_spill] sm:$0xff] }
 0x404   :  { %v4835_v49 = vmul.f32 %v11365_v20, %v13437_v55  ;;  %v4649_v58 = vadd.f32 %v4613_v38, %v4575_v14  ;;  %v4502_v16 = vadd.f32 %v4466_v30, %v4428_v37  ;;  %v4614_v21 = vmul.f32 %v11346_v51, %v13438_v61 }
 0x405   :  { %v4981_v50 = vadd.f32 %v11389_v28, %v4943_v59  ;;  %5612 = vst [vmem:[%s12101_s5 + $0x378] sm:$0xff] %v5016_v4  ;;  %v4870_v48 = vadd.f32 %v4834_v56, %v4796_v1  ;;  %v4909_v11 = vmul.f32 %v11370_v13, %v13439_v33  ;;  %v4688_v2 = vmul.f32 %v11349_v39, %v13415_v53  ;;  %v13441_v1 = vld [vmem:[#allocation74_spill] sm:$0xff] }
 0x406   :  { %v4429_v62 = vmul.f32 %v11329_v31, %v13416_v63  ;;  %v4723_v38 = vadd.f32 %v4687_v12, %v4649_v58  ;;  %v4576_v18 = vadd.f32 %v4540_v45, %v4502_v16  ;;  %v4467_v37 = vmul.f32 %v11334_v46, %v13420_v27  ;;  %v13440_v45 = vld [vmem:[#allocation37_spill] sm:$0xff] }
 0x407   :  { %v5017_v5 = vmax.f32 %v4981_v50, 0.0  ;;  %v4944_v59 = vadd.f32 %v4908_v41, %v4870_v48  ;;  %v4762_v14 = vmul.f32 %v11362_v42, %v13419_v3  ;;  %v4836_v56 = vmul.f32 %v11365_v20, %v13439_v33 }
 0x408   :  { %v4541_v30 = vmul.f32 %v11337_v54, %v13438_v61  ;;  %v4797_v53 = vadd.f32 %v4761_v35, %v4723_v38  ;;  %v4650_v63 = vadd.f32 %v4614_v21, %v4576_v18  ;;  %v4503_v12 = vadd.f32 %v4467_v37, %v4429_v62 }
 0x409   :  { %5613 = vst [vmem:[%s12101_s5 + $0x380] sm:$0xff] %v5017_v5  ;;  %v4615_v4 = vmul.f32 %v11346_v51, %v13440_v45  ;;  %v4982_v41 = vadd.f32 %v11389_v28, %v4944_v59  ;;  %v4910_v50 = vmul.f32 %v11370_v13, %v13441_v1  ;;  %v4689_v58 = vmul.f32 %v11349_v39, %v13419_v3 }
 0x40a   :  { %v4430_v16 = vmul.f32 %v11329_v31, %v13420_v27  ;;  %v4871_v48 = vadd.f32 %v4835_v49, %v4797_v53  ;;  %v4724_v6 = vadd.f32 %v4688_v2, %v4650_v63  ;;  %v4577_v5 = vadd.f32 %v4541_v30, %v4503_v12  ;;  %v13442_v2 = vld [vmem:[#allocation78_spill] sm:$0xff] }
 0x40b   :  { %v4468_v35 = vmul.f32 %v11334_v46, %v13424_v43  ;;  %v5018_v21 = vmax.f32 %v4982_v41, 0.0  ;;  %v4763_v62 = vmul.f32 %v11362_v42, %v13423_v57  ;;  %v4542_v38 = vmul.f32 %v11337_v54, %v13440_v45 }
 0x40c   :  { %v4616_v18 = vmul.f32 %v11346_v51, %v13358_v19  ;;  %v4945_v3 = vadd.f32 %v4909_v11, %v4871_v48  ;;  %v4798_v37 = vadd.f32 %v4762_v14, %v4724_v6  ;;  %v4651_v59 = vadd.f32 %v4615_v4, %v4577_v5 }
 0x40d   :  { %v4504_v27 = vadd.f32 %v4468_v35, %v4430_v16  ;;  %5614 = vst [vmem:[%s12101_s5 + $0x388] sm:$0xff] %v5018_v21  ;;  %v4837_v49 = vmul.f32 %v11365_v20, %v13441_v1  ;;  %v4911_v30 = vmul.f32 %v11370_v13, %v13442_v2  ;;  %v4690_v53 = vmul.f32 %v11349_v39, %v13423_v57  ;;  %v13443_v21 = vld [vmem:[#allocation81_spill] sm:$0xff] }
 0x40e   :  { %v4431_v63 = vmul.f32 %v11329_v31, %v13424_v43  ;;  %v4983_v6 = vadd.f32 %v11389_v28, %v4945_v3  ;;  %v4872_v11 = vadd.f32 %v4836_v56, %v4798_v37  ;;  %v4725_v14 = vadd.f32 %v4689_v58, %v4651_v59 }
 0x40f   :  { %v4578_v12 = vadd.f32 %v4542_v38, %v4504_v27  ;;  %v4764_v4 = vmul.f32 %v11362_v42, %v13428_v0  ;;  %v4838_v41 = vmul.f32 %v11365_v20, %v13442_v2  ;;  %v4469_v16 = vmul.f32 %v11334_v46, %v13427_v32  ;;  %v13444_v38 = vld [vmem:[#allocation83_spill] sm:$0xff] }
 0x410   :  { %v4543_v57 = vmul.f32 %v11337_v54, %v13358_v19  ;;  %v5019_v48 = vmax.f32 %v4983_v6, 0.0  ;;  %v4946_v5 = vadd.f32 %v4910_v50, %v4872_v11  ;;  %v4799_v43 = vadd.f32 %v4763_v62, %v4725_v14 }
 0x411   :  { %v4652_v35 = vadd.f32 %v4616_v18, %v4578_v12  ;;  %v4912_v56 = vmul.f32 %v11370_v13, %v13443_v21  ;;  %v4505_v58 = vadd.f32 %v4469_v16, %v4431_v63  ;;  %v4617_v3 = vmul.f32 %v11346_v51, %v13444_v38  ;;  %v13445_v16 = vld [vmem:[#allocation84_spill] sm:$0xff] }
 0x412   :  { %v4691_v37 = vmul.f32 %v11349_v39, %v13428_v0  ;;  %5615 = vst [vmem:[%s12101_s5 + $0x390] sm:$0xff] %v5019_v48  ;;  %v4984_v59 = vadd.f32 %v11389_v28, %v4946_v5  ;;  %v4873_v27 = vadd.f32 %v4837_v49, %v4799_v43  ;;  %v4432_v62 = vmul.f32 %v11329_v31, %v13427_v32  ;;  %v13446_v48 = vld [vmem:[#allocation60_spill] sm:$0xff] }
 0x413   :  { %v4726_v50 = vadd.f32 %v4690_v53, %v4652_v35  ;;  %v4579_v18 = vadd.f32 %v4543_v57, %v4505_v58  ;;  %v4765_v63 = vmul.f32 %v11362_v42, %v13432_v60  ;;  %v4470_v6 = vmul.f32 %v11334_v46, %v13431_v44 }
 0x414   :  { %v4544_v0 = vmul.f32 %v11337_v54, %v13444_v38  ;;  %v5020_v11 = vmax.f32 %v4984_v59, 0.0  ;;  %v4947_v14 = vadd.f32 %v4911_v30, %v4873_v27  ;;  %v4839_v49 = vmul.f32 %v11365_v20, %v13443_v21  ;;  %v13447_v59 = vld [vmem:[#allocation86_spill] sm:$0xff] }
 0x415   :  { %v4800_v12 = vadd.f32 %v4764_v4, %v4726_v50  ;;  %v4653_v53 = vadd.f32 %v4617_v3, %v4579_v18  ;;  %v4913_v32 = vmul.f32 %v11370_v13, %v13445_v16  ;;  %v4506_v57 = vadd.f32 %v4470_v6, %v4432_v62 }
 0x416   :  { %v4618_v5 = vmul.f32 %v11346_v51, %v13446_v48  ;;  %5616 = vst [vmem:[%s12101_s5 + $0x398] sm:$0xff] %v5020_v11  ;;  %v4985_v44 = vadd.f32 %v11389_v28, %v4947_v14  ;;  %v4692_v30 = vmul.f32 %v11349_v39, %v13432_v60  ;;  %v4433_v4 = vmul.f32 %v11329_v31, %v13434_v52  ;;  %v13448_v52 = vld [vmem:[#allocation87_spill] sm:$0xff]  ;;  %v13449_v14 = vld [vmem:[#allocation85_spill] sm:$0xff] }
 0x417   :  { %v4874_v43 = vadd.f32 %v4838_v41, %v4800_v12  ;;  %v4727_v35 = vadd.f32 %v4691_v37, %v4653_v53  ;;  %v4580_v58 = vadd.f32 %v4544_v0, %v4506_v57  ;;  %v4471_v3 = vmul.f32 %v11334_v46, %v13436_v15 }
 0x418   :  { %v4545_v27 = vmul.f32 %v11337_v54, %v13447_v59  ;;  %v5021_v50 = vmax.f32 %v4985_v44, 0.0  ;;  %v4766_v18 = vmul.f32 %v11362_v42, %v13435_v9  ;;  %v4840_v41 = vmul.f32 %v11365_v20, %v13445_v16 }
 0x419   :  { %v4948_v62 = vadd.f32 %v4912_v56, %v4874_v43  ;;  %v4801_v60 = vadd.f32 %v4765_v63, %v4727_v35  ;;  %v4654_v6 = vadd.f32 %v4618_v5, %v4580_v58  ;;  %v4507_v11 = vadd.f32 %v4471_v3, %v4433_v4 }
 0x41a   :  { %v4619_v37 = vmul.f32 %v11346_v51, %v13448_v52  ;;  %5617 = vst [vmem:[%s12101_s5 + $0x3a0] sm:$0xff] %v5021_v50  ;;  %v4914_v56 = vmul.f32 %v11370_v13, %v13449_v14  ;;  %v4693_v9 = vmul.f32 %v11349_v39, %v13437_v55  ;;  %v4434_v63 = vmul.f32 %v11329_v31, %v13436_v15 }
 0x41b   :  { %v4986_v0 = vadd.f32 %v11389_v28, %v4948_v62  ;;  %v4875_v12 = vadd.f32 %v4839_v49, %v4801_v60  ;;  %v4728_v53 = vadd.f32 %v4692_v30, %v4654_v6  ;;  %v4581_v57 = vadd.f32 %v4545_v27, %v4507_v11  ;;  %v13450_v49 = vld [vmem:[#allocation88_spill] sm:$0xff] }
 0x41c   :  { %v4472_v5 = vmul.f32 %v11334_v46, %v13438_v61  ;;  %v4767_v43 = vmul.f32 %v11362_v42, %v13439_v33  ;;  %v4546_v4 = vmul.f32 %v11337_v54, %v13448_v52  ;;  %v4620_v35 = vmul.f32 %v11346_v51, %v13368_v47 }
 0x41d   :  { %v5022_v44 = vmax.f32 %v4986_v0, 0.0  ;;  %v4949_v55 = vadd.f32 %v4913_v32, %v4875_v12  ;;  %v4802_v58 = vadd.f32 %v4766_v18, %v4728_v53  ;;  %v4655_v3 = vadd.f32 %v4619_v37, %v4581_v57  ;;  %v13451_v57 = vld [vmem:[#allocation92_spill] sm:$0xff] }
 0x41e   :  { %v4508_v15 = vadd.f32 %v4472_v5, %v4434_v63  ;;  %v4841_v30 = vmul.f32 %v11365_v20, %v13450_v49  ;;  %v4915_v27 = vmul.f32 %v11370_v13, %v13367_v7  ;;  %v4694_v50 = vmul.f32 %v11349_v39, %v13439_v33  ;;  %v13452_v5 = vld [vmem:[#allocation90_spill] sm:$0xff] }
 0x41f   :  { %5618 = vst [vmem:[%s12101_s5 + $0x3a8] sm:$0xff] %v5022_v44  ;;  %v4435_v62 = vmul.f32 %v11329_v31, %v13438_v61  ;;  %v4987_v32 = vadd.f32 %v11389_v28, %v4949_v55  ;;  %v4876_v18 = vadd.f32 %v4840_v41, %v4802_v58  ;;  %v4729_v60 = vadd.f32 %v4693_v9, %v4655_v3 }
 0x420   :  { %v4582_v6 = vadd.f32 %v4546_v4, %v4508_v15  ;;  %v4768_v11 = vmul.f32 %v11362_v42, %v13441_v1  ;;  %v4842_v37 = vmul.f32 %v11365_v20, %v13367_v7  ;;  %v4473_v0 = vmul.f32 %v11334_v46, %v13440_v45 }
 0x421   :  { %v4547_v33 = vmul.f32 %v11337_v54, %v13368_v47  ;;  %v5023_v63 = vmax.f32 %v4987_v32, 0.0  ;;  %v4950_v12 = vadd.f32 %v4914_v56, %v4876_v18  ;;  %v4803_v61 = vadd.f32 %v4767_v43, %v4729_v60  ;;  %v13453_v60 = vld [vmem:[#allocation93_spill] sm:$0xff] }
 0x422   :  { %v4656_v53 = vadd.f32 %v4620_v35, %v4582_v6  ;;  %v4916_v41 = vmul.f32 %v11370_v13, %v13451_v57  ;;  %v4509_v9 = vadd.f32 %v4473_v0, %v4435_v62  ;;  %v4621_v44 = vmul.f32 %v11346_v51, %v13452_v5  ;;  %v13454_v0 = vld [vmem:[#allocation94_spill] sm:$0xff] }
 0x423   :  { %v4695_v4 = vmul.f32 %v11349_v39, %v13441_v1  ;;  %5619 = vst [vmem:[%s12101_s5 + $0x3b0] sm:$0xff] %v5023_v63  ;;  %v4988_v55 = vadd.f32 %v11389_v28, %v4950_v12  ;;  %v4877_v58 = vadd.f32 %v4841_v30, %v4803_v61  ;;  %v4436_v43 = vmul.f32 %v11329_v31, %v13440_v45 }
 0x424   :  { %v4730_v56 = vadd.f32 %v4694_v50, %v4656_v53  ;;  %v4583_v35 = vadd.f32 %v4547_v33, %v4509_v9  ;;  %v4769_v3 = vmul.f32 %v11362_v42, %v13442_v2  ;;  %v4474_v15 = vmul.f32 %v11334_v46, %v13358_v19 }
 0x425   :  { %v4548_v1 = vmul.f32 %v11337_v54, %v13452_v5  ;;  %v5024_v62 = vmax.f32 %v4988_v55, 0.0  ;;  %v4951_v32 = vadd.f32 %v4915_v27, %v4877_v58  ;;  %v4843_v30 = vmul.f32 %v11365_v20, %v13451_v57 }
 0x426   :  { %v4804_v18 = vadd.f32 %v4768_v11, %v4730_v56  ;;  %v4657_v50 = vadd.f32 %v4621_v44, %v4583_v35  ;;  %v4917_v45 = vmul.f32 %v11370_v13, %v13453_v60  ;;  %v4510_v6 = vadd.f32 %v4474_v15, %v4436_v43 }
 0x427   :  { %v4622_v33 = vmul.f32 %v11346_v51, %v13454_v0  ;;  %5620 = vst [vmem:[%s12101_s5 + $0x3b8] sm:$0xff] %v5024_v62  ;;  %v4989_v63 = vadd.f32 %v11389_v28, %v4951_v32  ;;  %v4696_v27 = vmul.f32 %v11349_v39, %v13442_v2  ;;  %v4437_v11 = vmul.f32 %v11329_v31, %v13358_v19 }
 0x428   :  { %v4878_v12 = vadd.f32 %v4842_v37, %v4804_v18  ;;  %v4731_v61 = vadd.f32 %v4695_v4, %v4657_v50  ;;  %v4584_v53 = vadd.f32 %v4548_v1, %v4510_v6  ;;  %v4475_v9 = vmul.f32 %v11334_v46, %v13444_v38 }
 0x429   :  { %v4549_v44 = vmul.f32 %v11337_v54, %v13454_v0  ;;  %v5025_v55 = vmax.f32 %v4989_v63, 0.0  ;;  %v4770_v56 = vmul.f32 %v11362_v42, %v13443_v21  ;;  %v4844_v37 = vmul.f32 %v11365_v20, %v13453_v60 }
 0x42a   :  { %v4952_v58 = vadd.f32 %v4916_v41, %v4878_v12  ;;  %v4805_v2 = vadd.f32 %v4769_v3, %v4731_v61  ;;  %v4658_v43 = vadd.f32 %v4622_v33, %v4584_v53  ;;  %v4511_v35 = vadd.f32 %v4475_v9, %v4437_v11 }
 0x42b   :  { %v4623_v19 = vmul.f32 %v11346_v51, %v13374_v17  ;;  %5621 = vst [vmem:[%s12101_s5 + $0x3c0] sm:$0xff] %v5025_v55  ;;  %v4918_v41 = vmul.f32 %v11370_v13, %v13373_v34  ;;  %v4697_v15 = vmul.f32 %v11349_v39, %v13443_v21  ;;  %v4438_v3 = vmul.f32 %v11329_v31, %v13444_v38 }
 0x42c   :  { %v4990_v4 = vadd.f32 %v11389_v28, %v4952_v58  ;;  %v4879_v1 = vadd.f32 %v4843_v30, %v4805_v2  ;;  %v4732_v62 = vadd.f32 %v4696_v27, %v4658_v43  ;;  %v4585_v32 = vadd.f32 %v4549_v44, %v4511_v35 }
 0x42d   :  { %v4476_v18 = vmul.f32 %v11334_v46, %v13446_v48  ;;  %v4771_v6 = vmul.f32 %v11362_v42, %v13445_v16  ;;  %v4550_v33 = vmul.f32 %v11337_v54, %v13374_v17  ;;  %v4624_v63 = vmul.f32 %v11346_v51, %v13375_v22 }
 0x42e   :  { %v5026_v50 = vmax.f32 %v4990_v4, 0.0  ;;  %v4953_v21 = vadd.f32 %v4917_v45, %v4879_v1  ;;  %v4806_v12 = vadd.f32 %v4770_v56, %v4732_v62  ;;  %v4659_v11 = vadd.f32 %v4623_v19, %v4585_v32 }
 0x42f   :  { %v4512_v38 = vadd.f32 %v4476_v18, %v4438_v3  ;;  %v4845_v48 = vmul.f32 %v11365_v20, %v13373_v34  ;;  %v4919_v30 = vmul.f32 %v11370_v13, %v13290_v24  ;;  %v4698_v27 = vmul.f32 %v11349_v39, %v13445_v16 }
 0x430   :  { %5622 = vst [vmem:[%s12101_s5 + $0x3c8] sm:$0xff] %v5026_v50  ;;  %v4439_v61 = vmul.f32 %v11329_v31, %v13447_v59  ;;  %v4991_v45 = vadd.f32 %v11389_v28, %v4953_v21  ;;  %v4880_v53 = vadd.f32 %v4844_v37, %v4806_v12  ;;  %v4733_v9 = vadd.f32 %v4697_v15, %v4659_v11  ;;  %v13456_v11 = vld [vmem:[#allocation103_spill] sm:$0xff] }
 0x431   :  { %v4586_v44 = vadd.f32 %v4550_v33, %v4512_v38  ;;  %v4772_v55 = vmul.f32 %v11362_v42, %v13449_v14  ;;  %v4846_v58 = vmul.f32 %v11365_v20, %v13290_v24  ;;  %v4477_v56 = vmul.f32 %v11334_v46, %v13448_v52 }
 0x432   :  { %v4551_v16 = vmul.f32 %v11337_v54, %v13376_v36  ;;  %v5027_v2 = vmax.f32 %v4991_v45, 0.0  ;;  %v4954_v43 = vadd.f32 %v4918_v41, %v4880_v53  ;;  %v4807_v59 = vadd.f32 %v4771_v6, %v4733_v9 }
 0x433   :  { %v4660_v35 = vadd.f32 %v4624_v63, %v4586_v44  ;;  %v4920_v37 = vmul.f32 %v11370_v13, %v13378_v23  ;;  %v4513_v19 = vadd.f32 %v4477_v56, %v4439_v61  ;;  %v4625_v14 = vmul.f32 %v11346_v51, %v13377_v40  ;;  %v13455_v63 = vld [vmem:[#allocation102_spill] sm:$0xff] }
 0x434   :  { %v4699_v4 = vmul.f32 %v11349_v39, %v13450_v49  ;;  %5623 = vst [vmem:[%s12101_s5 + $0x3d0] sm:$0xff] %v5027_v2  ;;  %v4992_v15 = vadd.f32 %v11389_v28, %v4954_v43  ;;  %v4881_v3 = vadd.f32 %v4845_v48, %v4807_v59  ;;  %v4440_v1 = vmul.f32 %v11329_v31, %v13448_v52  ;;  %v13457_v48 = vld [vmem:[#allocation105_spill] sm:$0xff] }
 0x435   :  { %v4734_v41 = vadd.f32 %v4698_v27, %v4660_v35  ;;  %v4587_v62 = vadd.f32 %v4551_v16, %v4513_v19  ;;  %v4773_v32 = vmul.f32 %v11362_v42, %v13367_v7  ;;  %v4478_v18 = vmul.f32 %v11334_v46, %v13368_v47 }
 0x436   :  { %v4552_v49 = vmul.f32 %v11337_v54, %v13377_v40  ;;  %v5028_v50 = vmax.f32 %v4992_v15, 0.0  ;;  %v4955_v6 = vadd.f32 %v4919_v30, %v4881_v3  ;;  %v4847_v21 = vmul.f32 %v11365_v20, %v13455_v63 }
 0x437   :  { %v4808_v33 = vadd.f32 %v4772_v55, %v4734_v41  ;;  %v4661_v12 = vadd.f32 %v4625_v14, %v4587_v62  ;;  %v4921_v52 = vmul.f32 %v11370_v13, %v13456_v11  ;;  %v4514_v38 = vadd.f32 %v4478_v18, %v4440_v1 }
 0x438   :  { %v4626_v27 = vmul.f32 %v11346_v51, %v13457_v48  ;;  %5624 = vst [vmem:[%s12101_s5 + $0x3d8] sm:$0xff] %v5028_v50  ;;  %v4993_v61 = vadd.f32 %v11389_v28, %v4955_v6  ;;  %v4700_v30 = vmul.f32 %v11349_v39, %v13367_v7  ;;  %v4441_v53 = vmul.f32 %v11329_v31, %v13368_v47 }
 0x439   :  { %v4882_v45 = vadd.f32 %v4846_v58, %v4808_v33  ;;  %v4735_v9 = vadd.f32 %v4699_v4, %v4661_v12  ;;  %v4588_v44 = vadd.f32 %v4552_v49, %v4514_v38  ;;  %v4479_v55 = vmul.f32 %v11334_v46, %v13452_v5 }
 0x43a   :  { %v4553_v56 = vmul.f32 %v11337_v54, %v13457_v48  ;;  %v5029_v16 = vmax.f32 %v4993_v61, 0.0  ;;  %v4774_v43 = vmul.f32 %v11362_v42, %v13451_v57  ;;  %v4848_v58 = vmul.f32 %v11365_v20, %v13456_v11 }
 0x43b   :  { %v4956_v2 = vadd.f32 %v4920_v37, %v4882_v45  ;;  %v4809_v7 = vadd.f32 %v4773_v32, %v4735_v9  ;;  %v4662_v59 = vadd.f32 %v4626_v27, %v4588_v44  ;;  %v4515_v35 = vadd.f32 %v4479_v55, %v4441_v53 }
 0x43c   :  { %v4627_v47 = vmul.f32 %v11346_v51, %v13383_v29  ;;  %5625 = vst [vmem:[%s12101_s5 + $0x3e0] sm:$0xff] %v5029_v16  ;;  %v4922_v37 = vmul.f32 %v11370_v13, %v13382_v8  ;;  %v4701_v14 = vmul.f32 %v11349_v39, %v13451_v57  ;;  %v4442_v4 = vmul.f32 %v11329_v31, %v13452_v5  ;;  %v13458_v16 = vld [vmem:[#allocation109_spill] sm:$0xff] }
 0x43d   :  { %v4994_v19 = vadd.f32 %v11389_v28, %v4956_v2  ;;  %v4883_v15 = vadd.f32 %v4847_v21, %v4809_v7  ;;  %v4736_v3 = vadd.f32 %v4700_v30, %v4662_v59  ;;  %v4589_v41 = vadd.f32 %v4553_v56, %v4515_v35 }
 0x43e   :  { %v4480_v1 = vmul.f32 %v11334_v46, %v13454_v0  ;;  %v4775_v32 = vmul.f32 %v11362_v42, %v13453_v60  ;;  %v4554_v18 = vmul.f32 %v11337_v54, %v13383_v29  ;;  %v4628_v49 = vmul.f32 %v11346_v51, %v13384_v25 }
 0x43f   :  { %v5030_v62 = vmax.f32 %v4994_v19, 0.0  ;;  %v4957_v57 = vadd.f32 %v4921_v52, %v4883_v15  ;;  %v4810_v50 = vadd.f32 %v4774_v43, %v4736_v3  ;;  %v4663_v6 = vadd.f32 %v4627_v47, %v4589_v41 }
 0x440   :  { %v4516_v5 = vadd.f32 %v4480_v1, %v4442_v4  ;;  %v4849_v33 = vmul.f32 %v11365_v20, %v13382_v8  ;;  %v4923_v21 = vmul.f32 %v11370_v13, %v13300_v26  ;;  %v4702_v12 = vmul.f32 %v11349_v39, %v13453_v60 }
 0x441   :  { %5626 = vst [vmem:[%s12101_s5 + $0x3e8] sm:$0xff] %v5030_v62  ;;  %v4443_v38 = vmul.f32 %v11329_v31, %v13454_v0  ;;  %v4995_v52 = vadd.f32 %v11389_v28, %v4957_v57  ;;  %v4884_v27 = vadd.f32 %v4848_v58, %v4810_v50  ;;  %v4737_v61 = vadd.f32 %v4701_v14, %v4663_v6  ;;  %v13459_v58 = vld [vmem:[#allocation111_spill] sm:$0xff]  ;;  %v13461_v57 = vld [vmem:[#allocation64_spill] sm:$0xff] }
 0x442   :  { %v4590_v45 = vadd.f32 %v4554_v18, %v4516_v5  ;;  %v4776_v30 = vmul.f32 %v11362_v42, %v13373_v34  ;;  %v4850_v53 = vmul.f32 %v11365_v20, %v13300_v26  ;;  %v4481_v9 = vmul.f32 %v11334_v46, %v13374_v17  ;;  %v13460_v18 = vld [vmem:[#allocation112_spill] sm:$0xff] }
 0x443   :  { %v4555_v60 = vmul.f32 %v11337_v54, %v13384_v25  ;;  %v5031_v44 = vmax.f32 %v4995_v52, 0.0  ;;  %v4958_v55 = vadd.f32 %v4922_v37, %v4884_v27  ;;  %v4811_v0 = vadd.f32 %v4775_v32, %v4737_v61  ;;  %v13462_v52 = vld [vmem:[#allocation114_spill] sm:$0xff] }
 0x444   :  { %v4664_v56 = vadd.f32 %v4628_v49, %v4590_v45  ;;  %v4924_v2 = vmul.f32 %v11370_v13, %v13458_v16  ;;  %v4517_v43 = vadd.f32 %v4481_v9, %v4443_v38  ;;  %v4629_v7 = vmul.f32 %v11346_v51, %v13459_v58 }
 0x445   :  { %v4703_v59 = vmul.f32 %v11349_v39, %v13373_v34  ;;  %5627 = vst [vmem:[%s12101_s5 + $0x3f0] sm:$0xff] %v5031_v44  ;;  %v4996_v35 = vadd.f32 %v11389_v28, %v4958_v55  ;;  %v4885_v47 = vadd.f32 %v4849_v33, %v4811_v0  ;;  %v4444_v37 = vmul.f32 %v11329_v31, %v13374_v17  ;;  %v13464_v0 = vld [vmem:[#allocation113_spill] sm:$0xff] }
 0x446   :  { %v4738_v19 = vadd.f32 %v4702_v12, %v4664_v56  ;;  %v4591_v14 = vadd.f32 %v4555_v60, %v4517_v43  ;;  %v4777_v4 = vmul.f32 %v11362_v42, %v13290_v24  ;;  %v4482_v15 = vmul.f32 %v11334_v46, %v13375_v22 }
 0x447   :  { %v4556_v34 = vmul.f32 %v11337_v54, %v13459_v58  ;;  %v5032_v3 = vmax.f32 %v4996_v35, 0.0  ;;  %v4959_v41 = vadd.f32 %v4923_v21, %v4885_v47  ;;  %v4851_v62 = vmul.f32 %v11365_v20, %v13458_v16 }
 0x448   :  { %v4812_v1 = vadd.f32 %v4776_v30, %v4738_v19  ;;  %v4665_v32 = vadd.f32 %v4629_v7, %v4591_v14  ;;  %v4925_v17 = vmul.f32 %v11370_v13, %v13460_v18  ;;  %v4518_v49 = vadd.f32 %v4482_v15, %v4444_v37 }
 0x449   :  { %v4630_v50 = vmul.f32 %v11346_v51, %v13461_v57  ;;  %5628 = vst [vmem:[%s12101_s5 + $0x3f8] sm:$0xff] %v5032_v3  ;;  %v4997_v22 = vadd.f32 %v11389_v28, %v4959_v41  ;;  %v4704_v5 = vmul.f32 %v11349_v39, %v13290_v24  ;;  %v4445_v33 = vmul.f32 %v11329_v31, %v13376_v36  ;;  %v13463_v36 = vld [vmem:[#allocation115_spill] sm:$0xff]  ;;  %v13466_v41 = vld [vmem:[#allocation28_spill] sm:$0xff] }
 0x44a   :  { %v4886_v6 = vadd.f32 %v4850_v53, %v4812_v1  ;;  %v4739_v21 = vadd.f32 %v4703_v59, %v4665_v32  ;;  %v4592_v12 = vadd.f32 %v4556_v34, %v4518_v49  ;;  %v4483_v38 = vmul.f32 %v11334_v46, %v13377_v40  ;;  %v13465_v34 = vld [vmem:[#allocation69_spill] sm:$0xff] }
 0x44b   :  { %v4557_v27 = vmul.f32 %v11337_v54, %v13462_v52  ;;  %v5033_v61 = vmax.f32 %v4997_v22, 0.0  ;;  %v4778_v30 = vmul.f32 %v11362_v42, %v13378_v23  ;;  %v4852_v53 = vmul.f32 %v11365_v20, %v13460_v18 }
 0x44c   :  { %v4960_v45 = vadd.f32 %v4924_v2, %v4886_v6  ;;  %v4813_v24 = vadd.f32 %v4777_v4, %v4739_v21  ;;  %v4666_v9 = vadd.f32 %v4630_v50, %v4592_v12  ;;  %v4519_v60 = vadd.f32 %v4483_v38, %v4445_v33 }
 0x44d   :  { %v4631_v44 = vmul.f32 %v11346_v51, %v13463_v36  ;;  %5629 = vst [vmem:[%s12101_s5 + $0x400] sm:$0xff] %v5033_v61  ;;  %v4926_v56 = vmul.f32 %v11370_v13, %v13464_v0  ;;  %v4705_v23 = vmul.f32 %v11349_v39, %v13455_v63  ;;  %v4446_v2 = vmul.f32 %v11329_v31, %v13377_v40 }
 0x44e   :  { %v4998_v55 = vadd.f32 %v11389_v28, %v4960_v45  ;;  %v4887_v43 = vadd.f32 %v4851_v62, %v4813_v24  ;;  %v4740_v7 = vadd.f32 %v4704_v5, %v4666_v9  ;;  %v4593_v59 = vadd.f32 %v4557_v27, %v4519_v60  ;;  %v13467_v27 = vld [vmem:[#allocation30_spill] sm:$0xff] }
 0x44f   :  { %v4484_v35 = vmul.f32 %v11334_v46, %v13457_v48  ;;  %v4779_v19 = vmul.f32 %v11362_v42, %v13456_v11  ;;  %v4558_v37 = vmul.f32 %v11337_v54, %v13463_v36  ;;  %v4632_v14 = vmul.f32 %v11346_v51, %v13311_v10 }
 0x450   :  { %v5034_v47 = vmax.f32 %v4998_v55, 0.0  ;;  %v4961_v63 = vadd.f32 %v4925_v17, %v4887_v43  ;;  %v4814_v4 = vadd.f32 %v4778_v30, %v4740_v7  ;;  %v4667_v15 = vadd.f32 %v4631_v44, %v4593_v59  ;;  %v13468_v30 = vld [vmem:[#allocation116_spill] sm:$0xff] }
 0x451   :  { %v4520_v40 = vadd.f32 %v4484_v35, %v4446_v2  ;;  %v4853_v3 = vmul.f32 %v11365_v20, %v13465_v34  ;;  %v4927_v1 = vmul.f32 %v11370_v13, %v13466_v41  ;;  %v4706_v62 = vmul.f32 %v11349_v39, %v13456_v11 }
 0x452   :  { %5630 = vst [vmem:[%s12101_s5 + $0x408] sm:$0xff] %v5034_v47  ;;  %v4447_v32 = vmul.f32 %v11329_v31, %v13457_v48  ;;  %v4999_v17 = vadd.f32 %v11389_v28, %v4961_v63  ;;  %v4888_v49 = vadd.f32 %v4852_v53, %v4814_v4  ;;  %v4741_v50 = vadd.f32 %v4705_v23, %v4667_v15 }
 0x453   :  { %v4594_v22 = vadd.f32 %v4558_v37, %v4520_v40  ;;  %v4780_v6 = vmul.f32 %v11362_v42, %v13382_v8  ;;  %v4854_v5 = vmul.f32 %v11365_v20, %v13466_v41  ;;  %v4485_v33 = vmul.f32 %v11334_v46, %v13383_v29 }
 0x454   :  { %v4559_v11 = vmul.f32 %v11337_v54, %v13311_v10  ;;  %v5035_v21 = vmax.f32 %v4999_v17, 0.0  ;;  %v4962_v12 = vadd.f32 %v4926_v56, %v4888_v49  ;;  %v4815_v48 = vadd.f32 %v4779_v19, %v4741_v50  ;;  %v13469_v19 = vld [vmem:[#allocation29_spill] sm:$0xff] }
 0x455   :  { %v4668_v38 = vadd.f32 %v4632_v14, %v4594_v22  ;;  %v4928_v61 = vmul.f32 %v11370_v13, %v13467_v27  ;;  %v4521_v45 = vadd.f32 %v4485_v33, %v4447_v32  ;;  %v4633_v53 = vmul.f32 %v11346_v51, %v13468_v30  ;;  %v13470_v14 = vld [vmem:[#allocation18_spill] sm:$0xff] }
 0x456   :  { %v4707_v24 = vmul.f32 %v11349_v39, %v13382_v8  ;;  %5631 = vst [vmem:[%s12101_s5 + $0x410] sm:$0xff] %v5035_v21  ;;  %v5000_v9 = vadd.f32 %v11389_v28, %v4962_v12  ;;  %v4889_v60 = vadd.f32 %v4853_v3, %v4815_v48  ;;  %v4448_v55 = vmul.f32 %v11329_v31, %v13383_v29  ;;  %v13472_v12 = vld [vmem:[#allocation118_spill] sm:$0xff] }
 0x457   :  { %v4742_v44 = vadd.f32 %v4706_v62, %v4668_v38  ;;  %v4595_v56 = vadd.f32 %v4559_v11, %v4521_v45  ;;  %v4781_v23 = vmul.f32 %v11362_v42, %v13300_v26  ;;  %v4486_v2 = vmul.f32 %v11334_v46, %v13384_v25 }
 0x458   :  { %v4560_v8 = vmul.f32 %v11337_v54, %v13468_v30  ;;  %v5036_v43 = vmax.f32 %v5000_v9, 0.0  ;;  %v4963_v7 = vadd.f32 %v4927_v1, %v4889_v60  ;;  %v4855_v35 = vmul.f32 %v11365_v20, %v13467_v27 }
 0x459   :  { %v4816_v59 = vadd.f32 %v4780_v6, %v4742_v44  ;;  %v4669_v47 = vadd.f32 %v4633_v53, %v4595_v56  ;;  %v4929_v29 = vmul.f32 %v11370_v13, %v13469_v19  ;;  %v4522_v37 = vadd.f32 %v4486_v2, %v4448_v55  ;;  %v13473_v56 = vld [vmem:[#allocation59_spill] sm:$0xff] }
 0x45a   :  { %v4634_v63 = vmul.f32 %v11346_v51, %v13470_v14  ;;  %5632 = vst [vmem:[%s12101_s5 + $0x418] sm:$0xff] %v5036_v43  ;;  %v5001_v4 = vadd.f32 %v11389_v28, %v4963_v7  ;;  %v4708_v40 = vmul.f32 %v11349_v39, %v13300_v26  ;;  %v4449_v3 = vmul.f32 %v11329_v31, %v13384_v25  ;;  %v13471_v25 = vld [vmem:[#allocation20_spill] sm:$0xff] }
 0x45b   :  { %v4890_v15 = vadd.f32 %v4854_v5, %v4816_v59  ;;  %v4743_v1 = vadd.f32 %v4707_v24, %v4669_v47  ;;  %v4596_v62 = vadd.f32 %v4560_v8, %v4522_v37  ;;  %v4487_v32 = vmul.f32 %v11334_v46, %v13459_v58  ;;  %v13474_v43 = vld [vmem:[#allocation120_spill] sm:$0xff] }
 0x45c   :  { %v4561_v17 = vmul.f32 %v11337_v54, %v13470_v14  ;;  %v5037_v49 = vmax.f32 %v5001_v4, 0.0  ;;  %v4782_v22 = vmul.f32 %v11362_v42, %v13458_v16  ;;  %v4856_v6 = vmul.f32 %v11365_v20, %v13469_v19 }
 0x45d   :  { %v4964_v50 = vadd.f32 %v4928_v61, %v4890_v15  ;;  %v4817_v26 = vadd.f32 %v4781_v23, %v4743_v1  ;;  %v4670_v5 = vadd.f32 %v4634_v63, %v4596_v62  ;;  %v4523_v33 = vadd.f32 %v4487_v32, %v4449_v3  ;;  %v13475_v3 = vld [vmem:[#allocation82_spill] sm:$0xff] }
 0x45e   :  { %v4635_v11 = vmul.f32 %v11346_v51, %v13471_v25  ;;  %5633 = vst [vmem:[%s12101_s5 + $0x420] sm:$0xff] %v5037_v49  ;;  %v4930_v48 = vmul.f32 %v11370_v13, %v13472_v12  ;;  %v4709_v38 = vmul.f32 %v11349_v39, %v13458_v16  ;;  %v4450_v61 = vmul.f32 %v11329_v31, %v13459_v58 }
 0x45f   :  { %v5002_v21 = vadd.f32 %v11389_v28, %v4964_v50  ;;  %v4891_v45 = vadd.f32 %v4855_v35, %v4817_v26  ;;  %v4744_v53 = vadd.f32 %v4708_v40, %v4670_v5  ;;  %v4597_v24 = vadd.f32 %v4561_v17, %v4523_v33  ;;  %v13476_v17 = vld [vmem:[#allocation65_spill] sm:$0xff] }
 0x460   :  { %v4488_v9 = vmul.f32 %v11334_v46, %v13461_v57  ;;  %v4783_v44 = vmul.f32 %v11362_v42, %v13460_v18  ;;  %v4562_v55 = vmul.f32 %v11337_v54, %v13471_v25  ;;  %v4636_v23 = vmul.f32 %v11346_v51, %v13473_v56 }
 0x461   :  { %v5038_v60 = vmax.f32 %v5002_v21, 0.0  ;;  %v4965_v16 = vadd.f32 %v4929_v29, %v4891_v45  ;;  %v4818_v2 = vadd.f32 %v4782_v22, %v4744_v53  ;;  %v4671_v8 = vadd.f32 %v4635_v11, %v4597_v24  ;;  %v13477_v22 = vld [vmem:[#allocation96_spill] sm:$0xff]  ;;  %v13478_v24 = vld [vmem:[#allocation110_spill] sm:$0xff] }
 0x462   :  { %v4524_v58 = vadd.f32 %v4488_v9, %v4450_v61  ;;  %v4857_v57 = vmul.f32 %v11365_v20, %v13472_v12  ;;  %v4931_v7 = vmul.f32 %v11370_v13, %v13474_v43  ;;  %v4710_v59 = vmul.f32 %v11349_v39, %v13460_v18 }
 0x463   :  { %5634 = vst [vmem:[%s12101_s5 + $0x428] sm:$0xff] %v5038_v60  ;;  %v4451_v35 = vmul.f32 %v11329_v31, %v13462_v52  ;;  %v5003_v47 = vadd.f32 %v11389_v28, %v4965_v16  ;;  %v4892_v29 = vadd.f32 %v4856_v6, %v4818_v2  ;;  %v4745_v37 = vadd.f32 %v4709_v38, %v4671_v8 }
 0x464   :  { %v4598_v63 = vadd.f32 %v4562_v55, %v4524_v58  ;;  %v4784_v4 = vmul.f32 %v11362_v42, %v13464_v0  ;;  %v4858_v15 = vmul.f32 %v11365_v20, %v13474_v43  ;;  %v4489_v40 = vmul.f32 %v11334_v46, %v13463_v36 }
 0x465   :  { %v4563_v18 = vmul.f32 %v11337_v54, %v13475_v3  ;;  %v5039_v1 = vmax.f32 %v5003_v47, 0.0  ;;  %v4966_v62 = vadd.f32 %v4930_v48, %v4892_v29  ;;  %v4819_v52 = vadd.f32 %v4783_v44, %v4745_v37  ;;  %v13479_v44 = vld [vmem:[#allocation119_spill] sm:$0xff] }
 0x466   :  { %v4672_v32 = vadd.f32 %v4636_v23, %v4598_v63  ;;  %v4932_v49 = vmul.f32 %v11370_v13, %v13476_v17  ;;  %v4525_v50 = vadd.f32 %v4489_v40, %v4451_v35  ;;  %v4637_v0 = vmul.f32 %v11346_v51, %v13477_v22  ;;  %v13480_v23 = vld [vmem:[#allocation17_spill] sm:$0xff] }
 0x467   :  { %v4711_v6 = vmul.f32 %v11349_v39, %v13465_v34  ;;  %5635 = vst [vmem:[%s12101_s5 + $0x430] sm:$0xff] %v5039_v1  ;;  %v5004_v26 = vadd.f32 %v11389_v28, %v4966_v62  ;;  %v4893_v5 = vadd.f32 %v4857_v57, %v4819_v52  ;;  %v4452_v11 = vmul.f32 %v11329_v31, %v13463_v36  ;;  %v13482_v1 = vld [vmem:[#allocation21_spill] sm:$0xff] }
 0x468   :  { %v4746_v33 = vadd.f32 %v4710_v59, %v4672_v32  ;;  %v4599_v21 = vadd.f32 %v4563_v18, %v4525_v50  ;;  %v4785_v48 = vmul.f32 %v11362_v42, %v13466_v41  ;;  %v4490_v38 = vmul.f32 %v11334_v46, %v13311_v10 }
 0x469   :  { %v4564_v34 = vmul.f32 %v11337_v54, %v13477_v22  ;;  %v5040_v61 = vmax.f32 %v5004_v26, 0.0  ;;  %v4967_v45 = vadd.f32 %v4931_v7, %v4893_v5  ;;  %v4859_v9 = vmul.f32 %v11365_v20, %v13478_v24 }
 0x46a   :  { %v4820_v53 = vadd.f32 %v4784_v4, %v4746_v33  ;;  %v4673_v60 = vadd.f32 %v4637_v0, %v4599_v21  ;;  %v4933_v36 = vmul.f32 %v11370_v13, %v13479_v44  ;;  %v4526_v55 = vadd.f32 %v4490_v38, %v4452_v11  ;;  %v13483_v33 = vld [vmem:[#allocation31_spill] sm:$0xff] }
 0x46b   :  { %v4638_v16 = vmul.f32 %v11346_v51, %v13480_v23  ;;  %5636 = vst [vmem:[%s12101_s5 + $0x438] sm:$0xff] %v5040_v61  ;;  %v5005_v2 = vadd.f32 %v11389_v28, %v4967_v45  ;;  %v4712_v58 = vmul.f32 %v11349_v39, %v13466_v41  ;;  %v4453_v57 = vmul.f32 %v11329_v31, %v13311_v10  ;;  %v13481_v10 = vld [vmem:[#allocation12_spill] sm:$0xff] }
 0x46c   :  { %v4894_v8 = vadd.f32 %v4858_v15, %v4820_v53  ;;  %v4747_v7 = vadd.f32 %v4711_v6, %v4673_v60  ;;  %v4600_v59 = vadd.f32 %v4564_v34, %v4526_v55  ;;  %v4491_v35 = vmul.f32 %v11334_v46, %v13468_v30  ;;  %v13484_v60 = vld [vmem:[#allocation68_spill] sm:$0xff] }
 0x46d   :  { %v4565_v47 = vmul.f32 %v11337_v54, %v13480_v23  ;;  %v5041_v29 = vmax.f32 %v5005_v2, 0.0  ;;  %v4786_v63 = vmul.f32 %v11362_v42, %v13467_v27  ;;  %v4860_v4 = vmul.f32 %v11365_v20, %v13479_v44 }
 0x46e   :  { %v4968_v37 = vadd.f32 %v4932_v49, %v4894_v8  ;;  %v4821_v41 = vadd.f32 %v4785_v48, %v4747_v7  ;;  %v4674_v15 = vadd.f32 %v4638_v16, %v4600_v59  ;;  %v4527_v40 = vadd.f32 %v4491_v35, %v4453_v57  ;;  %v13485_v57 = vld [vmem:[#allocation15_spill] sm:$0xff] }
 0x46f   :  { %v4639_v3 = vmul.f32 %v11346_v51, %v13481_v10  ;;  %5637 = vst [vmem:[%s12101_s5 + $0x440] sm:$0xff] %v5041_v29  ;;  %v4934_v62 = vmul.f32 %v11370_v13, %v13482_v1  ;;  %v4713_v52 = vmul.f32 %v11349_v39, %v13467_v27  ;;  %v4454_v32 = vmul.f32 %v11329_v31, %v13468_v30 }
 0x470   :  { %v5006_v18 = vadd.f32 %v11389_v28, %v4968_v37  ;;  %v4895_v49 = vadd.f32 %v4859_v9, %v4821_v41  ;;  %v4748_v50 = vadd.f32 %v4712_v58, %v4674_v15  ;;  %v4601_v22 = vadd.f32 %v4565_v47, %v4527_v40 }
 0x471   :  { %v4492_v0 = vmul.f32 %v11334_v46, %v13470_v14  ;;  %v4787_v26 = vmul.f32 %v11362_v42, %v13469_v19  ;;  %v4566_v5 = vmul.f32 %v11337_v54, %v13481_v10  ;;  %v4640_v11 = vmul.f32 %v11346_v51, %v13483_v33 }
 0x472   :  { %v5042_v6 = vmax.f32 %v5006_v18, 0.0  ;;  %v4969_v27 = vadd.f32 %v4933_v36, %v4895_v49  ;;  %v4822_v21 = vadd.f32 %v4786_v63, %v4748_v50  ;;  %v4675_v48 = vadd.f32 %v4639_v3, %v4601_v22  ;;  %v13486_v3 = vld [vmem:[#allocation14_spill] sm:$0xff] }
 0x473   :  { %v4528_v30 = vadd.f32 %v4492_v0, %v4454_v32  ;;  %v4861_v38 = vmul.f32 %v11365_v20, %v13482_v1  ;;  %v4714_v34 = vmul.f32 %v11349_v39, %v13469_v19  ;;  %v4455_v61 = vmul.f32 %v11329_v31, %v13470_v14 }
 0x474   :  { %5638 = vst [vmem:[%s12101_s5 + $0x448] sm:$0xff] %v5042_v6  ;;  %v5007_v45 = vadd.f32 %v11389_v28, %v4969_v27  ;;  %v4896_v53 = vadd.f32 %v4860_v4, %v4822_v21  ;;  %v4749_v24 = vadd.f32 %v4713_v52, %v4675_v48  ;;  %v4935_v44 = vmul.f32 %v11370_v13, %v13484_v60  ;;  %v13488_v6 = vld [vmem:[#allocation16_spill] sm:$0xff] }
 0x475   :  { %v4602_v9 = vadd.f32 %v4566_v5, %v4528_v30  ;;  %v4788_v36 = vmul.f32 %v11362_v42, %v13472_v12  ;;  %v4493_v55 = vmul.f32 %v11334_v46, %v13471_v25  ;;  %v4567_v19 = vmul.f32 %v11337_v54, %v13483_v33  ;;  %v13489_v30 = vld [vmem:[#allocation71_spill] sm:$0xff] }
 0x476   :  { %v5043_v23 = vmax.f32 %v5007_v45, 0.0  ;;  %v4970_v16 = vadd.f32 %v4934_v62, %v4896_v53  ;;  %v4823_v14 = vadd.f32 %v4787_v26, %v4749_v24  ;;  %v4862_v8 = vmul.f32 %v11365_v20, %v13484_v60  ;;  %v13487_v62 = vld [vmem:[#allocation36_spill] sm:$0xff] }
 0x477   :  { %v4676_v2 = vadd.f32 %v4640_v11, %v4602_v9  ;;  %v4529_v58 = vadd.f32 %v4493_v55, %v4455_v61  ;;  %v4641_v7 = vmul.f32 %v11346_v51, %v13485_v57  ;;  %v4456_v29 = vmul.f32 %v11329_v31, %v13471_v25 }
 0x478   :  { %5639 = vst [vmem:[%s12101_s5 + $0x450] sm:$0xff] %v5043_v23  ;;  %v5008_v59 = vadd.f32 %v11389_v28, %v4970_v16  ;;  %v4897_v35 = vadd.f32 %v4861_v38, %v4823_v14  ;;  %v4715_v63 = vmul.f32 %v11349_v39, %v13472_v12  ;;  %v4494_v4 = vmul.f32 %v11334_v46, %v13473_v56 }
 0x479   :  { %v4750_v47 = vadd.f32 %v4714_v34, %v4676_v2  ;;  %v4603_v37 = vadd.f32 %v4567_v19, %v4529_v58  ;;  %v4568_v41 = vmul.f32 %v11337_v54, %v13485_v57  ;;  %v4936_v18 = vmul.f32 %v11370_v13, %v13486_v3 }
 0x47a   :  { %v5044_v15 = vmax.f32 %v5008_v59, 0.0  ;;  %v4971_v40 = vadd.f32 %v4935_v44, %v4897_v35  ;;  %v4789_v31 = vmul.f32 %v11362_v42, %v13474_v43  ;;  %v4530_v25 = vadd.f32 %v4494_v4, %v4456_v29 }
 0x47b   :  { %v4824_v10 = vadd.f32 %v4788_v36, %v4750_v47  ;;  %v4677_v1 = vadd.f32 %v4641_v7, %v4603_v37  ;;  %v4642_v12 = vmul.f32 %v11346_v51, %v13487_v62  ;;  %v4863_v52 = vmul.f32 %v11365_v20, %v13486_v3 }
 0x47c   :  { %5640 = vst [vmem:[%s12101_s5 + $0x458] sm:$0xff] %v5044_v15  ;;  %v5009_v46 = vadd.f32 %v11389_v28, %v4971_v40  ;;  %v4604_v32 = vadd.f32 %v4568_v41, %v4530_v25  ;;  %v4716_v49 = vmul.f32 %v11349_v39, %v13474_v43  ;;  %v4937_v51 = vmul.f32 %v11370_v13, %v13488_v6 }
 0x47d   :  { %v4898_v54 = vadd.f32 %v4862_v8, %v4824_v10  ;;  %v4751_v56 = vadd.f32 %v4715_v63, %v4677_v1  ;;  %v4790_v5 = vmul.f32 %v11362_v42, %v13476_v17  ;;  %v4864_v39 = vmul.f32 %v11365_v20, %v13488_v6 }
 0x47e   :  { %v5045_v50 = vmax.f32 %v5009_v46, 0.0  ;;  %v4678_v26 = vadd.f32 %v4642_v12, %v4604_v32  ;;  %v4938_v38 = vmul.f32 %v11370_v13, %v13489_v30 }
 0x47f   :  { %v4972_v22 = vadd.f32 %v4936_v18, %v4898_v54  ;;  %v4825_v0 = vadd.f32 %v4789_v31, %v4751_v56 }
 0x480   :  { %5641 = vst [vmem:[%s12101_s5 + $0x460] sm:$0xff] %v5045_v50  ;;  %v4752_v27 = vadd.f32 %v4716_v49, %v4678_v26 }
 0x481   :  { %v5010_v33 = vadd.f32 %v11389_v28, %v4972_v22  ;;  %v4899_v11 = vadd.f32 %v4863_v52, %v4825_v0 }
 0x482   :  { %v4826_v48 = vadd.f32 %v4790_v5, %v4752_v27 }
 0x483   :  { %v5046_v43 = vmax.f32 %v5010_v33, 0.0  ;;  %v4973_v21 = vadd.f32 %v4937_v51, %v4899_v11 }
 0x484   :  { %v4900_v17 = vadd.f32 %v4864_v39, %v4826_v48 }
 0x485   :  { %5642 = vst [vmem:[%s12101_s5 + $0x468] sm:$0xff] %v5046_v43  ;;  %v5011_v42 = vadd.f32 %v11389_v28, %v4973_v21 }
 0x486   :  { %v4974_v61 = vadd.f32 %v4938_v38, %v4900_v17 }
 0x487   :  { %v5047_v34 = vmax.f32 %v5011_v42, 0.0 }
 0x488   :  { %v5012_v20 = vadd.f32 %v11389_v28, %v4974_v61 }
 0x489   :  { %5643 = vst [vmem:[%s12101_s5 + $0x470] sm:$0xff] %v5047_v34 }
 0x48a   :  { %v5048_v45 = vmax.f32 %v5012_v20, 0.0 }
 0x48c   :  { %5644 = vst [vmem:[%s12101_s5 + $0x478] sm:$0xff] %v5048_v45 }
 0x48d   :  { %5090 = vsyncpa [#allocation3], 1 }
 0x48e   :  { %5091 = vsyncpa [#allocation5], 1 }
 0x48f   :  { %5092 = vsyncpa [#allocation8], 1 }

</bundles_post_ra>
